<compile_context>
chip_gen: v7x
topology: tpu7x:2x2x1
jax: 0.10.0
libtpu: 0.0.40
codegen_flags: <defaults>
</compile_context>

<pallas_src>
import jax
import jax.numpy as jnp
from jax import lax
from jax.experimental import pallas as pl
from jax.experimental.pallas import tpu as pltpu


def _gelayer_kernel(x_ref, w1_ref, s1_ref, b1_ref,
                    wdw_ref, s2_ref, b2_ref,
                    w2_ref, s3_ref, b3_ref,
                    o_ref, xpad_ref, f1pad_ref):
    _, H, W, C = x_ref.shape
    EXP = w2_ref.shape[0]            # expansion ratio (6)

    x = x_ref[0].astype(jnp.float32)                      # (H, W, C)

    # ---------------- conv1: dense 3x3 (C->C) + BN + ReLU ------------------
    # Zero the padded scratch each step (cheap; safe under parallel grid).
    xpad_ref[...] = jnp.zeros(xpad_ref.shape, xpad_ref.dtype)
    xpad_ref[1:H + 1, 1:W + 1, :] = x

    acc1 = jnp.zeros((H * W, C), jnp.float32)
    for ky in range(3):
        for kx in range(3):
            patch = xpad_ref[ky:ky + H, kx:kx + W, :].reshape(H * W, C)
            acc1 = acc1 + jnp.dot(patch.astype(jnp.bfloat16),
                                  w1_ref[ky * 3 + kx],
                                  preferred_element_type=jnp.float32)
    f1 = jnp.maximum(acc1 * s1_ref[...] + b1_ref[...], 0.0)   # (H*W, C)

    f1pad_ref[...] = jnp.zeros(f1pad_ref.shape, f1pad_ref.dtype)
    f1pad_ref[1:H + 1, 1:W + 1, :] = f1.reshape(H, W, C)

    # ------ dwconv (groups=C, EXP filters/channel) + BN + ReLU, folded ------
    # ------ directly into the 1x1 conv2 (6 MXU matmuls, register acc) ------
    acc_out = jnp.zeros((H * W, C), jnp.float32)
    for j in range(EXP):
        accj = jnp.zeros((H, W, C), jnp.float32)
        for ky in range(3):
            for kx in range(3):
                win = f1pad_ref[ky:ky + H, kx:kx + W, :]        # (H, W, C) f32
                accj = accj + win * wdw_ref[j * 9 + ky * 3 + kx]  # (1, C) bcast
        f2j = jnp.maximum(accj * s2_ref[j] + b2_ref[j], 0.0)      # (H, W, C)
        acc_out = acc_out + jnp.dot(
            f2j.reshape(H * W, C).astype(jnp.bfloat16), w2_ref[j],
            preferred_element_type=jnp.float32)

    # ---------------- BN3 + residual + ReLU --------------------------------
    y = acc_out.reshape(H, W, C) * s3_ref[...] + b3_ref[...] + x
    y = jnp.maximum(y, 0.0)
    o_ref[...] = y.reshape(1, H, W, C).astype(o_ref.dtype)


def gelayer(x_nhwc, params):
    """x_nhwc: (N, H, W, C) float32 -> (N, H, W, C) float32."""
    N, H, W, C = x_nhwc.shape
    w1, s1, b1, wdw, s2, b2, w2, s3, b3 = params
    exp = w2.shape[0]
    x_lo = x_nhwc.astype(jnp.bfloat16)     # halve HBM traffic for the input

    grid_spec = pltpu.PrefetchScalarGridSpec(
        num_scalar_prefetch=0,
        grid=(N,),
        in_specs=[
            pl.BlockSpec((1, H, W, C), lambda n: (n, 0, 0, 0)),      # x
            pl.BlockSpec((9, C, C), lambda n: (0, 0, 0)),            # w1
            pl.BlockSpec((1, C), lambda n: (0, 0)),                  # s1
            pl.BlockSpec((1, C), lambda n: (0, 0)),                  # b1
            pl.BlockSpec((exp * 9, 1, C), lambda n: (0, 0, 0)),      # wdw
            pl.BlockSpec((exp, 1, C), lambda n: (0, 0, 0)),          # s2
            pl.BlockSpec((exp, 1, C), lambda n: (0, 0, 0)),          # b2
            pl.BlockSpec((exp, C, C), lambda n: (0, 0, 0)),          # w2
            pl.BlockSpec((1, C), lambda n: (0, 0)),                  # s3
            pl.BlockSpec((1, C), lambda n: (0, 0)),                  # b3
        ],
        out_specs=pl.BlockSpec((1, H, W, C), lambda n: (n, 0, 0, 0)),
        scratch_shapes=[
            pltpu.VMEM((H + 2, W + 2, C), jnp.float32),   # padded x
            pltpu.VMEM((H + 2, W + 2, C), jnp.float32),   # padded conv1 output
        ],
    )
    return pl.pallas_call(
        _gelayer_kernel,
        out_shape=jax.ShapeDtypeStruct((N, H, W, C), jnp.float32),
        grid_spec=grid_spec,
        compiler_params=pltpu.CompilerParams(
            dimension_semantics=("parallel",)),
    )(x_lo, w1, s1, b1, wdw, s2, b2, w2, s3, b3)


# ------------------- deterministic parameter construction -------------------

def _fold_bn(gamma, beta, mean, var, eps=1e-5):
    scale = gamma / jnp.sqrt(var + eps)
    shift = beta - mean * scale
    return scale, shift


def init_params(key, C, exp_ratio=6):
    mid = C * exp_ratio
    ks = jax.random.split(key, 6)

    def bn_params(k, n):
        k1, k2, k3, k4 = jax.random.split(k, 4)
        gamma = 1.0 + 0.1 * jax.random.normal(k1, (n,), jnp.float32)
        beta = 0.05 * jax.random.normal(k2, (n,), jnp.float32)
        mean = 0.02 * jax.random.normal(k3, (n,), jnp.float32)
        var = 1.0 + 0.1 * jax.random.uniform(k4, (n,), jnp.float32)
        return gamma, beta, mean, var

    # conv1 : Conv2d(C, C, 3, pad=1, bias=False) + BN + ReLU        (OIHW)
    w1_t = 0.1 * jax.random.normal(ks[0], (C, C, 3, 3), jnp.float32)
    s1, b1 = _fold_bn(*bn_params(ks[1], C))
    # dwconv: Conv2d(C, mid, 3, pad=1, groups=C, bias=False) + BN + ReLU
    wdw_t = 0.2 * jax.random.normal(ks[2], (mid, 1, 3, 3), jnp.float32)
    s2, b2 = _fold_bn(*bn_params(ks[3], mid))
    # conv2 : Conv2d(mid, C, 1, bias=False) + BN (last_bn, no ReLU)
    w2_t = 0.1 * jax.random.normal(ks[4], (C, mid, 1, 1), jnp.float32)
    s3, b3 = _fold_bn(*bn_params(ks[5], C))

    # bf16-round the matmul weights once; kernel and reference use identical
    # rounded values so the correctness check stays tight.
    w1_q = w1_t.astype(jnp.bfloat16).astype(jnp.float32)
    w2_q = w2_t.astype(jnp.bfloat16).astype(jnp.float32)

    # ---- kernel packing (tap-major / expansion-major, NHWC matmul form) ----
    w1_k = jnp.transpose(w1_q, (2, 3, 1, 0)).reshape(9, C, C).astype(jnp.bfloat16)
    wdw_k = jnp.transpose(wdw_t[:, 0].reshape(C, exp_ratio, 3, 3),
                          (1, 2, 3, 0)).reshape(exp_ratio * 9, 1, C)   # f32
    s2_k = jnp.transpose(s2.reshape(C, exp_ratio))[:, None, :]         # (exp,1,C)
    b2_k = jnp.transpose(b2.reshape(C, exp_ratio))[:, None, :]
    w2_mat = jnp.transpose(w2_q[:, :, 0, 0])                            # (mid, C)
    w2_k = jnp.transpose(w2_mat.reshape(C, exp_ratio, C),
                         (1, 0, 2)).astype(jnp.bfloat16)                # (exp,C,C)
    kernel_params = (w1_k, s1.reshape(1, C), b1.reshape(1, C),
                     wdw_k, s2_k, b2_k,
                     w2_k, s3.reshape(1, C), b3.reshape(1, C))

    # ---- reference packing --------------------------------------------------
    w1_hwio = jnp.transpose(w1_q, (2, 3, 1, 0))     # (3, 3, C, C)
    wdw_hwio = jnp.transpose(wdw_t, (2, 3, 1, 0))   # (3, 3, 1, mid)
    ref_params = (w1_hwio, s1, b1, wdw_hwio, s2, b2, w2_mat, s3, b3)
    return kernel_params, ref_params


def ref_forward(x_nhwc, ref_params):
    """Pure-JAX reference of GELayer (inference-mode BN)."""
    w1_hwio, s1, b1, wdw_hwio, s2, b2, w2_mat, s3, b3 = ref_params
    C = x_nhwc.shape[-1]
    f = lax.conv_general_dilated(
        x_nhwc, w1_hwio, (1, 1), ((1, 1), (1, 1)),
        dimension_numbers=("NHWC", "HWIO", "NHWC"),
        precision=lax.Precision.HIGHEST)
    f = jnp.maximum(f * s1 + b1, 0.0)
    f = lax.conv_general_dilated(
        f, wdw_hwio, (1, 1), ((1, 1), (1, 1)),
        dimension_numbers=("NHWC", "HWIO", "NHWC"),
        feature_group_count=C, precision=lax.Precision.HIGHEST)
    f = jnp.maximum(f * s2 + b2, 0.0)
    # Kernel feeds the 1x1 conv in bf16; mirror that rounding here.
    f = f.astype(jnp.bfloat16).astype(jnp.float32)
    f = jnp.einsum("nhwm,mo->nhwo", f, w2_mat,
                   precision=lax.Precision.HIGHEST)
    f = f * s3 + b3
    return jnp.maximum(f + x_nhwc, 0.0)


if __name__ == "__main__":
    key = jax.random.PRNGKey(0)
    kx, kp = jax.random.split(key)
    N, C, H, W = 2, 32, 16, 16     # GELayer(32, 32), exp_ratio=6 -> mid=192

    # PyTorch-style NCHW input, transposed to the kernel's NHWC layout.
    x_nchw = jax.random.normal(kx, (N, C, H, W), jnp.float32)
    x_nhwc = jnp.transpose(x_nchw, (0, 2, 3, 1))

    kernel_params, ref_params = init_params(kp, C)

    y = gelayer(x_nhwc, kernel_params)
    jax.block_until_ready(y)

    # Reference consumes the same bf16-rounded input the kernel sees.
    x_q = x_nhwc.astype(jnp.bfloat16).astype(jnp.float32)
    y_ref = ref_forward(x_q, ref_params)
    max_err = float(jnp.max(jnp.abs(y - y_ref)))
    assert max_err < 2e-2, f"kernel/reference mismatch: max abs err {max_err}"

    print("KERNEL_OK")
</pallas_src>

<mosaic_0001>
module attributes {stable_mosaic.version = 11 : i64} {
  func.func @_gelayer_kernel(%arg0: i32, %arg1: memref<1x16x16x32xbf16, #tpu.memory_space<vmem>>, %arg2: memref<9x32x32xbf16, #tpu.memory_space<vmem>>, %arg3: memref<1x32xf32, #tpu.memory_space<vmem>>, %arg4: memref<1x32xf32, #tpu.memory_space<vmem>>, %arg5: memref<54x1x32xf32, #tpu.memory_space<vmem>>, %arg6: memref<6x1x32xf32, #tpu.memory_space<vmem>>, %arg7: memref<6x1x32xf32, #tpu.memory_space<vmem>>, %arg8: memref<6x32x32xbf16, #tpu.memory_space<vmem>>, %arg9: memref<1x32xf32, #tpu.memory_space<vmem>>, %arg10: memref<1x32xf32, #tpu.memory_space<vmem>>, %arg11: memref<1x16x16x32xf32, #tpu.memory_space<vmem>>, %arg12: memref<18x18x32xf32, #tpu.memory_space<vmem>>, %arg13: memref<18x18x32xf32, #tpu.memory_space<vmem>>) attributes {dimension_semantics = [#tpu.dimension_semantics<parallel>], iteration_bounds = array<i64: 2>, scalar_prefetch = 0 : i64, scratch_operands = 2 : i64, tpu.core_type = #tpu.core_type<tc>, window_params = [{transform_indices = @transform_0, window_bounds = array<i64: 1, 16, 16, 32>}, {pipeline_mode = #tpu.pipeline_mode<synchronous>, transform_indices = @transform_1, window_bounds = array<i64: 9, 32, 32>}, {pipeline_mode = #tpu.pipeline_mode<synchronous>, transform_indices = @transform_2, window_bounds = array<i64: 1, 32>}, {pipeline_mode = #tpu.pipeline_mode<synchronous>, transform_indices = @transform_3, window_bounds = array<i64: 1, 32>}, {pipeline_mode = #tpu.pipeline_mode<synchronous>, transform_indices = @transform_4, window_bounds = array<i64: 54, 1, 32>}, {pipeline_mode = #tpu.pipeline_mode<synchronous>, transform_indices = @transform_5, window_bounds = array<i64: 6, 1, 32>}, {pipeline_mode = #tpu.pipeline_mode<synchronous>, transform_indices = @transform_6, window_bounds = array<i64: 6, 1, 32>}, {pipeline_mode = #tpu.pipeline_mode<synchronous>, transform_indices = @transform_7, window_bounds = array<i64: 6, 32, 32>}, {pipeline_mode = #tpu.pipeline_mode<synchronous>, transform_indices = @transform_8, window_bounds = array<i64: 1, 32>}, {pipeline_mode = #tpu.pipeline_mode<synchronous>, transform_indices = @transform_9, window_bounds = array<i64: 1, 32>}, {transform_indices = @transform_10, window_bounds = array<i64: 1, 16, 16, 32>}]} {
    %c0 = arith.constant 0 : index
    %c0_0 = arith.constant 0 : index
    %c0_1 = arith.constant 0 : index
    %c0_2 = arith.constant 0 : index
    %0 = vector.load %arg1[%c0, %c0_0, %c0_1, %c0_2] : memref<1x16x16x32xbf16, #tpu.memory_space<vmem>>, vector<1x16x16x32xbf16>
    %1 = vector.shape_cast %0 : vector<1x16x16x32xbf16> to vector<16x16x32xbf16>
    %2 = arith.extf %1 : vector<16x16x32xbf16> to vector<16x16x32xf32>
    %cst = arith.constant 0.000000e+00 : f32
    %3 = vector.broadcast %cst : f32 to vector<18x18x32xf32>
    %c0_3 = arith.constant 0 : index
    %c0_4 = arith.constant 0 : index
    %c0_5 = arith.constant 0 : index
    %4 = vector.load %arg12[%c0_3, %c0_4, %c0_5] : memref<18x18x32xf32, #tpu.memory_space<vmem>>, vector<18x18x32xf32>
    tpu.vector_store %arg12[%c0_3, %c0_4, %c0_5], %3 {strides = array<i32>} : memref<18x18x32xf32, #tpu.memory_space<vmem>>, vector<18x18x32xf32>,
    %c1 = arith.constant 1 : index
    %c1_6 = arith.constant 1 : index
    %c0_7 = arith.constant 0 : index
    %5 = vector.load %arg12[%c1, %c1_6, %c0_7] : memref<18x18x32xf32, #tpu.memory_space<vmem>>, vector<16x16x32xf32>
    tpu.vector_store %arg12[%c1, %c1_6, %c0_7], %2 {strides = array<i32>} : memref<18x18x32xf32, #tpu.memory_space<vmem>>, vector<16x16x32xf32>,
    %cst_8 = arith.constant 0.000000e+00 : f32
    %6 = vector.broadcast %cst_8 : f32 to vector<256x32xf32>
    %c0_9 = arith.constant 0 : index
    %c0_10 = arith.constant 0 : index
    %c0_11 = arith.constant 0 : index
    %7 = vector.load %arg12[%c0_9, %c0_10, %c0_11] : memref<18x18x32xf32, #tpu.memory_space<vmem>>, vector<16x16x32xf32>
    %8 = vector.shape_cast %7 : vector<16x16x32xf32> to vector<256x32xf32>
    %9 = arith.truncf %8 : vector<256x32xf32> to vector<256x32xbf16>
    %c0_12 = arith.constant 0 : index
    %c0_13 = arith.constant 0 : index
    %c0_14 = arith.constant 0 : index
    %10 = vector.load %arg2[%c0_12, %c0_13, %c0_14] : memref<9x32x32xbf16, #tpu.memory_space<vmem>>, vector<1x32x32xbf16>
    %11 = vector.shape_cast %10 : vector<1x32x32xbf16> to vector<32x32xbf16>
    %cst_15 = arith.constant dense<0.000000e+00> : vector<256x32xf32>
    %12 = tpu.matmul %9, %11, %cst_15 {dimension_numbers = #tpu.dot_dimension_numbers<[1], [0], [0], [1], [0, 0, 1, 1], [], []>} : vector<256x32xbf16>, vector<32x32xbf16>, vector<256x32xf32> -> vector<256x32xf32>
    %13 = arith.addf %6, %12 : vector<256x32xf32>
    %c0_16 = arith.constant 0 : index
    %c1_17 = arith.constant 1 : index
    %c0_18 = arith.constant 0 : index
    %14 = vector.load %arg12[%c0_16, %c1_17, %c0_18] : memref<18x18x32xf32, #tpu.memory_space<vmem>>, vector<16x16x32xf32>
    %15 = vector.shape_cast %14 : vector<16x16x32xf32> to vector<256x32xf32>
    %16 = arith.truncf %15 : vector<256x32xf32> to vector<256x32xbf16>
    %c1_19 = arith.constant 1 : index
    %c0_20 = arith.constant 0 : index
    %c0_21 = arith.constant 0 : index
    %17 = vector.load %arg2[%c1_19, %c0_20, %c0_21] : memref<9x32x32xbf16, #tpu.memory_space<vmem>>, vector<1x32x32xbf16>
    %18 = vector.shape_cast %17 : vector<1x32x32xbf16> to vector<32x32xbf16>
    %cst_22 = arith.constant dense<0.000000e+00> : vector<256x32xf32>
    %19 = tpu.matmul %16, %18, %cst_22 {dimension_numbers = #tpu.dot_dimension_numbers<[1], [0], [0], [1], [0, 0, 1, 1], [], []>} : vector<256x32xbf16>, vector<32x32xbf16>, vector<256x32xf32> -> vector<256x32xf32>
    %20 = arith.addf %13, %19 : vector<256x32xf32>
    %c0_23 = arith.constant 0 : index
    %c2 = arith.constant 2 : index
    %c0_24 = arith.constant 0 : index
    %21 = vector.load %arg12[%c0_23, %c2, %c0_24] : memref<18x18x32xf32, #tpu.memory_space<vmem>>, vector<16x16x32xf32>
    %22 = vector.shape_cast %21 : vector<16x16x32xf32> to vector<256x32xf32>
    %23 = arith.truncf %22 : vector<256x32xf32> to vector<256x32xbf16>
    %c2_25 = arith.constant 2 : index
    %c0_26 = arith.constant 0 : index
    %c0_27 = arith.constant 0 : index
    %24 = vector.load %arg2[%c2_25, %c0_26, %c0_27] : memref<9x32x32xbf16, #tpu.memory_space<vmem>>, vector<1x32x32xbf16>
    %25 = vector.shape_cast %24 : vector<1x32x32xbf16> to vector<32x32xbf16>
    %cst_28 = arith.constant dense<0.000000e+00> : vector<256x32xf32>
    %26 = tpu.matmul %23, %25, %cst_28 {dimension_numbers = #tpu.dot_dimension_numbers<[1], [0], [0], [1], [0, 0, 1, 1], [], []>} : vector<256x32xbf16>, vector<32x32xbf16>, vector<256x32xf32> -> vector<256x32xf32>
    %27 = arith.addf %20, %26 : vector<256x32xf32>
    %c1_29 = arith.constant 1 : index
    %c0_30 = arith.constant 0 : index
    %c0_31 = arith.constant 0 : index
    %28 = vector.load %arg12[%c1_29, %c0_30, %c0_31] : memref<18x18x32xf32, #tpu.memory_space<vmem>>, vector<16x16x32xf32>
    %29 = vector.shape_cast %28 : vector<16x16x32xf32> to vector<256x32xf32>
    %30 = arith.truncf %29 : vector<256x32xf32> to vector<256x32xbf16>
    %c3 = arith.constant 3 : index
    %c0_32 = arith.constant 0 : index
    %c0_33 = arith.constant 0 : index
    %31 = vector.load %arg2[%c3, %c0_32, %c0_33] : memref<9x32x32xbf16, #tpu.memory_space<vmem>>, vector<1x32x32xbf16>
    %32 = vector.shape_cast %31 : vector<1x32x32xbf16> to vector<32x32xbf16>
    %cst_34 = arith.constant dense<0.000000e+00> : vector<256x32xf32>
    %33 = tpu.matmul %30, %32, %cst_34 {dimension_numbers = #tpu.dot_dimension_numbers<[1], [0], [0], [1], [0, 0, 1, 1], [], []>} : vector<256x32xbf16>, vector<32x32xbf16>, vector<256x32xf32> -> vector<256x32xf32>
    %34 = arith.addf %27, %33 : vector<256x32xf32>
    %c1_35 = arith.constant 1 : index
    %c1_36 = arith.constant 1 : index
    %c0_37 = arith.constant 0 : index
    %35 = vector.load %arg12[%c1_35, %c1_36, %c0_37] : memref<18x18x32xf32, #tpu.memory_space<vmem>>, vector<16x16x32xf32>
    %36 = vector.shape_cast %35 : vector<16x16x32xf32> to vector<256x32xf32>
    %37 = arith.truncf %36 : vector<256x32xf32> to vector<256x32xbf16>
    %c4 = arith.constant 4 : index
    %c0_38 = arith.constant 0 : index
    %c0_39 = arith.constant 0 : index
    %38 = vector.load %arg2[%c4, %c0_38, %c0_39] : memref<9x32x32xbf16, #tpu.memory_space<vmem>>, vector<1x32x32xbf16>
    %39 = vector.shape_cast %38 : vector<1x32x32xbf16> to vector<32x32xbf16>
    %cst_40 = arith.constant dense<0.000000e+00> : vector<256x32xf32>
    %40 = tpu.matmul %37, %39, %cst_40 {dimension_numbers = #tpu.dot_dimension_numbers<[1], [0], [0], [1], [0, 0, 1, 1], [], []>} : vector<256x32xbf16>, vector<32x32xbf16>, vector<256x32xf32> -> vector<256x32xf32>
    %41 = arith.addf %34, %40 : vector<256x32xf32>
    %c1_41 = arith.constant 1 : index
    %c2_42 = arith.constant 2 : index
    %c0_43 = arith.constant 0 : index
    %42 = vector.load %arg12[%c1_41, %c2_42, %c0_43] : memref<18x18x32xf32, #tpu.memory_space<vmem>>, vector<16x16x32xf32>
    %43 = vector.shape_cast %42 : vector<16x16x32xf32> to vector<256x32xf32>
    %44 = arith.truncf %43 : vector<256x32xf32> to vector<256x32xbf16>
    %c5 = arith.constant 5 : index
    %c0_44 = arith.constant 0 : index
    %c0_45 = arith.constant 0 : index
    %45 = vector.load %arg2[%c5, %c0_44, %c0_45] : memref<9x32x32xbf16, #tpu.memory_space<vmem>>, vector<1x32x32xbf16>
    %46 = vector.shape_cast %45 : vector<1x32x32xbf16> to vector<32x32xbf16>
    %cst_46 = arith.constant dense<0.000000e+00> : vector<256x32xf32>
    %47 = tpu.matmul %44, %46, %cst_46 {dimension_numbers = #tpu.dot_dimension_numbers<[1], [0], [0], [1], [0, 0, 1, 1], [], []>} : vector<256x32xbf16>, vector<32x32xbf16>, vector<256x32xf32> -> vector<256x32xf32>
    %48 = arith.addf %41, %47 : vector<256x32xf32>
    %c2_47 = arith.constant 2 : index
    %c0_48 = arith.constant 0 : index
    %c0_49 = arith.constant 0 : index
    %49 = vector.load %arg12[%c2_47, %c0_48, %c0_49] : memref<18x18x32xf32, #tpu.memory_space<vmem>>, vector<16x16x32xf32>
    %50 = vector.shape_cast %49 : vector<16x16x32xf32> to vector<256x32xf32>
    %51 = arith.truncf %50 : vector<256x32xf32> to vector<256x32xbf16>
    %c6 = arith.constant 6 : index
    %c0_50 = arith.constant 0 : index
    %c0_51 = arith.constant 0 : index
    %52 = vector.load %arg2[%c6, %c0_50, %c0_51] : memref<9x32x32xbf16, #tpu.memory_space<vmem>>, vector<1x32x32xbf16>
    %53 = vector.shape_cast %52 : vector<1x32x32xbf16> to vector<32x32xbf16>
    %cst_52 = arith.constant dense<0.000000e+00> : vector<256x32xf32>
    %54 = tpu.matmul %51, %53, %cst_52 {dimension_numbers = #tpu.dot_dimension_numbers<[1], [0], [0], [1], [0, 0, 1, 1], [], []>} : vector<256x32xbf16>, vector<32x32xbf16>, vector<256x32xf32> -> vector<256x32xf32>
    %55 = arith.addf %48, %54 : vector<256x32xf32>
    %c2_53 = arith.constant 2 : index
    %c1_54 = arith.constant 1 : index
    %c0_55 = arith.constant 0 : index
    %56 = vector.load %arg12[%c2_53, %c1_54, %c0_55] : memref<18x18x32xf32, #tpu.memory_space<vmem>>, vector<16x16x32xf32>
    %57 = vector.shape_cast %56 : vector<16x16x32xf32> to vector<256x32xf32>
    %58 = arith.truncf %57 : vector<256x32xf32> to vector<256x32xbf16>
    %c7 = arith.constant 7 : index
    %c0_56 = arith.constant 0 : index
    %c0_57 = arith.constant 0 : index
    %59 = vector.load %arg2[%c7, %c0_56, %c0_57] : memref<9x32x32xbf16, #tpu.memory_space<vmem>>, vector<1x32x32xbf16>
    %60 = vector.shape_cast %59 : vector<1x32x32xbf16> to vector<32x32xbf16>
    %cst_58 = arith.constant dense<0.000000e+00> : vector<256x32xf32>
    %61 = tpu.matmul %58, %60, %cst_58 {dimension_numbers = #tpu.dot_dimension_numbers<[1], [0], [0], [1], [0, 0, 1, 1], [], []>} : vector<256x32xbf16>, vector<32x32xbf16>, vector<256x32xf32> -> vector<256x32xf32>
    %62 = arith.addf %55, %61 : vector<256x32xf32>
    %c2_59 = arith.constant 2 : index
    %c2_60 = arith.constant 2 : index
    %c0_61 = arith.constant 0 : index
    %63 = vector.load %arg12[%c2_59, %c2_60, %c0_61] : memref<18x18x32xf32, #tpu.memory_space<vmem>>, vector<16x16x32xf32>
    %64 = vector.shape_cast %63 : vector<16x16x32xf32> to vector<256x32xf32>
    %65 = arith.truncf %64 : vector<256x32xf32> to vector<256x32xbf16>
    %c8 = arith.constant 8 : index
    %c0_62 = arith.constant 0 : index
    %c0_63 = arith.constant 0 : index
    %66 = vector.load %arg2[%c8, %c0_62, %c0_63] : memref<9x32x32xbf16, #tpu.memory_space<vmem>>, vector<1x32x32xbf16>
    %67 = vector.shape_cast %66 : vector<1x32x32xbf16> to vector<32x32xbf16>
    %cst_64 = arith.constant dense<0.000000e+00> : vector<256x32xf32>
    %68 = tpu.matmul %65, %67, %cst_64 {dimension_numbers = #tpu.dot_dimension_numbers<[1], [0], [0], [1], [0, 0, 1, 1], [], []>} : vector<256x32xbf16>, vector<32x32xbf16>, vector<256x32xf32> -> vector<256x32xf32>
    %69 = arith.addf %62, %68 : vector<256x32xf32>
    %c0_65 = arith.constant 0 : index
    %c0_66 = arith.constant 0 : index
    %70 = vector.load %arg3[%c0_65, %c0_66] : memref<1x32xf32, #tpu.memory_space<vmem>>, vector<1x32xf32>
    %71 = vector.broadcast %70 : vector<1x32xf32> to vector<256x32xf32>
    %72 = arith.mulf %69, %71 : vector<256x32xf32>
    %c0_67 = arith.constant 0 : index
    %c0_68 = arith.constant 0 : index
    %73 = vector.load %arg4[%c0_67, %c0_68] : memref<1x32xf32, #tpu.memory_space<vmem>>, vector<1x32xf32>
    %74 = vector.broadcast %73 : vector<1x32xf32> to vector<256x32xf32>
    %75 = arith.addf %72, %74 : vector<256x32xf32>
    %cst_69 = arith.constant 0.000000e+00 : f32
    %76 = vector.broadcast %cst_69 : f32 to vector<256x32xf32>
    %77 = arith.maximumf %75, %76 : vector<256x32xf32>
    %cst_70 = arith.constant 0.000000e+00 : f32
    %78 = vector.broadcast %cst_70 : f32 to vector<18x18x32xf32>
    %c0_71 = arith.constant 0 : index
    %c0_72 = arith.constant 0 : index
    %c0_73 = arith.constant 0 : index
    %79 = vector.load %arg13[%c0_71, %c0_72, %c0_73] : memref<18x18x32xf32, #tpu.memory_space<vmem>>, vector<18x18x32xf32>
    tpu.vector_store %arg13[%c0_71, %c0_72, %c0_73], %78 {strides = array<i32>} : memref<18x18x32xf32, #tpu.memory_space<vmem>>, vector<18x18x32xf32>,
    %80 = vector.shape_cast %77 : vector<256x32xf32> to vector<16x16x32xf32>
    %c1_74 = arith.constant 1 : index
    %c1_75 = arith.constant 1 : index
    %c0_76 = arith.constant 0 : index
    %81 = vector.load %arg13[%c1_74, %c1_75, %c0_76] : memref<18x18x32xf32, #tpu.memory_space<vmem>>, vector<16x16x32xf32>
    tpu.vector_store %arg13[%c1_74, %c1_75, %c0_76], %80 {strides = array<i32>} : memref<18x18x32xf32, #tpu.memory_space<vmem>>, vector<16x16x32xf32>,
    %cst_77 = arith.constant 0.000000e+00 : f32
    %82 = vector.broadcast %cst_77 : f32 to vector<256x32xf32>
    %cst_78 = arith.constant 0.000000e+00 : f32
    %83 = vector.broadcast %cst_78 : f32 to vector<16x16x32xf32>
    %c0_79 = arith.constant 0 : index
    %c0_80 = arith.constant 0 : index
    %c0_81 = arith.constant 0 : index
    %84 = vector.load %arg13[%c0_79, %c0_80, %c0_81] : memref<18x18x32xf32, #tpu.memory_space<vmem>>, vector<16x16x32xf32>
    %c0_82 = arith.constant 0 : index
    %c0_83 = arith.constant 0 : index
    %c0_84 = arith.constant 0 : index
    %85 = vector.load %arg5[%c0_82, %c0_83, %c0_84] : memref<54x1x32xf32, #tpu.memory_space<vmem>>, vector<1x1x32xf32>
    %86 = vector.shape_cast %85 : vector<1x1x32xf32> to vector<1x32xf32>
    %87 = vector.shape_cast %86 : vector<1x32xf32> to vector<1x1x32xf32>
    %88 = vector.broadcast %87 : vector<1x1x32xf32> to vector<16x16x32xf32>
    %89 = arith.mulf %84, %88 : vector<16x16x32xf32>
    %90 = arith.addf %83, %89 : vector<16x16x32xf32>
    %c0_85 = arith.constant 0 : index
    %c1_86 = arith.constant 1 : index
    %c0_87 = arith.constant 0 : index
    %91 = vector.load %arg13[%c0_85, %c1_86, %c0_87] : memref<18x18x32xf32, #tpu.memory_space<vmem>>, vector<16x16x32xf32>
    %c1_88 = arith.constant 1 : index
    %c0_89 = arith.constant 0 : index
    %c0_90 = arith.constant 0 : index
    %92 = vector.load %arg5[%c1_88, %c0_89, %c0_90] : memref<54x1x32xf32, #tpu.memory_space<vmem>>, vector<1x1x32xf32>
    %93 = vector.shape_cast %92 : vector<1x1x32xf32> to vector<1x32xf32>
    %94 = vector.shape_cast %93 : vector<1x32xf32> to vector<1x1x32xf32>
    %95 = vector.broadcast %94 : vector<1x1x32xf32> to vector<16x16x32xf32>
    %96 = arith.mulf %91, %95 : vector<16x16x32xf32>
    %97 = arith.addf %90, %96 : vector<16x16x32xf32>
    %c0_91 = arith.constant 0 : index
    %c2_92 = arith.constant 2 : index
    %c0_93 = arith.constant 0 : index
    %98 = vector.load %arg13[%c0_91, %c2_92, %c0_93] : memref<18x18x32xf32, #tpu.memory_space<vmem>>, vector<16x16x32xf32>
    %c2_94 = arith.constant 2 : index
    %c0_95 = arith.constant 0 : index
    %c0_96 = arith.constant 0 : index
    %99 = vector.load %arg5[%c2_94, %c0_95, %c0_96] : memref<54x1x32xf32, #tpu.memory_space<vmem>>, vector<1x1x32xf32>
    %100 = vector.shape_cast %99 : vector<1x1x32xf32> to vector<1x32xf32>
    %101 = vector.shape_cast %100 : vector<1x32xf32> to vector<1x1x32xf32>
    %102 = vector.broadcast %101 : vector<1x1x32xf32> to vector<16x16x32xf32>
    %103 = arith.mulf %98, %102 : vector<16x16x32xf32>
    %104 = arith.addf %97, %103 : vector<16x16x32xf32>
    %c1_97 = arith.constant 1 : index
    %c0_98 = arith.constant 0 : index
    %c0_99 = arith.constant 0 : index
    %105 = vector.load %arg13[%c1_97, %c0_98, %c0_99] : memref<18x18x32xf32, #tpu.memory_space<vmem>>, vector<16x16x32xf32>
    %c3_100 = arith.constant 3 : index
    %c0_101 = arith.constant 0 : index
    %c0_102 = arith.constant 0 : index
    %106 = vector.load %arg5[%c3_100, %c0_101, %c0_102] : memref<54x1x32xf32, #tpu.memory_space<vmem>>, vector<1x1x32xf32>
    %107 = vector.shape_cast %106 : vector<1x1x32xf32> to vector<1x32xf32>
    %108 = vector.shape_cast %107 : vector<1x32xf32> to vector<1x1x32xf32>
    %109 = vector.broadcast %108 : vector<1x1x32xf32> to vector<16x16x32xf32>
    %110 = arith.mulf %105, %109 : vector<16x16x32xf32>
    %111 = arith.addf %104, %110 : vector<16x16x32xf32>
    %c1_103 = arith.constant 1 : index
    %c1_104 = arith.constant 1 : index
    %c0_105 = arith.constant 0 : index
    %112 = vector.load %arg13[%c1_103, %c1_104, %c0_105] : memref<18x18x32xf32, #tpu.memory_space<vmem>>, vector<16x16x32xf32>
    %c4_106 = arith.constant 4 : index
    %c0_107 = arith.constant 0 : index
    %c0_108 = arith.constant 0 : index
    %113 = vector.load %arg5[%c4_106, %c0_107, %c0_108] : memref<54x1x32xf32, #tpu.memory_space<vmem>>, vector<1x1x32xf32>
    %114 = vector.shape_cast %113 : vector<1x1x32xf32> to vector<1x32xf32>
    %115 = vector.shape_cast %114 : vector<1x32xf32> to vector<1x1x32xf32>
    %116 = vector.broadcast %115 : vector<1x1x32xf32> to vector<16x16x32xf32>
    %117 = arith.mulf %112, %116 : vector<16x16x32xf32>
    %118 = arith.addf %111, %117 : vector<16x16x32xf32>
    %c1_109 = arith.constant 1 : index
    %c2_110 = arith.constant 2 : index
    %c0_111 = arith.constant 0 : index
    %119 = vector.load %arg13[%c1_109, %c2_110, %c0_111] : memref<18x18x32xf32, #tpu.memory_space<vmem>>, vector<16x16x32xf32>
    %c5_112 = arith.constant 5 : index
    %c0_113 = arith.constant 0 : index
    %c0_114 = arith.constant 0 : index
    %120 = vector.load %arg5[%c5_112, %c0_113, %c0_114] : memref<54x1x32xf32, #tpu.memory_space<vmem>>, vector<1x1x32xf32>
    %121 = vector.shape_cast %120 : vector<1x1x32xf32> to vector<1x32xf32>
    %122 = vector.shape_cast %121 : vector<1x32xf32> to vector<1x1x32xf32>
    %123 = vector.broadcast %122 : vector<1x1x32xf32> to vector<16x16x32xf32>
    %124 = arith.mulf %119, %123 : vector<16x16x32xf32>
    %125 = arith.addf %118, %124 : vector<16x16x32xf32>
    %c2_115 = arith.constant 2 : index
    %c0_116 = arith.constant 0 : index
    %c0_117 = arith.constant 0 : index
    %126 = vector.load %arg13[%c2_115, %c0_116, %c0_117] : memref<18x18x32xf32, #tpu.memory_space<vmem>>, vector<16x16x32xf32>
    %c6_118 = arith.constant 6 : index
    %c0_119 = arith.constant 0 : index
    %c0_120 = arith.constant 0 : index
    %127 = vector.load %arg5[%c6_118, %c0_119, %c0_120] : memref<54x1x32xf32, #tpu.memory_space<vmem>>, vector<1x1x32xf32>
    %128 = vector.shape_cast %127 : vector<1x1x32xf32> to vector<1x32xf32>
    %129 = vector.shape_cast %128 : vector<1x32xf32> to vector<1x1x32xf32>
    %130 = vector.broadcast %129 : vector<1x1x32xf32> to vector<16x16x32xf32>
    %131 = arith.mulf %126, %130 : vector<16x16x32xf32>
    %132 = arith.addf %125, %131 : vector<16x16x32xf32>
    %c2_121 = arith.constant 2 : index
    %c1_122 = arith.constant 1 : index
    %c0_123 = arith.constant 0 : index
    %133 = vector.load %arg13[%c2_121, %c1_122, %c0_123] : memref<18x18x32xf32, #tpu.memory_space<vmem>>, vector<16x16x32xf32>
    %c7_124 = arith.constant 7 : index
    %c0_125 = arith.constant 0 : index
    %c0_126 = arith.constant 0 : index
    %134 = vector.load %arg5[%c7_124, %c0_125, %c0_126] : memref<54x1x32xf32, #tpu.memory_space<vmem>>, vector<1x1x32xf32>
    %135 = vector.shape_cast %134 : vector<1x1x32xf32> to vector<1x32xf32>
    %136 = vector.shape_cast %135 : vector<1x32xf32> to vector<1x1x32xf32>
    %137 = vector.broadcast %136 : vector<1x1x32xf32> to vector<16x16x32xf32>
    %138 = arith.mulf %133, %137 : vector<16x16x32xf32>
    %139 = arith.addf %132, %138 : vector<16x16x32xf32>
    %c2_127 = arith.constant 2 : index
    %c2_128 = arith.constant 2 : index
    %c0_129 = arith.constant 0 : index
    %140 = vector.load %arg13[%c2_127, %c2_128, %c0_129] : memref<18x18x32xf32, #tpu.memory_space<vmem>>, vector<16x16x32xf32>
    %c8_130 = arith.constant 8 : index
    %c0_131 = arith.constant 0 : index
    %c0_132 = arith.constant 0 : index
    %141 = vector.load %arg5[%c8_130, %c0_131, %c0_132] : memref<54x1x32xf32, #tpu.memory_space<vmem>>, vector<1x1x32xf32>
    %142 = vector.shape_cast %141 : vector<1x1x32xf32> to vector<1x32xf32>
    %143 = vector.shape_cast %142 : vector<1x32xf32> to vector<1x1x32xf32>
    %144 = vector.broadcast %143 : vector<1x1x32xf32> to vector<16x16x32xf32>
    %145 = arith.mulf %140, %144 : vector<16x16x32xf32>
    %146 = arith.addf %139, %145 : vector<16x16x32xf32>
    %c0_133 = arith.constant 0 : index
    %c0_134 = arith.constant 0 : index
    %c0_135 = arith.constant 0 : index
    %147 = vector.load %arg6[%c0_133, %c0_134, %c0_135] : memref<6x1x32xf32, #tpu.memory_space<vmem>>, vector<1x1x32xf32>
    %148 = vector.shape_cast %147 : vector<1x1x32xf32> to vector<1x32xf32>
    %149 = vector.shape_cast %148 : vector<1x32xf32> to vector<1x1x32xf32>
    %150 = vector.broadcast %149 : vector<1x1x32xf32> to vector<16x16x32xf32>
    %151 = arith.mulf %146, %150 : vector<16x16x32xf32>
    %c0_136 = arith.constant 0 : index
    %c0_137 = arith.constant 0 : index
    %c0_138 = arith.constant 0 : index
    %152 = vector.load %arg7[%c0_136, %c0_137, %c0_138] : memref<6x1x32xf32, #tpu.memory_space<vmem>>, vector<1x1x32xf32>
    %153 = vector.shape_cast %152 : vector<1x1x32xf32> to vector<1x32xf32>
    %154 = vector.shape_cast %153 : vector<1x32xf32> to vector<1x1x32xf32>
    %155 = vector.broadcast %154 : vector<1x1x32xf32> to vector<16x16x32xf32>
    %156 = arith.addf %151, %155 : vector<16x16x32xf32>
    %cst_139 = arith.constant 0.000000e+00 : f32
    %157 = vector.broadcast %cst_139 : f32 to vector<16x16x32xf32>
    %158 = arith.maximumf %156, %157 : vector<16x16x32xf32>
    %159 = vector.shape_cast %158 : vector<16x16x32xf32> to vector<256x32xf32>
    %160 = arith.truncf %159 : vector<256x32xf32> to vector<256x32xbf16>
    %c0_140 = arith.constant 0 : index
    %c0_141 = arith.constant 0 : index
    %c0_142 = arith.constant 0 : index
    %161 = vector.load %arg8[%c0_140, %c0_141, %c0_142] : memref<6x32x32xbf16, #tpu.memory_space<vmem>>, vector<1x32x32xbf16>
    %162 = vector.shape_cast %161 : vector<1x32x32xbf16> to vector<32x32xbf16>
    %cst_143 = arith.constant dense<0.000000e+00> : vector<256x32xf32>
    %163 = tpu.matmul %160, %162, %cst_143 {dimension_numbers = #tpu.dot_dimension_numbers<[1], [0], [0], [1], [0, 0, 1, 1], [], []>} : vector<256x32xbf16>, vector<32x32xbf16>, vector<256x32xf32> -> vector<256x32xf32>
    %164 = arith.addf %82, %163 : vector<256x32xf32>
    %cst_144 = arith.constant 0.000000e+00 : f32
    %165 = vector.broadcast %cst_144 : f32 to vector<16x16x32xf32>
    %c0_145 = arith.constant 0 : index
    %c0_146 = arith.constant 0 : index
    %c0_147 = arith.constant 0 : index
    %166 = vector.load %arg13[%c0_145, %c0_146, %c0_147] : memref<18x18x32xf32, #tpu.memory_space<vmem>>, vector<16x16x32xf32>
    %c9 = arith.constant 9 : index
    %c0_148 = arith.constant 0 : index
    %c0_149 = arith.constant 0 : index
    %167 = vector.load %arg5[%c9, %c0_148, %c0_149] : memref<54x1x32xf32, #tpu.memory_space<vmem>>, vector<1x1x32xf32>
    %168 = vector.shape_cast %167 : vector<1x1x32xf32> to vector<1x32xf32>
    %169 = vector.shape_cast %168 : vector<1x32xf32> to vector<1x1x32xf32>
    %170 = vector.broadcast %169 : vector<1x1x32xf32> to vector<16x16x32xf32>
    %171 = arith.mulf %166, %170 : vector<16x16x32xf32>
    %172 = arith.addf %165, %171 : vector<16x16x32xf32>
    %c0_150 = arith.constant 0 : index
    %c1_151 = arith.constant 1 : index
    %c0_152 = arith.constant 0 : index
    %173 = vector.load %arg13[%c0_150, %c1_151, %c0_152] : memref<18x18x32xf32, #tpu.memory_space<vmem>>, vector<16x16x32xf32>
    %c10 = arith.constant 10 : index
    %c0_153 = arith.constant 0 : index
    %c0_154 = arith.constant 0 : index
    %174 = vector.load %arg5[%c10, %c0_153, %c0_154] : memref<54x1x32xf32, #tpu.memory_space<vmem>>, vector<1x1x32xf32>
    %175 = vector.shape_cast %174 : vector<1x1x32xf32> to vector<1x32xf32>
    %176 = vector.shape_cast %175 : vector<1x32xf32> to vector<1x1x32xf32>
    %177 = vector.broadcast %176 : vector<1x1x32xf32> to vector<16x16x32xf32>
    %178 = arith.mulf %173, %177 : vector<16x16x32xf32>
    %179 = arith.addf %172, %178 : vector<16x16x32xf32>
    %c0_155 = arith.constant 0 : index
    %c2_156 = arith.constant 2 : index
    %c0_157 = arith.constant 0 : index
    %180 = vector.load %arg13[%c0_155, %c2_156, %c0_157] : memref<18x18x32xf32, #tpu.memory_space<vmem>>, vector<16x16x32xf32>
    %c11 = arith.constant 11 : index
    %c0_158 = arith.constant 0 : index
    %c0_159 = arith.constant 0 : index
    %181 = vector.load %arg5[%c11, %c0_158, %c0_159] : memref<54x1x32xf32, #tpu.memory_space<vmem>>, vector<1x1x32xf32>
    %182 = vector.shape_cast %181 : vector<1x1x32xf32> to vector<1x32xf32>
    %183 = vector.shape_cast %182 : vector<1x32xf32> to vector<1x1x32xf32>
    %184 = vector.broadcast %183 : vector<1x1x32xf32> to vector<16x16x32xf32>
    %185 = arith.mulf %180, %184 : vector<16x16x32xf32>
    %186 = arith.addf %179, %185 : vector<16x16x32xf32>
    %c1_160 = arith.constant 1 : index
    %c0_161 = arith.constant 0 : index
    %c0_162 = arith.constant 0 : index
    %187 = vector.load %arg13[%c1_160, %c0_161, %c0_162] : memref<18x18x32xf32, #tpu.memory_space<vmem>>, vector<16x16x32xf32>
    %c12 = arith.constant 12 : index
    %c0_163 = arith.constant 0 : index
    %c0_164 = arith.constant 0 : index
    %188 = vector.load %arg5[%c12, %c0_163, %c0_164] : memref<54x1x32xf32, #tpu.memory_space<vmem>>, vector<1x1x32xf32>
    %189 = vector.shape_cast %188 : vector<1x1x32xf32> to vector<1x32xf32>
    %190 = vector.shape_cast %189 : vector<1x32xf32> to vector<1x1x32xf32>
    %191 = vector.broadcast %190 : vector<1x1x32xf32> to vector<16x16x32xf32>
    %192 = arith.mulf %187, %191 : vector<16x16x32xf32>
    %193 = arith.addf %186, %192 : vector<16x16x32xf32>
    %c1_165 = arith.constant 1 : index
    %c1_166 = arith.constant 1 : index
    %c0_167 = arith.constant 0 : index
    %194 = vector.load %arg13[%c1_165, %c1_166, %c0_167] : memref<18x18x32xf32, #tpu.memory_space<vmem>>, vector<16x16x32xf32>
    %c13 = arith.constant 13 : index
    %c0_168 = arith.constant 0 : index
    %c0_169 = arith.constant 0 : index
    %195 = vector.load %arg5[%c13, %c0_168, %c0_169] : memref<54x1x32xf32, #tpu.memory_space<vmem>>, vector<1x1x32xf32>
    %196 = vector.shape_cast %195 : vector<1x1x32xf32> to vector<1x32xf32>
    %197 = vector.shape_cast %196 : vector<1x32xf32> to vector<1x1x32xf32>
    %198 = vector.broadcast %197 : vector<1x1x32xf32> to vector<16x16x32xf32>
    %199 = arith.mulf %194, %198 : vector<16x16x32xf32>
    %200 = arith.addf %193, %199 : vector<16x16x32xf32>
    %c1_170 = arith.constant 1 : index
    %c2_171 = arith.constant 2 : index
    %c0_172 = arith.constant 0 : index
    %201 = vector.load %arg13[%c1_170, %c2_171, %c0_172] : memref<18x18x32xf32, #tpu.memory_space<vmem>>, vector<16x16x32xf32>
    %c14 = arith.constant 14 : index
    %c0_173 = arith.constant 0 : index
    %c0_174 = arith.constant 0 : index
    %202 = vector.load %arg5[%c14, %c0_173, %c0_174] : memref<54x1x32xf32, #tpu.memory_space<vmem>>, vector<1x1x32xf32>
    %203 = vector.shape_cast %202 : vector<1x1x32xf32> to vector<1x32xf32>
    %204 = vector.shape_cast %203 : vector<1x32xf32> to vector<1x1x32xf32>
    %205 = vector.broadcast %204 : vector<1x1x32xf32> to vector<16x16x32xf32>
    %206 = arith.mulf %201, %205 : vector<16x16x32xf32>
    %207 = arith.addf %200, %206 : vector<16x16x32xf32>
    %c2_175 = arith.constant 2 : index
    %c0_176 = arith.constant 0 : index
    %c0_177 = arith.constant 0 : index
    %208 = vector.load %arg13[%c2_175, %c0_176, %c0_177] : memref<18x18x32xf32, #tpu.memory_space<vmem>>, vector<16x16x32xf32>
    %c15 = arith.constant 15 : index
    %c0_178 = arith.constant 0 : index
    %c0_179 = arith.constant 0 : index
    %209 = vector.load %arg5[%c15, %c0_178, %c0_179] : memref<54x1x32xf32, #tpu.memory_space<vmem>>, vector<1x1x32xf32>
    %210 = vector.shape_cast %209 : vector<1x1x32xf32> to vector<1x32xf32>
    %211 = vector.shape_cast %210 : vector<1x32xf32> to vector<1x1x32xf32>
    %212 = vector.broadcast %211 : vector<1x1x32xf32> to vector<16x16x32xf32>
    %213 = arith.mulf %208, %212 : vector<16x16x32xf32>
    %214 = arith.addf %207, %213 : vector<16x16x32xf32>
    %c2_180 = arith.constant 2 : index
    %c1_181 = arith.constant 1 : index
    %c0_182 = arith.constant 0 : index
    %215 = vector.load %arg13[%c2_180, %c1_181, %c0_182] : memref<18x18x32xf32, #tpu.memory_space<vmem>>, vector<16x16x32xf32>
    %c16 = arith.constant 16 : index
    %c0_183 = arith.constant 0 : index
    %c0_184 = arith.constant 0 : index
    %216 = vector.load %arg5[%c16, %c0_183, %c0_184] : memref<54x1x32xf32, #tpu.memory_space<vmem>>, vector<1x1x32xf32>
    %217 = vector.shape_cast %216 : vector<1x1x32xf32> to vector<1x32xf32>
    %218 = vector.shape_cast %217 : vector<1x32xf32> to vector<1x1x32xf32>
    %219 = vector.broadcast %218 : vector<1x1x32xf32> to vector<16x16x32xf32>
    %220 = arith.mulf %215, %219 : vector<16x16x32xf32>
    %221 = arith.addf %214, %220 : vector<16x16x32xf32>
    %c2_185 = arith.constant 2 : index
    %c2_186 = arith.constant 2 : index
    %c0_187 = arith.constant 0 : index
    %222 = vector.load %arg13[%c2_185, %c2_186, %c0_187] : memref<18x18x32xf32, #tpu.memory_space<vmem>>, vector<16x16x32xf32>
    %c17 = arith.constant 17 : index
    %c0_188 = arith.constant 0 : index
    %c0_189 = arith.constant 0 : index
    %223 = vector.load %arg5[%c17, %c0_188, %c0_189] : memref<54x1x32xf32, #tpu.memory_space<vmem>>, vector<1x1x32xf32>
    %224 = vector.shape_cast %223 : vector<1x1x32xf32> to vector<1x32xf32>
    %225 = vector.shape_cast %224 : vector<1x32xf32> to vector<1x1x32xf32>
    %226 = vector.broadcast %225 : vector<1x1x32xf32> to vector<16x16x32xf32>
    %227 = arith.mulf %222, %226 : vector<16x16x32xf32>
    %228 = arith.addf %221, %227 : vector<16x16x32xf32>
    %c1_190 = arith.constant 1 : index
    %c0_191 = arith.constant 0 : index
    %c0_192 = arith.constant 0 : index
    %229 = vector.load %arg6[%c1_190, %c0_191, %c0_192] : memref<6x1x32xf32, #tpu.memory_space<vmem>>, vector<1x1x32xf32>
    %230 = vector.shape_cast %229 : vector<1x1x32xf32> to vector<1x32xf32>
    %231 = vector.shape_cast %230 : vector<1x32xf32> to vector<1x1x32xf32>
    %232 = vector.broadcast %231 : vector<1x1x32xf32> to vector<16x16x32xf32>
    %233 = arith.mulf %228, %232 : vector<16x16x32xf32>
    %c1_193 = arith.constant 1 : index
    %c0_194 = arith.constant 0 : index
    %c0_195 = arith.constant 0 : index
    %234 = vector.load %arg7[%c1_193, %c0_194, %c0_195] : memref<6x1x32xf32, #tpu.memory_space<vmem>>, vector<1x1x32xf32>
    %235 = vector.shape_cast %234 : vector<1x1x32xf32> to vector<1x32xf32>
    %236 = vector.shape_cast %235 : vector<1x32xf32> to vector<1x1x32xf32>
    %237 = vector.broadcast %236 : vector<1x1x32xf32> to vector<16x16x32xf32>
    %238 = arith.addf %233, %237 : vector<16x16x32xf32>
    %cst_196 = arith.constant 0.000000e+00 : f32
    %239 = vector.broadcast %cst_196 : f32 to vector<16x16x32xf32>
    %240 = arith.maximumf %238, %239 : vector<16x16x32xf32>
    %241 = vector.shape_cast %240 : vector<16x16x32xf32> to vector<256x32xf32>
    %242 = arith.truncf %241 : vector<256x32xf32> to vector<256x32xbf16>
    %c1_197 = arith.constant 1 : index
    %c0_198 = arith.constant 0 : index
    %c0_199 = arith.constant 0 : index
    %243 = vector.load %arg8[%c1_197, %c0_198, %c0_199] : memref<6x32x32xbf16, #tpu.memory_space<vmem>>, vector<1x32x32xbf16>
    %244 = vector.shape_cast %243 : vector<1x32x32xbf16> to vector<32x32xbf16>
    %cst_200 = arith.constant dense<0.000000e+00> : vector<256x32xf32>
    %245 = tpu.matmul %242, %244, %cst_200 {dimension_numbers = #tpu.dot_dimension_numbers<[1], [0], [0], [1], [0, 0, 1, 1], [], []>} : vector<256x32xbf16>, vector<32x32xbf16>, vector<256x32xf32> -> vector<256x32xf32>
    %246 = arith.addf %164, %245 : vector<256x32xf32>
    %cst_201 = arith.constant 0.000000e+00 : f32
    %247 = vector.broadcast %cst_201 : f32 to vector<16x16x32xf32>
    %c0_202 = arith.constant 0 : index
    %c0_203 = arith.constant 0 : index
    %c0_204 = arith.constant 0 : index
    %248 = vector.load %arg13[%c0_202, %c0_203, %c0_204] : memref<18x18x32xf32, #tpu.memory_space<vmem>>, vector<16x16x32xf32>
    %c18 = arith.constant 18 : index
    %c0_205 = arith.constant 0 : index
    %c0_206 = arith.constant 0 : index
    %249 = vector.load %arg5[%c18, %c0_205, %c0_206] : memref<54x1x32xf32, #tpu.memory_space<vmem>>, vector<1x1x32xf32>
    %250 = vector.shape_cast %249 : vector<1x1x32xf32> to vector<1x32xf32>
    %251 = vector.shape_cast %250 : vector<1x32xf32> to vector<1x1x32xf32>
    %252 = vector.broadcast %251 : vector<1x1x32xf32> to vector<16x16x32xf32>
    %253 = arith.mulf %248, %252 : vector<16x16x32xf32>
    %254 = arith.addf %247, %253 : vector<16x16x32xf32>
    %c0_207 = arith.constant 0 : index
    %c1_208 = arith.constant 1 : index
    %c0_209 = arith.constant 0 : index
    %255 = vector.load %arg13[%c0_207, %c1_208, %c0_209] : memref<18x18x32xf32, #tpu.memory_space<vmem>>, vector<16x16x32xf32>
    %c19 = arith.constant 19 : index
    %c0_210 = arith.constant 0 : index
    %c0_211 = arith.constant 0 : index
    %256 = vector.load %arg5[%c19, %c0_210, %c0_211] : memref<54x1x32xf32, #tpu.memory_space<vmem>>, vector<1x1x32xf32>
    %257 = vector.shape_cast %256 : vector<1x1x32xf32> to vector<1x32xf32>
    %258 = vector.shape_cast %257 : vector<1x32xf32> to vector<1x1x32xf32>
    %259 = vector.broadcast %258 : vector<1x1x32xf32> to vector<16x16x32xf32>
    %260 = arith.mulf %255, %259 : vector<16x16x32xf32>
    %261 = arith.addf %254, %260 : vector<16x16x32xf32>
    %c0_212 = arith.constant 0 : index
    %c2_213 = arith.constant 2 : index
    %c0_214 = arith.constant 0 : index
    %262 = vector.load %arg13[%c0_212, %c2_213, %c0_214] : memref<18x18x32xf32, #tpu.memory_space<vmem>>, vector<16x16x32xf32>
    %c20 = arith.constant 20 : index
    %c0_215 = arith.constant 0 : index
    %c0_216 = arith.constant 0 : index
    %263 = vector.load %arg5[%c20, %c0_215, %c0_216] : memref<54x1x32xf32, #tpu.memory_space<vmem>>, vector<1x1x32xf32>
    %264 = vector.shape_cast %263 : vector<1x1x32xf32> to vector<1x32xf32>
    %265 = vector.shape_cast %264 : vector<1x32xf32> to vector<1x1x32xf32>
    %266 = vector.broadcast %265 : vector<1x1x32xf32> to vector<16x16x32xf32>
    %267 = arith.mulf %262, %266 : vector<16x16x32xf32>
    %268 = arith.addf %261, %267 : vector<16x16x32xf32>
    %c1_217 = arith.constant 1 : index
    %c0_218 = arith.constant 0 : index
    %c0_219 = arith.constant 0 : index
    %269 = vector.load %arg13[%c1_217, %c0_218, %c0_219] : memref<18x18x32xf32, #tpu.memory_space<vmem>>, vector<16x16x32xf32>
    %c21 = arith.constant 21 : index
    %c0_220 = arith.constant 0 : index
    %c0_221 = arith.constant 0 : index
    %270 = vector.load %arg5[%c21, %c0_220, %c0_221] : memref<54x1x32xf32, #tpu.memory_space<vmem>>, vector<1x1x32xf32>
    %271 = vector.shape_cast %270 : vector<1x1x32xf32> to vector<1x32xf32>
    %272 = vector.shape_cast %271 : vector<1x32xf32> to vector<1x1x32xf32>
    %273 = vector.broadcast %272 : vector<1x1x32xf32> to vector<16x16x32xf32>
    %274 = arith.mulf %269, %273 : vector<16x16x32xf32>
    %275 = arith.addf %268, %274 : vector<16x16x32xf32>
    %c1_222 = arith.constant 1 : index
    %c1_223 = arith.constant 1 : index
    %c0_224 = arith.constant 0 : index
    %276 = vector.load %arg13[%c1_222, %c1_223, %c0_224] : memref<18x18x32xf32, #tpu.memory_space<vmem>>, vector<16x16x32xf32>
    %c22 = arith.constant 22 : index
    %c0_225 = arith.constant 0 : index
    %c0_226 = arith.constant 0 : index
    %277 = vector.load %arg5[%c22, %c0_225, %c0_226] : memref<54x1x32xf32, #tpu.memory_space<vmem>>, vector<1x1x32xf32>
    %278 = vector.shape_cast %277 : vector<1x1x32xf32> to vector<1x32xf32>
    %279 = vector.shape_cast %278 : vector<1x32xf32> to vector<1x1x32xf32>
    %280 = vector.broadcast %279 : vector<1x1x32xf32> to vector<16x16x32xf32>
    %281 = arith.mulf %276, %280 : vector<16x16x32xf32>
    %282 = arith.addf %275, %281 : vector<16x16x32xf32>
    %c1_227 = arith.constant 1 : index
    %c2_228 = arith.constant 2 : index
    %c0_229 = arith.constant 0 : index
    %283 = vector.load %arg13[%c1_227, %c2_228, %c0_229] : memref<18x18x32xf32, #tpu.memory_space<vmem>>, vector<16x16x32xf32>
    %c23 = arith.constant 23 : index
    %c0_230 = arith.constant 0 : index
    %c0_231 = arith.constant 0 : index
    %284 = vector.load %arg5[%c23, %c0_230, %c0_231] : memref<54x1x32xf32, #tpu.memory_space<vmem>>, vector<1x1x32xf32>
    %285 = vector.shape_cast %284 : vector<1x1x32xf32> to vector<1x32xf32>
    %286 = vector.shape_cast %285 : vector<1x32xf32> to vector<1x1x32xf32>
    %287 = vector.broadcast %286 : vector<1x1x32xf32> to vector<16x16x32xf32>
    %288 = arith.mulf %283, %287 : vector<16x16x32xf32>
    %289 = arith.addf %282, %288 : vector<16x16x32xf32>
    %c2_232 = arith.constant 2 : index
    %c0_233 = arith.constant 0 : index
    %c0_234 = arith.constant 0 : index
    %290 = vector.load %arg13[%c2_232, %c0_233, %c0_234] : memref<18x18x32xf32, #tpu.memory_space<vmem>>, vector<16x16x32xf32>
    %c24 = arith.constant 24 : index
    %c0_235 = arith.constant 0 : index
    %c0_236 = arith.constant 0 : index
    %291 = vector.load %arg5[%c24, %c0_235, %c0_236] : memref<54x1x32xf32, #tpu.memory_space<vmem>>, vector<1x1x32xf32>
    %292 = vector.shape_cast %291 : vector<1x1x32xf32> to vector<1x32xf32>
    %293 = vector.shape_cast %292 : vector<1x32xf32> to vector<1x1x32xf32>
    %294 = vector.broadcast %293 : vector<1x1x32xf32> to vector<16x16x32xf32>
    %295 = arith.mulf %290, %294 : vector<16x16x32xf32>
    %296 = arith.addf %289, %295 : vector<16x16x32xf32>
    %c2_237 = arith.constant 2 : index
    %c1_238 = arith.constant 1 : index
    %c0_239 = arith.constant 0 : index
    %297 = vector.load %arg13[%c2_237, %c1_238, %c0_239] : memref<18x18x32xf32, #tpu.memory_space<vmem>>, vector<16x16x32xf32>
    %c25 = arith.constant 25 : index
    %c0_240 = arith.constant 0 : index
    %c0_241 = arith.constant 0 : index
    %298 = vector.load %arg5[%c25, %c0_240, %c0_241] : memref<54x1x32xf32, #tpu.memory_space<vmem>>, vector<1x1x32xf32>
    %299 = vector.shape_cast %298 : vector<1x1x32xf32> to vector<1x32xf32>
    %300 = vector.shape_cast %299 : vector<1x32xf32> to vector<1x1x32xf32>
    %301 = vector.broadcast %300 : vector<1x1x32xf32> to vector<16x16x32xf32>
    %302 = arith.mulf %297, %301 : vector<16x16x32xf32>
    %303 = arith.addf %296, %302 : vector<16x16x32xf32>
    %c2_242 = arith.constant 2 : index
    %c2_243 = arith.constant 2 : index
    %c0_244 = arith.constant 0 : index
    %304 = vector.load %arg13[%c2_242, %c2_243, %c0_244] : memref<18x18x32xf32, #tpu.memory_space<vmem>>, vector<16x16x32xf32>
    %c26 = arith.constant 26 : index
    %c0_245 = arith.constant 0 : index
    %c0_246 = arith.constant 0 : index
    %305 = vector.load %arg5[%c26, %c0_245, %c0_246] : memref<54x1x32xf32, #tpu.memory_space<vmem>>, vector<1x1x32xf32>
    %306 = vector.shape_cast %305 : vector<1x1x32xf32> to vector<1x32xf32>
    %307 = vector.shape_cast %306 : vector<1x32xf32> to vector<1x1x32xf32>
    %308 = vector.broadcast %307 : vector<1x1x32xf32> to vector<16x16x32xf32>
    %309 = arith.mulf %304, %308 : vector<16x16x32xf32>
    %310 = arith.addf %303, %309 : vector<16x16x32xf32>
    %c2_247 = arith.constant 2 : index
    %c0_248 = arith.constant 0 : index
    %c0_249 = arith.constant 0 : index
    %311 = vector.load %arg6[%c2_247, %c0_248, %c0_249] : memref<6x1x32xf32, #tpu.memory_space<vmem>>, vector<1x1x32xf32>
    %312 = vector.shape_cast %311 : vector<1x1x32xf32> to vector<1x32xf32>
    %313 = vector.shape_cast %312 : vector<1x32xf32> to vector<1x1x32xf32>
    %314 = vector.broadcast %313 : vector<1x1x32xf32> to vector<16x16x32xf32>
    %315 = arith.mulf %310, %314 : vector<16x16x32xf32>
    %c2_250 = arith.constant 2 : index
    %c0_251 = arith.constant 0 : index
    %c0_252 = arith.constant 0 : index
    %316 = vector.load %arg7[%c2_250, %c0_251, %c0_252] : memref<6x1x32xf32, #tpu.memory_space<vmem>>, vector<1x1x32xf32>
    %317 = vector.shape_cast %316 : vector<1x1x32xf32> to vector<1x32xf32>
    %318 = vector.shape_cast %317 : vector<1x32xf32> to vector<1x1x32xf32>
    %319 = vector.broadcast %318 : vector<1x1x32xf32> to vector<16x16x32xf32>
    %320 = arith.addf %315, %319 : vector<16x16x32xf32>
    %cst_253 = arith.constant 0.000000e+00 : f32
    %321 = vector.broadcast %cst_253 : f32 to vector<16x16x32xf32>
    %322 = arith.maximumf %320, %321 : vector<16x16x32xf32>
    %323 = vector.shape_cast %322 : vector<16x16x32xf32> to vector<256x32xf32>
    %324 = arith.truncf %323 : vector<256x32xf32> to vector<256x32xbf16>
    %c2_254 = arith.constant 2 : index
    %c0_255 = arith.constant 0 : index
    %c0_256 = arith.constant 0 : index
    %325 = vector.load %arg8[%c2_254, %c0_255, %c0_256] : memref<6x32x32xbf16, #tpu.memory_space<vmem>>, vector<1x32x32xbf16>
    %326 = vector.shape_cast %325 : vector<1x32x32xbf16> to vector<32x32xbf16>
    %cst_257 = arith.constant dense<0.000000e+00> : vector<256x32xf32>
    %327 = tpu.matmul %324, %326, %cst_257 {dimension_numbers = #tpu.dot_dimension_numbers<[1], [0], [0], [1], [0, 0, 1, 1], [], []>} : vector<256x32xbf16>, vector<32x32xbf16>, vector<256x32xf32> -> vector<256x32xf32>
    %328 = arith.addf %246, %327 : vector<256x32xf32>
    %cst_258 = arith.constant 0.000000e+00 : f32
    %329 = vector.broadcast %cst_258 : f32 to vector<16x16x32xf32>
    %c0_259 = arith.constant 0 : index
    %c0_260 = arith.constant 0 : index
    %c0_261 = arith.constant 0 : index
    %330 = vector.load %arg13[%c0_259, %c0_260, %c0_261] : memref<18x18x32xf32, #tpu.memory_space<vmem>>, vector<16x16x32xf32>
    %c27 = arith.constant 27 : index
    %c0_262 = arith.constant 0 : index
    %c0_263 = arith.constant 0 : index
    %331 = vector.load %arg5[%c27, %c0_262, %c0_263] : memref<54x1x32xf32, #tpu.memory_space<vmem>>, vector<1x1x32xf32>
    %332 = vector.shape_cast %331 : vector<1x1x32xf32> to vector<1x32xf32>
    %333 = vector.shape_cast %332 : vector<1x32xf32> to vector<1x1x32xf32>
    %334 = vector.broadcast %333 : vector<1x1x32xf32> to vector<16x16x32xf32>
    %335 = arith.mulf %330, %334 : vector<16x16x32xf32>
    %336 = arith.addf %329, %335 : vector<16x16x32xf32>
    %c0_264 = arith.constant 0 : index
    %c1_265 = arith.constant 1 : index
    %c0_266 = arith.constant 0 : index
    %337 = vector.load %arg13[%c0_264, %c1_265, %c0_266] : memref<18x18x32xf32, #tpu.memory_space<vmem>>, vector<16x16x32xf32>
    %c28 = arith.constant 28 : index
    %c0_267 = arith.constant 0 : index
    %c0_268 = arith.constant 0 : index
    %338 = vector.load %arg5[%c28, %c0_267, %c0_268] : memref<54x1x32xf32, #tpu.memory_space<vmem>>, vector<1x1x32xf32>
    %339 = vector.shape_cast %338 : vector<1x1x32xf32> to vector<1x32xf32>
    %340 = vector.shape_cast %339 : vector<1x32xf32> to vector<1x1x32xf32>
    %341 = vector.broadcast %340 : vector<1x1x32xf32> to vector<16x16x32xf32>
    %342 = arith.mulf %337, %341 : vector<16x16x32xf32>
    %343 = arith.addf %336, %342 : vector<16x16x32xf32>
    %c0_269 = arith.constant 0 : index
    %c2_270 = arith.constant 2 : index
    %c0_271 = arith.constant 0 : index
    %344 = vector.load %arg13[%c0_269, %c2_270, %c0_271] : memref<18x18x32xf32, #tpu.memory_space<vmem>>, vector<16x16x32xf32>
    %c29 = arith.constant 29 : index
    %c0_272 = arith.constant 0 : index
    %c0_273 = arith.constant 0 : index
    %345 = vector.load %arg5[%c29, %c0_272, %c0_273] : memref<54x1x32xf32, #tpu.memory_space<vmem>>, vector<1x1x32xf32>
    %346 = vector.shape_cast %345 : vector<1x1x32xf32> to vector<1x32xf32>
    %347 = vector.shape_cast %346 : vector<1x32xf32> to vector<1x1x32xf32>
    %348 = vector.broadcast %347 : vector<1x1x32xf32> to vector<16x16x32xf32>
    %349 = arith.mulf %344, %348 : vector<16x16x32xf32>
    %350 = arith.addf %343, %349 : vector<16x16x32xf32>
    %c1_274 = arith.constant 1 : index
    %c0_275 = arith.constant 0 : index
    %c0_276 = arith.constant 0 : index
    %351 = vector.load %arg13[%c1_274, %c0_275, %c0_276] : memref<18x18x32xf32, #tpu.memory_space<vmem>>, vector<16x16x32xf32>
    %c30 = arith.constant 30 : index
    %c0_277 = arith.constant 0 : index
    %c0_278 = arith.constant 0 : index
    %352 = vector.load %arg5[%c30, %c0_277, %c0_278] : memref<54x1x32xf32, #tpu.memory_space<vmem>>, vector<1x1x32xf32>
    %353 = vector.shape_cast %352 : vector<1x1x32xf32> to vector<1x32xf32>
    %354 = vector.shape_cast %353 : vector<1x32xf32> to vector<1x1x32xf32>
    %355 = vector.broadcast %354 : vector<1x1x32xf32> to vector<16x16x32xf32>
    %356 = arith.mulf %351, %355 : vector<16x16x32xf32>
    %357 = arith.addf %350, %356 : vector<16x16x32xf32>
    %c1_279 = arith.constant 1 : index
    %c1_280 = arith.constant 1 : index
    %c0_281 = arith.constant 0 : index
    %358 = vector.load %arg13[%c1_279, %c1_280, %c0_281] : memref<18x18x32xf32, #tpu.memory_space<vmem>>, vector<16x16x32xf32>
    %c31 = arith.constant 31 : index
    %c0_282 = arith.constant 0 : index
    %c0_283 = arith.constant 0 : index
    %359 = vector.load %arg5[%c31, %c0_282, %c0_283] : memref<54x1x32xf32, #tpu.memory_space<vmem>>, vector<1x1x32xf32>
    %360 = vector.shape_cast %359 : vector<1x1x32xf32> to vector<1x32xf32>
    %361 = vector.shape_cast %360 : vector<1x32xf32> to vector<1x1x32xf32>
    %362 = vector.broadcast %361 : vector<1x1x32xf32> to vector<16x16x32xf32>
    %363 = arith.mulf %358, %362 : vector<16x16x32xf32>
    %364 = arith.addf %357, %363 : vector<16x16x32xf32>
    %c1_284 = arith.constant 1 : index
    %c2_285 = arith.constant 2 : index
    %c0_286 = arith.constant 0 : index
    %365 = vector.load %arg13[%c1_284, %c2_285, %c0_286] : memref<18x18x32xf32, #tpu.memory_space<vmem>>, vector<16x16x32xf32>
    %c32 = arith.constant 32 : index
    %c0_287 = arith.constant 0 : index
    %c0_288 = arith.constant 0 : index
    %366 = vector.load %arg5[%c32, %c0_287, %c0_288] : memref<54x1x32xf32, #tpu.memory_space<vmem>>, vector<1x1x32xf32>
    %367 = vector.shape_cast %366 : vector<1x1x32xf32> to vector<1x32xf32>
    %368 = vector.shape_cast %367 : vector<1x32xf32> to vector<1x1x32xf32>
    %369 = vector.broadcast %368 : vector<1x1x32xf32> to vector<16x16x32xf32>
    %370 = arith.mulf %365, %369 : vector<16x16x32xf32>
    %371 = arith.addf %364, %370 : vector<16x16x32xf32>
    %c2_289 = arith.constant 2 : index
    %c0_290 = arith.constant 0 : index
    %c0_291 = arith.constant 0 : index
    %372 = vector.load %arg13[%c2_289, %c0_290, %c0_291] : memref<18x18x32xf32, #tpu.memory_space<vmem>>, vector<16x16x32xf32>
    %c33 = arith.constant 33 : index
    %c0_292 = arith.constant 0 : index
    %c0_293 = arith.constant 0 : index
    %373 = vector.load %arg5[%c33, %c0_292, %c0_293] : memref<54x1x32xf32, #tpu.memory_space<vmem>>, vector<1x1x32xf32>
    %374 = vector.shape_cast %373 : vector<1x1x32xf32> to vector<1x32xf32>
    %375 = vector.shape_cast %374 : vector<1x32xf32> to vector<1x1x32xf32>
    %376 = vector.broadcast %375 : vector<1x1x32xf32> to vector<16x16x32xf32>
    %377 = arith.mulf %372, %376 : vector<16x16x32xf32>
    %378 = arith.addf %371, %377 : vector<16x16x32xf32>
    %c2_294 = arith.constant 2 : index
    %c1_295 = arith.constant 1 : index
    %c0_296 = arith.constant 0 : index
    %379 = vector.load %arg13[%c2_294, %c1_295, %c0_296] : memref<18x18x32xf32, #tpu.memory_space<vmem>>, vector<16x16x32xf32>
    %c34 = arith.constant 34 : index
    %c0_297 = arith.constant 0 : index
    %c0_298 = arith.constant 0 : index
    %380 = vector.load %arg5[%c34, %c0_297, %c0_298] : memref<54x1x32xf32, #tpu.memory_space<vmem>>, vector<1x1x32xf32>
    %381 = vector.shape_cast %380 : vector<1x1x32xf32> to vector<1x32xf32>
    %382 = vector.shape_cast %381 : vector<1x32xf32> to vector<1x1x32xf32>
    %383 = vector.broadcast %382 : vector<1x1x32xf32> to vector<16x16x32xf32>
    %384 = arith.mulf %379, %383 : vector<16x16x32xf32>
    %385 = arith.addf %378, %384 : vector<16x16x32xf32>
    %c2_299 = arith.constant 2 : index
    %c2_300 = arith.constant 2 : index
    %c0_301 = arith.constant 0 : index
    %386 = vector.load %arg13[%c2_299, %c2_300, %c0_301] : memref<18x18x32xf32, #tpu.memory_space<vmem>>, vector<16x16x32xf32>
    %c35 = arith.constant 35 : index
    %c0_302 = arith.constant 0 : index
    %c0_303 = arith.constant 0 : index
    %387 = vector.load %arg5[%c35, %c0_302, %c0_303] : memref<54x1x32xf32, #tpu.memory_space<vmem>>, vector<1x1x32xf32>
    %388 = vector.shape_cast %387 : vector<1x1x32xf32> to vector<1x32xf32>
    %389 = vector.shape_cast %388 : vector<1x32xf32> to vector<1x1x32xf32>
    %390 = vector.broadcast %389 : vector<1x1x32xf32> to vector<16x16x32xf32>
    %391 = arith.mulf %386, %390 : vector<16x16x32xf32>
    %392 = arith.addf %385, %391 : vector<16x16x32xf32>
    %c3_304 = arith.constant 3 : index
    %c0_305 = arith.constant 0 : index
    %c0_306 = arith.constant 0 : index
    %393 = vector.load %arg6[%c3_304, %c0_305, %c0_306] : memref<6x1x32xf32, #tpu.memory_space<vmem>>, vector<1x1x32xf32>
    %394 = vector.shape_cast %393 : vector<1x1x32xf32> to vector<1x32xf32>
    %395 = vector.shape_cast %394 : vector<1x32xf32> to vector<1x1x32xf32>
    %396 = vector.broadcast %395 : vector<1x1x32xf32> to vector<16x16x32xf32>
    %397 = arith.mulf %392, %396 : vector<16x16x32xf32>
    %c3_307 = arith.constant 3 : index
    %c0_308 = arith.constant 0 : index
    %c0_309 = arith.constant 0 : index
    %398 = vector.load %arg7[%c3_307, %c0_308, %c0_309] : memref<6x1x32xf32, #tpu.memory_space<vmem>>, vector<1x1x32xf32>
    %399 = vector.shape_cast %398 : vector<1x1x32xf32> to vector<1x32xf32>
    %400 = vector.shape_cast %399 : vector<1x32xf32> to vector<1x1x32xf32>
    %401 = vector.broadcast %400 : vector<1x1x32xf32> to vector<16x16x32xf32>
    %402 = arith.addf %397, %401 : vector<16x16x32xf32>
    %cst_310 = arith.constant 0.000000e+00 : f32
    %403 = vector.broadcast %cst_310 : f32 to vector<16x16x32xf32>
    %404 = arith.maximumf %402, %403 : vector<16x16x32xf32>
    %405 = vector.shape_cast %404 : vector<16x16x32xf32> to vector<256x32xf32>
    %406 = arith.truncf %405 : vector<256x32xf32> to vector<256x32xbf16>
    %c3_311 = arith.constant 3 : index
    %c0_312 = arith.constant 0 : index
    %c0_313 = arith.constant 0 : index
    %407 = vector.load %arg8[%c3_311, %c0_312, %c0_313] : memref<6x32x32xbf16, #tpu.memory_space<vmem>>, vector<1x32x32xbf16>
    %408 = vector.shape_cast %407 : vector<1x32x32xbf16> to vector<32x32xbf16>
    %cst_314 = arith.constant dense<0.000000e+00> : vector<256x32xf32>
    %409 = tpu.matmul %406, %408, %cst_314 {dimension_numbers = #tpu.dot_dimension_numbers<[1], [0], [0], [1], [0, 0, 1, 1], [], []>} : vector<256x32xbf16>, vector<32x32xbf16>, vector<256x32xf32> -> vector<256x32xf32>
    %410 = arith.addf %328, %409 : vector<256x32xf32>
    %cst_315 = arith.constant 0.000000e+00 : f32
    %411 = vector.broadcast %cst_315 : f32 to vector<16x16x32xf32>
    %c0_316 = arith.constant 0 : index
    %c0_317 = arith.constant 0 : index
    %c0_318 = arith.constant 0 : index
    %412 = vector.load %arg13[%c0_316, %c0_317, %c0_318] : memref<18x18x32xf32, #tpu.memory_space<vmem>>, vector<16x16x32xf32>
    %c36 = arith.constant 36 : index
    %c0_319 = arith.constant 0 : index
    %c0_320 = arith.constant 0 : index
    %413 = vector.load %arg5[%c36, %c0_319, %c0_320] : memref<54x1x32xf32, #tpu.memory_space<vmem>>, vector<1x1x32xf32>
    %414 = vector.shape_cast %413 : vector<1x1x32xf32> to vector<1x32xf32>
    %415 = vector.shape_cast %414 : vector<1x32xf32> to vector<1x1x32xf32>
    %416 = vector.broadcast %415 : vector<1x1x32xf32> to vector<16x16x32xf32>
    %417 = arith.mulf %412, %416 : vector<16x16x32xf32>
    %418 = arith.addf %411, %417 : vector<16x16x32xf32>
    %c0_321 = arith.constant 0 : index
    %c1_322 = arith.constant 1 : index
    %c0_323 = arith.constant 0 : index
    %419 = vector.load %arg13[%c0_321, %c1_322, %c0_323] : memref<18x18x32xf32, #tpu.memory_space<vmem>>, vector<16x16x32xf32>
    %c37 = arith.constant 37 : index
    %c0_324 = arith.constant 0 : index
    %c0_325 = arith.constant 0 : index
    %420 = vector.load %arg5[%c37, %c0_324, %c0_325] : memref<54x1x32xf32, #tpu.memory_space<vmem>>, vector<1x1x32xf32>
    %421 = vector.shape_cast %420 : vector<1x1x32xf32> to vector<1x32xf32>
    %422 = vector.shape_cast %421 : vector<1x32xf32> to vector<1x1x32xf32>
    %423 = vector.broadcast %422 : vector<1x1x32xf32> to vector<16x16x32xf32>
    %424 = arith.mulf %419, %423 : vector<16x16x32xf32>
    %425 = arith.addf %418, %424 : vector<16x16x32xf32>
    %c0_326 = arith.constant 0 : index
    %c2_327 = arith.constant 2 : index
    %c0_328 = arith.constant 0 : index
    %426 = vector.load %arg13[%c0_326, %c2_327, %c0_328] : memref<18x18x32xf32, #tpu.memory_space<vmem>>, vector<16x16x32xf32>
    %c38 = arith.constant 38 : index
    %c0_329 = arith.constant 0 : index
    %c0_330 = arith.constant 0 : index
    %427 = vector.load %arg5[%c38, %c0_329, %c0_330] : memref<54x1x32xf32, #tpu.memory_space<vmem>>, vector<1x1x32xf32>
    %428 = vector.shape_cast %427 : vector<1x1x32xf32> to vector<1x32xf32>
    %429 = vector.shape_cast %428 : vector<1x32xf32> to vector<1x1x32xf32>
    %430 = vector.broadcast %429 : vector<1x1x32xf32> to vector<16x16x32xf32>
    %431 = arith.mulf %426, %430 : vector<16x16x32xf32>
    %432 = arith.addf %425, %431 : vector<16x16x32xf32>
    %c1_331 = arith.constant 1 : index
    %c0_332 = arith.constant 0 : index
    %c0_333 = arith.constant 0 : index
    %433 = vector.load %arg13[%c1_331, %c0_332, %c0_333] : memref<18x18x32xf32, #tpu.memory_space<vmem>>, vector<16x16x32xf32>
    %c39 = arith.constant 39 : index
    %c0_334 = arith.constant 0 : index
    %c0_335 = arith.constant 0 : index
    %434 = vector.load %arg5[%c39, %c0_334, %c0_335] : memref<54x1x32xf32, #tpu.memory_space<vmem>>, vector<1x1x32xf32>
    %435 = vector.shape_cast %434 : vector<1x1x32xf32> to vector<1x32xf32>
    %436 = vector.shape_cast %435 : vector<1x32xf32> to vector<1x1x32xf32>
    %437 = vector.broadcast %436 : vector<1x1x32xf32> to vector<16x16x32xf32>
    %438 = arith.mulf %433, %437 : vector<16x16x32xf32>
    %439 = arith.addf %432, %438 : vector<16x16x32xf32>
    %c1_336 = arith.constant 1 : index
    %c1_337 = arith.constant 1 : index
    %c0_338 = arith.constant 0 : index
    %440 = vector.load %arg13[%c1_336, %c1_337, %c0_338] : memref<18x18x32xf32, #tpu.memory_space<vmem>>, vector<16x16x32xf32>
    %c40 = arith.constant 40 : index
    %c0_339 = arith.constant 0 : index
    %c0_340 = arith.constant 0 : index
    %441 = vector.load %arg5[%c40, %c0_339, %c0_340] : memref<54x1x32xf32, #tpu.memory_space<vmem>>, vector<1x1x32xf32>
    %442 = vector.shape_cast %441 : vector<1x1x32xf32> to vector<1x32xf32>
    %443 = vector.shape_cast %442 : vector<1x32xf32> to vector<1x1x32xf32>
    %444 = vector.broadcast %443 : vector<1x1x32xf32> to vector<16x16x32xf32>
    %445 = arith.mulf %440, %444 : vector<16x16x32xf32>
    %446 = arith.addf %439, %445 : vector<16x16x32xf32>
    %c1_341 = arith.constant 1 : index
    %c2_342 = arith.constant 2 : index
    %c0_343 = arith.constant 0 : index
    %447 = vector.load %arg13[%c1_341, %c2_342, %c0_343] : memref<18x18x32xf32, #tpu.memory_space<vmem>>, vector<16x16x32xf32>
    %c41 = arith.constant 41 : index
    %c0_344 = arith.constant 0 : index
    %c0_345 = arith.constant 0 : index
    %448 = vector.load %arg5[%c41, %c0_344, %c0_345] : memref<54x1x32xf32, #tpu.memory_space<vmem>>, vector<1x1x32xf32>
    %449 = vector.shape_cast %448 : vector<1x1x32xf32> to vector<1x32xf32>
    %450 = vector.shape_cast %449 : vector<1x32xf32> to vector<1x1x32xf32>
    %451 = vector.broadcast %450 : vector<1x1x32xf32> to vector<16x16x32xf32>
    %452 = arith.mulf %447, %451 : vector<16x16x32xf32>
    %453 = arith.addf %446, %452 : vector<16x16x32xf32>
    %c2_346 = arith.constant 2 : index
    %c0_347 = arith.constant 0 : index
    %c0_348 = arith.constant 0 : index
    %454 = vector.load %arg13[%c2_346, %c0_347, %c0_348] : memref<18x18x32xf32, #tpu.memory_space<vmem>>, vector<16x16x32xf32>
    %c42 = arith.constant 42 : index
    %c0_349 = arith.constant 0 : index
    %c0_350 = arith.constant 0 : index
    %455 = vector.load %arg5[%c42, %c0_349, %c0_350] : memref<54x1x32xf32, #tpu.memory_space<vmem>>, vector<1x1x32xf32>
    %456 = vector.shape_cast %455 : vector<1x1x32xf32> to vector<1x32xf32>
    %457 = vector.shape_cast %456 : vector<1x32xf32> to vector<1x1x32xf32>
    %458 = vector.broadcast %457 : vector<1x1x32xf32> to vector<16x16x32xf32>
    %459 = arith.mulf %454, %458 : vector<16x16x32xf32>
    %460 = arith.addf %453, %459 : vector<16x16x32xf32>
    %c2_351 = arith.constant 2 : index
    %c1_352 = arith.constant 1 : index
    %c0_353 = arith.constant 0 : index
    %461 = vector.load %arg13[%c2_351, %c1_352, %c0_353] : memref<18x18x32xf32, #tpu.memory_space<vmem>>, vector<16x16x32xf32>
    %c43 = arith.constant 43 : index
    %c0_354 = arith.constant 0 : index
    %c0_355 = arith.constant 0 : index
    %462 = vector.load %arg5[%c43, %c0_354, %c0_355] : memref<54x1x32xf32, #tpu.memory_space<vmem>>, vector<1x1x32xf32>
    %463 = vector.shape_cast %462 : vector<1x1x32xf32> to vector<1x32xf32>
    %464 = vector.shape_cast %463 : vector<1x32xf32> to vector<1x1x32xf32>
    %465 = vector.broadcast %464 : vector<1x1x32xf32> to vector<16x16x32xf32>
    %466 = arith.mulf %461, %465 : vector<16x16x32xf32>
    %467 = arith.addf %460, %466 : vector<16x16x32xf32>
    %c2_356 = arith.constant 2 : index
    %c2_357 = arith.constant 2 : index
    %c0_358 = arith.constant 0 : index
    %468 = vector.load %arg13[%c2_356, %c2_357, %c0_358] : memref<18x18x32xf32, #tpu.memory_space<vmem>>, vector<16x16x32xf32>
    %c44 = arith.constant 44 : index
    %c0_359 = arith.constant 0 : index
    %c0_360 = arith.constant 0 : index
    %469 = vector.load %arg5[%c44, %c0_359, %c0_360] : memref<54x1x32xf32, #tpu.memory_space<vmem>>, vector<1x1x32xf32>
    %470 = vector.shape_cast %469 : vector<1x1x32xf32> to vector<1x32xf32>
    %471 = vector.shape_cast %470 : vector<1x32xf32> to vector<1x1x32xf32>
    %472 = vector.broadcast %471 : vector<1x1x32xf32> to vector<16x16x32xf32>
    %473 = arith.mulf %468, %472 : vector<16x16x32xf32>
    %474 = arith.addf %467, %473 : vector<16x16x32xf32>
    %c4_361 = arith.constant 4 : index
    %c0_362 = arith.constant 0 : index
    %c0_363 = arith.constant 0 : index
    %475 = vector.load %arg6[%c4_361, %c0_362, %c0_363] : memref<6x1x32xf32, #tpu.memory_space<vmem>>, vector<1x1x32xf32>
    %476 = vector.shape_cast %475 : vector<1x1x32xf32> to vector<1x32xf32>
    %477 = vector.shape_cast %476 : vector<1x32xf32> to vector<1x1x32xf32>
    %478 = vector.broadcast %477 : vector<1x1x32xf32> to vector<16x16x32xf32>
    %479 = arith.mulf %474, %478 : vector<16x16x32xf32>
    %c4_364 = arith.constant 4 : index
    %c0_365 = arith.constant 0 : index
    %c0_366 = arith.constant 0 : index
    %480 = vector.load %arg7[%c4_364, %c0_365, %c0_366] : memref<6x1x32xf32, #tpu.memory_space<vmem>>, vector<1x1x32xf32>
    %481 = vector.shape_cast %480 : vector<1x1x32xf32> to vector<1x32xf32>
    %482 = vector.shape_cast %481 : vector<1x32xf32> to vector<1x1x32xf32>
    %483 = vector.broadcast %482 : vector<1x1x32xf32> to vector<16x16x32xf32>
    %484 = arith.addf %479, %483 : vector<16x16x32xf32>
    %cst_367 = arith.constant 0.000000e+00 : f32
    %485 = vector.broadcast %cst_367 : f32 to vector<16x16x32xf32>
    %486 = arith.maximumf %484, %485 : vector<16x16x32xf32>
    %487 = vector.shape_cast %486 : vector<16x16x32xf32> to vector<256x32xf32>
    %488 = arith.truncf %487 : vector<256x32xf32> to vector<256x32xbf16>
    %c4_368 = arith.constant 4 : index
    %c0_369 = arith.constant 0 : index
    %c0_370 = arith.constant 0 : index
    %489 = vector.load %arg8[%c4_368, %c0_369, %c0_370] : memref<6x32x32xbf16, #tpu.memory_space<vmem>>, vector<1x32x32xbf16>
    %490 = vector.shape_cast %489 : vector<1x32x32xbf16> to vector<32x32xbf16>
    %cst_371 = arith.constant dense<0.000000e+00> : vector<256x32xf32>
    %491 = tpu.matmul %488, %490, %cst_371 {dimension_numbers = #tpu.dot_dimension_numbers<[1], [0], [0], [1], [0, 0, 1, 1], [], []>} : vector<256x32xbf16>, vector<32x32xbf16>, vector<256x32xf32> -> vector<256x32xf32>
    %492 = arith.addf %410, %491 : vector<256x32xf32>
    %cst_372 = arith.constant 0.000000e+00 : f32
    %493 = vector.broadcast %cst_372 : f32 to vector<16x16x32xf32>
    %c0_373 = arith.constant 0 : index
    %c0_374 = arith.constant 0 : index
    %c0_375 = arith.constant 0 : index
    %494 = vector.load %arg13[%c0_373, %c0_374, %c0_375] : memref<18x18x32xf32, #tpu.memory_space<vmem>>, vector<16x16x32xf32>
    %c45 = arith.constant 45 : index
    %c0_376 = arith.constant 0 : index
    %c0_377 = arith.constant 0 : index
    %495 = vector.load %arg5[%c45, %c0_376, %c0_377] : memref<54x1x32xf32, #tpu.memory_space<vmem>>, vector<1x1x32xf32>
    %496 = vector.shape_cast %495 : vector<1x1x32xf32> to vector<1x32xf32>
    %497 = vector.shape_cast %496 : vector<1x32xf32> to vector<1x1x32xf32>
    %498 = vector.broadcast %497 : vector<1x1x32xf32> to vector<16x16x32xf32>
    %499 = arith.mulf %494, %498 : vector<16x16x32xf32>
    %500 = arith.addf %493, %499 : vector<16x16x32xf32>
    %c0_378 = arith.constant 0 : index
    %c1_379 = arith.constant 1 : index
    %c0_380 = arith.constant 0 : index
    %501 = vector.load %arg13[%c0_378, %c1_379, %c0_380] : memref<18x18x32xf32, #tpu.memory_space<vmem>>, vector<16x16x32xf32>
    %c46 = arith.constant 46 : index
    %c0_381 = arith.constant 0 : index
    %c0_382 = arith.constant 0 : index
    %502 = vector.load %arg5[%c46, %c0_381, %c0_382] : memref<54x1x32xf32, #tpu.memory_space<vmem>>, vector<1x1x32xf32>
    %503 = vector.shape_cast %502 : vector<1x1x32xf32> to vector<1x32xf32>
    %504 = vector.shape_cast %503 : vector<1x32xf32> to vector<1x1x32xf32>
    %505 = vector.broadcast %504 : vector<1x1x32xf32> to vector<16x16x32xf32>
    %506 = arith.mulf %501, %505 : vector<16x16x32xf32>
    %507 = arith.addf %500, %506 : vector<16x16x32xf32>
    %c0_383 = arith.constant 0 : index
    %c2_384 = arith.constant 2 : index
    %c0_385 = arith.constant 0 : index
    %508 = vector.load %arg13[%c0_383, %c2_384, %c0_385] : memref<18x18x32xf32, #tpu.memory_space<vmem>>, vector<16x16x32xf32>
    %c47 = arith.constant 47 : index
    %c0_386 = arith.constant 0 : index
    %c0_387 = arith.constant 0 : index
    %509 = vector.load %arg5[%c47, %c0_386, %c0_387] : memref<54x1x32xf32, #tpu.memory_space<vmem>>, vector<1x1x32xf32>
    %510 = vector.shape_cast %509 : vector<1x1x32xf32> to vector<1x32xf32>
    %511 = vector.shape_cast %510 : vector<1x32xf32> to vector<1x1x32xf32>
    %512 = vector.broadcast %511 : vector<1x1x32xf32> to vector<16x16x32xf32>
    %513 = arith.mulf %508, %512 : vector<16x16x32xf32>
    %514 = arith.addf %507, %513 : vector<16x16x32xf32>
    %c1_388 = arith.constant 1 : index
    %c0_389 = arith.constant 0 : index
    %c0_390 = arith.constant 0 : index
    %515 = vector.load %arg13[%c1_388, %c0_389, %c0_390] : memref<18x18x32xf32, #tpu.memory_space<vmem>>, vector<16x16x32xf32>
    %c48 = arith.constant 48 : index
    %c0_391 = arith.constant 0 : index
    %c0_392 = arith.constant 0 : index
    %516 = vector.load %arg5[%c48, %c0_391, %c0_392] : memref<54x1x32xf32, #tpu.memory_space<vmem>>, vector<1x1x32xf32>
    %517 = vector.shape_cast %516 : vector<1x1x32xf32> to vector<1x32xf32>
    %518 = vector.shape_cast %517 : vector<1x32xf32> to vector<1x1x32xf32>
    %519 = vector.broadcast %518 : vector<1x1x32xf32> to vector<16x16x32xf32>
    %520 = arith.mulf %515, %519 : vector<16x16x32xf32>
    %521 = arith.addf %514, %520 : vector<16x16x32xf32>
    %c1_393 = arith.constant 1 : index
    %c1_394 = arith.constant 1 : index
    %c0_395 = arith.constant 0 : index
    %522 = vector.load %arg13[%c1_393, %c1_394, %c0_395] : memref<18x18x32xf32, #tpu.memory_space<vmem>>, vector<16x16x32xf32>
    %c49 = arith.constant 49 : index
    %c0_396 = arith.constant 0 : index
    %c0_397 = arith.constant 0 : index
    %523 = vector.load %arg5[%c49, %c0_396, %c0_397] : memref<54x1x32xf32, #tpu.memory_space<vmem>>, vector<1x1x32xf32>
    %524 = vector.shape_cast %523 : vector<1x1x32xf32> to vector<1x32xf32>
    %525 = vector.shape_cast %524 : vector<1x32xf32> to vector<1x1x32xf32>
    %526 = vector.broadcast %525 : vector<1x1x32xf32> to vector<16x16x32xf32>
    %527 = arith.mulf %522, %526 : vector<16x16x32xf32>
    %528 = arith.addf %521, %527 : vector<16x16x32xf32>
    %c1_398 = arith.constant 1 : index
    %c2_399 = arith.constant 2 : index
    %c0_400 = arith.constant 0 : index
    %529 = vector.load %arg13[%c1_398, %c2_399, %c0_400] : memref<18x18x32xf32, #tpu.memory_space<vmem>>, vector<16x16x32xf32>
    %c50 = arith.constant 50 : index
    %c0_401 = arith.constant 0 : index
    %c0_402 = arith.constant 0 : index
    %530 = vector.load %arg5[%c50, %c0_401, %c0_402] : memref<54x1x32xf32, #tpu.memory_space<vmem>>, vector<1x1x32xf32>
    %531 = vector.shape_cast %530 : vector<1x1x32xf32> to vector<1x32xf32>
    %532 = vector.shape_cast %531 : vector<1x32xf32> to vector<1x1x32xf32>
    %533 = vector.broadcast %532 : vector<1x1x32xf32> to vector<16x16x32xf32>
    %534 = arith.mulf %529, %533 : vector<16x16x32xf32>
    %535 = arith.addf %528, %534 : vector<16x16x32xf32>
    %c2_403 = arith.constant 2 : index
    %c0_404 = arith.constant 0 : index
    %c0_405 = arith.constant 0 : index
    %536 = vector.load %arg13[%c2_403, %c0_404, %c0_405] : memref<18x18x32xf32, #tpu.memory_space<vmem>>, vector<16x16x32xf32>
    %c51 = arith.constant 51 : index
    %c0_406 = arith.constant 0 : index
    %c0_407 = arith.constant 0 : index
    %537 = vector.load %arg5[%c51, %c0_406, %c0_407] : memref<54x1x32xf32, #tpu.memory_space<vmem>>, vector<1x1x32xf32>
    %538 = vector.shape_cast %537 : vector<1x1x32xf32> to vector<1x32xf32>
    %539 = vector.shape_cast %538 : vector<1x32xf32> to vector<1x1x32xf32>
    %540 = vector.broadcast %539 : vector<1x1x32xf32> to vector<16x16x32xf32>
    %541 = arith.mulf %536, %540 : vector<16x16x32xf32>
    %542 = arith.addf %535, %541 : vector<16x16x32xf32>
    %c2_408 = arith.constant 2 : index
    %c1_409 = arith.constant 1 : index
    %c0_410 = arith.constant 0 : index
    %543 = vector.load %arg13[%c2_408, %c1_409, %c0_410] : memref<18x18x32xf32, #tpu.memory_space<vmem>>, vector<16x16x32xf32>
    %c52 = arith.constant 52 : index
    %c0_411 = arith.constant 0 : index
    %c0_412 = arith.constant 0 : index
    %544 = vector.load %arg5[%c52, %c0_411, %c0_412] : memref<54x1x32xf32, #tpu.memory_space<vmem>>, vector<1x1x32xf32>
    %545 = vector.shape_cast %544 : vector<1x1x32xf32> to vector<1x32xf32>
    %546 = vector.shape_cast %545 : vector<1x32xf32> to vector<1x1x32xf32>
    %547 = vector.broadcast %546 : vector<1x1x32xf32> to vector<16x16x32xf32>
    %548 = arith.mulf %543, %547 : vector<16x16x32xf32>
    %549 = arith.addf %542, %548 : vector<16x16x32xf32>
    %c2_413 = arith.constant 2 : index
    %c2_414 = arith.constant 2 : index
    %c0_415 = arith.constant 0 : index
    %550 = vector.load %arg13[%c2_413, %c2_414, %c0_415] : memref<18x18x32xf32, #tpu.memory_space<vmem>>, vector<16x16x32xf32>
    %c53 = arith.constant 53 : index
    %c0_416 = arith.constant 0 : index
    %c0_417 = arith.constant 0 : index
    %551 = vector.load %arg5[%c53, %c0_416, %c0_417] : memref<54x1x32xf32, #tpu.memory_space<vmem>>, vector<1x1x32xf32>
    %552 = vector.shape_cast %551 : vector<1x1x32xf32> to vector<1x32xf32>
    %553 = vector.shape_cast %552 : vector<1x32xf32> to vector<1x1x32xf32>
    %554 = vector.broadcast %553 : vector<1x1x32xf32> to vector<16x16x32xf32>
    %555 = arith.mulf %550, %554 : vector<16x16x32xf32>
    %556 = arith.addf %549, %555 : vector<16x16x32xf32>
    %c5_418 = arith.constant 5 : index
    %c0_419 = arith.constant 0 : index
    %c0_420 = arith.constant 0 : index
    %557 = vector.load %arg6[%c5_418, %c0_419, %c0_420] : memref<6x1x32xf32, #tpu.memory_space<vmem>>, vector<1x1x32xf32>
    %558 = vector.shape_cast %557 : vector<1x1x32xf32> to vector<1x32xf32>
    %559 = vector.shape_cast %558 : vector<1x32xf32> to vector<1x1x32xf32>
    %560 = vector.broadcast %559 : vector<1x1x32xf32> to vector<16x16x32xf32>
    %561 = arith.mulf %556, %560 : vector<16x16x32xf32>
    %c5_421 = arith.constant 5 : index
    %c0_422 = arith.constant 0 : index
    %c0_423 = arith.constant 0 : index
    %562 = vector.load %arg7[%c5_421, %c0_422, %c0_423] : memref<6x1x32xf32, #tpu.memory_space<vmem>>, vector<1x1x32xf32>
    %563 = vector.shape_cast %562 : vector<1x1x32xf32> to vector<1x32xf32>
    %564 = vector.shape_cast %563 : vector<1x32xf32> to vector<1x1x32xf32>
    %565 = vector.broadcast %564 : vector<1x1x32xf32> to vector<16x16x32xf32>
    %566 = arith.addf %561, %565 : vector<16x16x32xf32>
    %cst_424 = arith.constant 0.000000e+00 : f32
    %567 = vector.broadcast %cst_424 : f32 to vector<16x16x32xf32>
    %568 = arith.maximumf %566, %567 : vector<16x16x32xf32>
    %569 = vector.shape_cast %568 : vector<16x16x32xf32> to vector<256x32xf32>
    %570 = arith.truncf %569 : vector<256x32xf32> to vector<256x32xbf16>
    %c5_425 = arith.constant 5 : index
    %c0_426 = arith.constant 0 : index
    %c0_427 = arith.constant 0 : index
    %571 = vector.load %arg8[%c5_425, %c0_426, %c0_427] : memref<6x32x32xbf16, #tpu.memory_space<vmem>>, vector<1x32x32xbf16>
    %572 = vector.shape_cast %571 : vector<1x32x32xbf16> to vector<32x32xbf16>
    %cst_428 = arith.constant dense<0.000000e+00> : vector<256x32xf32>
    %573 = tpu.matmul %570, %572, %cst_428 {dimension_numbers = #tpu.dot_dimension_numbers<[1], [0], [0], [1], [0, 0, 1, 1], [], []>} : vector<256x32xbf16>, vector<32x32xbf16>, vector<256x32xf32> -> vector<256x32xf32>
    %574 = arith.addf %492, %573 : vector<256x32xf32>
    %575 = vector.shape_cast %574 : vector<256x32xf32> to vector<16x16x32xf32>
    %c0_429 = arith.constant 0 : index
    %c0_430 = arith.constant 0 : index
    %576 = vector.load %arg9[%c0_429, %c0_430] : memref<1x32xf32, #tpu.memory_space<vmem>>, vector<1x32xf32>
    %577 = vector.shape_cast %576 : vector<1x32xf32> to vector<1x1x32xf32>
    %578 = vector.broadcast %577 : vector<1x1x32xf32> to vector<16x16x32xf32>
    %579 = arith.mulf %575, %578 : vector<16x16x32xf32>
    %c0_431 = arith.constant 0 : index
    %c0_432 = arith.constant 0 : index
    %580 = vector.load %arg10[%c0_431, %c0_432] : memref<1x32xf32, #tpu.memory_space<vmem>>, vector<1x32xf32>
    %581 = vector.shape_cast %580 : vector<1x32xf32> to vector<1x1x32xf32>
    %582 = vector.broadcast %581 : vector<1x1x32xf32> to vector<16x16x32xf32>
    %583 = arith.addf %579, %582 : vector<16x16x32xf32>
    %584 = arith.addf %583, %2 : vector<16x16x32xf32>
    %cst_433 = arith.constant 0.000000e+00 : f32
    %585 = vector.broadcast %cst_433 : f32 to vector<16x16x32xf32>
    %586 = arith.maximumf %584, %585 : vector<16x16x32xf32>
    %587 = vector.shape_cast %586 : vector<16x16x32xf32> to vector<1x16x16x32xf32>
    %c0_434 = arith.constant 0 : index
    %c0_435 = arith.constant 0 : index
    %c0_436 = arith.constant 0 : index
    %c0_437 = arith.constant 0 : index
    %588 = vector.load %arg11[%c0_434, %c0_435, %c0_436, %c0_437] : memref<1x16x16x32xf32, #tpu.memory_space<vmem>>, vector<1x16x16x32xf32>
    tpu.vector_store %arg11[%c0_434, %c0_435, %c0_436, %c0_437], %587 {strides = array<i32>} : memref<1x16x16x32xf32, #tpu.memory_space<vmem>>, vector<1x16x16x32xf32>,
    return
  }
  func.func @transform_0(%arg0: i32) -> (i32, i32, i32, i32) {
    %c0_i32 = arith.constant 0 : i32
    %c0_i32_0 = arith.constant 0 : i32
    %c0_i32_1 = arith.constant 0 : i32
    %c0_i32_2 = arith.constant 0 : i32
    return %arg0, %c0_i32, %c0_i32_0, %c0_i32_1 : i32, i32, i32, i32
  }
  func.func @transform_1(%arg0: i32) -> (i32, i32, i32) {
    %c0_i32 = arith.constant 0 : i32
    %c0_i32_0 = arith.constant 0 : i32
    %c0_i32_1 = arith.constant 0 : i32
    %c0_i32_2 = arith.constant 0 : i32
    return %c0_i32, %c0_i32_0, %c0_i32_1 : i32, i32, i32
  }
  func.func @transform_2(%arg0: i32) -> (i32, i32) {
    %c0_i32 = arith.constant 0 : i32
    %c0_i32_0 = arith.constant 0 : i32
    %c0_i32_1 = arith.constant 0 : i32
    return %c0_i32, %c0_i32_0 : i32, i32
  }
  func.func @transform_3(%arg0: i32) -> (i32, i32) {
    %c0_i32 = arith.constant 0 : i32
    %c0_i32_0 = arith.constant 0 : i32
    %c0_i32_1 = arith.constant 0 : i32
    return %c0_i32, %c0_i32_0 : i32, i32
  }
  func.func @transform_4(%arg0: i32) -> (i32, i32, i32) {
    %c0_i32 = arith.constant 0 : i32
    %c0_i32_0 = arith.constant 0 : i32
    %c0_i32_1 = arith.constant 0 : i32
    %c0_i32_2 = arith.constant 0 : i32
    return %c0_i32, %c0_i32_0, %c0_i32_1 : i32, i32, i32
  }
  func.func @transform_5(%arg0: i32) -> (i32, i32, i32) {
    %c0_i32 = arith.constant 0 : i32
    %c0_i32_0 = arith.constant 0 : i32
    %c0_i32_1 = arith.constant 0 : i32
    %c0_i32_2 = arith.constant 0 : i32
    return %c0_i32, %c0_i32_0, %c0_i32_1 : i32, i32, i32
  }
  func.func @transform_6(%arg0: i32) -> (i32, i32, i32) {
    %c0_i32 = arith.constant 0 : i32
    %c0_i32_0 = arith.constant 0 : i32
    %c0_i32_1 = arith.constant 0 : i32
    %c0_i32_2 = arith.constant 0 : i32
    return %c0_i32, %c0_i32_0, %c0_i32_1 : i32, i32, i32
  }
  func.func @transform_7(%arg0: i32) -> (i32, i32, i32) {
    %c0_i32 = arith.constant 0 : i32
    %c0_i32_0 = arith.constant 0 : i32
    %c0_i32_1 = arith.constant 0 : i32
    %c0_i32_2 = arith.constant 0 : i32
    return %c0_i32, %c0_i32_0, %c0_i32_1 : i32, i32, i32
  }
  func.func @transform_8(%arg0: i32) -> (i32, i32) {
    %c0_i32 = arith.constant 0 : i32
    %c0_i32_0 = arith.constant 0 : i32
    %c0_i32_1 = arith.constant 0 : i32
    return %c0_i32, %c0_i32_0 : i32, i32
  }
  func.func @transform_9(%arg0: i32) -> (i32, i32) {
    %c0_i32 = arith.constant 0 : i32
    %c0_i32_0 = arith.constant 0 : i32
    %c0_i32_1 = arith.constant 0 : i32
    return %c0_i32, %c0_i32_0 : i32, i32
  }
  func.func @transform_10(%arg0: i32) -> (i32, i32, i32, i32) {
    %c0_i32 = arith.constant 0 : i32
    %c0_i32_0 = arith.constant 0 : i32
    %c0_i32_1 = arith.constant 0 : i32
    %c0_i32_2 = arith.constant 0 : i32
    return %arg0, %c0_i32, %c0_i32_0, %c0_i32_1 : i32, i32, i32, i32
  }
}

</mosaic_0001>

<bundles_post_ra>
// kernel: tpu_custom_call.1
= control target key start
LH: loop header
LB: loop body
LE: loop exit
PB: predicated region body
PF: predicated region fallthrough
CT: control target
= control target key end

     0   :  { %15 = vsyncpa [#allocation5], 0  ;;  %s18996_s0 = inlined_call_operand.hbm [shape: bf16[2,16,16,32], index: 0, kind: input, shape index: {}]   ;;  %s18997_s1 = inlined_call_operand.hbm [shape: bf16[9,32,32], index: 1, kind: input, shape index: {}]   ;;  %s18998_s2 = inlined_call_operand.vmem [shape: f32[1,32], index: 2, kind: input, shape index: {}]   ;;  %s18999_s3 = inlined_call_operand.vmem [shape: f32[1,32], index: 3, kind: input, shape index: {}]   ;;  %s19000_s4 = inlined_call_operand.vmem [shape: f32[54,1,32], index: 4, kind: input, shape index: {}]   ;;  %s19001_s5 = inlined_call_operand.vmem [shape: f32[6,1,32], index: 5, kind: input, shape index: {}]   ;;  %s19002_s6 = inlined_call_operand.vmem [shape: f32[6,1,32], index: 6, kind: input, shape index: {}]   ;;  %s19003_s7 = inlined_call_operand.vmem [shape: bf16[6,32,32], index: 7, kind: input, shape index: {}]   ;;  %s19004_s8 = inlined_call_operand.vmem [shape: f32[1,32], index: 8, kind: input, shape index: {}]   ;;  %s19005_s9 = inlined_call_operand.vmem [shape: f32[1,32], index: 9, kind: input, shape index: {}]   ;;  %s19006_s10 = inlined_call_operand.hbm [shape: f32[2,16,16,32], index: 10, kind: output, shape index: {}]  }
   0x1   :  { %17 = vsyncpa [#allocation5 + $0x1], 0 }
   0x2   :  { %18 = vsyncpa [#allocation8], 0 }
   0x3   :  { %19 = vsyncpa [#allocation6], 0 }
   0x4   :  { %21 = vsyncpa [#allocation6 + $0x1], 0  ;;  %s12772_s13 = smov 0   ;;  %s12774_s14 = smov 0  }
   0x5   :  { %s12776_s15 = smov 0   ;;  %s12778_s16 = smov 0  }
   0x6 LB: > { %19080 = sst [smem:[#allocation13_spill]] %s12695_s13  ;;  %s12793_s17 = sadd.s32 4294967295, %s12707_s16   ;;  %s12707_s16 = sphi %s12778_s16, %s19179_s16   ;;  %s12703_s15 = sphi %s12776_s15, %s19182_s15   ;;  %s12699_s14 = sphi %s12774_s14, %s19181_s14   ;;  %s12695_s13 = sphi %s12772_s13, %s19180_s13  }
   0x7   : > { %s10130_s18 = sadd.s32 4294967294, %s12707_s16   ;;  %p47_p0 = scmp.ne.s32.totalorder %s12699_s14, %s12695_s13 }
   0x8   : > { %p19009_p1 = scmp.eq.s32.totalorder %s12793_s17, 0  ;;  %p266_p3 = scmp.eq.s32.totalorder %s10130_s18, 1 }
   0x9   : > { %p10131_p5 = scmp.ge.s32.totalorder %s12707_s16, 1  ;;  %p273_p7 = scmp.lt.s32.totalorder %s12707_s16, 3 }
   0xa   : > { %p12802_p4 = por %p19009_p1, %p47_p0  ;;  %p12807_p6 = por %p266_p3, %p47_p0 }
   0xb   : > { %p12812_p8 = pnand %p10131_p5, %p273_p7  ;;  %s12709_s22 = smov [#allocation7]  }
   0xc   : > { %s19081_s19 = scalar_select %p12802_p4, 1, 0 }
   0xd   : > { %s19082_s20 = scalar_select %p12807_p6, 1, 0 }
   0xe   : > { %s19084_s21 = scalar_select %p12812_p8, 1, 0 }
   0xf   : > { %19083 = sst [smem:[#allocation14_spill]] %s19082_s20  ;;  %s285_s23 = sshll.u32 %s12709_s22, 4  ;;  %s12816_s23 = int_to_ptr.vmem [resolvable:$true] %s285_s23 }
  0x10   : > { %p11888_p9 = pneg %p12812_p8  ;;  %s12828_s25 = sadd.s32 1, %s12707_s16  }
  0x11   : > { %19086 = sst [smem:[#allocation15_spill]] %s12828_s25  ;;  %s34_s26 = sadd.s32 1, %s12703_s15 }
  0x12   : > { %p12823_p11 = pnand %p11888_p9, %p19009_p1  ;;  %s31_s27 = ssub.s32 %s12707_s16, %s12828_s25 }
  0x13   : > { %s12579_s30 = scalar_lea.hbm %s18997_s1, 2304 }
  0x14   : > { %p12580_p12 = scmp.ne.s32.totalorder %s18997_s1, %s12579_s30  ;;  %p12581_p13 = pneg %p12823_p11 }
  0x15   : > { %p12586_p5 = scmp.lt.u32.totalorder %s12579_s30, %s18997_s1 }
  0x16   : > { %p12582_p0 = pnand %p12581_p13, %p12580_p12 }
  0x18   : > { %p12583_p3 = pneg %p12582_p0 }
  0x1a   : > { %p12588_p7 = pnand %p12586_p5, %p12583_p3 }
  0x1c   : > { %12591 = shalt.err (!%p12588_p7)
}
  0x1d   : > { %s12592_s25 = scalar_lea.vmem %s12816_s23, 2304  ;;  %p12600_p2 = scmp.lt.s32.totalorder %s12816_s23, %s12816_s23 }
  0x1e   : > { %p12593_p9 = scmp.ne.s32.totalorder %s12816_s23, %s12592_s25  ;;  %p12601_p6 = scmp.lt.s32.totalorder %s12592_s25, %s12592_s25 }
  0x20   : > { %p12595_p10 = pnand %p12593_p9, %p12581_p13  ;;  %p12602_p4 = por %p12601_p6, %p12600_p2 }
  0x22   : > { %p12596_p1 = pneg %p12595_p10 }
  0x24   : > { %p12603_p8 = pnand %p12602_p4, %p12596_p1 }
  0x26   : > { %12606 = shalt.err (!%p12603_p8)
}
  0x27   : > { %s19014_s28 = smov 64   ;;  %s12711_s29 = smov 4  }
  0x28   : > { %11891 = dma.hbm_to_vmem [thread:$0]  (!%p12823_p11), %s18997_s1, 2304, %s12816_s23, [#allocation8], %s19014_s28, %s19014_s28, %s12711_s29  }
  0x29   : > { %p32_p1 = scmp.eq.s32.totalorder %s31_s27, 0  ;;  %p41_p2 = scmp.ne.s32.totalorder %s12703_s15, %s12699_s14 }
  0x2a   : > { %p42_p4 = scmp.eq.s32.totalorder %s12707_s16, 0  ;;  %p11901_p6 = scmp.lt.s32.totalorder %s12707_s16, 2 }
  0x2b   : > { %s12862_s11 = scalar_select %p32_p1, %s12703_s15, %s34_s26  }
  0x2c   : > { %p43_p8 = por %p42_p4, %p41_p2  ;;  %p19087_p10 = scmp.eq.s32.totalorder %s12793_s17, 1 }
  0x2d   : > { %s323_s24 = sand.u32 1, %s12703_s15   ;;  %s10569_s18 = sshll.u32 %s12707_s16, 11 }
  0x2e   : > { %p12866_p12 = por %p19087_p10, %p41_p2  ;;  %s10134_s22 = sshll.u32 %s323_s24, 7 }
  0x2f   : > { %s12875_s25 = scalar_lea.hbm %s18996_s0, %s10569_s18  ;;  %s327_s23 = scalar_lea.vmem [#allocation4], %s10134_s22 }
  0x30   : > { %s334_s26 = sshll.u32 %s327_s23, 4  ;;  %p12877_p11 = pnand %p11901_p6, %p43_p8  ;;  %s12881_s26 = int_to_ptr.vmem [resolvable:$true] %s334_s26 }
  0x31   : > { %s12883_s30 = scalar_lea.sflag [#allocation5], %s323_s24  ;;  %s12607_s28 = scalar_lea.hbm %s12875_s25, 2048 }
  0x32   : > { %p12608_p13 = scmp.ne.s32.totalorder %s12875_s25, %s12607_s28  ;;  %p12609_p0 = pneg %p12877_p11 }
  0x33   : > { %s12612_s18 = scalar_lea.hbm %s18996_s0, 4096  ;;  %p12613_p7 = scmp.lt.u32.totalorder %s12875_s25, %s18996_s0 }
  0x34   : > { %p12610_p3 = pnand %p12609_p0, %p12608_p13  ;;  %p12614_p9 = scmp.lt.u32.totalorder %s12612_s18, %s12607_s28 }
  0x35   : > { %p12616_p2 = scmp.lt.u32.totalorder %s12607_s28, %s12875_s25 }
  0x36   : > { %p12611_p5 = pneg %p12610_p3  ;;  %p12615_p1 = por %p12614_p9, %p12613_p7 }
  0x38   : > { %p12617_p4 = por %p12616_p2, %p12615_p1 }
  0x3a   : > { %p12618_p6 = pnand %p12617_p4, %p12611_p5 }
  0x3c   : > { %12621 = shalt.err (!%p12618_p6)
}
  0x3d   : > { %s12622_s24 = scalar_lea.vmem %s12881_s26, 2048  ;;  %s12712_s13 = smov [#allocation4]  }
  0x3e   : > { %p12623_p8 = scmp.ne.s32.totalorder %s12881_s26, %s12622_s24  ;;  %s12627_s20 = sshll.u32 %s12712_s13, 4  ;;  %s12628_s20 = int_to_ptr.vmem [resolvable:$false] %s12627_s20 }
  0x3f   : > { %s12629_s22 = scalar_lea.vmem %s12628_s20, 4096  ;;  %p12630_p3 = scmp.lt.s32.totalorder %s12881_s26, %s12628_s20 }
  0x40   : > { %p12625_p10 = pnand %p12623_p8, %p12609_p0  ;;  %p12631_p7 = scmp.lt.s32.totalorder %s12629_s22, %s12622_s24 }
  0x42   : > { %p12626_p13 = pneg %p12625_p10  ;;  %p12632_p9 = por %p12631_p7, %p12630_p3 }
  0x44   : > { %p12633_p1 = pnand %p12632_p9, %p12626_p13 }
  0x46   : > { %12636 = shalt.err (!%p12633_p1)
}
  0x47   : > { %s19090_s28 = smov 64   ;;  %p19091_p0 = scmp.ne.s32.totalorder %s19084_s21, 0 }
  0x48   : > { %11895 = dma.hbm_to_vmem [thread:$0]  (!%p12877_p11), %s12875_s25, 2048, %s12881_s26, %s12883_s30, %s19090_s28, %s19090_s28, %s12711_s29  }
  0x49   : > { %346 = sbr.rel (%p19091_p0) target bundleno = 2054 (0x806), region = 60 }
  0x50   : > { %s12917_s18 = sand.u32 1, %s12699_s14   ;;  %p19092_p5 = scmp.ne.s32.totalorder %s19081_s19, 0 }
  0x51   : > { %s10138_s23 = sshll.u32 %s12917_s18, 7  ;;  %s349_s24 = scalar_lea.sflag [#allocation5], %s12917_s18 }
  0x52   : > { %s12921_s13 = scalar_lea.vmem [#allocation4], %s10138_s23 }
  0x53   : > { %12682 = dma.done.wait (%p19092_p5), %s349_s24, 2048  }
  0x54   : > { %12684 = vsyncadd (%p19092_p5), %s349_s24, 4294965248  ;;  %p19093_p11 = scmp.eq.s32.totalorder %s12793_s17, 0 }
  0x56   : > { %12686 = dma.done.wait (%p19093_p11), [#allocation8], 2304   ;;  %p19094_p2 = pmov %p19093_p11 }
  0x57   : > { %vm458_vm0 = vcmask 261120   ;;  %vm461_vm1 = vcmask 254976   ;;  %v12713_v0 = vmov 0.0   ;;  %v13147_v1 = vld [vmem:[#allocation7] sm:$0xff]   ;;  %v13149_v2 = vld [vmem:[#allocation7 + $0x8] sm:$0xff]   ;;  %v13165_v11 = vld [vmem:[%s12921_s13 + $0x10] sm:$0xff]  }
  0x58   : > { %12688 = vsyncadd (%p19094_p2), [#allocation8], 4294964992  ;;  %459 = vst.msk [vmem:[#allocation2] sm:$0xff] %vm458_vm0, %v12713_v0  ;;  %10956 = vmatprep.subr.bf16.mxu0 %v13147_v1  ;;  %v13153_v6 = vld [vmem:[#allocation7 + $0x20] sm:$0xff]   ;;  %v13162_v10 = vld [vmem:[%s12921_s13 + $0x8] sm:$0xff]   ;;  %v19041_v15 = vunpack.c.l.bf16 %v13165_v11  ;;  %v19039_v16 = vunpack.c.h.bf16 %v13165_v11  ;;  %s10140_s24 = sshll.u32 %s12917_s18, 8 }
  0x59   : > { %460 = vst.msk [vmem:[#allocation2 + $0x8] sm:$0xff] %vm458_vm0, %v12713_v0  ;;  %463 = vst.msk [vmem:[#allocation2 + $0x18] sm:$0xff] %vm458_vm0, %v12713_v0  ;;  %10957 = vmatpush3.bf16.msra.mxu0 %v13147_v1  ;;  %v13156_v7 = vld [vmem:[%s12921_s13] sm:$0xff]   ;;  %v13168_v12 = vld [vmem:[%s12921_s13 + $0x18] sm:$0xff]   ;;  %v19046_v13 = vunpack.c.l.bf16 %v13162_v10  ;;  %v19044_v14 = vunpack.c.h.bf16 %v13162_v10  ;;  %s10570_s19 = sshll.u32 %s12793_s17, 12  ;;  %s10034_s17 = scalar_lea.sflag [#allocation6], %s12917_s18 }
  0x5a   : > { %464 = vst.msk [vmem:[#allocation2 + $0x20] sm:$0xff] %vm458_vm0, %v12713_v0  ;;  %466 = vst.msk [vmem:[#allocation2 + $0x30] sm:$0xff] %vm458_vm0, %v12713_v0  ;;  %10958 = vmatprep.subr.bf16.mxu0 %v13149_v2  ;;  %v19045_v8 = vunpack.c.l.bf16 %v13156_v7  ;;  %v19043_v9 = vunpack.c.h.bf16 %v13156_v7  ;;  %v19042_v17 = vunpack.c.l.bf16 %v13168_v12  ;;  %v19040_v18 = vunpack.c.h.bf16 %v13168_v12  ;;  %v13184_v19 = vld [vmem:[%s12921_s13 + $0x20] sm:$0xff]   ;;  %v13187_v20 = vld [vmem:[%s12921_s13 + $0x28] sm:$0xff]   ;;  %s18944_s26 = scalar_lea.hbm %s19006_s10, %s10570_s19  ;;  %s12714_s30 = smov [#allocation9]  }
  0x5b   : > { %467 = vst.msk [vmem:[#allocation2 + $0x38] sm:$0xff] %vm458_vm0, %v12713_v0  ;;  %469 = vst.msk [vmem:[#allocation2 + $0x48] sm:$0xff] %vm458_vm0, %v12713_v0  ;;  %v13190_v21 = vld [vmem:[%s12921_s13 + $0x30] sm:$0xff]   ;;  %v19037_v22 = vunpack.c.l.bf16 %v13184_v19  ;;  %v19035_v23 = vunpack.c.h.bf16 %v13184_v19  ;;  %v19038_v24 = vunpack.c.l.bf16 %v13187_v20  ;;  %v19036_v25 = vunpack.c.h.bf16 %v13187_v20  ;;  %v13219_v28 = vld [vmem:[%s12921_s13 + $0x38] sm:$0xff]   ;;  %s12641_s20 = sshll.u32 %s12714_s30, 4  ;;  %s12642_s20 = int_to_ptr.vmem [resolvable:$false] %s12641_s20 }
  0x5c   : > { %470 = vst.msk [vmem:[#allocation2 + $0x50] sm:$0xff] %vm458_vm0, %v12713_v0  ;;  %472 = vst.msk [vmem:[#allocation2 + $0x60] sm:$0xff] %vm458_vm0, %v12713_v0  ;;  %v19033_v26 = vunpack.c.l.bf16 %v13190_v21  ;;  %v19031_v27 = vunpack.c.h.bf16 %v13190_v21  ;;  %v19034_v29 = vunpack.c.l.bf16 %v13219_v28  ;;  %v19032_v30 = vunpack.c.h.bf16 %v13219_v28  ;;  %v13242_v31 = vld [vmem:[%s12921_s13 + $0x40] sm:$0xff]   ;;  %v13245_v32 = vld [vmem:[%s12921_s13 + $0x48] sm:$0xff]   ;;  %s12643_s22 = scalar_lea.vmem %s12642_s20, 8192 }
  0x5d   : > { %473 = vst.msk [vmem:[#allocation2 + $0x68] sm:$0xff] %vm458_vm0, %v12713_v0  ;;  %475 = vst.msk [vmem:[#allocation2 + $0x78] sm:$0xff] %vm458_vm0, %v12713_v0  ;;  %10959 = vmatpush3.bf16.msra.mxu0 %v13149_v2  ;;  %v13248_v33 = vld [vmem:[%s12921_s13 + $0x50] sm:$0xff]   ;;  %v19029_v34 = vunpack.c.l.bf16 %v13242_v31  ;;  %v19027_v35 = vunpack.c.h.bf16 %v13242_v31  ;;  %v19030_v36 = vunpack.c.l.bf16 %v13245_v32  ;;  %v19028_v37 = vunpack.c.h.bf16 %v13245_v32  ;;  %v13261_v38 = vld [vmem:[%s12921_s13 + $0x58] sm:$0xff]  }
  0x5e   : > { %476 = vst.msk [vmem:[#allocation2 + $0x80] sm:$0xff] %vm458_vm0, %v12713_v0  ;;  %478 = vst.msk [vmem:[#allocation2 + $0x90] sm:$0xff] %vm458_vm0, %v12713_v0  ;;  %10992 = vmatprep.subr.bf16.mxu0 %v13153_v6  ;;  %v13264_v39 = vld [vmem:[%s12921_s13 + $0x60] sm:$0xff]   ;;  %v13267_v40 = vld [vmem:[%s12921_s13 + $0x68] sm:$0xff]   ;;  %v19025_v41 = vunpack.c.l.bf16 %v13248_v33  ;;  %v19023_v42 = vunpack.c.h.bf16 %v13248_v33  ;;  %v19026_v43 = vunpack.c.l.bf16 %v13261_v38  ;;  %v19024_v44 = vunpack.c.h.bf16 %v13261_v38 }
  0x5f   : > { %479 = vst.msk [vmem:[#allocation2 + $0x98] sm:$0xff] %vm458_vm0, %v12713_v0  ;;  %481 = vst.msk [vmem:[#allocation2 + $0xa8] sm:$0xff] %vm458_vm0, %v12713_v0  ;;  %v547_v3 = vld [vmem:[#allocation2] sm:$0xff]  ;;  %v13274_v45 = vld [vmem:[%s12921_s13 + $0x70] sm:$0xff]   ;;  %v19021_v48 = vunpack.c.l.bf16 %v13264_v39  ;;  %v19017_v49 = vunpack.c.h.bf16 %v13264_v39  ;;  %v19022_v50 = vunpack.c.l.bf16 %v13267_v40  ;;  %v19020_v51 = vunpack.c.h.bf16 %v13267_v40 }
  0x60   : > { %482 = vst.msk [vmem:[#allocation2 + $0xb0] sm:$0xff] %vm458_vm0, %v12713_v0  ;;  %484 = vst.msk [vmem:[#allocation2 + $0xc0] sm:$0xff] %vm458_vm0, %v12713_v0  ;;  %v548_v4 = vld [vmem:[#allocation2 + $0x8] sm:$0xff]  ;;  %v19016_v56 = vunpack.c.l.bf16 %v13274_v45  ;;  %v19015_v57 = vunpack.c.h.bf16 %v13274_v45  ;;  %v11946_v63 = vld [vmem:[#allocation7 + $0x30] sm:$0xff]  }
  0x61   : > { %485 = vst.msk [vmem:[#allocation2 + $0xc8] sm:$0xff] %vm458_vm0, %v12713_v0  ;;  %487 = vst.msk [vmem:[#allocation2 + $0xd8] sm:$0xff] %vm458_vm0, %v12713_v0  ;;  %v579_v5 = vpack.c.bf16 %v548_v4, %v547_v3  ;;  %v11945_v55 = vld [vmem:[#allocation7 + $0x28] sm:$0xff]  }
  0x62   : > { %488 = vst.msk [vmem:[#allocation2 + $0xe0] sm:$0xff] %vm458_vm0, %v12713_v0  ;;  %490 = vst.msk [vmem:[#allocation2 + $0xf0] sm:$0xff] %vm458_vm0, %v12713_v0 }
  0x63   : > { %491 = vst.msk [vmem:[#allocation2 + $0xf8] sm:$0xff] %vm458_vm0, %v12713_v0  ;;  %493 = vst.msk [vmem:[#allocation2 + $0x108] sm:$0xff] %vm458_vm0, %v12713_v0  ;;  %10960 = vmatprep.mubr.msk.bf16.mxu0 %vm458_vm0, %v579_v5 }
  0x64   : > { %494 = vst.msk [vmem:[#allocation2 + $0x110] sm:$0xff] %vm458_vm0, %v12713_v0  ;;  %496 = vst.msk [vmem:[#allocation2 + $0x120] sm:$0xff] %vm458_vm0, %v12713_v0 }
  0x65   : > { %497 = vst.msk [vmem:[#allocation2 + $0x128] sm:$0xff] %vm458_vm0, %v12713_v0  ;;  %499 = vst.msk [vmem:[#allocation2 + $0x138] sm:$0xff] %vm458_vm0, %v12713_v0 }
  0x66   : > { %500 = vst.msk [vmem:[#allocation2 + $0x140] sm:$0xff] %vm458_vm0, %v12713_v0  ;;  %502 = vst.msk [vmem:[#allocation2 + $0x150] sm:$0xff] %vm458_vm0, %v12713_v0 }
  0x67   : > { %503 = vst.msk [vmem:[#allocation2 + $0x158] sm:$0xff] %vm458_vm0, %v12713_v0  ;;  %505 = vst.msk [vmem:[#allocation2 + $0x168] sm:$0xff] %vm458_vm0, %v12713_v0 }
  0x68   : > { %506 = vst.msk [vmem:[#allocation2 + $0x170] sm:$0xff] %vm458_vm0, %v12713_v0  ;;  %508 = vst.msk [vmem:[#allocation2 + $0x180] sm:$0xff] %vm458_vm0, %v12713_v0 }
  0x69   : > { %509 = vst.msk [vmem:[#allocation2 + $0x188] sm:$0xff] %vm458_vm0, %v12713_v0  ;;  %511 = vst.msk [vmem:[#allocation2 + $0x198] sm:$0xff] %vm458_vm0, %v12713_v0 }
  0x6a   : > { %512 = vst.msk [vmem:[#allocation2 + $0x1a0] sm:$0xff] %vm458_vm0, %v12713_v0  ;;  %3347 = vst.msk [vmem:[#allocation3] sm:$0xff] %vm458_vm0, %v12713_v0 }
  0x6b   : > { %3348 = vst.msk [vmem:[#allocation3 + $0x8] sm:$0xff] %vm458_vm0, %v12713_v0  ;;  %3350 = vst.msk [vmem:[#allocation3 + $0x18] sm:$0xff] %vm458_vm0, %v12713_v0 }
  0x6c   : > { %3351 = vst.msk [vmem:[#allocation3 + $0x20] sm:$0xff] %vm458_vm0, %v12713_v0  ;;  %3353 = vst.msk [vmem:[#allocation3 + $0x30] sm:$0xff] %vm458_vm0, %v12713_v0 }
  0x6d   : > { %3354 = vst.msk [vmem:[#allocation3 + $0x38] sm:$0xff] %vm458_vm0, %v12713_v0  ;;  %3356 = vst.msk [vmem:[#allocation3 + $0x48] sm:$0xff] %vm458_vm0, %v12713_v0 }
  0x6e   : > { %3357 = vst.msk [vmem:[#allocation3 + $0x50] sm:$0xff] %vm458_vm0, %v12713_v0  ;;  %3359 = vst.msk [vmem:[#allocation3 + $0x60] sm:$0xff] %vm458_vm0, %v12713_v0 }
  0x6f   : > { %3360 = vst.msk [vmem:[#allocation3 + $0x68] sm:$0xff] %vm458_vm0, %v12713_v0  ;;  %3362 = vst.msk [vmem:[#allocation3 + $0x78] sm:$0xff] %vm458_vm0, %v12713_v0 }
  0x70   : > { %3363 = vst.msk [vmem:[#allocation3 + $0x80] sm:$0xff] %vm458_vm0, %v12713_v0  ;;  %3365 = vst.msk [vmem:[#allocation3 + $0x90] sm:$0xff] %vm458_vm0, %v12713_v0 }
  0x71   : > { %3366 = vst.msk [vmem:[#allocation3 + $0x98] sm:$0xff] %vm458_vm0, %v12713_v0  ;;  %3368 = vst.msk [vmem:[#allocation3 + $0xa8] sm:$0xff] %vm458_vm0, %v12713_v0 }
  0x72   : > { %3369 = vst.msk [vmem:[#allocation3 + $0xb0] sm:$0xff] %vm458_vm0, %v12713_v0  ;;  %3371 = vst.msk [vmem:[#allocation3 + $0xc0] sm:$0xff] %vm458_vm0, %v12713_v0 }
  0x73   : > { %3372 = vst.msk [vmem:[#allocation3 + $0xc8] sm:$0xff] %vm458_vm0, %v12713_v0  ;;  %3374 = vst.msk [vmem:[#allocation3 + $0xd8] sm:$0xff] %vm458_vm0, %v12713_v0 }
  0x74   : > { %3375 = vst.msk [vmem:[#allocation3 + $0xe0] sm:$0xff] %vm458_vm0, %v12713_v0  ;;  %3377 = vst.msk [vmem:[#allocation3 + $0xf0] sm:$0xff] %vm458_vm0, %v12713_v0 }
  0x75   : > { %3378 = vst.msk [vmem:[#allocation3 + $0xf8] sm:$0xff] %vm458_vm0, %v12713_v0  ;;  %3380 = vst.msk [vmem:[#allocation3 + $0x108] sm:$0xff] %vm458_vm0, %v12713_v0 }
  0x76   : > { %3381 = vst.msk [vmem:[#allocation3 + $0x110] sm:$0xff] %vm458_vm0, %v12713_v0  ;;  %3383 = vst.msk [vmem:[#allocation3 + $0x120] sm:$0xff] %vm458_vm0, %v12713_v0 }
  0x77   : > { %3384 = vst.msk [vmem:[#allocation3 + $0x128] sm:$0xff] %vm458_vm0, %v12713_v0  ;;  %3386 = vst.msk [vmem:[#allocation3 + $0x138] sm:$0xff] %vm458_vm0, %v12713_v0 }
  0x78   : > { %3387 = vst.msk [vmem:[#allocation3 + $0x140] sm:$0xff] %vm458_vm0, %v12713_v0  ;;  %3389 = vst.msk [vmem:[#allocation3 + $0x150] sm:$0xff] %vm458_vm0, %v12713_v0 }
  0x79   : > { %3390 = vst.msk [vmem:[#allocation3 + $0x158] sm:$0xff] %vm458_vm0, %v12713_v0  ;;  %3392 = vst.msk [vmem:[#allocation3 + $0x168] sm:$0xff] %vm458_vm0, %v12713_v0 }
  0x7a   : > { %3393 = vst.msk [vmem:[#allocation3 + $0x170] sm:$0xff] %vm458_vm0, %v12713_v0  ;;  %3395 = vst.msk [vmem:[#allocation3 + $0x180] sm:$0xff] %vm458_vm0, %v12713_v0 }
  0x7b   : > { %3396 = vst.msk [vmem:[#allocation3 + $0x188] sm:$0xff] %vm458_vm0, %v12713_v0  ;;  %3398 = vst.msk [vmem:[#allocation3 + $0x198] sm:$0xff] %vm458_vm0, %v12713_v0 }
  0x7c   : > { %3399 = vst.msk [vmem:[#allocation3 + $0x1a0] sm:$0xff] %vm458_vm0, %v12713_v0  ;;  %19095 = vst [vmem:[#allocation16_spill] sm:$0xff] %v13156_v7  ;;  %v13923_v7 = vld [vmem:[%s19000_s4 + $0x11] ss:$0 sm:$0xff] }
  0x7d   : > { %465 = vst.msk [vmem:[#allocation2 + $0x28] sm:$0x3] %vm461_vm1, %v12713_v0  ;;  %462 = vst.msk [vmem:[#allocation2 + $0x10] sm:$0x3] %vm461_vm1, %v12713_v0 }
  0x7e   : > { %468 = vst.msk [vmem:[#allocation2 + $0x40] sm:$0x3] %vm461_vm1, %v12713_v0  ;;  %471 = vst.msk [vmem:[#allocation2 + $0x58] sm:$0x3] %vm461_vm1, %v12713_v0 }
  0x7f   : > { %474 = vst.msk [vmem:[#allocation2 + $0x70] sm:$0x3] %vm461_vm1, %v12713_v0  ;;  %477 = vst.msk [vmem:[#allocation2 + $0x88] sm:$0x3] %vm461_vm1, %v12713_v0 }
  0x80   : > { %480 = vst.msk [vmem:[#allocation2 + $0xa0] sm:$0x3] %vm461_vm1, %v12713_v0  ;;  %483 = vst.msk [vmem:[#allocation2 + $0xb8] sm:$0x3] %vm461_vm1, %v12713_v0 }
  0x81   : > { %486 = vst.msk [vmem:[#allocation2 + $0xd0] sm:$0x3] %vm461_vm1, %v12713_v0  ;;  %489 = vst.msk [vmem:[#allocation2 + $0xe8] sm:$0x3] %vm461_vm1, %v12713_v0 }
  0x82   : > { %492 = vst.msk [vmem:[#allocation2 + $0x100] sm:$0x3] %vm461_vm1, %v12713_v0  ;;  %495 = vst.msk [vmem:[#allocation2 + $0x118] sm:$0x3] %vm461_vm1, %v12713_v0 }
  0x83   : > { %498 = vst.msk [vmem:[#allocation2 + $0x130] sm:$0x3] %vm461_vm1, %v12713_v0  ;;  %501 = vst.msk [vmem:[#allocation2 + $0x148] sm:$0x3] %vm461_vm1, %v12713_v0 }
  0x84   : > { %504 = vst.msk [vmem:[#allocation2 + $0x160] sm:$0x3] %vm461_vm1, %v12713_v0  ;;  %507 = vst.msk [vmem:[#allocation2 + $0x178] sm:$0x3] %vm461_vm1, %v12713_v0 }
  0x85   : > { %510 = vst.msk [vmem:[#allocation2 + $0x190] sm:$0x3] %vm461_vm1, %v12713_v0  ;;  %513 = vst.msk [vmem:[#allocation2 + $0x1a8] sm:$0x3] %vm461_vm1, %v12713_v0 }
  0x86   : > { %3349 = vst.msk [vmem:[#allocation3 + $0x10] sm:$0x3] %vm461_vm1, %v12713_v0  ;;  %3352 = vst.msk [vmem:[#allocation3 + $0x28] sm:$0x3] %vm461_vm1, %v12713_v0 }
  0x87   : > { %3355 = vst.msk [vmem:[#allocation3 + $0x40] sm:$0x3] %vm461_vm1, %v12713_v0  ;;  %3358 = vst.msk [vmem:[#allocation3 + $0x58] sm:$0x3] %vm461_vm1, %v12713_v0 }
  0x88   : > { %3361 = vst.msk [vmem:[#allocation3 + $0x70] sm:$0x3] %vm461_vm1, %v12713_v0  ;;  %3364 = vst.msk [vmem:[#allocation3 + $0x88] sm:$0x3] %vm461_vm1, %v12713_v0 }
  0x89   : > { %3367 = vst.msk [vmem:[#allocation3 + $0xa0] sm:$0x3] %vm461_vm1, %v12713_v0  ;;  %3370 = vst.msk [vmem:[#allocation3 + $0xb8] sm:$0x3] %vm461_vm1, %v12713_v0 }
  0x8a   : > { %3373 = vst.msk [vmem:[#allocation3 + $0xd0] sm:$0x3] %vm461_vm1, %v12713_v0  ;;  %3376 = vst.msk [vmem:[#allocation3 + $0xe8] sm:$0x3] %vm461_vm1, %v12713_v0 }
  0x8b   : > { %3379 = vst.msk [vmem:[#allocation3 + $0x100] sm:$0x3] %vm461_vm1, %v12713_v0  ;;  %3382 = vst.msk [vmem:[#allocation3 + $0x118] sm:$0x3] %vm461_vm1, %v12713_v0 }
  0x8c   : > { %3385 = vst.msk [vmem:[#allocation3 + $0x130] sm:$0x3] %vm461_vm1, %v12713_v0  ;;  %3388 = vst.msk [vmem:[#allocation3 + $0x148] sm:$0x3] %vm461_vm1, %v12713_v0 }
  0x8d   : > { %3391 = vst.msk [vmem:[#allocation3 + $0x160] sm:$0x3] %vm461_vm1, %v12713_v0  ;;  %3394 = vst.msk [vmem:[#allocation3 + $0x178] sm:$0x3] %vm461_vm1, %v12713_v0 }
  0x8e   : > { %3397 = vst.msk [vmem:[#allocation3 + $0x190] sm:$0x3] %vm461_vm1, %v12713_v0  ;;  %3400 = vst.msk [vmem:[#allocation3 + $0x1a8] sm:$0x3] %vm461_vm1, %v12713_v0 }
  0x8f   : > { %19096 = vst [vmem:[#allocation17_spill] sm:$0xff] %v13162_v10  ;;  %19097 = vst [vmem:[#allocation18_spill] sm:$0xff] %v13165_v11 }
  0x90   : > { %19098 = vst [vmem:[#allocation19_spill] sm:$0xff] %v13168_v12  ;;  %515 = vst.msk [vmem:[#allocation2 + $0x19] sm:$0xff] %vm458_vm0, %v19045_v8 }
  0x91   : > { %516 = vst.msk [vmem:[#allocation2 + $0x21] sm:$0xff] %vm458_vm0, %v19043_v9  ;;  %19099 = vst [vmem:[#allocation20_spill] sm:$0xff] %v13184_v19  ;;  %v11951_v9 = vld [vmem:[#allocation7 + $0x58] sm:$0xff]  }
  0x92   : > { %19100 = vst [vmem:[#allocation21_spill] sm:$0xff] %v13187_v20  ;;  %19101 = vst [vmem:[#allocation22_spill] sm:$0xff] %v13190_v21  ;;  %v11957_v21 = vld [vmem:[#allocation7 + $0x18] sm:$0xff]   ;;  %v10309_v20 = vld [vmem:[%s19000_s4 + $0x2] ss:$0 sm:$0xff] }
  0x93   : > { %517 = vst.msk [vmem:[#allocation2 + $0x31] sm:$0xff] %vm458_vm0, %v19046_v13  ;;  %518 = vst.msk [vmem:[#allocation2 + $0x39] sm:$0xff] %vm458_vm0, %v19044_v14  ;;  %v13487_v14 = vld [vmem:[#allocation7 + $0x60] sm:$0xff]  }
  0x94   : > { %519 = vst.msk [vmem:[#allocation2 + $0x49] sm:$0xff] %vm458_vm0, %v19041_v15  ;;  %520 = vst.msk [vmem:[#allocation2 + $0x51] sm:$0xff] %vm458_vm0, %v19039_v16 }
  0x95   : > { %521 = vst.msk [vmem:[#allocation2 + $0x61] sm:$0xff] %vm458_vm0, %v19042_v17  ;;  %522 = vst.msk [vmem:[#allocation2 + $0x69] sm:$0xff] %vm458_vm0, %v19040_v18 }
  0x96   : > { %19102 = vst [vmem:[#allocation23_spill] sm:$0xff] %v13219_v28  ;;  %523 = vst.msk [vmem:[#allocation2 + $0x79] sm:$0xff] %vm458_vm0, %v19037_v22 }
  0x97   : > { %524 = vst.msk [vmem:[#allocation2 + $0x81] sm:$0xff] %vm458_vm0, %v19035_v23  ;;  %525 = vst.msk [vmem:[#allocation2 + $0x91] sm:$0xff] %vm458_vm0, %v19038_v24  ;;  %v549_v46 = vld [vmem:[#allocation2 + $0x18] sm:$0xff] }
  0x98   : > { %526 = vst.msk [vmem:[#allocation2 + $0x99] sm:$0xff] %vm458_vm0, %v19036_v25  ;;  %527 = vst.msk [vmem:[#allocation2 + $0xa9] sm:$0xff] %vm458_vm0, %v19033_v26  ;;  %v550_v47 = vld [vmem:[#allocation2 + $0x20] sm:$0xff] }
  0x99   : > { %528 = vst.msk [vmem:[#allocation2 + $0xb1] sm:$0xff] %vm458_vm0, %v19031_v27  ;;  %19103 = vst [vmem:[#allocation24_spill] sm:$0xff] %v13242_v31  ;;  %v13292_v52 = vpack.c.bf16 %v550_v47, %v549_v46 }
  0x9a   : > { %19104 = vst [vmem:[#allocation25_spill] sm:$0xff] %v13245_v32  ;;  %19105 = vst [vmem:[#allocation26_spill] sm:$0xff] %v13248_v33  ;;  %v551_v53 = vld [vmem:[#allocation2 + $0x30] sm:$0xff]  ;;  %v552_v54 = vld [vmem:[#allocation2 + $0x38] sm:$0xff] }
  0x9b   : > { %529 = vst.msk [vmem:[#allocation2 + $0xc1] sm:$0xff] %vm458_vm0, %v19034_v29  ;;  %530 = vst.msk [vmem:[#allocation2 + $0xc9] sm:$0xff] %vm458_vm0, %v19032_v30  ;;  %v13308_v58 = vpack.c.bf16 %v552_v54, %v551_v53  ;;  %10961 = vmatmul.mubr.msk.bf16.vlgmr.msra.gmra.mrb[0].mxu0 %vm458_vm0, %v13292_v52  ;;  %v553_v59 = vld [vmem:[#allocation2 + $0x48] sm:$0xff]  ;;  %v554_v60 = vld [vmem:[#allocation2 + $0x50] sm:$0xff] }
  0x9c   : > { %19106 = vst [vmem:[#allocation27_spill] sm:$0xff] %v13261_v38  ;;  %19107 = vst [vmem:[#allocation28_spill] sm:$0xff] %v13264_v39  ;;  %10993 = vmatpush3.bf16.msra.mxu0 %v13153_v6  ;;  %v555_v61 = vld [vmem:[#allocation2 + $0x60] sm:$0xff]  ;;  %v556_v62 = vld [vmem:[#allocation2 + $0x68] sm:$0xff]  ;;  %v13333_v0 = vpack.c.bf16 %v554_v60, %v553_v59 }
  0x9d   : > { %19108 = vst [vmem:[#allocation29_spill] sm:$0xff] %v13267_v40  ;;  %19109 = vst [vmem:[#allocation30_spill] sm:$0xff] %v13274_v45  ;;  %10964 = vmatprep.mubr.msk.bf16.mxu0 %vm458_vm0, %v13308_v58  ;;  %10994 = vmatprep.subr.bf16.mxu0 %v11945_v55  ;;  %v13335_v3 = vpack.c.bf16 %v556_v62, %v555_v61  ;;  %v557_v4 = vld [vmem:[#allocation2 + $0x78] sm:$0xff]  ;;  %v1094_v59 = vld [vmem:[#allocation2 + $0x2] sm:$0xff] }
  0x9e   : > { %531 = vst.msk [vmem:[#allocation2 + $0xd9] sm:$0xff] %vm458_vm0, %v19029_v34  ;;  %532 = vst.msk [vmem:[#allocation2 + $0xe1] sm:$0xff] %vm458_vm0, %v19027_v35  ;;  %v558_v5 = vld [vmem:[#allocation2 + $0x80] sm:$0xff]  ;;  %v559_v6 = vld [vmem:[#allocation2 + $0x90] sm:$0xff] }
  0x9f   : > { %533 = vst.msk [vmem:[#allocation2 + $0xf1] sm:$0xff] %vm458_vm0, %v19030_v36  ;;  %534 = vst.msk [vmem:[#allocation2 + $0xf9] sm:$0xff] %vm458_vm0, %v19028_v37  ;;  %v560_v46 = vld [vmem:[#allocation2 + $0x98] sm:$0xff]  ;;  %v13341_v47 = vpack.c.bf16 %v558_v5, %v557_v4  ;;  %v561_v54 = vld [vmem:[#allocation2 + $0xa8] sm:$0xff] }
  0xa0   : > { %535 = vst.msk [vmem:[#allocation2 + $0x109] sm:$0xff] %vm458_vm0, %v19025_v41  ;;  %536 = vst.msk [vmem:[#allocation2 + $0x111] sm:$0xff] %vm458_vm0, %v19023_v42  ;;  %10995 = vmatpush3.bf16.msra.mxu0 %v11945_v55  ;;  %v13343_v53 = vpack.c.bf16 %v560_v46, %v559_v6  ;;  %v562_v55 = vld [vmem:[#allocation2 + $0xb0] sm:$0xff]  ;;  %v13350_v61 = vld [vmem:[%s12921_s13 + $0x78] sm:$0xff]   ;;  %s18767_s13 = scalar_lea.vmem [#allocation9], %s10140_s24 }
  0xa1   : > { %537 = vst.msk [vmem:[#allocation2 + $0x121] sm:$0xff] %vm458_vm0, %v19026_v43  ;;  %538 = vst.msk [vmem:[#allocation2 + $0x129] sm:$0xff] %vm458_vm0, %v19024_v44  ;;  %11028 = vmatprep.subr.bf16.mxu0 %v11946_v63  ;;  %v1095_v60 = vld [vmem:[#allocation2 + $0xa] sm:$0xff]  ;;  %v19019_v62 = vunpack.c.l.bf16 %v13350_v61  ;;  %v13354_v4 = vpack.c.bf16 %v562_v55, %v561_v54  ;;  %v1096_v6 = vld [vmem:[#allocation2 + $0x1a] sm:$0xff]  ;;  %s10047_s21 = sshll.u32 %s18767_s13, 4  ;;  %s18946_s21 = int_to_ptr.vmem [resolvable:$true] %s10047_s21 }
  0xa2   : > { %539 = vst.msk [vmem:[#allocation2 + $0x139] sm:$0xff] %vm458_vm0, %v19021_v48  ;;  %540 = vst.msk [vmem:[#allocation2 + $0x141] sm:$0xff] %vm458_vm0, %v19017_v49  ;;  %v1126_v5 = vpack.c.bf16 %v1095_v60, %v1094_v59  ;;  %v1097_v46 = vld [vmem:[#allocation2 + $0x22] sm:$0xff]  ;;  %v1099_v49 = vld [vmem:[#allocation2 + $0x3a] sm:$0xff]  ;;  %s12637_s27 = scalar_lea.vmem %s18946_s21, 4096  ;;  %p12644_p10 = scmp.lt.s32.totalorder %s18946_s21, %s12642_s20 }
  0xa3   : > { %541 = vst.msk [vmem:[#allocation2 + $0x151] sm:$0xff] %vm458_vm0, %v19022_v50  ;;  %542 = vst.msk [vmem:[#allocation2 + $0x159] sm:$0xff] %vm458_vm0, %v19020_v51  ;;  %10965 = vmatmul.mubr.msk.bf16.gmra.mrb[4].mxu0 %vm458_vm0, %v13333_v0  ;;  %v13365_v54 = vpack.c.bf16 %v1097_v46, %v1096_v6  ;;  %v11947_v55 = vld [vmem:[#allocation7 + $0x38] sm:$0xff]   ;;  %v1100_v60 = vld [vmem:[#allocation2 + $0x4a] sm:$0xff]  ;;  %p12638_p4 = scmp.ne.s32.totalorder %s18946_s21, %s12637_s27  ;;  %p12645_p13 = scmp.lt.s32.totalorder %s12643_s22, %s12637_s27 }
  0xa4   : > { %543 = vst.msk [vmem:[#allocation2 + $0x169] sm:$0xff] %vm458_vm0, %v19016_v56  ;;  %544 = vst.msk [vmem:[#allocation2 + $0x171] sm:$0xff] %vm458_vm0, %v19015_v57  ;;  %10968 = vmatprep.mubr.msk.bf16.mxu0 %vm458_vm0, %v13335_v3  ;;  %v19018_v57 = vunpack.c.h.bf16 %v13350_v61  ;;  %v1098_v56 = vld [vmem:[#allocation2 + $0x32] sm:$0xff]  ;;  %v1103_v51 = vld [vmem:[#allocation2 + $0x6a] sm:$0xff] }
  0xa5   : > { %19110 = vst [vmem:[#allocation31_spill] sm:$0xff] %v13350_v61  ;;  %545 = vst.msk [vmem:[#allocation2 + $0x181] sm:$0xff] %vm458_vm0, %v19019_v62  ;;  %v13367_v59 = vpack.c.bf16 %v1099_v49, %v1098_v56  ;;  %v1102_v62 = vld [vmem:[#allocation2 + $0x62] sm:$0xff]  ;;  %v1104_v49 = vld [vmem:[#allocation2 + $0x7a] sm:$0xff]  ;;  %p12639_p6 = pnand %p12638_p4, %p12866_p12  ;;  %p12646_p3 = por %p12645_p13, %p12644_p10 }
  0xa6   : > { %546 = vst.msk [vmem:[#allocation2 + $0x189] sm:$0xff] %vm458_vm0, %v19018_v57  ;;  %v1101_v57 = vld [vmem:[#allocation2 + $0x52] sm:$0xff]  ;;  %v13375_v6 = vpack.c.bf16 %v1103_v51, %v1102_v62  ;;  %v1105_v56 = vld [vmem:[#allocation2 + $0x82] sm:$0xff]  ;;  %v1107_v46 = vld [vmem:[#allocation2 + $0x9a] sm:$0xff] }
  0xa7   : > { %v13373_v48 = vpack.c.bf16 %v1101_v57, %v1100_v60  ;;  %v13381_v50 = vpack.c.bf16 %v1105_v56, %v1104_v49  ;;  %v1108_v51 = vld [vmem:[#allocation2 + $0xaa] sm:$0xff]  ;;  %v1109_v57 = vld [vmem:[#allocation2 + $0xb2] sm:$0xff]  ;;  %v1110_v62 = vld [vmem:[#allocation2 + $0xc2] sm:$0xff]  ;;  %p12640_p8 = pneg %p12639_p6 }
  0xa8   : > { %v13389_v60 = vpack.c.bf16 %v1109_v57, %v1108_v51  ;;  %v1112_v49 = vld [vmem:[#allocation2 + $0xda] sm:$0xff]  ;;  %v1113_v56 = vld [vmem:[#allocation2 + $0xe2] sm:$0xff]  ;;  %v1116_v51 = vld [vmem:[#allocation2 + $0x10a] sm:$0xff] }
  0xa9   : > { %v13397_v41 = vpack.c.bf16 %v1113_v56, %v1112_v49  ;;  %v1117_v57 = vld [vmem:[#allocation2 + $0x112] sm:$0xff]  ;;  %v1120_v49 = vld [vmem:[#allocation2 + $0x13a] sm:$0xff]  ;;  %v1121_v56 = vld [vmem:[#allocation2 + $0x142] sm:$0xff]  ;;  %p12647_p7 = pnand %p12646_p3, %p12640_p8 }
  0xaa   : > { %v13405_v35 = vpack.c.bf16 %v1117_v57, %v1116_v51  ;;  %v13413_v34 = vpack.c.bf16 %v1121_v56, %v1120_v49  ;;  %v11950_v49 = vld [vmem:[#allocation7 + $0x50] sm:$0xff]   ;;  %v1416_v56 = vld [vmem:[#allocation2 + $0xd8] sm:$0xff]  ;;  %v1420_v27 = vld [vmem:[#allocation2 + $0x108] sm:$0xff] }
  0xab   : > { %10969 = vmatmul.mubr.msk.bf16.gmra.mrb[8].mxu0 %vm458_vm0, %v13341_v47  ;;  %v1124_v51 = vld [vmem:[#allocation2 + $0x16a] sm:$0xff]  ;;  %v1125_v57 = vld [vmem:[#allocation2 + $0x172] sm:$0xff] }
  0xac   : > { %10972 = vmatprep.mubr.msk.bf16.mxu0 %vm458_vm0, %v13343_v53  ;;  %v1421_v30 = vld [vmem:[#allocation2 + $0x110] sm:$0xff] }
  0xad   : > { %v13449_v29 = vpack.c.bf16 %v1421_v30, %v1420_v27  ;;  %v1426_v27 = vld [vmem:[#allocation2 + $0x150] sm:$0xff]  ;;  %v1427_v30 = vld [vmem:[#allocation2 + $0x158] sm:$0xff] }
  0xae   : > { %v13463_v22 = vpack.c.bf16 %v1427_v30, %v1426_v27  ;;  %v1708_v27 = vld [vmem:[#allocation2 + $0x31] sm:$0xff]  ;;  %v1709_v30 = vld [vmem:[#allocation2 + $0x39] sm:$0xff] }
  0xaf   : > { %v13479_v15 = vpack.c.bf16 %v1709_v30, %v1708_v27  ;;  %v1717_v30 = vld [vmem:[#allocation2 + $0x99] sm:$0xff] }
  0xb3   : > { %10973 = vmatmul.mubr.msk.bf16.gmra.mrb[12].mxu0 %vm458_vm0, %v13354_v4 }
  0xb4   : > { %10996 = vmatprep.mubr.msk.bf16.mxu0 %vm458_vm0, %v1126_v5  ;;  %v11948_v5 = vld [vmem:[#allocation7 + $0x40] sm:$0xff]  }
  0xbb   : > { %10997 = vmatmul.mubr.msk.bf16.vlgmr.msra.gmra.mrb[0].mxu0 %vm458_vm0, %v13365_v54 }
  0xbc   : > { %11029 = vmatpush3.bf16.msra.mxu0 %v11946_v63  ;;  %11000 = vmatprep.mubr.msk.bf16.mxu0 %vm458_vm0, %v13367_v59  ;;  %v1106_v63 = vld [vmem:[#allocation2 + $0x92] sm:$0xff] }
  0xbd   : > { %11030 = vmatprep.subr.bf16.mxu0 %v11947_v55  ;;  %v13383_v42 = vpack.c.bf16 %v1107_v46, %v1106_v63  ;;  %v1114_v63 = vld [vmem:[#allocation2 + $0xf2] sm:$0xff]  ;;  %v1115_v46 = vld [vmem:[#allocation2 + $0xfa] sm:$0xff] }
  0xbe   : > { %v13399_v43 = vpack.c.bf16 %v1115_v46, %v1114_v63  ;;  %v1122_v63 = vld [vmem:[#allocation2 + $0x152] sm:$0xff]  ;;  %v1123_v46 = vld [vmem:[#allocation2 + $0x15a] sm:$0xff] }
  0xbf   : > { %v13415_v36 = vpack.c.bf16 %v1123_v46, %v1122_v63  ;;  %v1417_v63 = vld [vmem:[#allocation2 + $0xe0] sm:$0xff] }
  0xc0   : > { %11031 = vmatpush3.bf16.msra.mxu0 %v11947_v55  ;;  %v1111_v55 = vld [vmem:[#allocation2 + $0xca] sm:$0xff] }
  0xc1   : > { %11064 = vmatprep.subr.bf16.mxu0 %v11948_v5  ;;  %v13391_v44 = vpack.c.bf16 %v1111_v55, %v1110_v62  ;;  %v1118_v62 = vld [vmem:[#allocation2 + $0x122] sm:$0xff]  ;;  %v1119_v55 = vld [vmem:[#allocation2 + $0x12a] sm:$0xff] }
  0xc2   : > { %v13407_v37 = vpack.c.bf16 %v1119_v55, %v1118_v62  ;;  %v13421_v62 = vpack.c.bf16 %v1125_v57, %v1124_v51  ;;  %v11949_v55 = vld [vmem:[#allocation7 + $0x48] sm:$0xff]   ;;  %v13441_v51 = vpack.c.bf16 %v1417_v63, %v1416_v56  ;;  %v1418_v57 = vld [vmem:[#allocation2 + $0xf0] sm:$0xff]  ;;  %v1424_v56 = vld [vmem:[#allocation2 + $0x138] sm:$0xff] }
  0xc3   : > { %11001 = vmatmul.mubr.msk.bf16.gmra.mrb[4].mxu0 %vm458_vm0, %v13373_v48  ;;  %v1425_v63 = vld [vmem:[#allocation2 + $0x140] sm:$0xff] }
  0xc4   : > { %11004 = vmatprep.mubr.msk.bf16.mxu0 %vm458_vm0, %v13375_v6  ;;  %v13457_v25 = vpack.c.bf16 %v1425_v63, %v1424_v56  ;;  %v1706_v56 = vld [vmem:[#allocation2 + $0x19] sm:$0xff]  ;;  %v1707_v63 = vld [vmem:[#allocation2 + $0x21] sm:$0xff] }
  0xc5   : > { %v13473_v18 = vpack.c.bf16 %v1707_v63, %v1706_v56  ;;  %v1714_v56 = vld [vmem:[#allocation2 + $0x79] sm:$0xff]  ;;  %v1715_v63 = vld [vmem:[#allocation2 + $0x81] sm:$0xff] }
  0xc6   : > { %v13491_v27 = vpack.c.bf16 %v1715_v63, %v1714_v56  ;;  %v1723_v56 = vld [vmem:[#allocation2 + $0xe1] sm:$0xff] }
  0xcb   : > { %11005 = vmatmul.mubr.msk.bf16.gmra.mrb[8].mxu0 %vm458_vm0, %v13381_v50 }
  0xcc   : > { %11008 = vmatprep.mubr.msk.bf16.mxu0 %vm458_vm0, %v13383_v42 }
  0xd3   : > { %11009 = vmatmul.mubr.msk.bf16.gmra.mrb[12].mxu0 %vm458_vm0, %v13389_v60 }
  0xd4   : > { %11012 = vmatprep.mubr.msk.bf16.mxu0 %vm458_vm0, %v13391_v44 }
  0xdb   : > { %11013 = vmatmul.mubr.msk.bf16.gmra.mrb[16].mxu0 %vm458_vm0, %v13397_v41 }
  0xdc   : > { %11016 = vmatprep.mubr.msk.bf16.mxu0 %vm458_vm0, %v13399_v43 }
  0xe3   : > { %11017 = vmatmul.mubr.msk.bf16.gmra.mrb[20].mxu0 %vm458_vm0, %v13405_v35 }
  0xe4   : > { %11020 = vmatprep.mubr.msk.bf16.mxu0 %vm458_vm0, %v13407_v37 }
  0xeb   : > { %11021 = vmatmul.mubr.msk.bf16.gmra.mrb[24].mxu0 %vm458_vm0, %v13413_v34 }
  0xec   : > { %11024 = vmatprep.mubr.msk.bf16.mxu0 %vm458_vm0, %v13415_v36 }
  0xf3   : > { %11025 = vmatmul.mubr.msk.bf16.gmra.mrb[28].mxu0 %vm458_vm0, %v13421_v62 }
  0xf4   : > { %11032 = vmatprep.mubr.msk.bf16.mxu0 %vm458_vm0, %v13292_v52  ;;  %v1414_v52 = vld [vmem:[#allocation2 + $0xc0] sm:$0xff] }
  0xfb   : > { %11033 = vmatmul.mubr.msk.bf16.vlgmr.msra.gmra.mrb[0].mxu0 %vm458_vm0, %v13308_v58 }
  0xfc   : > { %11065 = vmatpush3.bf16.msra.mxu0 %v11948_v5  ;;  %11036 = vmatprep.mubr.msk.bf16.mxu0 %vm458_vm0, %v13333_v0  ;;  %v1415_v5 = vld [vmem:[#allocation2 + $0xc8] sm:$0xff] }
  0xfd   : > { %11066 = vmatprep.subr.bf16.mxu0 %v11949_v55  ;;  %v13439_v46 = vpack.c.bf16 %v1415_v5, %v1414_v52  ;;  %v1422_v52 = vld [vmem:[#allocation2 + $0x120] sm:$0xff]  ;;  %v1423_v5 = vld [vmem:[#allocation2 + $0x128] sm:$0xff] }
  0xfe   : > { %v13455_v23 = vpack.c.bf16 %v1423_v5, %v1422_v52  ;;  %v1430_v52 = vld [vmem:[#allocation2 + $0x180] sm:$0xff]  ;;  %v1431_v5 = vld [vmem:[#allocation2 + $0x188] sm:$0xff] }
  0xff   : > { %v13471_v16 = vpack.c.bf16 %v1431_v5, %v1430_v52  ;;  %v1712_v52 = vld [vmem:[#allocation2 + $0x61] sm:$0xff]  ;;  %v1713_v5 = vld [vmem:[#allocation2 + $0x69] sm:$0xff] }
 0x100   : > { %11067 = vmatpush3.bf16.msra.mxu0 %v11949_v55  ;;  %v1419_v55 = vld [vmem:[#allocation2 + $0xf8] sm:$0xff]  ;;  %v13489_v8 = vpack.c.bf16 %v1713_v5, %v1712_v52  ;;  %v1721_v52 = vld [vmem:[#allocation2 + $0xc9] sm:$0xff] }
 0x101   : > { %11100 = vmatprep.subr.bf16.mxu0 %v11950_v49  ;;  %v13447_v26 = vpack.c.bf16 %v1419_v55, %v1418_v57  ;;  %v1428_v57 = vld [vmem:[#allocation2 + $0x168] sm:$0xff]  ;;  %v1429_v55 = vld [vmem:[#allocation2 + $0x170] sm:$0xff]  ;;  %v1722_v5 = vld [vmem:[#allocation2 + $0xd9] sm:$0xff] }
 0x102   : > { %v13465_v24 = vpack.c.bf16 %v1429_v55, %v1428_v57  ;;  %v1710_v57 = vld [vmem:[#allocation2 + $0x49] sm:$0xff]  ;;  %v1711_v55 = vld [vmem:[#allocation2 + $0x51] sm:$0xff]  ;;  %v13508_v61 = vpack.c.bf16 %v1723_v56, %v1722_v5  ;;  %v1730_v5 = vld [vmem:[#allocation2 + $0x139] sm:$0xff] }
 0x103   : > { %11037 = vmatmul.mubr.msk.bf16.gmra.mrb[4].mxu0 %vm458_vm0, %v13335_v3  ;;  %v13481_v17 = vpack.c.bf16 %v1711_v55, %v1710_v57  ;;  %v1718_v57 = vld [vmem:[#allocation2 + $0xa9] sm:$0xff]  ;;  %v1719_v55 = vld [vmem:[#allocation2 + $0xb1] sm:$0xff]  ;;  %v1731_v56 = vld [vmem:[#allocation2 + $0x141] sm:$0xff] }
 0x104   : > { %11040 = vmatprep.mubr.msk.bf16.mxu0 %vm458_vm0, %v13341_v47  ;;  %v13500_v45 = vpack.c.bf16 %v1719_v55, %v1718_v57  ;;  %v1726_v57 = vld [vmem:[#allocation2 + $0x109] sm:$0xff]  ;;  %v1727_v55 = vld [vmem:[#allocation2 + $0x111] sm:$0xff]  ;;  %v13524_v38 = vpack.c.bf16 %v1731_v56, %v1730_v5 }
 0x105   : > { %v13516_v40 = vpack.c.bf16 %v1727_v55, %v1726_v57  ;;  %v1734_v57 = vld [vmem:[#allocation2 + $0x169] sm:$0xff]  ;;  %v1735_v55 = vld [vmem:[#allocation2 + $0x171] sm:$0xff] }
 0x106   : > { %v13532_v32 = vpack.c.bf16 %v1735_v55, %v1734_v57  ;;  %v1737_v5 = vld [vmem:[#allocation2 + $0x189] sm:$0xff] }
 0x107   : > { %v11953_v55 = vld [vmem:[#allocation7 + $0x68] sm:$0xff]  }
 0x10b   : > { %11041 = vmatmul.mubr.msk.bf16.gmra.mrb[8].mxu0 %vm458_vm0, %v13343_v53 }
 0x10c   : > { %11044 = vmatprep.mubr.msk.bf16.mxu0 %vm458_vm0, %v13354_v4 }
 0x113   : > { %11045 = vmatmul.mubr.msk.bf16.gmra.mrb[12].mxu0 %vm458_vm0, %v13439_v46 }
 0x114   : > { %11048 = vmatprep.mubr.msk.bf16.mxu0 %vm458_vm0, %v13441_v51 }
 0x11b   : > { %11049 = vmatmul.mubr.msk.bf16.gmra.mrb[16].mxu0 %vm458_vm0, %v13447_v26 }
 0x11c   : > { %11052 = vmatprep.mubr.msk.bf16.mxu0 %vm458_vm0, %v13449_v29 }
 0x123   : > { %11053 = vmatmul.mubr.msk.bf16.gmra.mrb[20].mxu0 %vm458_vm0, %v13455_v23 }
 0x124   : > { %11056 = vmatprep.mubr.msk.bf16.mxu0 %vm458_vm0, %v13457_v25 }
 0x12b   : > { %11057 = vmatmul.mubr.msk.bf16.gmra.mrb[24].mxu0 %vm458_vm0, %v13463_v22 }
 0x12c   : > { %11060 = vmatprep.mubr.msk.bf16.mxu0 %vm458_vm0, %v13465_v24 }
 0x133   : > { %11061 = vmatmul.mubr.msk.bf16.gmra.mrb[28].mxu0 %vm458_vm0, %v13471_v16 }
 0x134   : > { %11068 = vmatprep.mubr.msk.bf16.mxu0 %vm458_vm0, %v13473_v18 }
 0x13b   : > { %11069 = vmatmul.mubr.msk.bf16.vlgmr.msra.gmra.mrb[0].mxu0 %vm458_vm0, %v13479_v15 }
 0x13c   : > { %11101 = vmatpush3.bf16.msra.mxu0 %v11950_v49  ;;  %11072 = vmatprep.mubr.msk.bf16.mxu0 %vm458_vm0, %v13481_v17  ;;  %v1716_v49 = vld [vmem:[#allocation2 + $0x91] sm:$0xff] }
 0x13d   : > { %11102 = vmatprep.subr.bf16.mxu0 %v11951_v9  ;;  %v13498_v13 = vpack.c.bf16 %v1717_v30, %v1716_v49  ;;  %v1724_v49 = vld [vmem:[#allocation2 + $0xf1] sm:$0xff]  ;;  %v1725_v30 = vld [vmem:[#allocation2 + $0xf9] sm:$0xff] }
 0x13e   : > { %v13514_v39 = vpack.c.bf16 %v1725_v30, %v1724_v49  ;;  %v1732_v49 = vld [vmem:[#allocation2 + $0x151] sm:$0xff]  ;;  %v1733_v30 = vld [vmem:[#allocation2 + $0x159] sm:$0xff] }
 0x13f   : > { %v13530_v31 = vpack.c.bf16 %v1733_v30, %v1732_v49  ;;  %v599_v49 = vld [vmem:[#allocation2 + $0x1] sm:$0xff]  ;;  %v600_v30 = vld [vmem:[#allocation2 + $0x9] sm:$0xff] }
 0x140   : > { %11103 = vmatpush3.bf16.msra.mxu0 %v11951_v9  ;;  %v1720_v9 = vld [vmem:[#allocation2 + $0xc1] sm:$0xff]  ;;  %v631_v57 = vpack.c.bf16 %v600_v30, %v599_v49 }
 0x141   : > { %11136 = vmatprep.subr.bf16.mxu0 %v13487_v14  ;;  %v13506_v63 = vpack.c.bf16 %v1721_v52, %v1720_v9  ;;  %v1728_v9 = vld [vmem:[#allocation2 + $0x121] sm:$0xff]  ;;  %v1729_v52 = vld [vmem:[#allocation2 + $0x129] sm:$0xff] }
 0x142   : > { %v13522_v33 = vpack.c.bf16 %v1729_v52, %v1728_v9  ;;  %v11956_v9 = vld [vmem:[#allocation7 + $0x10] sm:$0xff]   ;;  %v1736_v52 = vld [vmem:[#allocation2 + $0x181] sm:$0xff]  ;;  %10924 = vmatprep.mubr.msk.bf16.mxu1 %vm458_vm0, %v631_v57 }
 0x143   : > { %11073 = vmatmul.mubr.msk.bf16.gmra.mrb[4].mxu0 %vm458_vm0, %v13489_v8  ;;  %10920 = vmatprep.subr.bf16.mxu1 %v11956_v9  ;;  %v13538_v56 = vpack.c.bf16 %v1737_v5, %v1736_v52  ;;  %v2953_v57 = vld [vmem:[#allocation2 + $0x13a] sm:$0xff] }
 0x144   : > { %11076 = vmatprep.mubr.msk.bf16.mxu0 %vm458_vm0, %v13491_v27  ;;  %10921 = vmatpush3.bf16.msra.mxu1 %v11956_v9  ;;  %v2952_v9 = vld [vmem:[#allocation2 + $0x12a] sm:$0xff] }
 0x145   : > { %10922 = vmatprep.subr.bf16.mxu1 %v11957_v21 }
 0x148   : > { %10923 = vmatpush3.bf16.msra.mxu1 %v11957_v21  ;;  %v11954_v21 = vld [vmem:[#allocation7 + $0x70] sm:$0xff]  }
 0x149   : > { %11460 = vmatprep.subr.bf16.mxu1 %v13147_v1 }
 0x14b   : > { %11077 = vmatmul.mubr.msk.bf16.gmra.mrb[8].mxu0 %vm458_vm0, %v13498_v13  ;;  %10925 = vmatmul.mubr.msk.bf16.vlgmr.msra.gmra.mrb[0].mxu1 %vm458_vm0, %v13473_v18  ;;  %v11955_v18 = vld [vmem:[#allocation7 + $0x78] sm:$0xff]  }
 0x14c   : > { %11080 = vmatprep.mubr.msk.bf16.mxu0 %vm458_vm0, %v13500_v45  ;;  %10928 = vmatprep.mubr.msk.bf16.mxu1 %vm458_vm0, %v13479_v15 }
 0x14d   : > { %11462 = vmatpush3.bf16.msra.mxu1 %v13147_v1  ;;  %v2042_v1 = vld [vmem:[#allocation2 + $0x182] sm:$0xff] }
 0x14e   : > { %11461 = vmatprep.subr.bf16.mxu1 %v13149_v2 }
 0x151   : > { %11463 = vmatpush3.bf16.msra.mxu1 %v13149_v2  ;;  %v2043_v2 = vld [vmem:[#allocation2 + $0x18a] sm:$0xff] }
 0x153   : > { %11081 = vmatmul.mubr.msk.bf16.gmra.mrb[12].mxu0 %vm458_vm0, %v13506_v63  ;;  %10929 = vmatmul.mubr.msk.bf16.gmra.mrb[4].mxu1 %vm458_vm0, %v13481_v17 }
 0x154   : > { %11084 = vmatprep.mubr.msk.bf16.mxu0 %vm458_vm0, %v13508_v61  ;;  %10932 = vmatprep.mubr.msk.bf16.mxu1 %vm458_vm0, %v13489_v8 }
 0x15b   : > { %11085 = vmatmul.mubr.msk.bf16.gmra.mrb[16].mxu0 %vm458_vm0, %v13514_v39  ;;  %10933 = vmatmul.mubr.msk.bf16.gmra.mrb[8].mxu1 %vm458_vm0, %v13491_v27 }
 0x15c   : > { %11088 = vmatprep.mubr.msk.bf16.mxu0 %vm458_vm0, %v13516_v40  ;;  %10936 = vmatprep.mubr.msk.bf16.mxu1 %vm458_vm0, %v13498_v13 }
 0x163   : > { %11089 = vmatmul.mubr.msk.bf16.gmra.mrb[20].mxu0 %vm458_vm0, %v13522_v33  ;;  %10937 = vmatmul.mubr.msk.bf16.gmra.mrb[12].mxu1 %vm458_vm0, %v13500_v45 }
 0x164   : > { %11092 = vmatprep.mubr.msk.bf16.mxu0 %vm458_vm0, %v13524_v38  ;;  %10940 = vmatprep.mubr.msk.bf16.mxu1 %vm458_vm0, %v13506_v63 }
 0x16b   : > { %11093 = vmatmul.mubr.msk.bf16.gmra.mrb[24].mxu0 %vm458_vm0, %v13530_v31  ;;  %10941 = vmatmul.mubr.msk.bf16.gmra.mrb[16].mxu1 %vm458_vm0, %v13508_v61 }
 0x16c   : > { %11096 = vmatprep.mubr.msk.bf16.mxu0 %vm458_vm0, %v13532_v32  ;;  %10944 = vmatprep.mubr.msk.bf16.mxu1 %vm458_vm0, %v13514_v39 }
 0x173   : > { %11097 = vmatmul.mubr.msk.bf16.gmra.mrb[28].mxu0 %vm458_vm0, %v13538_v56  ;;  %10945 = vmatmul.mubr.msk.bf16.gmra.mrb[20].mxu1 %vm458_vm0, %v13516_v40 }
 0x174   : > { %11104 = vmatprep.mubr.msk.bf16.mxu0 %vm458_vm0, %v13365_v54  ;;  %10948 = vmatprep.mubr.msk.bf16.mxu1 %vm458_vm0, %v13522_v33 }
 0x17b   : > { %11105 = vmatmul.mubr.msk.bf16.vlgmr.msra.gmra.mrb[0].mxu0 %vm458_vm0, %v13367_v59  ;;  %10949 = vmatmul.mubr.msk.bf16.gmra.mrb[24].mxu1 %vm458_vm0, %v13524_v38 }
 0x17c   : > { %11137 = vmatpush3.bf16.msra.mxu0 %v13487_v14  ;;  %11108 = vmatprep.mubr.msk.bf16.mxu0 %vm458_vm0, %v13373_v48  ;;  %v13606_v14 = vpack.c.bf16 %v2043_v2, %v2042_v1  ;;  %v2944_v48 = vld [vmem:[#allocation2 + $0xca] sm:$0xff]  ;;  %v2955_v1 = vld [vmem:[#allocation2 + $0x152] sm:$0xff]  ;;  %v2956_v2 = vld [vmem:[#allocation2 + $0x15a] sm:$0xff] }
 0x17d   : > { %11138 = vmatprep.subr.bf16.mxu0 %v11953_v55  ;;  %10952 = vmatprep.mubr.msk.bf16.mxu1 %vm458_vm0, %v13530_v31 }
 0x180   : > { %11139 = vmatpush3.bf16.msra.mxu0 %v11953_v55  ;;  %v2954_v55 = vld [vmem:[#allocation2 + $0x142] sm:$0xff] }
 0x181   : > { %11172 = vmatprep.subr.bf16.mxu0 %v11954_v21 }
 0x183   : > { %11109 = vmatmul.mubr.msk.bf16.gmra.mrb[4].mxu0 %vm458_vm0, %v13375_v6  ;;  %10953 = vmatmul.mubr.msk.bf16.gmra.mrb[28].mxu1 %vm458_vm0, %v13532_v32 }
 0x184   : > { %11112 = vmatprep.mubr.msk.bf16.mxu0 %vm458_vm0, %v13381_v50  ;;  %10976 = vmatprep.mubr.msk.bf16.mxu1 %vm458_vm0, %v13439_v46 }
 0x18b   : > { %11113 = vmatmul.mubr.msk.bf16.gmra.mrb[8].mxu0 %vm458_vm0, %v13383_v42  ;;  %10977 = vmatmul.mubr.msk.bf16.vlgmr.msra.gmra.mrb[16].mxu1 %vm458_vm0, %v13441_v51 }
 0x18c   : > { %11116 = vmatprep.mubr.msk.bf16.mxu0 %vm458_vm0, %v13389_v60  ;;  %10980 = vmatprep.mubr.msk.bf16.mxu1 %vm458_vm0, %v13447_v26 }
 0x193   : > { %11117 = vmatmul.mubr.msk.bf16.gmra.mrb[12].mxu0 %vm458_vm0, %v13391_v44  ;;  %10981 = vmatmul.mubr.msk.bf16.gmra.mrb[20].mxu1 %vm458_vm0, %v13449_v29  ;;  %v2942_v44 = vld [vmem:[#allocation2 + $0xb2] sm:$0xff] }
 0x194   : > { %11120 = vmatprep.mubr.msk.bf16.mxu0 %vm458_vm0, %v13397_v41  ;;  %10984 = vmatprep.mubr.msk.bf16.mxu1 %vm458_vm0, %v13455_v23 }
 0x19b   : > { %11121 = vmatmul.mubr.msk.bf16.gmra.mrb[16].mxu0 %vm458_vm0, %v13399_v43  ;;  %10985 = vmatmul.mubr.msk.bf16.gmra.mrb[24].mxu1 %vm458_vm0, %v13457_v25  ;;  %v2941_v43 = vld [vmem:[#allocation2 + $0xaa] sm:$0xff] }
 0x19c   : > { %11124 = vmatprep.mubr.msk.bf16.mxu0 %vm458_vm0, %v13405_v35  ;;  %10988 = vmatprep.mubr.msk.bf16.mxu1 %vm458_vm0, %v13463_v22  ;;  %v2349_v35 = vld [vmem:[#allocation2 + $0x198] sm:$0xff]  ;;  %v2968_v50 = vpack.c.bf16 %v2942_v44, %v2941_v43  ;;  %v11960_v44 = vld [vmem:[%s19003_s7 + $0x10] sm:$0xff]  }
 0x19d   : > { %11244 = vmatprep.subr.bf16.mxu1 %v11960_v44 }
 0x19e   : > { %11245 = vmatpush3.bf16.msra.mxu1 %v11960_v44  ;;  %v3641_v44 = vld [vmem:[#allocation3 + $0x2] sm:$0xff] }
 0x1a3   : > { %11125 = vmatmul.mubr.msk.bf16.gmra.mrb[20].mxu0 %vm458_vm0, %v13407_v37  ;;  %10989 = vmatmul.mubr.msk.bf16.gmra.mrb[28].mxu1 %vm458_vm0, %v13465_v24 }
 0x1a4   : > { %11128 = vmatprep.mubr.msk.bf16.mxu0 %vm458_vm0, %v13413_v34  ;;  %v11958_v34 = vld [vmem:[#allocation7 + $0x80] sm:$0xff]  }
 0x1ab   : > { %11129 = vmatmul.mubr.msk.bf16.gmra.mrb[24].mxu0 %vm458_vm0, %v13415_v36 }
 0x1ac   : > { %11132 = vmatprep.mubr.msk.bf16.mxu0 %vm458_vm0, %v13421_v62 }
 0x1b3   : > { %11133 = vmatmul.mubr.msk.bf16.gmra.mrb[28].mxu0 %vm458_vm0, %v13606_v14 }
 0x1b4   : > { %11140 = vmatprep.mubr.msk.bf16.mxu0 %vm458_vm0, %v13308_v58 }
 0x1bb   : > { %11141 = vmatmul.mubr.msk.bf16.vlgmr.msra.gmra.mrb[0].mxu0 %vm458_vm0, %v13333_v0 }
 0x1bc   : > { %11173 = vmatpush3.bf16.msra.mxu0 %v11954_v21  ;;  %11144 = vmatprep.mubr.msk.bf16.mxu0 %vm458_vm0, %v13335_v3  ;;  %v2945_v3 = vld [vmem:[#allocation2 + $0xda] sm:$0xff] }
 0x1bd   : > { %11174 = vmatprep.subr.bf16.mxu0 %v11955_v18 }
 0x1c0   : > { %11175 = vmatpush3.bf16.msra.mxu0 %v11955_v18 }
 0x1c1   : > { %11208 = vmatprep.subr.bf16.mxu0 %v11958_v34 }
 0x1c3   : > { %11145 = vmatmul.mubr.msk.bf16.gmra.mrb[4].mxu0 %vm458_vm0, %v13341_v47  ;;  %v2946_v47 = vld [vmem:[#allocation2 + $0xe2] sm:$0xff] }
 0x1c4   : > { %11148 = vmatprep.mubr.msk.bf16.mxu0 %vm458_vm0, %v13343_v53  ;;  %v2970_v6 = vpack.c.bf16 %v2946_v47, %v2945_v3  ;;  %v11961_v3 = vld [vmem:[%s19003_s7 + $0x18] sm:$0xff]   ;;  %v13780_v47 = vld [vmem:[%s19003_s7] sm:$0xff]  }
 0x1c5   : > { %11246 = vmatprep.subr.bf16.mxu1 %v11961_v3  ;;  %19116 = vst [vmem:[#allocation37_spill] sm:$0xff] %v13780_v47 }
 0x1c6   : > { %11247 = vmatpush3.bf16.msra.mxu1 %v11961_v3 }
 0x1c7   : > { %11280 = vmatprep.subr.bf16.mxu1 %v13780_v47 }
 0x1cb   : > { %11149 = vmatmul.mubr.msk.bf16.gmra.mrb[8].mxu0 %vm458_vm0, %v13354_v4  ;;  %v2948_v4 = vld [vmem:[#allocation2 + $0xfa] sm:$0xff] }
 0x1cc   : > { %11152 = vmatprep.mubr.msk.bf16.mxu0 %vm458_vm0, %v13439_v46  ;;  %v2949_v46 = vld [vmem:[#allocation2 + $0x10a] sm:$0xff] }
 0x1d3   : > { %11153 = vmatmul.mubr.msk.bf16.gmra.mrb[12].mxu0 %vm458_vm0, %v13441_v51  ;;  %v2950_v51 = vld [vmem:[#allocation2 + $0x112] sm:$0xff] }
 0x1d4   : > { %11156 = vmatprep.mubr.msk.bf16.mxu0 %vm458_vm0, %v13447_v26  ;;  %v2350_v26 = vld [vmem:[#allocation2 + $0x1a0] sm:$0xff] }
 0x1d5   : > { %v2366_v36 = vpack.c.bf16 %v2350_v26, %v2349_v35  ;;  %v2974_v35 = vpack.c.bf16 %v2954_v55, %v2953_v57  ;;  %v2975_v26 = vpack.c.bf16 %v2956_v2, %v2955_v1  ;;  %v3435_v2 = vld [vmem:[#allocation3 + $0x8] sm:$0xff] }
 0x1db   : > { %11157 = vmatmul.mubr.msk.bf16.gmra.mrb[16].mxu0 %vm458_vm0, %v13449_v29  ;;  %v2935_v29 = vld [vmem:[#allocation2 + $0x62] sm:$0xff] }
 0x1dc   : > { %11160 = vmatprep.mubr.msk.bf16.mxu0 %vm458_vm0, %v13455_v23  ;;  %v11959_v23 = vld [vmem:[#allocation7 + $0x88] sm:$0xff]  }
 0x1e3   : > { %11161 = vmatmul.mubr.msk.bf16.gmra.mrb[20].mxu0 %vm458_vm0, %v13457_v25  ;;  %v2934_v25 = vld [vmem:[#allocation2 + $0x52] sm:$0xff] }
 0x1e4   : > { %11164 = vmatprep.mubr.msk.bf16.mxu0 %vm458_vm0, %v13463_v22 }
 0x1eb   : > { %11165 = vmatmul.mubr.msk.bf16.gmra.mrb[24].mxu0 %vm458_vm0, %v13465_v24  ;;  %v2933_v24 = vld [vmem:[#allocation2 + $0x4a] sm:$0xff] }
 0x1ec   : > { %11168 = vmatprep.mubr.msk.bf16.mxu0 %vm458_vm0, %v13471_v16  ;;  %v2932_v16 = vld [vmem:[#allocation2 + $0x3a] sm:$0xff] }
 0x1f3   : > { %11169 = vmatmul.mubr.msk.bf16.gmra.mrb[28].mxu0 %vm458_vm0, %v2366_v36 }
 0x1f4   : > { %11176 = vmatprep.mubr.msk.bf16.mxu0 %vm458_vm0, %v13479_v15  ;;  %v2931_v15 = vld [vmem:[#allocation2 + $0x32] sm:$0xff] }
 0x1f5   : > { %v2963_v22 = vpack.c.bf16 %v2932_v16, %v2931_v15 }
 0x1fb   : > { %11177 = vmatmul.mubr.msk.bf16.vlgmr.msra.gmra.mrb[0].mxu0 %vm458_vm0, %v13481_v17 }
 0x1fc   : > { %11209 = vmatpush3.bf16.msra.mxu0 %v11958_v34  ;;  %11180 = vmatprep.mubr.msk.bf16.mxu0 %vm458_vm0, %v13489_v8  ;;  %v2655_v8 = vld [vmem:[#allocation2 + $0x199] sm:$0xff] }
 0x1fd   : > { %11210 = vmatprep.subr.bf16.mxu0 %v11959_v23 }
 0x200   : > { %11211 = vmatpush3.bf16.msra.mxu0 %v11959_v23  ;;  %v2957_v23 = vld [vmem:[#allocation2 + $0x16a] sm:$0xff] }
 0x203   : > { %11181 = vmatmul.mubr.msk.bf16.gmra.mrb[4].mxu0 %vm458_vm0, %v13491_v27 }
 0x204   : > { %11184 = vmatprep.mubr.msk.bf16.mxu0 %vm458_vm0, %v13498_v13  ;;  %v2656_v13 = vld [vmem:[#allocation2 + $0x1a1] sm:$0xff] }
 0x205   : > { %v2672_v17 = vpack.c.bf16 %v2656_v13, %v2655_v8  ;;  %v2958_v8 = vld [vmem:[#allocation2 + $0x172] sm:$0xff] }
 0x20b   : > { %11185 = vmatmul.mubr.msk.bf16.gmra.mrb[8].mxu0 %vm458_vm0, %v13500_v45  ;;  %v2943_v45 = vld [vmem:[#allocation2 + $0xc2] sm:$0xff] }
 0x20c   : > { %11188 = vmatprep.mubr.msk.bf16.mxu0 %vm458_vm0, %v13506_v63  ;;  %v2969_v58 = vpack.c.bf16 %v2944_v48, %v2943_v45  ;;  %v2951_v63 = vld [vmem:[#allocation2 + $0x122] sm:$0xff] }
 0x20d   : > { %v2973_v49 = vpack.c.bf16 %v2952_v9, %v2951_v63 }
 0x213   : > { %11189 = vmatmul.mubr.msk.bf16.gmra.mrb[12].mxu0 %vm458_vm0, %v13508_v61  ;;  %v2947_v61 = vld [vmem:[#allocation2 + $0xf2] sm:$0xff] }
 0x214   : > { %11192 = vmatprep.mubr.msk.bf16.mxu0 %vm458_vm0, %v13514_v39  ;;  %v2939_v39 = vld [vmem:[#allocation2 + $0x92] sm:$0xff]  ;;  %v2971_v60 = vpack.c.bf16 %v2948_v4, %v2947_v61  ;;  %v13786_v4 = vld [vmem:[%s18998_s2] ss:$0 sm:$0xff] }
 0x21b   : > { %11193 = vmatmul.mubr.msk.bf16.gmra.mrb[16].mxu0 %vm458_vm0, %v13516_v40  ;;  %v2940_v40 = vld [vmem:[#allocation2 + $0x9a] sm:$0xff] }
 0x21c   : > { %11196 = vmatprep.mubr.msk.bf16.mxu0 %vm458_vm0, %v13522_v33  ;;  %v2964_v33 = vpack.c.bf16 %v2934_v25, %v2933_v24  ;;  %v2967_v42 = vpack.c.bf16 %v2940_v40, %v2939_v39  ;;  %v2962_v24 = vld [vmem:[#allocation2 + $0x1a2] sm:$0xff] }
 0x21e   : > { %v13696_v0 = vpop.f32.mrb[0].mxu1 }
 0x21f   : > { %v13699_v53 = vpop.f32.mrb[1].mxu1 }
 0x220   : > { %v13701_v54 = vpop.f32.mrb[2].mxu1 }
 0x221   : > { %v13703_v59 = vpop.f32.mrb[3].mxu1 }
 0x223   : > { %11197 = vmatmul.mubr.msk.bf16.gmra.mrb[20].mxu0 %vm458_vm0, %v13524_v38  ;;  %v2938_v38 = vld [vmem:[#allocation2 + $0x82] sm:$0xff] }
 0x224   : > { %11200 = vmatprep.mubr.msk.bf16.mxu0 %vm458_vm0, %v13530_v31  ;;  %v2936_v31 = vld [vmem:[#allocation2 + $0x6a] sm:$0xff] }
 0x225   : > { %v2965_v37 = vpack.c.bf16 %v2936_v31, %v2935_v29 }
 0x226   : > { %v13706_v62 = vpop.f32.mrb[4].mxu1 }
 0x227   : > { %v13709_v27 = vpop.f32.mrb[5].mxu1 }
 0x228   : > { %v13711_v52 = vpop.f32.mrb[6].mxu1 }
 0x229   : > { %v13713_v5 = vpop.f32.mrb[7].mxu1 }
 0x22b   : > { %11201 = vmatmul.mubr.msk.bf16.gmra.mrb[24].mxu0 %vm458_vm0, %v13532_v32  ;;  %v2937_v32 = vld [vmem:[#allocation2 + $0x7a] sm:$0xff] }
 0x22c   : > { %11204 = vmatprep.mubr.msk.bf16.mxu0 %vm458_vm0, %v13538_v56  ;;  %v2966_v41 = vpack.c.bf16 %v2938_v38, %v2937_v32  ;;  %v2972_v56 = vpack.c.bf16 %v2950_v51, %v2949_v46  ;;  %v3434_v51 = vld [vmem:[#allocation3] sm:$0xff] }
 0x22e   : > { %v13716_v30 = vpop.f32.mrb[8].mxu1 }
 0x22f   : > { %v13719_v21 = vpop.f32.mrb[9].mxu1 }
 0x230   : > { %v13721_v18 = vpop.f32.mrb[10].mxu1 }
 0x231   : > { %v13723_v34 = vpop.f32.mrb[11].mxu1 }
 0x233   : > { %11205 = vmatmul.mubr.msk.bf16.gmra.mrb[28].mxu0 %vm458_vm0, %v2672_v17  ;;  %v2976_v17 = vpack.c.bf16 %v2958_v8, %v2957_v23  ;;  %v10305_v23 = vld [vmem:[%s19000_s4] ss:$0 sm:$0xff]  ;;  %v10307_v8 = vld [vmem:[%s19000_s4 + $0x1] ss:$0 sm:$0xff] }
 0x234   : > { %11212 = vmatprep.mubr.msk.bf16.mxu0 %vm458_vm0, %v2963_v22  ;;  %v2961_v22 = vld [vmem:[#allocation2 + $0x19a] sm:$0xff]  ;;  %v3474_v28 = vmul.f32 %v10305_v23, %v3435_v2 }
 0x235   : > { %v2978_v25 = vpack.c.bf16 %v2962_v24, %v2961_v22 }
 0x236   : > { %v13726_v36 = vpop.f32.mrb[12].mxu1 }
 0x237   : > { %v13729_v13 = vpop.f32.mrb[13].mxu1 }
 0x238   : > { %v13731_v15 = vpop.f32.mrb[14].mxu1 }
 0x239   : > { %v13733_v16 = vpop.f32.mrb[15].mxu1 }
 0x23b   : > { %11213 = vmatmul.mubr.msk.bf16.vlgmr.msra.gmra.mrb[0].mxu0 %vm458_vm0, %v2964_v33 }
 0x23c   : > { %11216 = vmatprep.mubr.msk.bf16.mxu0 %vm458_vm0, %v2965_v37 }
 0x243   : > { %11217 = vmatmul.mubr.msk.bf16.gmra.mrb[4].mxu0 %vm458_vm0, %v2966_v41 }
 0x244   : > { %11220 = vmatprep.mubr.msk.bf16.mxu0 %vm458_vm0, %v2967_v42 }
 0x24b   : > { %11221 = vmatmul.mubr.msk.bf16.gmra.mrb[8].mxu0 %vm458_vm0, %v2968_v50 }
 0x24c   : > { %11224 = vmatprep.mubr.msk.bf16.mxu0 %vm458_vm0, %v2969_v58 }
 0x253   : > { %11225 = vmatmul.mubr.msk.bf16.gmra.mrb[12].mxu0 %vm458_vm0, %v2970_v6 }
 0x254   : > { %11228 = vmatprep.mubr.msk.bf16.mxu0 %vm458_vm0, %v2971_v60  ;;  %v13792_v60 = vld [vmem:[%s18999_s3] ss:$0 sm:$0xff] }
 0x25b   : > { %11229 = vmatmul.mubr.msk.bf16.gmra.mrb[16].mxu0 %vm458_vm0, %v2972_v56  ;;  %v3537_v56 = vld [vmem:[#allocation3 + $0x1] sm:$0xff] }
 0x25c   : > { %11232 = vmatprep.mubr.msk.bf16.mxu0 %vm458_vm0, %v2973_v49  ;;  %v13798_v49 = vld [vmem:[%s19000_s4 + $0x9] ss:$0 sm:$0xff] }
 0x25d   : > { %v4509_v3 = vmul.f32 %v13798_v49, %v3435_v2 }
 0x25e   : > { %v13739_v29 = vpop.f32.mrb[16].mxu1 }
 0x25f   : > { %v13741_v31 = vpop.f32.mrb[17].mxu1 }
 0x260   : > { %v13743_v33 = vpop.f32.mrb[18].mxu1 }
 0x261   : > { %v13745_v37 = vpop.f32.mrb[19].mxu1 }
 0x263   : > { %11233 = vmatmul.mubr.msk.bf16.gmra.mrb[20].mxu0 %vm458_vm0, %v2974_v35  ;;  %v3538_v35 = vld [vmem:[#allocation3 + $0x9] sm:$0xff] }
 0x264   : > { %11236 = vmatprep.mubr.msk.bf16.mxu0 %vm458_vm0, %v2975_v26  ;;  %v3578_v19 = vmul.f32 %v10307_v8, %v3538_v35 }
 0x266   : > { %v13747_v32 = vpop.f32.mrb[20].mxu1 }
 0x267   : > { %v13749_v38 = vpop.f32.mrb[21].mxu1 }
 0x268   : > { %v13751_v39 = vpop.f32.mrb[22].mxu1 }
 0x26b   : > { %11237 = vmatmul.mubr.msk.bf16.gmra.mrb[24].mxu0 %vm458_vm0, %v2976_v17 }
 0x26c   : > { %11240 = vmatprep.mubr.msk.bf16.mxu0 %vm458_vm0, %v13606_v14  ;;  %v13753_v14 = vpop.f32.mrb[23].mxu1 }
 0x26e   : > { %v13755_v40 = vpop.f32.mrb[24].mxu1 }
 0x26f   : > { %v13757_v41 = vpop.f32.mrb[25].mxu1 }
 0x270   : > { %v13759_v42 = vpop.f32.mrb[26].mxu1 }
 0x271   : > { %v13761_v43 = vpop.f32.mrb[27].mxu1 }
 0x272   : > { %19111 = vst [vmem:[#allocation32_spill] sm:$0xff] %v13761_v43 }
 0x273   : > { %11241 = vmatmul.mubr.msk.bf16.gmra.mrb[28].mxu0 %vm458_vm0, %v2978_v25 }
 0x276   : > { %v13766_v45 = vpop.f32.mrb[28].mxu1 }
 0x277   : > { %19112 = vst [vmem:[#allocation33_spill] sm:$0xff] %v13766_v45  ;;  %v13768_v48 = vpop.f32.mrb[29].mxu1 }
 0x278   : > { %19113 = vst [vmem:[#allocation34_spill] sm:$0xff] %v13768_v48  ;;  %v13770_v50 = vpop.f32.mrb[30].mxu1 }
 0x279   : > { %19114 = vst [vmem:[#allocation35_spill] sm:$0xff] %v13770_v50  ;;  %v13772_v58 = vpop.f32.mrb[31].mxu1 }
 0x27a   : > { %19115 = vst [vmem:[#allocation36_spill] sm:$0xff] %v13772_v58 }
 0x30e   : > { %v11214_v61 = vpop.f32.mrb[0].mxu0 }
 0x30f   : > { %v11464_v6 = vadd.f32 %v11214_v61, %v13696_v0  ;;  %v3078_v46 = vpop.f32.mrb[1].mxu0  ;;  %v13803_v0 = vld [vmem:[%s19000_s4 + $0xa] ss:$0 sm:$0xff] }
 0x310   : > { %v11465_v63 = vadd.f32 %v3078_v46, %v13699_v53  ;;  %v11215_v9 = vpop.f32.mrb[2].mxu0  ;;  %v4580_v24 = vmul.f32 %v13803_v0, %v3537_v56  ;;  %v4581_v61 = vmul.f32 %v13803_v0, %v3538_v35 }
 0x311   : > { %v3246_v57 = vmul.f32 %v11464_v6, %v13786_v4  ;;  %v11466_v55 = vadd.f32 %v11215_v9, %v13701_v54  ;;  %v3081_v1 = vpop.f32.mrb[3].mxu0  ;;  %v4508_v54 = vmul.f32 %v13798_v49, %v3434_v51  ;;  %v13826_v6 = vld [vmem:[%s19000_s4 + $0xb] ss:$0 sm:$0xff]  ;;  %v3642_v9 = vld [vmem:[#allocation3 + $0xa] sm:$0xff] }
 0x312   : > { %v3244_v53 = vmul.f32 %v11465_v63, %v13786_v4  ;;  %v11467_v26 = vadd.f32 %v3081_v1, %v13703_v59  ;;  %v4613_v35 = vadd.f32 %v4581_v61, %v4509_v3 }
 0x313   : > { %v3285_v17 = vadd.f32 %v13792_v60, %v3246_v57  ;;  %v3247_v22 = vmul.f32 %v11466_v55, %v13786_v4  ;;  %v3473_v57 = vmul.f32 %v10305_v23, %v3434_v51  ;;  %v3577_v55 = vmul.f32 %v10307_v8, %v3537_v56 }
 0x314   : > { %v3283_v25 = vadd.f32 %v13792_v60, %v3244_v53  ;;  %v3245_v59 = vmul.f32 %v11467_v26, %v13786_v4  ;;  %v4652_v51 = vmul.f32 %v13826_v6, %v3641_v44  ;;  %v4653_v23 = vmul.f32 %v13826_v6, %v3642_v9 }
 0x315   : > { %v3317_v46 = vmax.f32 %v3285_v17, 0.0  ;;  %v3286_v63 = vadd.f32 %v13792_v60, %v3247_v22  ;;  %v4612_v22 = vadd.f32 %v4580_v24, %v4508_v54  ;;  %v3681_v54 = vmul.f32 %v10309_v20, %v3641_v44  ;;  %v13857_v44 = vld [vmem:[%s19000_s4 + $0x10] ss:$0 sm:$0xff] }
 0x316   : > { %v3315_v1 = vmax.f32 %v3283_v25, 0.0  ;;  %v3284_v53 = vadd.f32 %v13792_v60, %v3245_v59  ;;  %v11218_v26 = vpop.f32.mrb[4].mxu0 }
 0x317   : > { %3404 = vst.msk [vmem:[#allocation3 + $0x31] sm:$0xff] %vm458_vm0, %v3317_v46  ;;  %v3318_v11 = vmax.f32 %v3286_v63, 0.0  ;;  %v11468_v17 = vadd.f32 %v11218_v26, %v13706_v62  ;;  %v3094_v12 = vpop.f32.mrb[5].mxu0  ;;  %v3609_v46 = vadd.f32 %v3577_v55, %v3473_v57  ;;  %v13868_v57 = vld [vmem:[%s19000_s4 + $0xd] ss:$0 sm:$0xff] }
 0x318   : > { %3402 = vst.msk [vmem:[#allocation3 + $0x19] sm:$0xff] %vm458_vm0, %v3315_v1  ;;  %v3316_v56 = vmax.f32 %v3284_v53, 0.0  ;;  %v11469_v25 = vadd.f32 %v3094_v12, %v13709_v27  ;;  %v11219_v2 = vpop.f32.mrb[6].mxu0  ;;  %v3610_v12 = vadd.f32 %v3578_v19, %v3474_v28  ;;  %v3682_v27 = vmul.f32 %v10309_v20, %v3642_v9  ;;  %v13863_v9 = vld [vmem:[%s19000_s4 + $0xc] ss:$0 sm:$0xff] }
 0x319   : > { %3405 = vst.msk [vmem:[#allocation3 + $0x39] sm:$0xff] %vm458_vm0, %v3318_v11  ;;  %v3250_v8 = vmul.f32 %v11468_v17, %v13786_v4  ;;  %v11470_v59 = vadd.f32 %v11219_v2, %v13711_v52  ;;  %v3097_v62 = vpop.f32.mrb[7].mxu0  ;;  %v13852_v52 = vld [vmem:[%s19000_s4 + $0xf] ss:$0 sm:$0xff]  ;;  %v4684_v28 = vadd.f32 %v4652_v51, %v4612_v22  ;;  %v13875_v22 = vadd.f32 %v3681_v54, %v3609_v46 }
 0x31a   : > { %3403 = vst.msk [vmem:[#allocation3 + $0x21] sm:$0xff] %vm458_vm0, %v3316_v56  ;;  %v3248_v24 = vmul.f32 %v11469_v25, %v13786_v4  ;;  %v11471_v63 = vadd.f32 %v3097_v62, %v13713_v5  ;;  %v4685_v5 = vadd.f32 %v4653_v23, %v4613_v35  ;;  %v13877_v51 = vadd.f32 %v3682_v27, %v3610_v12 }
 0x31b   : > { %v3289_v3 = vadd.f32 %v13792_v60, %v3250_v8  ;;  %v3251_v61 = vmul.f32 %v11470_v59, %v13786_v4  ;;  %19117 = vst [vmem:[#allocation38_spill] sm:$0xff] %v13875_v22 }
 0x31c   : > { %v3287_v11 = vadd.f32 %v13792_v60, %v3248_v24  ;;  %v3249_v1 = vmul.f32 %v11471_v63, %v13786_v4  ;;  %19118 = vst [vmem:[#allocation39_spill] sm:$0xff] %v13877_v51 }
 0x31d   : > { %v3321_v19 = vmax.f32 %v3289_v3, 0.0  ;;  %v3290_v20 = vadd.f32 %v13792_v60, %v3251_v61  ;;  %v13901_v3 = vld [vmem:[%s19000_s4 + $0xe] ss:$0 sm:$0xff] }
 0x31e   : > { %v3319_v55 = vmax.f32 %v3287_v11, 0.0  ;;  %v3288_v53 = vadd.f32 %v13792_v60, %v3249_v1  ;;  %v11222_v26 = vpop.f32.mrb[8].mxu0  ;;  %v13871_v17 = vld [vmem:[#allocation3 + $0x30] sm:$0xff] }
 0x31f   : > { %v13873_v56 = vld [vmem:[#allocation3 + $0x31] sm:$0xff]  ;;  %3408 = vst.msk [vmem:[#allocation3 + $0x61] sm:$0xff] %vm458_vm0, %v3321_v19  ;;  %v3322_v25 = vmax.f32 %v3290_v20, 0.0  ;;  %v11472_v2 = vadd.f32 %v11222_v26, %v13716_v30  ;;  %v3110_v35 = vpop.f32.mrb[9].mxu0  ;;  %v13881_v8 = vld [vmem:[#allocation3 + $0x19] sm:$0xff]  ;;  %v4940_v59 = vmul.f32 %v13852_v52, %v13871_v17 }
 0x320   : > { %v3745_v23 = vld [vmem:[#allocation3 + $0x18] sm:$0xff]  ;;  %v13887_v62 = vmul.f32 %v13857_v44, %v13873_v56  ;;  %3406 = vst.msk [vmem:[#allocation3 + $0x49] sm:$0xff] %vm458_vm0, %v3319_v55  ;;  %v3320_v46 = vmax.f32 %v3288_v53, 0.0  ;;  %v11473_v54 = vadd.f32 %v3110_v35, %v13719_v21  ;;  %v11223_v24 = vpop.f32.mrb[10].mxu0  ;;  %v4796_v27 = vmul.f32 %v13868_v57, %v13881_v8 }
 0x321   : > { %v13891_v63 = vld [vmem:[#allocation3 + $0x38] sm:$0xff]  ;;  %v4724_v12 = vmul.f32 %v13863_v9, %v3745_v23  ;;  %3409 = vst.msk [vmem:[#allocation3 + $0x69] sm:$0xff] %vm458_vm0, %v3322_v25  ;;  %v3254_v61 = vmul.f32 %v11472_v2, %v13786_v4  ;;  %v11474_v21 = vadd.f32 %v11223_v24, %v13721_v18  ;;  %v3113_v11 = vpop.f32.mrb[11].mxu0  ;;  %v3746_v1 = vld [vmem:[#allocation3 + $0x20] sm:$0xff] }
 0x322   : > { %v13893_v30 = vld [vmem:[#allocation3 + $0x39] sm:$0xff]  ;;  %v3850_v19 = vld [vmem:[#allocation3 + $0x21] sm:$0xff]  ;;  %v4941_v55 = vmul.f32 %v13852_v52, %v13891_v63  ;;  %3407 = vst.msk [vmem:[#allocation3 + $0x51] sm:$0xff] %vm458_vm0, %v3320_v46  ;;  %v3252_v26 = vmul.f32 %v11473_v54, %v13786_v4  ;;  %v11475_v25 = vadd.f32 %v3113_v11, %v13723_v34  ;;  %v4725_v35 = vmul.f32 %v13863_v9, %v3746_v1 }
 0x323   : > { %v13906_v20 = vld [vmem:[#allocation3 + $0x1a] sm:$0xff]  ;;  %v5013_v53 = vmul.f32 %v13857_v44, %v13893_v30  ;;  %v13915_v2 = vld [vmem:[#allocation3 + $0x22] sm:$0xff]  ;;  %v13917_v18 = vld [vmem:[#allocation3 + $0x32] sm:$0xff]  ;;  %v4756_v24 = vadd.f32 %v4724_v12, %v4684_v28  ;;  %v3293_v10 = vadd.f32 %v13792_v60, %v3254_v61  ;;  %v3255_v46 = vmul.f32 %v11474_v21, %v13786_v4 }
 0x324   : > { %v4797_v54 = vmul.f32 %v13868_v57, %v3850_v19  ;;  %v4868_v34 = vmul.f32 %v13901_v3, %v13906_v20  ;;  %v3291_v11 = vadd.f32 %v13792_v60, %v3252_v26  ;;  %v3253_v51 = vmul.f32 %v11475_v25, %v13786_v4  ;;  %v13932_v22 = vld [vmem:[#allocation3 + $0x3a] sm:$0xff] }
 0x325   : > { %v4757_v28 = vadd.f32 %v4725_v35, %v4685_v5  ;;  %v4828_v12 = vadd.f32 %v4796_v27, %v4756_v24  ;;  %v3325_v58 = vmax.f32 %v3293_v10, 0.0  ;;  %v3294_v50 = vadd.f32 %v13792_v60, %v3255_v46 }
 0x326   : > { %v4869_v61 = vmul.f32 %v13901_v3, %v13915_v2  ;;  %v5084_v21 = vmul.f32 %v13923_v7, %v13917_v18  ;;  %v3323_v48 = vmax.f32 %v3291_v11, 0.0  ;;  %v3292_v45 = vadd.f32 %v13792_v60, %v3253_v51  ;;  %v11226_v43 = vpop.f32.mrb[12].mxu0 }
 0x327   : > { %v4829_v26 = vadd.f32 %v4797_v54, %v4757_v28  ;;  %v4900_v47 = vadd.f32 %v4868_v34, %v4828_v12  ;;  %3412 = vst.msk [vmem:[#allocation3 + $0x91] sm:$0xff] %vm458_vm0, %v3325_v58  ;;  %v3326_v25 = vmax.f32 %v3294_v50, 0.0  ;;  %v11476_v5 = vadd.f32 %v11226_v43, %v13726_v36  ;;  %v3126_v10 = vpop.f32.mrb[13].mxu0 }
 0x328   : > { %v5085_v27 = vmul.f32 %v13923_v7, %v13932_v22  ;;  %v4510_v35 = vmul.f32 %v13798_v49, %v3745_v23  ;;  %3410 = vst.msk [vmem:[#allocation3 + $0x79] sm:$0xff] %vm458_vm0, %v3323_v48  ;;  %v3324_v24 = vmax.f32 %v3292_v45, 0.0  ;;  %v11477_v46 = vadd.f32 %v3126_v10, %v13729_v13  ;;  %v11227_v51 = vpop.f32.mrb[14].mxu0 }
 0x329   : > { %v4901_v11 = vadd.f32 %v4869_v61, %v4829_v26  ;;  %v4972_v54 = vadd.f32 %v4940_v59, %v4900_v47  ;;  %3413 = vst.msk [vmem:[#allocation3 + $0x99] sm:$0xff] %vm458_vm0, %v3326_v25  ;;  %v3258_v50 = vmul.f32 %v11476_v5, %v13786_v4  ;;  %v11478_v36 = vadd.f32 %v11227_v51, %v13731_v15  ;;  %v3129_v43 = vpop.f32.mrb[15].mxu0  ;;  %v13962_v15 = vld [vmem:[%s19001_s5 + $0x1] ss:$0 sm:$0xff] }
 0x32a   : > { %v4511_v58 = vmul.f32 %v13798_v49, %v3746_v1  ;;  %v4582_v23 = vmul.f32 %v13803_v0, %v13881_v8  ;;  %3411 = vst.msk [vmem:[#allocation3 + $0x81] sm:$0xff] %vm458_vm0, %v3324_v24  ;;  %v3256_v45 = vmul.f32 %v11477_v46, %v13786_v4  ;;  %v11479_v13 = vadd.f32 %v3129_v43, %v13733_v16  ;;  %v13971_v26 = vld [vmem:[%s19002_s6 + $0x1] ss:$0 sm:$0xff] }
 0x32b   : > { %v4973_v48 = vadd.f32 %v4941_v55, %v4901_v11  ;;  %v5044_v47 = vadd.f32 %v13887_v62, %v4972_v54  ;;  %v3297_v59 = vadd.f32 %v13792_v60, %v3258_v50  ;;  %v3259_v34 = vmul.f32 %v11478_v36, %v13786_v4 }
 0x32c   : > { %v4583_v8 = vmul.f32 %v13803_v0, %v3850_v19  ;;  %v4614_v1 = vadd.f32 %v4582_v23, %v4510_v35  ;;  %v3295_v28 = vadd.f32 %v13792_v60, %v3256_v45  ;;  %v3257_v12 = vmul.f32 %v11479_v13, %v13786_v4 }
 0x32d   : > { %v5045_v16 = vadd.f32 %v5013_v53, %v4973_v48  ;;  %v5116_v55 = vadd.f32 %v5084_v21, %v5044_v47  ;;  %v3329_v61 = vmax.f32 %v3297_v59, 0.0  ;;  %v3298_v62 = vadd.f32 %v13792_v60, %v3259_v34 }
 0x32e   : > { %v4615_v25 = vadd.f32 %v4583_v8, %v4511_v58  ;;  %v4654_v5 = vmul.f32 %v13826_v6, %v13906_v20  ;;  %v3327_v19 = vmax.f32 %v3295_v28, 0.0  ;;  %v3296_v10 = vadd.f32 %v13792_v60, %v3257_v12  ;;  %v11230_v35 = vpop.f32.mrb[16].mxu0 }
 0x32f   : > { %v5117_v24 = vadd.f32 %v5085_v27, %v5045_v16  ;;  %v5156_v53 = vmul.f32 %v13962_v15, %v5116_v55  ;;  %3416 = vst.msk [vmem:[#allocation3 + $0xc1] sm:$0xff] %vm458_vm0, %v3329_v61  ;;  %v3330_v21 = vmax.f32 %v3298_v62, 0.0  ;;  %v11480_v46 = vadd.f32 %v11230_v35, %v13739_v29  ;;  %v3142_v51 = vpop.f32.mrb[17].mxu0  ;;  %v14003_v61 = vld [vmem:[#allocation3 + $0x48] sm:$0xff] }
 0x330   : > { %v4655_v11 = vmul.f32 %v13826_v6, %v13915_v2  ;;  %v4686_v54 = vadd.f32 %v4654_v5, %v4614_v1  ;;  %3414 = vst.msk [vmem:[#allocation3 + $0xa9] sm:$0xff] %vm458_vm0, %v3327_v19  ;;  %v3328_v20 = vmax.f32 %v3296_v10, 0.0  ;;  %v11481_v50 = vadd.f32 %v3142_v51, %v13741_v31  ;;  %v11231_v36 = vpop.f32.mrb[18].mxu0 }
 0x331   : > { %v5157_v27 = vmul.f32 %v13962_v15, %v5117_v24  ;;  %v5196_v43 = vadd.f32 %v13971_v26, %v5156_v53  ;;  %3417 = vst.msk [vmem:[#allocation3 + $0xc9] sm:$0xff] %vm458_vm0, %v3330_v21  ;;  %v3262_v58 = vmul.f32 %v11480_v46, %v13786_v4  ;;  %v11482_v29 = vadd.f32 %v11231_v36, %v13743_v33  ;;  %v3145_v23 = vpop.f32.mrb[19].mxu0  ;;  %v14008_v24 = vld [vmem:[#allocation3 + $0x50] sm:$0xff] }
 0x332   : > { %v4687_v45 = vadd.f32 %v4655_v11, %v4615_v25  ;;  %v4726_v2 = vmul.f32 %v13863_v9, %v13871_v17  ;;  %3415 = vst.msk [vmem:[#allocation3 + $0xb1] sm:$0xff] %vm458_vm0, %v3328_v20  ;;  %v3260_v31 = vmul.f32 %v11481_v50, %v13786_v4  ;;  %v11483_v13 = vadd.f32 %v3145_v23, %v13745_v37  ;;  %v14012_v11 = vld [vmem:[#allocation3 + $0x49] sm:$0xff] }
 0x333   : > { %v5197_v48 = vadd.f32 %v13971_v26, %v5157_v27  ;;  %v5228_v47 = vmax.f32 %v5196_v43, 0.0  ;;  %v3301_v59 = vadd.f32 %v13792_v60, %v3262_v58  ;;  %v3263_v34 = vmul.f32 %v11482_v29, %v13786_v4  ;;  %v14019_v43 = vld [vmem:[#allocation3 + $0x51] sm:$0xff] }
 0x334   : > { %v4727_v33 = vmul.f32 %v13863_v9, %v13891_v63  ;;  %v4758_v8 = vadd.f32 %v4726_v2, %v4686_v54  ;;  %v3299_v1 = vadd.f32 %v13792_v60, %v3260_v31  ;;  %v3261_v28 = vmul.f32 %v11483_v13, %v13786_v4  ;;  %v14028_v2 = vld [vmem:[#allocation3 + $0x4a] sm:$0xff] }
 0x335   : > { %v5229_v12 = vmax.f32 %v5197_v48, 0.0  ;;  %v4798_v16 = vmul.f32 %v13868_v57, %v13873_v56  ;;  %v3333_v37 = vmax.f32 %v3301_v59, 0.0  ;;  %v3302_v55 = vadd.f32 %v13792_v60, %v3263_v34 }
 0x336   : > { %v4759_v62 = vadd.f32 %v4727_v33, %v4687_v45  ;;  %v4799_v25 = vmul.f32 %v13868_v57, %v13893_v30  ;;  %v3331_v5 = vmax.f32 %v3299_v1, 0.0  ;;  %v3300_v19 = vadd.f32 %v13792_v60, %v3261_v28  ;;  %v11234_v10 = vpop.f32.mrb[20].mxu0 }
 0x337   : > { %v5260_v35 = vpack.c.bf16 %v5229_v12, %v5228_v47  ;;  %v4830_v53 = vadd.f32 %v4798_v16, %v4758_v8  ;;  %3420 = vst.msk [vmem:[#allocation3 + $0xf1] sm:$0xff] %vm458_vm0, %v3333_v37  ;;  %v3334_v21 = vmax.f32 %v3302_v55, 0.0  ;;  %v11484_v46 = vadd.f32 %v11234_v10, %v13747_v32  ;;  %v3158_v51 = vpop.f32.mrb[21].mxu0  ;;  %v14035_v47 = vld [vmem:[#allocation3 + $0x52] sm:$0xff] }
 0x338   : > { %v4831_v54 = vadd.f32 %v4799_v25, %v4759_v62  ;;  %v4870_v20 = vmul.f32 %v13901_v3, %v13917_v18  ;;  %3418 = vst.msk [vmem:[#allocation3 + $0xd9] sm:$0xff] %vm458_vm0, %v3331_v5  ;;  %v3332_v50 = vmax.f32 %v3300_v19, 0.0  ;;  %v11485_v36 = vadd.f32 %v3158_v51, %v13749_v38  ;;  %v11235_v27 = vpop.f32.mrb[22].mxu0 }
 0x339   : > { %11248 = vmatprep.mubr.msk.bf16.mxu1 %vm458_vm0, %v5260_v35  ;;  %v4871_v32 = vmul.f32 %v13901_v3, %v13932_v22  ;;  %v4942_v58 = vmul.f32 %v13852_v52, %v14003_v61  ;;  %3421 = vst.msk [vmem:[#allocation3 + $0xf9] sm:$0xff] %vm458_vm0, %v3334_v21  ;;  %v3266_v29 = vmul.f32 %v11484_v46, %v13786_v4  ;;  %v3161_v45 = vpop.f32.mrb[23].mxu0 }
 0x33a   : > { %v11486_v23 = vadd.f32 %v11235_v27, %v13751_v39  ;;  %v4902_v38 = vadd.f32 %v4870_v20, %v4830_v53  ;;  %v4943_v31 = vmul.f32 %v13852_v52, %v14008_v24  ;;  %3419 = vst.msk [vmem:[#allocation3 + $0xe1] sm:$0xff] %vm458_vm0, %v3332_v50  ;;  %v3264_v13 = vmul.f32 %v11485_v36, %v13786_v4 }
 0x33b   : > { %v11487_v48 = vadd.f32 %v3161_v45, %v13753_v14  ;;  %v4903_v59 = vadd.f32 %v4871_v32, %v4831_v54  ;;  %v5014_v34 = vmul.f32 %v13857_v44, %v14012_v11  ;;  %v3305_v39 = vadd.f32 %v13792_v60, %v3266_v29 }
 0x33c   : > { %v3267_v33 = vmul.f32 %v11486_v23, %v13786_v4  ;;  %v4974_v8 = vadd.f32 %v4942_v58, %v4902_v38  ;;  %v5015_v1 = vmul.f32 %v13857_v44, %v14019_v43  ;;  %v3303_v28 = vadd.f32 %v13792_v60, %v3264_v13 }
 0x33d   : > { %v3265_v12 = vmul.f32 %v11487_v48, %v13786_v4  ;;  %v4975_v16 = vadd.f32 %v4943_v31, %v4903_v59  ;;  %v5086_v14 = vmul.f32 %v13923_v7, %v14028_v2  ;;  %v3337_v37 = vmax.f32 %v3305_v39, 0.0 }
 0x33e   : > { %v3306_v55 = vadd.f32 %v13792_v60, %v3267_v33  ;;  %v5046_v62 = vadd.f32 %v5014_v34, %v4974_v8  ;;  %v5087_v25 = vmul.f32 %v13923_v7, %v14035_v47  ;;  %v3335_v5 = vmax.f32 %v3303_v28, 0.0  ;;  %v11238_v35 = vpop.f32.mrb[24].mxu0 }
 0x33f   : > { %v3304_v19 = vadd.f32 %v13792_v60, %v3265_v12  ;;  %v5047_v10 = vadd.f32 %v5015_v1, %v4975_v16  ;;  %v4512_v53 = vmul.f32 %v13798_v49, %v13871_v17  ;;  %3424 = vst.msk [vmem:[#allocation3 + $0x121] sm:$0xff] %vm458_vm0, %v3337_v37  ;;  %v11488_v51 = vadd.f32 %v11238_v35, %v13755_v40  ;;  %v3174_v54 = vpop.f32.mrb[25].mxu0  ;;  %v14082_v16 = vld [vmem:[#allocation3 + $0x60] sm:$0xff] }
 0x340   : > { %v3338_v21 = vmax.f32 %v3306_v55, 0.0  ;;  %v5118_v46 = vadd.f32 %v5086_v14, %v5046_v62  ;;  %v4513_v20 = vmul.f32 %v13798_v49, %v13891_v63  ;;  %3422 = vst.msk [vmem:[#allocation3 + $0x109] sm:$0xff] %vm458_vm0, %v3335_v5  ;;  %v11489_v27 = vadd.f32 %v3174_v54, %v13757_v41  ;;  %v11239_v32 = vpop.f32.mrb[26].mxu0  ;;  %v14084_v14 = vld [vmem:[#allocation3 + $0x68] sm:$0xff] }
 0x341   : > { %v3336_v50 = vmax.f32 %v3304_v19, 0.0  ;;  %v5119_v36 = vadd.f32 %v5087_v25, %v5047_v10  ;;  %v4584_v17 = vmul.f32 %v13803_v0, %v13873_v56  ;;  %v3270_v40 = vmul.f32 %v11488_v51, %v13786_v4  ;;  %v3177_v23 = vpop.f32.mrb[27].mxu0  ;;  %v14086_v37 = vld [vmem:[#allocation3 + $0x61] sm:$0xff]  ;;  %v14093_v5 = vld [vmem:[#allocation3 + $0x69] sm:$0xff] }
 0x342   : > { %3425 = vst.msk [vmem:[#allocation3 + $0x129] sm:$0xff] %vm458_vm0, %v3338_v21  ;;  %v5158_v58 = vmul.f32 %v13962_v15, %v5118_v46  ;;  %v11490_v29 = vadd.f32 %v11239_v32, %v13759_v42  ;;  %v4585_v63 = vmul.f32 %v13803_v0, %v13893_v30  ;;  %v3268_v45 = vmul.f32 %v11489_v27, %v13786_v4  ;;  %v14095_v19 = vld [vmem:[#allocation3 + $0x62] sm:$0xff]  ;;  %v14097_v10 = vld [vmem:[#allocation3 + $0x6a] sm:$0xff]  ;;  %v11963_v27 = vld [vmem:[%s19003_s7 + $0x8] sm:$0xff]  }
 0x343   : > { %3423 = vst.msk [vmem:[#allocation3 + $0x111] sm:$0xff] %vm458_vm0, %v3336_v50  ;;  %v5159_v41 = vmul.f32 %v13962_v15, %v5119_v36  ;;  %v4616_v38 = vadd.f32 %v4584_v17, %v4512_v53  ;;  %v4656_v56 = vmul.f32 %v13826_v6, %v13917_v18  ;;  %v3309_v13 = vadd.f32 %v13792_v60, %v3270_v40 }
 0x344   : > { %v5198_v31 = vadd.f32 %v13971_v26, %v5158_v58  ;;  %v3271_v42 = vmul.f32 %v11490_v29, %v13786_v4  ;;  %v4617_v48 = vadd.f32 %v4585_v63, %v4513_v20  ;;  %v3307_v59 = vadd.f32 %v13792_v60, %v3268_v45 }
 0x345   : > { %v5199_v30 = vadd.f32 %v13971_v26, %v5159_v41  ;;  %v4657_v34 = vmul.f32 %v13826_v6, %v13932_v22  ;;  %v4688_v39 = vadd.f32 %v4656_v56, %v4616_v38  ;;  %v3341_v8 = vmax.f32 %v3309_v13, 0.0  ;;  %v19119_v56 = vld [vmem:[#allocation37_spill] sm:$0xff]  ;;  %v19120_v13 = vld [vmem:[#allocation32_spill] sm:$0xff] }
 0x346   : > { %v5230_v33 = vmax.f32 %v5198_v31, 0.0  ;;  %v3310_v1 = vadd.f32 %v13792_v60, %v3271_v42  ;;  %v4728_v18 = vmul.f32 %v13863_v9, %v14003_v61  ;;  %v3339_v12 = vmax.f32 %v3307_v59, 0.0  ;;  %v14090_v62 = vpop.f32.mrb[28].mxu0 }
 0x347   : > { %v5231_v28 = vmax.f32 %v5199_v30, 0.0  ;;  %v4689_v55 = vadd.f32 %v4657_v34, %v4617_v48  ;;  %v4729_v22 = vmul.f32 %v13863_v9, %v14008_v24  ;;  %3428 = vst.msk [vmem:[#allocation3 + $0x151] sm:$0xff] %vm458_vm0, %v3341_v8  ;;  %v4800_v53 = vmul.f32 %v13868_v57, %v14012_v11  ;;  %v14103_v46 = vpop.f32.mrb[29].mxu0 }
 0x348   : > { %v3342_v25 = vmax.f32 %v3310_v1, 0.0  ;;  %v4760_v35 = vadd.f32 %v4728_v18, %v4688_v39  ;;  %v4801_v21 = vmul.f32 %v13868_v57, %v14019_v43  ;;  %3426 = vst.msk [vmem:[#allocation3 + $0x139] sm:$0xff] %vm458_vm0, %v3339_v12  ;;  %v4872_v20 = vmul.f32 %v13901_v3, %v14028_v2  ;;  %v14110_v36 = vpop.f32.mrb[30].mxu0  ;;  %v14148_v18 = vld [vmem:[#allocation3 + $0x78] sm:$0xff] }
 0x349   : > { %v5261_v51 = vpack.c.bf16 %v5231_v28, %v5230_v33  ;;  %v4761_v54 = vadd.f32 %v4729_v22, %v4689_v55  ;;  %v4873_v50 = vmul.f32 %v13901_v3, %v14035_v47  ;;  %v4944_v17 = vmul.f32 %v13852_v52, %v14082_v16  ;;  %v14122_v29 = vpop.f32.mrb[31].mxu0  ;;  %v14153_v55 = vld [vmem:[#allocation3 + $0x80] sm:$0xff] }
 0x34a   : > { %3429 = vst.msk [vmem:[#allocation3 + $0x159] sm:$0xff] %vm458_vm0, %v3342_v25  ;;  %v4832_v32 = vadd.f32 %v4800_v53, %v4760_v35  ;;  %v4945_v58 = vmul.f32 %v13852_v52, %v14084_v14  ;;  %v5016_v40 = vmul.f32 %v13857_v44, %v14086_v37  ;;  %v5017_v41 = vmul.f32 %v13857_v44, %v14093_v5  ;;  %v14159_v35 = vld [vmem:[#allocation3 + $0x79] sm:$0xff]  ;;  %v14161_v53 = vld [vmem:[#allocation3 + $0x81] sm:$0xff] }
 0x34b   : > { %11249 = vmatmul.mubr.msk.bf16.vlgmr.msra.gmra.mrb[32].mxu1 %vm458_vm0, %v5261_v51  ;;  %v4833_v63 = vadd.f32 %v4801_v21, %v4761_v54  ;;  %v5088_v45 = vmul.f32 %v13923_v7, %v14095_v19  ;;  %v5089_v38 = vmul.f32 %v13923_v7, %v14097_v10  ;;  %v11491_v42 = vadd.f32 %v3177_v23, %v19120_v13  ;;  %v14163_v21 = vld [vmem:[#allocation3 + $0x7a] sm:$0xff] }
 0x34c   : > { %11281 = vmatpush3.bf16.msra.mxu1 %v19119_v56  ;;  %v4904_v31 = vadd.f32 %v4872_v20, %v4832_v32  ;;  %v4514_v48 = vmul.f32 %v13798_v49, %v14003_v61  ;;  %v4515_v30 = vmul.f32 %v13798_v49, %v14008_v24  ;;  %v4586_v34 = vmul.f32 %v13803_v0, %v14012_v11 }
 0x34d   : > { %v4905_v59 = vadd.f32 %v4873_v50, %v4833_v63  ;;  %v4587_v39 = vmul.f32 %v13803_v0, %v14019_v43  ;;  %v4658_v33 = vmul.f32 %v13826_v6, %v14028_v2  ;;  %11282 = vmatprep.subr.bf16.mxu1 %v11963_v27  ;;  %v3269_v23 = vmul.f32 %v11491_v42, %v13786_v4 }
 0x34e   : > { %v4976_v8 = vadd.f32 %v4944_v17, %v4904_v31  ;;  %v4659_v61 = vmul.f32 %v13826_v6, %v14035_v47  ;;  %v4730_v24 = vmul.f32 %v13863_v9, %v14082_v16  ;;  %v4618_v11 = vadd.f32 %v4586_v34, %v4514_v48  ;;  %v14167_v17 = vld [vmem:[#allocation3 + $0x82] sm:$0xff] }
 0x34f   : > { %v4977_v1 = vadd.f32 %v4945_v58, %v4905_v59  ;;  %v4619_v28 = vadd.f32 %v4587_v39, %v4515_v30  ;;  %v4731_v43 = vmul.f32 %v13863_v9, %v14084_v14  ;;  %v3308_v2 = vadd.f32 %v13792_v60, %v3269_v23  ;;  %v19121_v39 = vld [vmem:[#allocation33_spill] sm:$0xff] }
 0x350   : > { %v5048_v12 = vadd.f32 %v5016_v40, %v4976_v8  ;;  %v4802_v22 = vmul.f32 %v13868_v57, %v14086_v37  ;;  %v4803_v47 = vmul.f32 %v13868_v57, %v14093_v5  ;;  %11283 = vmatpush3.bf16.msra.mxu1 %v11963_v27  ;;  %v4690_v51 = vadd.f32 %v4658_v33, %v4618_v11  ;;  %v19122_v8 = vld [vmem:[#allocation34_spill] sm:$0xff] }
 0x351   : > { %v5049_v25 = vadd.f32 %v5017_v41, %v4977_v1  ;;  %v4691_v54 = vadd.f32 %v4659_v61, %v4619_v28  ;;  %v4874_v20 = vmul.f32 %v13901_v3, %v14095_v19  ;;  %v3340_v32 = vmax.f32 %v3308_v2, 0.0  ;;  %v19123_v61 = vld [vmem:[#allocation35_spill] sm:$0xff] }
 0x352   : > { %v5120_v50 = vadd.f32 %v5088_v45, %v5048_v12  ;;  %v4875_v58 = vmul.f32 %v13901_v3, %v14097_v10  ;;  %v4946_v27 = vmul.f32 %v13852_v52, %v14148_v18  ;;  %v4762_v63 = vadd.f32 %v4730_v24, %v4690_v51 }
 0x353   : > { %v5121_v40 = vadd.f32 %v5089_v38, %v5049_v25  ;;  %v4763_v41 = vadd.f32 %v4731_v43, %v4691_v54  ;;  %v4947_v56 = vmul.f32 %v13852_v52, %v14153_v55  ;;  %3427 = vst.msk [vmem:[#allocation3 + $0x141] sm:$0xff] %vm458_vm0, %v3340_v32  ;;  %v5018_v45 = vmul.f32 %v13857_v44, %v14159_v35 }
 0x354   : > { %v5160_v31 = vmul.f32 %v13962_v15, %v5120_v50  ;;  %v5019_v13 = vmul.f32 %v13857_v44, %v14161_v53  ;;  %v5090_v42 = vmul.f32 %v13923_v7, %v14163_v21  ;;  %v4834_v48 = vadd.f32 %v4802_v22, %v4762_v63 }
 0x355   : > { %v5161_v38 = vmul.f32 %v13962_v15, %v5121_v40  ;;  %v4835_v30 = vadd.f32 %v4803_v47, %v4763_v41  ;;  %v5091_v59 = vmul.f32 %v13923_v7, %v14167_v17  ;;  %v11492_v33 = vadd.f32 %v14090_v62, %v19121_v39  ;;  %v14230_v39 = vld [vmem:[#allocation3 + $0x99] sm:$0xff] }
 0x356   : > { %v5200_v34 = vadd.f32 %v13971_v26, %v5160_v31  ;;  %v11493_v23 = vadd.f32 %v14103_v46, %v19122_v8  ;;  %v11494_v24 = vadd.f32 %v14110_v36, %v19123_v61  ;;  %v4906_v11 = vadd.f32 %v4874_v20, %v4834_v48 }
 0x357   : > { %v5201_v1 = vadd.f32 %v13971_v26, %v5161_v38  ;;  %v4907_v28 = vadd.f32 %v4875_v58, %v4835_v30  ;;  %v4516_v43 = vmul.f32 %v13798_v49, %v14082_v16  ;;  %v3274_v2 = vmul.f32 %v11492_v33, %v13786_v4  ;;  %v14209_v38 = vld [vmem:[#allocation3 + $0x90] sm:$0xff] }
 0x358   : > { %v5232_v12 = vmax.f32 %v5200_v34, 0.0  ;;  %v3272_v22 = vmul.f32 %v11493_v23, %v13786_v4  ;;  %v3275_v62 = vmul.f32 %v11494_v24, %v13786_v4  ;;  %v4978_v25 = vadd.f32 %v4946_v27, %v4906_v11  ;;  %v14228_v34 = vld [vmem:[#allocation3 + $0x91] sm:$0xff]  ;;  %v14236_v23 = vld [vmem:[#allocation3 + $0x9a] sm:$0xff] }
 0x359   : > { %v5233_v47 = vmax.f32 %v5201_v1, 0.0  ;;  %v4979_v46 = vadd.f32 %v4947_v56, %v4907_v28  ;;  %v4517_v36 = vmul.f32 %v13798_v49, %v14084_v14  ;;  %v3313_v51 = vadd.f32 %v13792_v60, %v3274_v2  ;;  %v14232_v33 = vld [vmem:[#allocation3 + $0x92] sm:$0xff] }
 0x35a   : > { %v3311_v54 = vadd.f32 %v13792_v60, %v3272_v22  ;;  %v3314_v20 = vadd.f32 %v13792_v60, %v3275_v62  ;;  %v4588_v16 = vmul.f32 %v13803_v0, %v14086_v37  ;;  %v5050_v32 = vadd.f32 %v5018_v45, %v4978_v25 }
 0x35b   : > { %v5262_v50 = vpack.c.bf16 %v5233_v47, %v5232_v12  ;;  %v5051_v58 = vadd.f32 %v5019_v13, %v4979_v46  ;;  %v4589_v40 = vmul.f32 %v13803_v0, %v14093_v5  ;;  %v3345_v27 = vmax.f32 %v3313_v51, 0.0  ;;  %v14216_v5 = vld [vmem:[#allocation3 + $0x98] sm:$0xff] }
 0x35c   : > { %v3343_v63 = vmax.f32 %v3311_v54, 0.0  ;;  %v3346_v41 = vmax.f32 %v3314_v20, 0.0  ;;  %v4620_v56 = vadd.f32 %v4588_v16, %v4516_v43  ;;  %v5122_v14 = vadd.f32 %v5090_v42, %v5050_v32  ;;  %v19124_v16 = vld [vmem:[#allocation36_spill] sm:$0xff] }
 0x35d   : > { %11252 = vmatprep.mubr.msk.bf16.mxu1 %vm458_vm0, %v5262_v50  ;;  %v5123_v31 = vadd.f32 %v5091_v59, %v5051_v58  ;;  %v4621_v48 = vadd.f32 %v4589_v40, %v4517_v36  ;;  %v4660_v37 = vmul.f32 %v13826_v6, %v14095_v19  ;;  %3432 = vst.msk [vmem:[#allocation3 + $0x181] sm:$0xff] %vm458_vm0, %v3345_v27 }
 0x35e   : > { %3430 = vst.msk [vmem:[#allocation3 + $0x169] sm:$0xff] %vm458_vm0, %v3343_v63  ;;  %3433 = vst.msk [vmem:[#allocation3 + $0x189] sm:$0xff] %vm458_vm0, %v3346_v41  ;;  %v4661_v45 = vmul.f32 %v13826_v6, %v14097_v10  ;;  %v4732_v13 = vmul.f32 %v13863_v9, %v14148_v18  ;;  %v4733_v42 = vmul.f32 %v13863_v9, %v14153_v55 }
 0x35f   : > { %v4804_v19 = vmul.f32 %v13868_v57, %v14159_v35  ;;  %v5162_v30 = vmul.f32 %v13962_v15, %v5122_v14  ;;  %v5163_v59 = vmul.f32 %v13962_v15, %v5123_v31  ;;  %v4692_v10 = vadd.f32 %v4660_v37, %v4620_v56 }
 0x360   : > { %v4805_v8 = vmul.f32 %v13868_v57, %v14161_v53  ;;  %v4693_v61 = vadd.f32 %v4661_v45, %v4621_v48  ;;  %v4876_v24 = vmul.f32 %v13901_v3, %v14163_v21  ;;  %v4877_v1 = vmul.f32 %v13901_v3, %v14167_v17  ;;  %v14275_v45 = vld [vmem:[#allocation3 + $0xa8] sm:$0xff] }
 0x361   : > { %v4948_v11 = vmul.f32 %v13852_v52, %v14209_v38  ;;  %v5202_v28 = vadd.f32 %v13971_v26, %v5162_v30  ;;  %v5203_v43 = vadd.f32 %v13971_v26, %v5163_v59  ;;  %v4764_v12 = vadd.f32 %v4732_v13, %v4692_v10  ;;  %v14281_v13 = vld [vmem:[#allocation3 + $0xb0] sm:$0xff] }
 0x362   : > { %v4949_v2 = vmul.f32 %v13852_v52, %v14216_v5  ;;  %v4765_v22 = vadd.f32 %v4733_v42, %v4693_v61  ;;  %v5020_v62 = vmul.f32 %v13857_v44, %v14228_v34  ;;  %v5021_v47 = vmul.f32 %v13857_v44, %v14230_v39  ;;  %v14283_v42 = vld [vmem:[#allocation3 + $0xa9] sm:$0xff] }
 0x363   : > { %v5092_v25 = vmul.f32 %v13923_v7, %v14232_v33  ;;  %v5234_v46 = vmax.f32 %v5202_v28, 0.0  ;;  %v5235_v36 = vmax.f32 %v5203_v43, 0.0  ;;  %v4836_v51 = vadd.f32 %v4804_v19, %v4764_v12  ;;  %v14285_v19 = vld [vmem:[#allocation3 + $0xb1] sm:$0xff] }
 0x364   : > { %v5093_v54 = vmul.f32 %v13923_v7, %v14236_v23  ;;  %v4837_v20 = vadd.f32 %v4805_v8, %v4765_v22  ;;  %v11495_v50 = vadd.f32 %v14122_v29, %v19124_v16  ;;  %v4518_v32 = vmul.f32 %v13798_v49, %v14148_v18  ;;  %v14289_v61 = vld [vmem:[#allocation3 + $0xaa] sm:$0xff]  ;;  %v14295_v28 = vld [vmem:[#allocation3 + $0xb2] sm:$0xff] }
 0x365   : > { %v4519_v58 = vmul.f32 %v13798_v49, %v14153_v55  ;;  %v5263_v40 = vpack.c.bf16 %v5235_v36, %v5234_v46  ;;  %v4908_v27 = vadd.f32 %v4876_v24, %v4836_v51  ;;  %v4590_v63 = vmul.f32 %v13803_v0, %v14159_v35  ;;  %v11964_v22 = vld [vmem:[%s19003_s7 + $0x20] sm:$0xff]  }
 0x366   : > { %v4591_v41 = vmul.f32 %v13803_v0, %v14161_v53  ;;  %v4909_v56 = vadd.f32 %v4877_v1, %v4837_v20  ;;  %v3273_v14 = vmul.f32 %v11495_v50, %v13786_v4  ;;  %v4662_v29 = vmul.f32 %v13826_v6, %v14163_v21  ;;  %11316 = vmatprep.subr.bf16.mxu1 %v11964_v22 }
 0x367   : > { %v4663_v18 = vmul.f32 %v13826_v6, %v14167_v17  ;;  %11253 = vmatmul.mubr.msk.bf16.gmra.mrb[36].mxu1 %vm458_vm0, %v5263_v40  ;;  %v4980_v55 = vadd.f32 %v4948_v11, %v4908_v27  ;;  %v4622_v31 = vadd.f32 %v4590_v63, %v4518_v32  ;;  %v4734_v35 = vmul.f32 %v13863_v9, %v14209_v38 }
 0x368   : > { %v4623_v48 = vadd.f32 %v4591_v41, %v4519_v58  ;;  %v4981_v37 = vadd.f32 %v4949_v2, %v4909_v56  ;;  %v3312_v53 = vadd.f32 %v13792_v60, %v3273_v14  ;;  %v4735_v4 = vmul.f32 %v13863_v9, %v14216_v5 }
 0x369   : > { %v4806_v21 = vmul.f32 %v13868_v57, %v14228_v34  ;;  %v5052_v17 = vadd.f32 %v5020_v62, %v4980_v55  ;;  %v4694_v30 = vadd.f32 %v4662_v29, %v4622_v31  ;;  %v4807_v60 = vmul.f32 %v13868_v57, %v14230_v39 }
 0x36a   : > { %v4695_v59 = vadd.f32 %v4663_v18, %v4623_v48  ;;  %v5053_v10 = vadd.f32 %v5021_v47, %v4981_v37  ;;  %v3344_v8 = vmax.f32 %v3312_v53, 0.0  ;;  %v4878_v24 = vmul.f32 %v13901_v3, %v14232_v33  ;;  %v14337_v53 = vld [vmem:[#allocation3 + $0xc1] sm:$0xff] }
 0x36b   : > { %v4879_v1 = vmul.f32 %v13901_v3, %v14236_v23  ;;  %v5124_v11 = vadd.f32 %v5092_v25, %v5052_v17  ;;  %v4766_v43 = vadd.f32 %v4734_v35, %v4694_v30  ;;  %v4950_v2 = vmul.f32 %v13852_v52, %v14275_v45 }
 0x36c   : > { %v4767_v12 = vadd.f32 %v4735_v4, %v4695_v59  ;;  %v5125_v62 = vadd.f32 %v5093_v54, %v5053_v10  ;;  %3431 = vst.msk [vmem:[#allocation3 + $0x171] sm:$0xff] %vm458_vm0, %v3344_v8  ;;  %v4951_v47 = vmul.f32 %v13852_v52, %v14281_v13  ;;  %v5022_v25 = vmul.f32 %v13857_v44, %v14283_v42  ;;  %v14347_v8 = vld [vmem:[#allocation3 + $0xc2] sm:$0xff] }
 0x36d   : > { %v5023_v46 = vmul.f32 %v13857_v44, %v14285_v19  ;;  %v5164_v36 = vmul.f32 %v13962_v15, %v5124_v11  ;;  %v4838_v51 = vadd.f32 %v4806_v21, %v4766_v43  ;;  %v5094_v16 = vmul.f32 %v13923_v7, %v14289_v61  ;;  %v14341_v21 = vld [vmem:[#allocation3 + $0xc9] sm:$0xff] }
 0x36e   : > { %v4839_v20 = vadd.f32 %v4807_v60, %v4767_v12  ;;  %v5165_v54 = vmul.f32 %v13962_v15, %v5125_v62  ;;  %v5095_v50 = vmul.f32 %v13923_v7, %v14295_v28  ;;  %v4520_v32 = vmul.f32 %v13798_v49, %v14209_v38 }
 0x36f   : > { %v4521_v58 = vmul.f32 %v13798_v49, %v14216_v5  ;;  %v5204_v40 = vadd.f32 %v13971_v26, %v5164_v36  ;;  %v4910_v27 = vadd.f32 %v4878_v24, %v4838_v51  ;;  %v4592_v41 = vmul.f32 %v13803_v0, %v14228_v34  ;;  %v14349_v24 = vld [vmem:[#allocation3 + $0xca] sm:$0xff] }
 0x370   : > { %v4911_v63 = vadd.f32 %v4879_v1, %v4839_v20  ;;  %v5205_v56 = vadd.f32 %v13971_v26, %v5165_v54  ;;  %v4593_v14 = vmul.f32 %v13803_v0, %v14230_v39  ;;  %v4664_v29 = vmul.f32 %v13826_v6, %v14232_v33  ;;  %v14333_v39 = vld [vmem:[#allocation3 + $0xc0] sm:$0xff]  ;;  %v14335_v33 = vld [vmem:[#allocation3 + $0xc8] sm:$0xff] }
 0x371   : > { %v4665_v38 = vmul.f32 %v13826_v6, %v14236_v23  ;;  %v5236_v18 = vmax.f32 %v5204_v40, 0.0  ;;  %v4982_v49 = vadd.f32 %v4950_v2, %v4910_v27  ;;  %v4624_v55 = vadd.f32 %v4592_v41, %v4520_v32  ;;  %v14382_v40 = vld [vmem:[%s19000_s4 + $0xa] ss:$0 sm:$0xff] }
 0x372   : > { %v4983_v5 = vadd.f32 %v4951_v47, %v4911_v63  ;;  %v5237_v31 = vmax.f32 %v5205_v56, 0.0  ;;  %v4625_v48 = vadd.f32 %v4593_v14, %v4521_v58  ;;  %v4736_v34 = vmul.f32 %v13863_v9, %v14275_v45  ;;  %v14391_v63 = vld [vmem:[%s19000_s4 + $0xb] ss:$0 sm:$0xff] }
 0x373   : > { %v4737_v35 = vmul.f32 %v13863_v9, %v14281_v13  ;;  %v5054_v37 = vadd.f32 %v5022_v25, %v4982_v49  ;;  %v4696_v6 = vadd.f32 %v4664_v29, %v4624_v55  ;;  %v4808_v23 = vmul.f32 %v13868_v57, %v14283_v42 }
 0x374   : > { %v5055_v0 = vadd.f32 %v5023_v46, %v4983_v5  ;;  %v5264_v4 = vpack.c.bf16 %v5237_v31, %v5236_v18  ;;  %v4697_v17 = vadd.f32 %v4665_v38, %v4625_v48  ;;  %v4809_v30 = vmul.f32 %v13868_v57, %v14285_v19  ;;  %v14397_v18 = vld [vmem:[#allocation3 + $0xd8] sm:$0xff]  ;;  %v14401_v31 = vld [vmem:[#allocation3 + $0xe0] sm:$0xff] }
 0x375   : > { %v4880_v59 = vmul.f32 %v13901_v3, %v14289_v61  ;;  %v5126_v60 = vadd.f32 %v5094_v16, %v5054_v37  ;;  %v4768_v1 = vadd.f32 %v4736_v34, %v4696_v6  ;;  %v4881_v11 = vmul.f32 %v13901_v3, %v14295_v28  ;;  %v14411_v37 = vld [vmem:[#allocation3 + $0xda] sm:$0xff] }
 0x376   : > { %v5127_v10 = vadd.f32 %v5095_v50, %v5055_v0  ;;  %11256 = vmatprep.mubr.msk.bf16.mxu1 %vm458_vm0, %v5264_v4  ;;  %v4769_v43 = vadd.f32 %v4737_v35, %v4697_v17  ;;  %v4952_v12 = vmul.f32 %v13852_v52, %v14333_v39  ;;  %v4953_v2 = vmul.f32 %v13852_v52, %v14335_v33  ;;  %v14371_v52 = vld [vmem:[%s19000_s4 + $0x9] ss:$0 sm:$0xff]  ;;  %v14409_v35 = vld [vmem:[#allocation3 + $0xe1] sm:$0xff] }
 0x377   : > { %v5024_v22 = vmul.f32 %v13857_v44, %v14337_v53  ;;  %v5166_v62 = vmul.f32 %v13962_v15, %v5126_v60  ;;  %v4840_v25 = vadd.f32 %v4808_v23, %v4768_v1  ;;  %v5025_v46 = vmul.f32 %v13857_v44, %v14341_v21  ;;  %v14416_v17 = vld [vmem:[#allocation3 + $0xe2] sm:$0xff] }
 0x378   : > { %v5167_v47 = vmul.f32 %v13962_v15, %v5127_v10  ;;  %v4841_v36 = vadd.f32 %v4809_v30, %v4769_v43  ;;  %v5096_v51 = vmul.f32 %v13923_v7, %v14347_v8  ;;  %v5097_v20 = vmul.f32 %v13923_v7, %v14349_v24 }
 0x379   : > { %v4522_v16 = vmul.f32 %v14371_v52, %v14275_v45  ;;  %v5206_v54 = vadd.f32 %v13971_v26, %v5166_v62  ;;  %v4912_v44 = vadd.f32 %v4880_v59, %v4840_v25  ;;  %v4523_v32 = vmul.f32 %v14371_v52, %v14281_v13  ;;  %v14425_v59 = vld [vmem:[%s19000_s4 + $0xf] ss:$0 sm:$0xff] }
 0x37a   : > { %v5207_v50 = vadd.f32 %v13971_v26, %v5167_v47  ;;  %v4913_v58 = vadd.f32 %v4881_v11, %v4841_v36  ;;  %v4594_v27 = vmul.f32 %v14382_v40, %v14283_v42  ;;  %v4595_v45 = vmul.f32 %v14382_v40, %v14285_v19 }
 0x37b   : > { %v4666_v13 = vmul.f32 %v14391_v63, %v14289_v61  ;;  %v5238_v41 = vmax.f32 %v5206_v54, 0.0  ;;  %v4984_v14 = vadd.f32 %v4952_v12, %v4912_v44  ;;  %v4667_v29 = vmul.f32 %v14391_v63, %v14295_v28  ;;  %v14407_v28 = vld [vmem:[#allocation3 + $0xd9] sm:$0xff] }
 0x37c   : > { %v5239_v56 = vmax.f32 %v5207_v50, 0.0  ;;  %v4985_v38 = vadd.f32 %v4953_v2, %v4913_v58  ;;  %v4626_v42 = vadd.f32 %v4594_v27, %v4522_v16  ;;  %v4627_v49 = vadd.f32 %v4595_v45, %v4523_v32 }
 0x37d   : > { %v4738_v19 = vmul.f32 %v13863_v9, %v14333_v39  ;;  %v5056_v55 = vadd.f32 %v5024_v22, %v4984_v14  ;;  %v4739_v61 = vmul.f32 %v13863_v9, %v14335_v33  ;;  %v4810_v48 = vmul.f32 %v13868_v57, %v14337_v53  ;;  %v14465_v14 = vld [vmem:[%s19000_s4 + $0xc] ss:$0 sm:$0xff] }
 0x37e   : > { %v5265_v5 = vpack.c.bf16 %v5239_v56, %v5238_v41  ;;  %v5057_v34 = vadd.f32 %v5025_v46, %v4985_v38  ;;  %v4698_v0 = vadd.f32 %v4666_v13, %v4626_v42  ;;  %v4699_v6 = vadd.f32 %v4667_v29, %v4627_v49 }
 0x37f   : > { %v4811_v23 = vmul.f32 %v13868_v57, %v14341_v21  ;;  %v5128_v4 = vadd.f32 %v5096_v51, %v5056_v55  ;;  %v4882_v9 = vmul.f32 %v13901_v3, %v14347_v8  ;;  %v4883_v30 = vmul.f32 %v13901_v3, %v14349_v24  ;;  %v14435_v3 = vld [vmem:[%s19000_s4 + $0x10] ss:$0 sm:$0xff] }
 0x380   : > { %11257 = vmatmul.mubr.msk.bf16.gmra.mrb[40].mxu1 %vm458_vm0, %v5265_v5  ;;  %v4954_v60 = vmul.f32 %v14425_v59, %v14397_v18  ;;  %v5129_v57 = vadd.f32 %v5097_v20, %v5057_v34  ;;  %v4770_v10 = vadd.f32 %v4738_v19, %v4698_v0  ;;  %v4771_v1 = vadd.f32 %v4739_v61, %v4699_v6  ;;  %v14478_v19 = vld [vmem:[#allocation3 + $0xf8] sm:$0xff] }
 0x381   : > { %v4955_v11 = vmul.f32 %v14425_v59, %v14401_v31  ;;  %v5168_v43 = vmul.f32 %v13962_v15, %v5128_v4  ;;  %v5026_v12 = vmul.f32 %v14435_v3, %v14407_v28  ;;  %v5027_v2 = vmul.f32 %v14435_v3, %v14409_v35  ;;  %v14480_v5 = vld [vmem:[#allocation3 + $0xf1] sm:$0xff]  ;;  %v14482_v55 = vld [vmem:[#allocation3 + $0xf9] sm:$0xff] }
 0x382   : > { %v5098_v22 = vmul.f32 %v13923_v7, %v14411_v37  ;;  %v5169_v62 = vmul.f32 %v13962_v15, %v5129_v57  ;;  %v4842_v47 = vadd.f32 %v4810_v48, %v4770_v10  ;;  %v4843_v25 = vadd.f32 %v4811_v23, %v4771_v1  ;;  %v14484_v48 = vld [vmem:[#allocation3 + $0xf2] sm:$0xff]  ;;  %v14491_v6 = vld [vmem:[%s19000_s4 + $0xe] ss:$0 sm:$0xff] }
 0x383   : > { %v5099_v46 = vmul.f32 %v13923_v7, %v14416_v17  ;;  %v5208_v36 = vadd.f32 %v13971_v26, %v5168_v43  ;;  %v4524_v51 = vmul.f32 %v14371_v52, %v14333_v39  ;;  %v4525_v20 = vmul.f32 %v14371_v52, %v14335_v33 }
 0x384   : > { %v4596_v16 = vmul.f32 %v14382_v40, %v14337_v53  ;;  %v5209_v54 = vadd.f32 %v13971_v26, %v5169_v62  ;;  %v4914_v50 = vadd.f32 %v4882_v9, %v4842_v47  ;;  %v4915_v44 = vadd.f32 %v4883_v30, %v4843_v25  ;;  %v14460_v53 = vld [vmem:[#allocation3 + $0xf0] sm:$0xff]  ;;  %v14513_v47 = vld [vmem:[%s19000_s4 + $0x11] ss:$0 sm:$0xff] }
 0x385   : > { %v4597_v32 = vmul.f32 %v14382_v40, %v14341_v21  ;;  %v5240_v58 = vmax.f32 %v5208_v36, 0.0  ;;  %v4668_v27 = vmul.f32 %v14391_v63, %v14347_v8  ;;  %v4669_v39 = vmul.f32 %v14391_v63, %v14349_v24  ;;  %v14474_v24 = vld [vmem:[%s19000_s4 + $0xd] ss:$0 sm:$0xff] }
 0x386   : > { %v4628_v7 = vadd.f32 %v4596_v16, %v4524_v51  ;;  %v5241_v45 = vmax.f32 %v5209_v54, 0.0  ;;  %v4986_v33 = vadd.f32 %v4954_v60, %v4914_v50  ;;  %v4987_v13 = vadd.f32 %v4955_v11, %v4915_v44  ;;  %v14498_v60 = vld [vmem:[#allocation3 + $0xfa] sm:$0xff] }
 0x387   : > { %v4629_v41 = vadd.f32 %v4597_v32, %v4525_v20  ;;  %v4740_v21 = vmul.f32 %v14465_v14, %v14397_v18  ;;  %v4741_v8 = vmul.f32 %v14465_v14, %v14401_v31  ;;  %v4812_v29 = vmul.f32 %v14474_v24, %v14407_v28 }
 0x388   : > { %v4700_v56 = vadd.f32 %v4668_v27, %v4628_v7  ;;  %v5266_v38 = vpack.c.bf16 %v5241_v45, %v5240_v58  ;;  %v5058_v42 = vadd.f32 %v5026_v12, %v4986_v33  ;;  %v5059_v49 = vadd.f32 %v5027_v2, %v4987_v13 }
 0x389   : > { %v4701_v61 = vadd.f32 %v4669_v39, %v4629_v41  ;;  %v4813_v0 = vmul.f32 %v14474_v24, %v14409_v35  ;;  %v4884_v23 = vmul.f32 %v14491_v6, %v14411_v37  ;;  %v4885_v4 = vmul.f32 %v14491_v6, %v14416_v17 }
 0x38a   : > { %v4772_v34 = vadd.f32 %v4740_v21, %v4700_v56  ;;  %11260 = vmatprep.mubr.msk.bf16.mxu1 %vm458_vm0, %v5266_v38  ;;  %v5130_v9 = vadd.f32 %v5098_v22, %v5058_v42  ;;  %v5131_v30 = vadd.f32 %v5099_v46, %v5059_v49  ;;  %v4956_v10 = vmul.f32 %v14425_v59, %v14460_v53  ;;  %v14541_v56 = vld [vmem:[#allocation3 + $0x109] sm:$0xff] }
 0x38b   : > { %v4773_v57 = vadd.f32 %v4741_v8, %v4701_v61  ;;  %v4957_v11 = vmul.f32 %v14425_v59, %v14478_v19  ;;  %v5028_v43 = vmul.f32 %v14435_v3, %v14480_v5  ;;  %v5029_v12 = vmul.f32 %v14435_v3, %v14482_v55  ;;  %v14547_v38 = vld [vmem:[#allocation3 + $0x10a] sm:$0xff] }
 0x38c   : > { %v4844_v1 = vadd.f32 %v4812_v29, %v4772_v34  ;;  %v5170_v2 = vmul.f32 %v13962_v15, %v5130_v9  ;;  %v5171_v22 = vmul.f32 %v13962_v15, %v5131_v30  ;;  %v5100_v25 = vmul.f32 %v14513_v47, %v14484_v48  ;;  %v14545_v29 = vld [vmem:[#allocation3 + $0x111] sm:$0xff] }
 0x38d   : > { %v4845_v62 = vadd.f32 %v4813_v0, %v4773_v57  ;;  %v5101_v36 = vmul.f32 %v14513_v47, %v14498_v60  ;;  %v4526_v51 = vmul.f32 %v14371_v52, %v14397_v18  ;;  %v4527_v20 = vmul.f32 %v14371_v52, %v14401_v31  ;;  %v14554_v0 = vld [vmem:[#allocation3 + $0x112] sm:$0xff]  ;;  %v14563_v30 = vld [vmem:[%s19001_s5 + $0x1] ss:$0 sm:$0xff] }
 0x38e   : > { %v4916_v46 = vadd.f32 %v4884_v23, %v4844_v1  ;;  %v5210_v15 = vadd.f32 %v13971_v26, %v5170_v2  ;;  %v5211_v16 = vadd.f32 %v13971_v26, %v5171_v22  ;;  %v4598_v50 = vmul.f32 %v14382_v40, %v14407_v28  ;;  %v14533_v26 = vld [vmem:[#allocation3 + $0x108] sm:$0xff] }
 0x38f   : > { %v4917_v54 = vadd.f32 %v4885_v4, %v4845_v62  ;;  %v4599_v32 = vmul.f32 %v14382_v40, %v14409_v35  ;;  %v4670_v58 = vmul.f32 %v14391_v63, %v14411_v37  ;;  %v4671_v18 = vmul.f32 %v14391_v63, %v14416_v17  ;;  %v14539_v37 = vld [vmem:[#allocation3 + $0x110] sm:$0xff] }
 0x390   : > { %v4988_v44 = vadd.f32 %v4956_v10, %v4916_v46  ;;  %v5242_v7 = vmax.f32 %v5210_v15, 0.0  ;;  %v5243_v31 = vmax.f32 %v5211_v16, 0.0  ;;  %v4630_v39 = vadd.f32 %v4598_v50, %v4526_v51  ;;  %v14578_v62 = vld [vmem:[%s19002_s6 + $0x1] ss:$0 sm:$0xff] }
 0x391   : > { %v4989_v27 = vadd.f32 %v4957_v11, %v4917_v54  ;;  %v4631_v33 = vadd.f32 %v4599_v32, %v4527_v20  ;;  %v4742_v28 = vmul.f32 %v14465_v14, %v14460_v53  ;;  %v4743_v35 = vmul.f32 %v14465_v14, %v14478_v19 }
 0x392   : > { %v5060_v45 = vadd.f32 %v5028_v43, %v4988_v44  ;;  %v5267_v13 = vpack.c.bf16 %v5243_v31, %v5242_v7  ;;  %v4702_v17 = vadd.f32 %v4670_v58, %v4630_v39  ;;  %v4814_v21 = vmul.f32 %v14474_v24, %v14480_v5  ;;  %v14596_v39 = vld [vmem:[#allocation3 + $0x120] sm:$0xff] }
 0x393   : > { %v5061_v41 = vadd.f32 %v5029_v12, %v4989_v27  ;;  %v4703_v42 = vadd.f32 %v4671_v18, %v4631_v33  ;;  %v4815_v49 = vmul.f32 %v14474_v24, %v14482_v55  ;;  %v4886_v61 = vmul.f32 %v14491_v6, %v14484_v48 }
 0x394   : > { %v5132_v8 = vadd.f32 %v5100_v25, %v5060_v45  ;;  %11261 = vmatmul.mubr.msk.bf16.gmra.mrb[44].mxu1 %vm458_vm0, %v5267_v13  ;;  %v4774_v23 = vadd.f32 %v4742_v28, %v4702_v17  ;;  %v4887_v4 = vmul.f32 %v14491_v6, %v14498_v60  ;;  %v4958_v9 = vmul.f32 %v14425_v59, %v14533_v26  ;;  %v14602_v28 = vld [vmem:[#allocation3 + $0x128] sm:$0xff] }
 0x395   : > { %v5133_v34 = vadd.f32 %v5101_v36, %v5061_v41  ;;  %v4775_v10 = vadd.f32 %v4743_v35, %v4703_v42  ;;  %v4959_v1 = vmul.f32 %v14425_v59, %v14539_v37  ;;  %v5030_v11 = vmul.f32 %v14435_v3, %v14541_v56  ;;  %v14608_v41 = vld [vmem:[#allocation3 + $0x129] sm:$0xff] }
 0x396   : > { %v5172_v57 = vmul.f32 %v14563_v30, %v5132_v8  ;;  %v4846_v12 = vadd.f32 %v4814_v21, %v4774_v23  ;;  %v5031_v2 = vmul.f32 %v14435_v3, %v14545_v29  ;;  %v5102_v22 = vmul.f32 %v14513_v47, %v14547_v38  ;;  %v14610_v17 = vld [vmem:[#allocation3 + $0x122] sm:$0xff] }
 0x397   : > { %v5173_v43 = vmul.f32 %v14563_v30, %v5133_v34  ;;  %v4847_v46 = vadd.f32 %v4815_v49, %v4775_v10  ;;  %v5103_v36 = vmul.f32 %v14513_v47, %v14554_v0  ;;  %v4528_v51 = vmul.f32 %v14371_v52, %v14460_v53 }
 0x398   : > { %v5212_v25 = vadd.f32 %v14578_v62, %v5172_v57  ;;  %v4918_v15 = vadd.f32 %v4886_v61, %v4846_v12  ;;  %v4529_v16 = vmul.f32 %v14371_v52, %v14478_v19  ;;  %v4600_v54 = vmul.f32 %v14382_v40, %v14480_v5  ;;  %v14617_v61 = vld [vmem:[#allocation3 + $0x12a] sm:$0xff] }
 0x399   : > { %v5213_v20 = vadd.f32 %v14578_v62, %v5173_v43  ;;  %v4919_v44 = vadd.f32 %v4887_v4, %v4847_v46  ;;  %v4601_v32 = vmul.f32 %v14382_v40, %v14482_v55  ;;  %v4672_v58 = vmul.f32 %v14391_v63, %v14484_v48  ;;  %v14604_v48 = vld [vmem:[#allocation3 + $0x121] sm:$0xff] }
 0x39a   : > { %v5244_v50 = vmax.f32 %v5212_v25, 0.0  ;;  %v4990_v7 = vadd.f32 %v4958_v9, %v4918_v15  ;;  %v4632_v53 = vadd.f32 %v4600_v54, %v4528_v51  ;;  %v4673_v31 = vmul.f32 %v14391_v63, %v14498_v60 }
 0x39b   : > { %v5245_v18 = vmax.f32 %v5213_v20, 0.0  ;;  %v4991_v27 = vadd.f32 %v4959_v1, %v4919_v44  ;;  %v4633_v19 = vadd.f32 %v4601_v32, %v4529_v16  ;;  %v4744_v5 = vmul.f32 %v14465_v14, %v14533_v26 }
 0x39c   : > { %v4745_v45 = vmul.f32 %v14465_v14, %v14539_v37  ;;  %v5062_v33 = vadd.f32 %v5030_v11, %v4990_v7  ;;  %v4704_v35 = vadd.f32 %v4672_v58, %v4632_v53  ;;  %v4816_v60 = vmul.f32 %v14474_v24, %v14541_v56 }
 0x39d   : > { %v5268_v55 = vpack.c.bf16 %v5245_v18, %v5244_v50  ;;  %v5063_v13 = vadd.f32 %v5031_v2, %v4991_v27  ;;  %v4705_v21 = vadd.f32 %v4673_v31, %v4633_v19  ;;  %v4817_v8 = vmul.f32 %v14474_v24, %v14545_v29  ;;  %v14651_v19 = vld [vmem:[#allocation3 + $0x138] sm:$0xff] }
 0x39e   : > { %v4888_v42 = vmul.f32 %v14491_v6, %v14547_v38  ;;  %v5134_v49 = vadd.f32 %v5102_v22, %v5062_v33  ;;  %v4776_v34 = vadd.f32 %v4744_v5, %v4704_v35  ;;  %v4889_v23 = vmul.f32 %v14491_v6, %v14554_v0  ;;  %v14653_v5 = vld [vmem:[#allocation3 + $0x140] sm:$0xff] }
 0x39f   : > { %11264 = vmatprep.mubr.msk.bf16.mxu1 %vm458_vm0, %v5268_v55  ;;  %v4960_v4 = vmul.f32 %v14425_v59, %v14596_v39  ;;  %v5135_v9 = vadd.f32 %v5103_v36, %v5063_v13  ;;  %v4777_v57 = vadd.f32 %v4745_v45, %v4705_v21  ;;  %v4961_v10 = vmul.f32 %v14425_v59, %v14602_v28  ;;  %v14659_v33 = vld [vmem:[#allocation3 + $0x139] sm:$0xff]  ;;  %v14661_v35 = vld [vmem:[#allocation3 + $0x141] sm:$0xff] }
 0x3a0   : > { %v5032_v1 = vmul.f32 %v14435_v3, %v14604_v48  ;;  %v5174_v11 = vmul.f32 %v14563_v30, %v5134_v49  ;;  %v4848_v43 = vadd.f32 %v4816_v60, %v4776_v34  ;;  %v5033_v12 = vmul.f32 %v14435_v3, %v14608_v41 }
 0x3a1   : > { %v5104_v2 = vmul.f32 %v14513_v47, %v14610_v17  ;;  %v5175_v22 = vmul.f32 %v14563_v30, %v5135_v9  ;;  %v4849_v25 = vadd.f32 %v4817_v8, %v4777_v57  ;;  %v5105_v46 = vmul.f32 %v14513_v47, %v14617_v61  ;;  %v14665_v8 = vld [vmem:[#allocation3 + $0x13a] sm:$0xff] }
 0x3a2   : > { %v4530_v36 = vmul.f32 %v14371_v52, %v14533_v26  ;;  %v5214_v51 = vadd.f32 %v14578_v62, %v5174_v11  ;;  %v4920_v20 = vadd.f32 %v4888_v42, %v4848_v43  ;;  %v4531_v15 = vmul.f32 %v14371_v52, %v14539_v37  ;;  %v14667_v42 = vld [vmem:[#allocation3 + $0x142] sm:$0xff] }
 0x3a3   : > { %v4602_v16 = vmul.f32 %v14382_v40, %v14541_v56  ;;  %v5215_v54 = vadd.f32 %v14578_v62, %v5175_v22  ;;  %v4921_v50 = vadd.f32 %v4889_v23, %v4849_v25  ;;  %v4603_v44 = vmul.f32 %v14382_v40, %v14545_v29 }
 0x3a4   : > { %v4674_v32 = vmul.f32 %v14391_v63, %v14547_v38  ;;  %v5246_v58 = vmax.f32 %v5214_v51, 0.0  ;;  %v4992_v26 = vadd.f32 %v4960_v4, %v4920_v20  ;;  %v4675_v7 = vmul.f32 %v14391_v63, %v14554_v0 }
 0x3a5   : > { %v4634_v18 = vadd.f32 %v4602_v16, %v4530_v36  ;;  %v5247_v53 = vmax.f32 %v5215_v54, 0.0  ;;  %v4993_v37 = vadd.f32 %v4961_v10, %v4921_v50  ;;  %v4635_v31 = vadd.f32 %v4603_v44, %v4531_v15 }
 0x3a6   : > { %v4746_v56 = vmul.f32 %v14465_v14, %v14596_v39  ;;  %v5064_v27 = vadd.f32 %v5032_v1, %v4992_v26  ;;  %v4747_v38 = vmul.f32 %v14465_v14, %v14602_v28  ;;  %v4818_v45 = vmul.f32 %v14474_v24, %v14604_v48 }
 0x3a7   : > { %v4706_v29 = vadd.f32 %v4674_v32, %v4634_v18  ;;  %v5269_v55 = vpack.c.bf16 %v5247_v53, %v5246_v58  ;;  %v5065_v0 = vadd.f32 %v5033_v12, %v4993_v37  ;;  %v4707_v60 = vadd.f32 %v4675_v7, %v4635_v31  ;;  %v14702_v31 = vld [vmem:[#allocation3 + $0x150] sm:$0xff] }
 0x3a8   : > { %v4819_v13 = vmul.f32 %v14474_v24, %v14608_v41  ;;  %v5136_v21 = vadd.f32 %v5104_v2, %v5064_v27  ;;  %v4890_v34 = vmul.f32 %v14491_v6, %v14610_v17  ;;  %v4891_v23 = vmul.f32 %v14491_v6, %v14617_v61 }
 0x3a9   : > { %v4778_v49 = vadd.f32 %v4746_v56, %v4706_v29  ;;  %11265 = vmatmul.mubr.msk.bf16.gmra.mrb[48].mxu1 %vm458_vm0, %v5269_v55  ;;  %v5137_v4 = vadd.f32 %v5105_v46, %v5065_v0  ;;  %v4779_v9 = vadd.f32 %v4747_v38, %v4707_v60  ;;  %v4962_v57 = vmul.f32 %v14425_v59, %v14651_v19  ;;  %v14710_v29 = vld [vmem:[#allocation3 + $0x158] sm:$0xff] }
 0x3aa   : > { %v4963_v10 = vmul.f32 %v14425_v59, %v14653_v5  ;;  %v5176_v1 = vmul.f32 %v14563_v30, %v5136_v21  ;;  %v5034_v43 = vmul.f32 %v14435_v3, %v14659_v33  ;;  %v5035_v12 = vmul.f32 %v14435_v3, %v14661_v35  ;;  %v14714_v38 = vld [vmem:[#allocation3 + $0x159] sm:$0xff] }
 0x3ab   : > { %v4850_v11 = vadd.f32 %v4818_v45, %v4778_v49  ;;  %v5177_v2 = vmul.f32 %v14563_v30, %v5137_v4  ;;  %v4851_v22 = vadd.f32 %v4819_v13, %v4779_v9  ;;  %v5106_v25 = vmul.f32 %v14513_v47, %v14665_v8  ;;  %v14716_v60 = vld [vmem:[#allocation3 + $0x152] sm:$0xff] }
 0x3ac   : > { %v5107_v46 = vmul.f32 %v14513_v47, %v14667_v42  ;;  %v5216_v36 = vadd.f32 %v14578_v62, %v5176_v1  ;;  %v4532_v20 = vmul.f32 %v14371_v52, %v14596_v39  ;;  %v4533_v15 = vmul.f32 %v14371_v52, %v14602_v28 }
 0x3ad   : > { %v4922_v51 = vadd.f32 %v4890_v34, %v4850_v11  ;;  %v5217_v16 = vadd.f32 %v14578_v62, %v5177_v2  ;;  %v4923_v54 = vadd.f32 %v4891_v23, %v4851_v22  ;;  %v4604_v50 = vmul.f32 %v14382_v40, %v14604_v48  ;;  %v14725_v23 = vld [vmem:[#allocation3 + $0x15a] sm:$0xff] }
 0x3ae   : > { %v4605_v44 = vmul.f32 %v14382_v40, %v14608_v41  ;;  %v5248_v32 = vmax.f32 %v5216_v36, 0.0  ;;  %v4676_v26 = vmul.f32 %v14391_v63, %v14610_v17  ;;  %v4677_v39 = vmul.f32 %v14391_v63, %v14617_v61  ;;  %v14712_v61 = vld [vmem:[#allocation3 + $0x151] sm:$0xff] }
 0x3af   : > { %v4994_v58 = vadd.f32 %v4962_v57, %v4922_v51  ;;  %v5249_v18 = vmax.f32 %v5217_v16, 0.0  ;;  %v4995_v7 = vadd.f32 %v4963_v10, %v4923_v54  ;;  %v4636_v28 = vadd.f32 %v4604_v50, %v4532_v20 }
 0x3b0   : > { %v4637_v53 = vadd.f32 %v4605_v44, %v4533_v15  ;;  %v4748_v48 = vmul.f32 %v14465_v14, %v14651_v19  ;;  %v4749_v41 = vmul.f32 %v14465_v14, %v14653_v5  ;;  %v4820_v56 = vmul.f32 %v14474_v24, %v14659_v33 }
 0x3b1   : > { %v5066_v37 = vadd.f32 %v5034_v43, %v4994_v58  ;;  %v5270_v17 = vpack.c.bf16 %v5249_v18, %v5248_v32  ;;  %v5067_v27 = vadd.f32 %v5035_v12, %v4995_v7  ;;  %v4708_v45 = vadd.f32 %v4676_v26, %v4636_v28  ;;  %v14755_v7 = vld [vmem:[#allocation3 + $0x168] sm:$0xff] }
 0x3b2   : > { %v4709_v55 = vadd.f32 %v4677_v39, %v4637_v53  ;;  %v4821_v13 = vmul.f32 %v14474_v24, %v14661_v35  ;;  %v4892_v21 = vmul.f32 %v14491_v6, %v14665_v8  ;;  %v4893_v49 = vmul.f32 %v14491_v6, %v14667_v42 }
 0x3b3   : > { %v5138_v0 = vadd.f32 %v5106_v25, %v5066_v37  ;;  %11268 = vmatprep.mubr.msk.bf16.mxu1 %vm458_vm0, %v5270_v17  ;;  %v5139_v34 = vadd.f32 %v5107_v46, %v5067_v27  ;;  %v4780_v4 = vadd.f32 %v4748_v48, %v4708_v45  ;;  %v4964_v57 = vmul.f32 %v14425_v59, %v14702_v31  ;;  %v14769_v27 = vld [vmem:[#allocation3 + $0x16a] sm:$0xff] }
 0x3b4   : > { %v4781_v9 = vadd.f32 %v4749_v41, %v4709_v55  ;;  %v4965_v1 = vmul.f32 %v14425_v59, %v14710_v29  ;;  %v5036_v11 = vmul.f32 %v14435_v3, %v14712_v61  ;;  %v5037_v43 = vmul.f32 %v14435_v3, %v14714_v38  ;;  %v14765_v41 = vld [vmem:[#allocation3 + $0x169] sm:$0xff] }
 0x3b5   : > { %v5178_v10 = vmul.f32 %v14563_v30, %v5138_v0  ;;  %v5179_v12 = vmul.f32 %v14563_v30, %v5139_v34  ;;  %v4852_v2 = vadd.f32 %v4820_v56, %v4780_v4  ;;  %v5108_v25 = vmul.f32 %v14513_v47, %v14716_v60  ;;  %v14767_v56 = vld [vmem:[#allocation3 + $0x171] sm:$0xff] }
 0x3b6   : > { %v4853_v22 = vadd.f32 %v4821_v13, %v4781_v9  ;;  %v5109_v36 = vmul.f32 %v14513_v47, %v14725_v23  ;;  %v4534_v51 = vmul.f32 %v14371_v52, %v14651_v19  ;;  %v4535_v20 = vmul.f32 %v14371_v52, %v14653_v5  ;;  %v14778_v34 = vld [vmem:[#allocation3 + $0x172] sm:$0xff] }
 0x3b7   : > { %v5218_v46 = vadd.f32 %v14578_v62, %v5178_v10  ;;  %v5219_v15 = vadd.f32 %v14578_v62, %v5179_v12  ;;  %v4924_v16 = vadd.f32 %v4892_v21, %v4852_v2  ;;  %v4606_v50 = vmul.f32 %v14382_v40, %v14659_v33 }
 0x3b8   : > { %v4925_v54 = vadd.f32 %v4893_v49, %v4853_v22  ;;  %v4607_v32 = vmul.f32 %v14382_v40, %v14661_v35  ;;  %v4678_v58 = vmul.f32 %v14391_v63, %v14665_v8  ;;  %v4679_v19 = vmul.f32 %v14391_v63, %v14667_v42  ;;  %v14763_v42 = vld [vmem:[#allocation3 + $0x170] sm:$0xff] }
 0x3b9   : > { %v5250_v44 = vmax.f32 %v5218_v46, 0.0  ;;  %v5251_v26 = vmax.f32 %v5219_v15, 0.0  ;;  %v4996_v39 = vadd.f32 %v4964_v57, %v4924_v16  ;;  %v4638_v18 = vadd.f32 %v4606_v50, %v4534_v51 }
 0x3ba   : > { %v4997_v5 = vadd.f32 %v4965_v1, %v4925_v54  ;;  %v4639_v28 = vadd.f32 %v4607_v32, %v4535_v20  ;;  %v4750_v33 = vmul.f32 %v14465_v14, %v14702_v31  ;;  %v4751_v53 = vmul.f32 %v14465_v14, %v14710_v29 }
 0x3bb   : > { %v4822_v35 = vmul.f32 %v14474_v24, %v14712_v61  ;;  %v5271_v8 = vpack.c.bf16 %v5251_v26, %v5250_v44  ;;  %v5068_v37 = vadd.f32 %v5036_v11, %v4996_v39  ;;  %v4710_v17 = vadd.f32 %v4678_v58, %v4638_v18 }
 0x3bc   : > { %v5069_v48 = vadd.f32 %v5037_v43, %v4997_v5  ;;  %v4711_v45 = vadd.f32 %v4679_v19, %v4639_v28  ;;  %v4823_v55 = vmul.f32 %v14474_v24, %v14714_v38  ;;  %v4894_v0 = vmul.f32 %v14491_v6, %v14716_v60  ;;  %v4086_v5 = vld [vmem:[#allocation3 + $0x180] sm:$0xff] }
 0x3bd   : > { %v4895_v13 = vmul.f32 %v14491_v6, %v14725_v23  ;;  %11269 = vmatmul.mubr.msk.bf16.gmra.mrb[52].mxu1 %vm458_vm0, %v5271_v8  ;;  %v5140_v21 = vadd.f32 %v5108_v25, %v5068_v37  ;;  %v4782_v4 = vadd.f32 %v4750_v33, %v4710_v17  ;;  %v4966_v9 = vmul.f32 %v14425_v59, %v14755_v7  ;;  %v4191_v37 = vld [vmem:[#allocation3 + $0x189] sm:$0xff] }
 0x3be   : > { %v5141_v49 = vadd.f32 %v5109_v36, %v5069_v48  ;;  %v4783_v57 = vadd.f32 %v4751_v53, %v4711_v45  ;;  %v4967_v10 = vmul.f32 %v14425_v59, %v14763_v42  ;;  %v5038_v1 = vmul.f32 %v14435_v3, %v14765_v41  ;;  %v4087_v53 = vld [vmem:[#allocation3 + $0x188] sm:$0xff] }
 0x3bf   : > { %v5039_v11 = vmul.f32 %v14435_v3, %v14767_v56  ;;  %v5180_v43 = vmul.f32 %v14563_v30, %v5140_v21  ;;  %v4854_v2 = vadd.f32 %v4822_v35, %v4782_v4  ;;  %v5110_v22 = vmul.f32 %v14513_v47, %v14769_v27  ;;  %v4294_v48 = vld [vmem:[#allocation3 + $0x182] sm:$0xff] }
 0x3c0   : > { %v5181_v12 = vmul.f32 %v14563_v30, %v5141_v49  ;;  %v4855_v25 = vadd.f32 %v4823_v55, %v4783_v57  ;;  %v5111_v46 = vmul.f32 %v14513_v47, %v14778_v34  ;;  %v4536_v36 = vmul.f32 %v14371_v52, %v14702_v31 }
 0x3c1   : > { %v4537_v51 = vmul.f32 %v14371_v52, %v14710_v29  ;;  %v5220_v20 = vadd.f32 %v14578_v62, %v5180_v43  ;;  %v4926_v16 = vadd.f32 %v4894_v0, %v4854_v2  ;;  %v4608_v54 = vmul.f32 %v14382_v40, %v14712_v61 }
 0x3c2   : > { %v5221_v15 = vadd.f32 %v14578_v62, %v5181_v12  ;;  %v4927_v50 = vadd.f32 %v4895_v13, %v4855_v25  ;;  %v4609_v44 = vmul.f32 %v14382_v40, %v14714_v38  ;;  %v4680_v32 = vmul.f32 %v14391_v63, %v14716_v60  ;;  %v4190_v60 = vld [vmem:[#allocation3 + $0x181] sm:$0xff]  ;;  %v4295_v13 = vld [vmem:[#allocation3 + $0x18a] sm:$0xff] }
 0x3c3   : > { %v4681_v31 = vmul.f32 %v14391_v63, %v14725_v23  ;;  %v5252_v58 = vmax.f32 %v5220_v20, 0.0  ;;  %v4998_v19 = vadd.f32 %v4966_v9, %v4926_v16  ;;  %v4640_v26 = vadd.f32 %v4608_v54, %v4536_v36 }
 0x3c4   : > { %v5253_v29 = vmax.f32 %v5221_v15, 0.0  ;;  %v4999_v39 = vadd.f32 %v4967_v10, %v4927_v50  ;;  %v4641_v18 = vadd.f32 %v4609_v44, %v4537_v51  ;;  %v4752_v61 = vmul.f32 %v14465_v14, %v14755_v7 }
 0x3c5   : > { %v4753_v28 = vmul.f32 %v14465_v14, %v14763_v42  ;;  %v5070_v33 = vadd.f32 %v5038_v1, %v4998_v19  ;;  %v4712_v35 = vadd.f32 %v4680_v32, %v4640_v26  ;;  %v4824_v23 = vmul.f32 %v14474_v24, %v14765_v41 }
 0x3c6   : > { %v5272_v38 = vpack.c.bf16 %v5253_v29, %v5252_v58  ;;  %v5071_v8 = vadd.f32 %v5039_v11, %v4999_v39  ;;  %v4713_v17 = vadd.f32 %v4681_v31, %v4641_v18  ;;  %v4825_v45 = vmul.f32 %v14474_v24, %v14767_v56  ;;  %v4088_v39 = vld [vmem:[#allocation3 + $0x198] sm:$0xff]  ;;  %v4089_v18 = vld [vmem:[#allocation3 + $0x1a0] sm:$0xff] }
 0x3c7   : > { %v4896_v55 = vmul.f32 %v14491_v6, %v14769_v27  ;;  %v5142_v0 = vadd.f32 %v5110_v22, %v5070_v33  ;;  %v4784_v21 = vadd.f32 %v4752_v61, %v4712_v35  ;;  %v4897_v49 = vmul.f32 %v14491_v6, %v14778_v34  ;;  %v4193_v33 = vld [vmem:[#allocation3 + $0x1a1] sm:$0xff] }
 0x3c8   : > { %11272 = vmatprep.mubr.msk.bf16.mxu1 %vm458_vm0, %v5272_v38  ;;  %v4968_v4 = vmul.f32 %v14425_v59, %v4086_v5  ;;  %v5143_v9 = vadd.f32 %v5111_v46, %v5071_v8  ;;  %v4785_v57 = vadd.f32 %v4753_v28, %v4713_v17  ;;  %v4969_v10 = vmul.f32 %v14425_v59, %v4087_v53  ;;  %v4192_v38 = vld [vmem:[#allocation3 + $0x199] sm:$0xff]  ;;  %v4297_v8 = vld [vmem:[#allocation3 + $0x1a2] sm:$0xff] }
 0x3c9   : > { %v5040_v1 = vmul.f32 %v14435_v3, %v4190_v60  ;;  %v5182_v11 = vmul.f32 %v14563_v30, %v5142_v0  ;;  %v4856_v43 = vadd.f32 %v4824_v23, %v4784_v21  ;;  %v5041_v12 = vmul.f32 %v14435_v3, %v4191_v37  ;;  %v4296_v23 = vld [vmem:[#allocation3 + $0x19a] sm:$0xff] }
 0x3ca   : > { %v5112_v2 = vmul.f32 %v14513_v47, %v4294_v48  ;;  %v5183_v22 = vmul.f32 %v14563_v30, %v5143_v9  ;;  %v4857_v25 = vadd.f32 %v4825_v45, %v4785_v57  ;;  %v5113_v36 = vmul.f32 %v14513_v47, %v4295_v13 }
 0x3cb   : > { %v4538_v46 = vmul.f32 %v14371_v52, %v14755_v7  ;;  %v5222_v51 = vadd.f32 %v14578_v62, %v5182_v11  ;;  %v4928_v20 = vadd.f32 %v4896_v55, %v4856_v43  ;;  %v4539_v15 = vmul.f32 %v14371_v52, %v14763_v42  ;;  %v11984_v11 = vld [vmem:[#allocation3 + $0x20] sm:$0xff]  ;;  %v14874_v43 = vld [vmem:[%s19000_s4 + $0x5] ss:$0 sm:$0xff] }
 0x3cc   : > { %v4610_v16 = vmul.f32 %v14382_v40, %v14765_v41  ;;  %v5223_v54 = vadd.f32 %v14578_v62, %v5183_v22  ;;  %v4929_v50 = vadd.f32 %v4897_v49, %v4857_v25  ;;  %v4611_v44 = vmul.f32 %v14382_v40, %v14767_v56  ;;  %v11985_v22 = vld [vmem:[#allocation3 + $0x19] sm:$0xff]  ;;  %v11986_v25 = vld [vmem:[#allocation3 + $0x21] sm:$0xff] }
 0x3cd   : > { %v4682_v32 = vmul.f32 %v14391_v63, %v14769_v27  ;;  %v5254_v31 = vmax.f32 %v5222_v51, 0.0  ;;  %v5000_v7 = vadd.f32 %v4968_v4, %v4928_v20  ;;  %v4683_v29 = vmul.f32 %v14391_v63, %v14778_v34 }
 0x3ce   : > { %v4642_v58 = vadd.f32 %v4610_v16, %v4538_v46  ;;  %v5255_v19 = vmax.f32 %v5223_v54, 0.0  ;;  %v5001_v52 = vadd.f32 %v4969_v10, %v4929_v50  ;;  %v4643_v42 = vadd.f32 %v4611_v44, %v4539_v15  ;;  %v11983_v10 = vld [vmem:[#allocation3 + $0x18] sm:$0xff]  ;;  %v14882_v46 = vld [vmem:[%s19000_s4 + $0x6] ss:$0 sm:$0xff]  ;;  %v14889_v44 = vld [vmem:[%s19000_s4 + $0x7] ss:$0 sm:$0xff] }
 0x3cf   : > { %v4754_v41 = vmul.f32 %v14465_v14, %v4086_v5  ;;  %v5072_v26 = vadd.f32 %v5040_v1, %v5000_v7  ;;  %v4755_v40 = vmul.f32 %v14465_v14, %v4087_v53  ;;  %v4826_v56 = vmul.f32 %v14474_v24, %v4190_v60  ;;  %v19125_v15 = vld [vmem:[#allocation38_spill] sm:$0xff]  ;;  %v19126_v54 = vld [vmem:[#allocation39_spill] sm:$0xff] }
 0x3d0   : > { %v4714_v61 = vadd.f32 %v4682_v32, %v4642_v58  ;;  %v5273_v27 = vpack.c.bf16 %v5255_v19, %v5254_v31  ;;  %v5073_v28 = vadd.f32 %v5041_v12, %v5001_v52  ;;  %v4715_v35 = vadd.f32 %v4683_v29, %v4643_v42  ;;  %v11987_v7 = vld [vmem:[#allocation3 + $0x1a] sm:$0xff]  ;;  %v11988_v29 = vld [vmem:[#allocation3 + $0x22] sm:$0xff] }
 0x3d1   : > { %v4827_v63 = vmul.f32 %v14474_v24, %v4191_v37  ;;  %v5144_v34 = vadd.f32 %v5112_v2, %v5072_v26  ;;  %v4898_v5 = vmul.f32 %v14491_v6, %v4294_v48  ;;  %v4899_v45 = vmul.f32 %v14491_v6, %v4295_v13  ;;  %v14855_v24 = vld [vmem:[%s19000_s4 + $0x3] ss:$0 sm:$0xff]  ;;  %v14863_v13 = vld [vmem:[%s19000_s4 + $0x4] ss:$0 sm:$0xff] }
 0x3d2   : > { %v4786_v17 = vadd.f32 %v4754_v41, %v4714_v61  ;;  %11273 = vmatmul.mubr.msk.bf16.gmra.mrb[56].mxu1 %vm458_vm0, %v5273_v27  ;;  %v5145_v14 = vadd.f32 %v5113_v36, %v5073_v28  ;;  %v4787_v53 = vadd.f32 %v4755_v40, %v4715_v35  ;;  %v4970_v60 = vmul.f32 %v14425_v59, %v4088_v39  ;;  %v14893_v26 = vld [vmem:[#allocation3 + $0x30] sm:$0xff] }
 0x3d3   : > { %v4971_v55 = vmul.f32 %v14425_v59, %v4089_v18  ;;  %v5184_v37 = vmul.f32 %v14563_v30, %v5144_v34  ;;  %v5042_v48 = vmul.f32 %v14435_v3, %v4192_v38  ;;  %v5043_v6 = vmul.f32 %v14435_v3, %v4193_v33  ;;  %v14900_v18 = vld [vmem:[%s19000_s4 + $0x8] ss:$0 sm:$0xff]  ;;  %v14910_v34 = vld [vmem:[#allocation3 + $0x39] sm:$0xff] }
 0x3d4   : > { %v4858_v0 = vadd.f32 %v4826_v56, %v4786_v17  ;;  %v5185_v21 = vmul.f32 %v14563_v30, %v5145_v14  ;;  %v4859_v59 = vadd.f32 %v4827_v63, %v4787_v53  ;;  %v5114_v49 = vmul.f32 %v14513_v47, %v4296_v23  ;;  %v14902_v56 = vld [vmem:[#allocation3 + $0x38] sm:$0xff]  ;;  %v14926_v53 = vld [vmem:[%s19000_s4] ss:$0 sm:$0xff] }
 0x3d5   : > { %v5115_v4 = vmul.f32 %v14513_v47, %v4297_v8  ;;  %v5224_v9 = vadd.f32 %v14578_v62, %v5184_v37  ;;  %v3785_v1 = vmul.f32 %v11983_v10, %v14855_v24  ;;  %v3786_v3 = vmul.f32 %v11984_v11, %v14855_v24  ;;  %v14906_v28 = vld [vmem:[#allocation3 + $0x31] sm:$0xff] }
 0x3d6   : > { %v4930_v57 = vadd.f32 %v4898_v5, %v4858_v0  ;;  %v5225_v12 = vadd.f32 %v14578_v62, %v5185_v21  ;;  %v4931_v2 = vadd.f32 %v4899_v45, %v4859_v59  ;;  %v3889_v47 = vmul.f32 %v11985_v22, %v14863_v13  ;;  %v14915_v17 = vld [vmem:[#allocation3 + $0x32] sm:$0xff]  ;;  %v14919_v45 = vld [vmem:[#allocation3 + $0x3a] sm:$0xff]  ;;  %v14935_v21 = vld [vmem:[%s19000_s4 + $0x1] ss:$0 sm:$0xff] }
 0x3d7   : > { %v3890_v36 = vmul.f32 %v11986_v25, %v14863_v13  ;;  %v5256_v51 = vmax.f32 %v5224_v9, 0.0  ;;  %v3817_v16 = vadd.f32 %v3785_v1, %v19125_v15  ;;  %v3818_v50 = vadd.f32 %v3786_v3, %v19126_v54  ;;  %v14951_v3 = vld [vmem:[%s19001_s5] ss:$0 sm:$0xff] }
 0x3d8   : > { %v5002_v20 = vadd.f32 %v4970_v60, %v4930_v57  ;;  %v5257_v32 = vmax.f32 %v5225_v12, 0.0  ;;  %v5003_v31 = vadd.f32 %v4971_v55, %v4931_v2  ;;  %v3993_v58 = vmul.f32 %v11987_v7, %v14874_v43 }
 0x3d9   : > { %v3994_v19 = vmul.f32 %v11988_v29, %v14874_v43  ;;  %v3921_v42 = vadd.f32 %v3889_v47, %v3817_v16  ;;  %v3922_v41 = vadd.f32 %v3890_v36, %v3818_v50  ;;  %v4098_v39 = vmul.f32 %v14893_v26, %v14882_v46 }
 0x3da   : > { %v5074_v52 = vadd.f32 %v5042_v48, %v5002_v20  ;;  %v5274_v61 = vpack.c.bf16 %v5257_v32, %v5256_v51  ;;  %v5075_v40 = vadd.f32 %v5043_v6, %v5003_v31  ;;  %v4099_v27 = vmul.f32 %v14902_v56, %v14882_v46 }
 0x3db   : > { %v4202_v38 = vmul.f32 %v14906_v28, %v14889_v44  ;;  %v4025_v35 = vadd.f32 %v3993_v58, %v3921_v42  ;;  %v4026_v63 = vadd.f32 %v3994_v19, %v3922_v41  ;;  %v4203_v23 = vmul.f32 %v14910_v34, %v14889_v44 }
 0x3dc   : > { %v5146_v33 = vadd.f32 %v5114_v49, %v5074_v52  ;;  %11276 = vmatprep.mubr.msk.bf16.mxu1 %vm458_vm0, %v5274_v61  ;;  %v5147_v8 = vadd.f32 %v5115_v4, %v5075_v40  ;;  %v4306_v5 = vmul.f32 %v14915_v17, %v14900_v18  ;;  %v4307_v14 = vmul.f32 %v14919_v45, %v14900_v18  ;;  %v14942_v4 = vld [vmem:[%s19000_s4 + $0x2] ss:$0 sm:$0xff] }
 0x3dd   : > { %v3475_v60 = vmul.f32 %v14926_v53, %v11983_v10  ;;  %v4130_v37 = vadd.f32 %v4098_v39, %v4025_v35  ;;  %v4131_v0 = vadd.f32 %v4099_v27, %v4026_v63  ;;  %v3476_v48 = vmul.f32 %v14926_v53, %v11984_v11  ;;  %v11998_v39 = vld [vmem:[#allocation3 + $0x48] sm:$0xff]  ;;  %v11999_v40 = vld [vmem:[#allocation3 + $0x50] sm:$0xff] }
 0x3de   : > { %v5186_v55 = vmul.f32 %v14563_v30, %v5146_v33  ;;  %v5187_v6 = vmul.f32 %v14563_v30, %v5147_v8  ;;  %v3579_v59 = vmul.f32 %v14935_v21, %v11985_v22  ;;  %v3580_v49 = vmul.f32 %v14935_v21, %v11986_v25  ;;  %v12000_v35 = vld [vmem:[#allocation3 + $0x49] sm:$0xff] }
 0x3df   : > { %v3683_v9 = vmul.f32 %v14942_v4, %v11987_v7  ;;  %v4234_v10 = vadd.f32 %v4202_v38, %v4130_v37  ;;  %v4235_v30 = vadd.f32 %v4203_v23, %v4131_v0  ;;  %v3684_v1 = vmul.f32 %v14942_v4, %v11988_v29  ;;  %v12001_v23 = vld [vmem:[#allocation3 + $0x51] sm:$0xff] }
 0x3e0   : > { %v5226_v57 = vadd.f32 %v14578_v62, %v5186_v55  ;;  %v5227_v11 = vadd.f32 %v14578_v62, %v5187_v6  ;;  %v3611_v12 = vadd.f32 %v3579_v59, %v3475_v60  ;;  %v3612_v2 = vadd.f32 %v3580_v49, %v3476_v48  ;;  %v14960_v62 = vld [vmem:[%s19002_s6] ss:$0 sm:$0xff]  ;;  %v12003_v37 = vld [vmem:[#allocation3 + $0x52] sm:$0xff] }
 0x3e1   : > { %v3787_v22 = vmul.f32 %v14893_v26, %v14855_v24  ;;  %v4338_v25 = vadd.f32 %v4306_v5, %v4234_v10  ;;  %v4339_v36 = vadd.f32 %v4307_v14, %v4235_v30  ;;  %v3788_v51 = vmul.f32 %v14902_v56, %v14855_v24  ;;  %v12002_v60 = vld [vmem:[#allocation3 + $0x4a] sm:$0xff] }
 0x3e2   : > { %v5258_v47 = vmax.f32 %v5226_v57, 0.0  ;;  %v5259_v20 = vmax.f32 %v5227_v11, 0.0  ;;  %v3715_v15 = vadd.f32 %v3683_v9, %v3611_v12  ;;  %v3716_v16 = vadd.f32 %v3684_v1, %v3612_v2 }
 0x3e3   : > { %v3891_v54 = vmul.f32 %v14906_v28, %v14863_v13  ;;  %v4377_v50 = vmul.f32 %v14951_v3, %v4338_v25  ;;  %v4378_v32 = vmul.f32 %v14951_v3, %v4339_v36  ;;  %v3892_v31 = vmul.f32 %v14910_v34, %v14863_v13 }
 0x3e4   : > { %v3995_v7 = vmul.f32 %v14915_v17, %v14874_v43  ;;  %v5275_v58 = vpack.c.bf16 %v5259_v20, %v5258_v47  ;;  %v3819_v29 = vadd.f32 %v3787_v22, %v3715_v15  ;;  %v3820_v19 = vadd.f32 %v3788_v51, %v3716_v16  ;;  %v15000_v20 = vld [vmem:[#allocation3 + $0x60] sm:$0xff] }
 0x3e5   : > { %v3996_v52 = vmul.f32 %v14919_v45, %v14874_v43  ;;  %v4416_v42 = vadd.f32 %v14960_v62, %v4377_v50  ;;  %v4417_v41 = vadd.f32 %v14960_v62, %v4378_v32  ;;  %v4100_v61 = vmul.f32 %v11998_v39, %v14882_v46  ;;  %v15004_v50 = vld [vmem:[#allocation3 + $0x68] sm:$0xff] }
 0x3e6   : > { %v4101_v27 = vmul.f32 %v11999_v40, %v14882_v46  ;;  %11277 = vmatmul.mubr.msk.bf16.gmra.mrb[60].mxu1 %vm458_vm0, %v5275_v58  ;;  %v3923_v38 = vadd.f32 %v3891_v54, %v3819_v29  ;;  %v3924_v33 = vadd.f32 %v3892_v31, %v3820_v19  ;;  %v4204_v63 = vmul.f32 %v12000_v35, %v14889_v44  ;;  %v15008_v31 = vld [vmem:[#allocation3 + $0x61] sm:$0xff]  ;;  %v15012_v19 = vld [vmem:[#allocation3 + $0x69] sm:$0xff] }
 0x3e7   : > { %v4205_v8 = vmul.f32 %v12001_v23, %v14889_v44  ;;  %v4448_v5 = vmax.f32 %v4416_v42, 0.0  ;;  %v4449_v14 = vmax.f32 %v4417_v41, 0.0  ;;  %v4308_v55 = vmul.f32 %v12002_v60, %v14900_v18  ;;  %v15016_v42 = vld [vmem:[#allocation3 + $0x62] sm:$0xff] }
 0x3e8   : > { %v4309_v0 = vmul.f32 %v12003_v37, %v14900_v18  ;;  %v4027_v48 = vadd.f32 %v3995_v7, %v3923_v38  ;;  %v4028_v6 = vadd.f32 %v3996_v52, %v3924_v33  ;;  %v3477_v59 = vmul.f32 %v14926_v53, %v14893_v26  ;;  %v15022_v38 = vld [vmem:[#allocation3 + $0x6a] sm:$0xff] }
 0x3e9   : > { %v3478_v49 = vmul.f32 %v14926_v53, %v14902_v56  ;;  %v4480_v9 = vpack.c.bf16 %v4449_v14, %v4448_v5  ;;  %v3581_v57 = vmul.f32 %v14935_v21, %v14906_v28  ;;  %v3582_v10 = vmul.f32 %v14935_v21, %v14910_v34 }
 0x3ea   : > { %v3685_v30 = vmul.f32 %v14942_v4, %v14915_v17  ;;  %v4132_v1 = vadd.f32 %v4100_v61, %v4027_v48  ;;  %v4133_v11 = vadd.f32 %v4101_v27, %v4028_v6  ;;  %v3686_v12 = vmul.f32 %v14942_v4, %v14919_v45 }
 0x3eb   : > { %v3789_v26 = vmul.f32 %v11998_v39, %v14855_v24  ;;  %11284 = vmatprep.mubr.msk.bf16.mxu1 %vm458_vm0, %v4480_v9  ;;  %v3613_v56 = vadd.f32 %v3581_v57, %v3477_v59  ;;  %v3614_v2 = vadd.f32 %v3582_v10, %v3478_v49  ;;  %v3790_v22 = vmul.f32 %v11999_v40, %v14855_v24 }
 0x3ec   : > { %v3893_v28 = vmul.f32 %v12000_v35, %v14863_v13  ;;  %v4236_v47 = vadd.f32 %v4204_v63, %v4132_v1  ;;  %v4237_v34 = vadd.f32 %v4205_v8, %v4133_v11  ;;  %v3894_v25 = vmul.f32 %v12001_v23, %v14863_v13 }
 0x3ed   : > { %v3997_v17 = vmul.f32 %v12002_v60, %v14874_v43  ;;  %v3717_v36 = vadd.f32 %v3685_v30, %v3613_v56  ;;  %v3718_v51 = vadd.f32 %v3686_v12, %v3614_v2  ;;  %v3998_v45 = vmul.f32 %v12003_v37, %v14874_v43  ;;  %v11965_v2 = vld [vmem:[%s19003_s7 + $0x28] sm:$0xff]  }
 0x3ee   : > { %v4102_v15 = vmul.f32 %v15000_v20, %v14882_v46  ;;  %v4340_v16 = vadd.f32 %v4308_v55, %v4236_v47  ;;  %v4341_v54 = vadd.f32 %v4309_v0, %v4237_v34  ;;  %v4103_v32 = vmul.f32 %v15004_v50, %v14882_v46 }
 0x3ef   : > { %v4206_v7 = vmul.f32 %v15008_v31, %v14889_v44  ;;  %v3821_v58 = vadd.f32 %v3789_v26, %v3717_v36  ;;  %v3822_v29 = vadd.f32 %v3790_v22, %v3718_v51  ;;  %v4207_v52 = vmul.f32 %v15012_v19, %v14889_v44  ;;  %v15050_v36 = vld [vmem:[#allocation3 + $0x78] sm:$0xff] }
 0x3f0   : > { %v4310_v41 = vmul.f32 %v15016_v42, %v14900_v18  ;;  %v4379_v61 = vmul.f32 %v14951_v3, %v4340_v16  ;;  %v4380_v27 = vmul.f32 %v14951_v3, %v4341_v54  ;;  %v4311_v33 = vmul.f32 %v15022_v38, %v14900_v18  ;;  %v12012_v16 = vld [vmem:[%s19003_s7 + $0x20] sm:$0xff]  }
 0x3f1   : > { %v3479_v63 = vmul.f32 %v11998_v39, %v14926_v53  ;;  %v3925_v8 = vadd.f32 %v3893_v28, %v3821_v58  ;;  %v3926_v5 = vadd.f32 %v3894_v25, %v3822_v29  ;;  %v3480_v14 = vmul.f32 %v11999_v40, %v14926_v53  ;;  %v15061_v58 = vld [vmem:[#allocation3 + $0x79] sm:$0xff] }
 0x3f2   : > { %v3583_v55 = vmul.f32 %v12000_v35, %v14935_v21  ;;  %v4418_v0 = vadd.f32 %v14960_v62, %v4379_v61  ;;  %v4419_v48 = vadd.f32 %v14960_v62, %v4380_v27  ;;  %v3584_v6 = vmul.f32 %v12001_v23, %v14935_v21  ;;  %v15065_v61 = vld [vmem:[#allocation3 + $0x81] sm:$0xff] }
 0x3f3   : > { %v3687_v59 = vmul.f32 %v12002_v60, %v14942_v4  ;;  %v4029_v49 = vadd.f32 %v3997_v17, %v3925_v8  ;;  %v4030_v9 = vadd.f32 %v3998_v45, %v3926_v5  ;;  %v3688_v10 = vmul.f32 %v12003_v37, %v14942_v4  ;;  %v15054_v45 = vld [vmem:[#allocation3 + $0x80] sm:$0xff] }
 0x3f4   : > { %v3615_v57 = vadd.f32 %v3583_v55, %v3479_v63  ;;  %v4450_v39 = vmax.f32 %v4418_v0, 0.0  ;;  %v4451_v30 = vmax.f32 %v4419_v48, 0.0  ;;  %v3616_v1 = vadd.f32 %v3584_v6, %v3480_v14  ;;  %v15069_v63 = vld [vmem:[#allocation3 + $0x7a] sm:$0xff]  ;;  %v15073_v5 = vld [vmem:[#allocation3 + $0x82] sm:$0xff] }
 0x3f5   : > { %v3791_v40 = vmul.f32 %v15000_v20, %v14855_v24  ;;  %v4134_v35 = vadd.f32 %v4102_v15, %v4029_v49  ;;  %v4135_v11 = vadd.f32 %v4103_v32, %v4030_v9  ;;  %v3792_v26 = vmul.f32 %v15004_v50, %v14855_v24 }
 0x3f6   : > { %v3719_v12 = vadd.f32 %v3687_v59, %v3615_v57  ;;  %v4481_v23 = vpack.c.bf16 %v4451_v30, %v4450_v39  ;;  %v3720_v56 = vadd.f32 %v3688_v10, %v3616_v1  ;;  %v3895_v60 = vmul.f32 %v15008_v31, %v14863_v13 }
 0x3f7   : > { %v3896_v37 = vmul.f32 %v15012_v19, %v14863_v13  ;;  %v4238_v22 = vadd.f32 %v4206_v7, %v4134_v35  ;;  %v4239_v28 = vadd.f32 %v4207_v52, %v4135_v11  ;;  %v3999_v34 = vmul.f32 %v15016_v42, %v14874_v43 }
 0x3f8   : > { %v3823_v47 = vadd.f32 %v3791_v40, %v3719_v12  ;;  %11285 = vmatmul.mubr.msk.bf16.vlgmr.msra.gmra.mrb[32].mxu1 %vm458_vm0, %v4481_v23  ;;  %v3824_v25 = vadd.f32 %v3792_v26, %v3720_v56  ;;  %v4000_v17 = vmul.f32 %v15022_v38, %v14874_v43  ;;  %v4104_v51 = vmul.f32 %v15050_v36, %v14882_v46 }
 0x3f9   : > { %v4105_v15 = vmul.f32 %v15054_v45, %v14882_v46  ;;  %11317 = vmatpush3.bf16.msra.mxu1 %v12012_v16  ;;  %v4342_v54 = vadd.f32 %v4310_v41, %v4238_v22  ;;  %v4343_v32 = vadd.f32 %v4311_v33, %v4239_v28  ;;  %v4208_v29 = vmul.f32 %v15061_v58, %v14889_v44 }
 0x3fa   : > { %v3927_v7 = vadd.f32 %v3895_v60, %v3823_v47  ;;  %v3928_v52 = vadd.f32 %v3896_v37, %v3824_v25  ;;  %v4209_v27 = vmul.f32 %v15065_v61, %v14889_v44  ;;  %v4312_v8 = vmul.f32 %v15069_v63, %v14900_v18  ;;  %11318 = vmatprep.subr.bf16.mxu1 %v11965_v2  ;;  %v15107_v25 = vld [vmem:[#allocation3 + $0x90] sm:$0xff] }
 0x3fb   : > { %v4313_v41 = vmul.f32 %v15073_v5, %v14900_v18  ;;  %v4381_v33 = vmul.f32 %v14951_v3, %v4342_v54  ;;  %v4382_v14 = vmul.f32 %v14951_v3, %v4343_v32  ;;  %v3481_v0 = vmul.f32 %v15000_v20, %v14926_v53 }
 0x3fc   : > { %v4031_v55 = vadd.f32 %v3999_v34, %v3927_v7  ;;  %v4032_v48 = vadd.f32 %v4000_v17, %v3928_v52  ;;  %v3482_v6 = vmul.f32 %v15004_v50, %v14926_v53  ;;  %v3585_v59 = vmul.f32 %v15008_v31, %v14935_v21  ;;  %v12019_v7 = vld [vmem:[#allocation3 + $0x91] sm:$0xff] }
 0x3fd   : > { %v3586_v49 = vmul.f32 %v15012_v19, %v14935_v21  ;;  %v4420_v9 = vadd.f32 %v14960_v62, %v4381_v33  ;;  %v4421_v57 = vadd.f32 %v14960_v62, %v4382_v14  ;;  %v3689_v39 = vmul.f32 %v15016_v42, %v14942_v4  ;;  %11319 = vmatpush3.bf16.msra.mxu1 %v11965_v2  ;;  %v12022_v14 = vld [vmem:[#allocation3 + $0x9a] sm:$0xff] }
 0x3fe   : > { %v4136_v10 = vadd.f32 %v4104_v51, %v4031_v55  ;;  %v4137_v20 = vadd.f32 %v4105_v15, %v4032_v48  ;;  %v3617_v30 = vadd.f32 %v3585_v59, %v3481_v0  ;;  %v3690_v50 = vmul.f32 %v15022_v38, %v14942_v4  ;;  %v15111_v51 = vld [vmem:[#allocation3 + $0x98] sm:$0xff] }
 0x3ff   : > { %v3618_v1 = vadd.f32 %v3586_v49, %v3482_v6  ;;  %v4452_v40 = vmax.f32 %v4420_v9, 0.0  ;;  %v4453_v31 = vmax.f32 %v4421_v57, 0.0  ;;  %v3793_v19 = vmul.f32 %v15050_v36, %v14855_v24 }
 0x400   : > { %v4240_v35 = vadd.f32 %v4208_v29, %v4136_v10  ;;  %v4241_v11 = vadd.f32 %v4209_v27, %v4137_v20  ;;  %v3721_v12 = vadd.f32 %v3689_v39, %v3617_v30  ;;  %v3794_v23 = vmul.f32 %v15054_v45, %v14855_v24  ;;  %v12020_v27 = vld [vmem:[#allocation3 + $0x99] sm:$0xff] }
 0x401   : > { %v3722_v26 = vadd.f32 %v3690_v50, %v3618_v1  ;;  %v4482_v42 = vpack.c.bf16 %v4453_v31, %v4452_v40  ;;  %v3897_v60 = vmul.f32 %v15061_v58, %v14863_v13  ;;  %v3898_v38 = vmul.f32 %v15065_v61, %v14863_v13 }
 0x402   : > { %v4344_v56 = vadd.f32 %v4312_v8, %v4240_v35  ;;  %v4345_v37 = vadd.f32 %v4313_v41, %v4241_v11  ;;  %v3825_v2 = vadd.f32 %v3793_v19, %v3721_v12  ;;  %v4001_v28 = vmul.f32 %v15069_v63, %v14874_v43  ;;  %v12021_v41 = vld [vmem:[#allocation3 + $0x92] sm:$0xff] }
 0x403   : > { %v3826_v22 = vadd.f32 %v3794_v23, %v3722_v26  ;;  %11288 = vmatprep.mubr.msk.bf16.mxu1 %vm458_vm0, %v4482_v42  ;;  %v4002_v34 = vmul.f32 %v15073_v5, %v14874_v43  ;;  %v4106_v17 = vmul.f32 %v15107_v25, %v14882_v46  ;;  %v4107_v15 = vmul.f32 %v15111_v51, %v14882_v46 }
 0x404   : > { %v4383_v47 = vmul.f32 %v14951_v3, %v4344_v56  ;;  %v4384_v16 = vmul.f32 %v14951_v3, %v4345_v37  ;;  %v3929_v54 = vadd.f32 %v3897_v60, %v3825_v2  ;;  %v4210_v29 = vmul.f32 %v12019_v7, %v14889_v44  ;;  %v15147_v2 = vld [vmem:[#allocation3 + $0xb0] sm:$0xff] }
 0x405   : > { %v3930_v32 = vadd.f32 %v3898_v38, %v3826_v22  ;;  %v4211_v8 = vmul.f32 %v12020_v27, %v14889_v44  ;;  %v4314_v33 = vmul.f32 %v12021_v41, %v14900_v18  ;;  %v4315_v55 = vmul.f32 %v12022_v14, %v14900_v18  ;;  %v15143_v38 = vld [vmem:[#allocation3 + $0xa8] sm:$0xff] }
 0x406   : > { %v4422_v52 = vadd.f32 %v14960_v62, %v4383_v47  ;;  %v4423_v0 = vadd.f32 %v14960_v62, %v4384_v16  ;;  %v4033_v48 = vadd.f32 %v4001_v28, %v3929_v54  ;;  %v3483_v59 = vmul.f32 %v15050_v36, %v14926_v53 }
 0x407   : > { %v4034_v6 = vadd.f32 %v4002_v34, %v3930_v32  ;;  %v3484_v9 = vmul.f32 %v15054_v45, %v14926_v53  ;;  %v3587_v57 = vmul.f32 %v15061_v58, %v14935_v21  ;;  %v3588_v10 = vmul.f32 %v15065_v61, %v14935_v21  ;;  %v12025_v34 = vld [vmem:[#allocation3 + $0xa9] sm:$0xff] }
 0x408   : > { %v4454_v49 = vmax.f32 %v4422_v52, 0.0  ;;  %v4455_v39 = vmax.f32 %v4423_v0, 0.0  ;;  %v4138_v20 = vadd.f32 %v4106_v17, %v4033_v48  ;;  %v3691_v1 = vmul.f32 %v15069_v63, %v14942_v4 }
 0x409   : > { %v4139_v30 = vadd.f32 %v4107_v15, %v4034_v6  ;;  %v3619_v50 = vadd.f32 %v3587_v57, %v3483_v59  ;;  %v3620_v40 = vadd.f32 %v3588_v10, %v3484_v9  ;;  %v3692_v36 = vmul.f32 %v15073_v5, %v14942_v4  ;;  %v15154_v15 = vld [vmem:[#allocation3 + $0xb1] sm:$0xff] }
 0x40a   : > { %v3795_v45 = vmul.f32 %v15107_v25, %v14855_v24  ;;  %v4483_v31 = vpack.c.bf16 %v4455_v39, %v4454_v49  ;;  %v4242_v35 = vadd.f32 %v4210_v29, %v4138_v20  ;;  %v3796_v61 = vmul.f32 %v15111_v51, %v14855_v24  ;;  %v15158_v29 = vld [vmem:[#allocation3 + $0xaa] sm:$0xff] }
 0x40b   : > { %v4243_v58 = vadd.f32 %v4211_v8, %v4139_v30  ;;  %v3723_v19 = vadd.f32 %v3691_v1, %v3619_v50  ;;  %v3724_v11 = vadd.f32 %v3692_v36, %v3620_v40  ;;  %v3899_v12 = vmul.f32 %v12019_v7, %v14863_v13  ;;  %v12028_v8 = vld [vmem:[#allocation3 + $0xb2] sm:$0xff]  ;;  %v11966_v1 = vld [vmem:[%s19003_s7 + $0x30] sm:$0xff]  }
 0x40c   : > { %v3900_v63 = vmul.f32 %v12020_v27, %v14863_v13  ;;  %11289 = vmatmul.mubr.msk.bf16.gmra.mrb[36].mxu1 %vm458_vm0, %v4483_v31  ;;  %v4346_v26 = vadd.f32 %v4314_v33, %v4242_v35  ;;  %v4003_v5 = vmul.f32 %v12021_v41, %v14874_v43  ;;  %v4004_v42 = vmul.f32 %v12022_v14, %v14874_v43 }
 0x40d   : > { %v4347_v23 = vadd.f32 %v4315_v55, %v4243_v58  ;;  %v3827_v56 = vadd.f32 %v3795_v45, %v3723_v19  ;;  %v3828_v60 = vadd.f32 %v3796_v61, %v3724_v11  ;;  %v4108_v37 = vmul.f32 %v15143_v38, %v14882_v46  ;;  %11352 = vmatprep.subr.bf16.mxu1 %v11966_v1  ;;  %v15187_v11 = vld [vmem:[#allocation3 + $0xc0] sm:$0xff] }
 0x40e   : > { %v4109_v22 = vmul.f32 %v15147_v2, %v14882_v46  ;;  %v4385_v28 = vmul.f32 %v14951_v3, %v4346_v26  ;;  %v4212_v17 = vmul.f32 %v12025_v34, %v14889_v44  ;;  %v4213_v16 = vmul.f32 %v15154_v15, %v14889_v44 }
 0x40f   : > { %v4386_v47 = vmul.f32 %v14951_v3, %v4347_v23  ;;  %v3931_v54 = vadd.f32 %v3899_v12, %v3827_v56  ;;  %v3932_v32 = vadd.f32 %v3900_v63, %v3828_v60  ;;  %v4316_v52 = vmul.f32 %v15158_v29, %v14900_v18  ;;  %v15195_v60 = vld [vmem:[#allocation3 + $0xc1] sm:$0xff] }
 0x410   : > { %v4317_v33 = vmul.f32 %v12028_v8, %v14900_v18  ;;  %v4424_v55 = vadd.f32 %v14960_v62, %v4385_v28  ;;  %v3485_v48 = vmul.f32 %v15107_v25, %v14926_v53  ;;  %v3486_v6 = vmul.f32 %v15111_v51, %v14926_v53 }
 0x411   : > { %v4425_v0 = vadd.f32 %v14960_v62, %v4386_v47  ;;  %v4035_v59 = vadd.f32 %v4003_v5, %v3931_v54  ;;  %v4036_v49 = vadd.f32 %v4004_v42, %v3932_v32  ;;  %v3589_v9 = vmul.f32 %v12019_v7, %v14935_v21  ;;  %v15191_v42 = vld [vmem:[#allocation3 + $0xc8] sm:$0xff] }
 0x412   : > { %v3590_v57 = vmul.f32 %v12020_v27, %v14935_v21  ;;  %v4456_v10 = vmax.f32 %v4424_v55, 0.0  ;;  %v3693_v20 = vmul.f32 %v12021_v41, %v14942_v4  ;;  %v3694_v30 = vmul.f32 %v12022_v14, %v14942_v4  ;;  %v15203_v47 = vld [vmem:[#allocation3 + $0xc2] sm:$0xff] }
 0x413   : > { %v4457_v39 = vmax.f32 %v4425_v0, 0.0  ;;  %v4140_v25 = vadd.f32 %v4108_v37, %v4035_v59  ;;  %v4141_v50 = vadd.f32 %v4109_v22, %v4036_v49  ;;  %v3621_v40 = vadd.f32 %v3589_v9, %v3485_v48  ;;  %v15199_v22 = vld [vmem:[#allocation3 + $0xc9] sm:$0xff] }
 0x414   : > { %v3622_v51 = vadd.f32 %v3590_v57, %v3486_v6  ;;  %v3797_v7 = vmul.f32 %v15143_v38, %v14855_v24  ;;  %v3798_v27 = vmul.f32 %v15147_v2, %v14855_v24  ;;  %v3901_v45 = vmul.f32 %v12025_v34, %v14863_v13 }
 0x415   : > { %v4484_v36 = vpack.c.bf16 %v4457_v39, %v4456_v10  ;;  %v4244_v41 = vadd.f32 %v4212_v17, %v4140_v25  ;;  %v4245_v14 = vadd.f32 %v4213_v16, %v4141_v50  ;;  %v3725_v31 = vadd.f32 %v3693_v20, %v3621_v40 }
 0x416   : > { %v3726_v35 = vadd.f32 %v3694_v30, %v3622_v51  ;;  %v3902_v58 = vmul.f32 %v15154_v15, %v14863_v13  ;;  %v4005_v61 = vmul.f32 %v15158_v29, %v14874_v43  ;;  %v4006_v19 = vmul.f32 %v12028_v8, %v14874_v43 }
 0x417   : > { %11292 = vmatprep.mubr.msk.bf16.mxu1 %vm458_vm0, %v4484_v36  ;;  %v4110_v12 = vmul.f32 %v15187_v11, %v14882_v46  ;;  %v4348_v63 = vadd.f32 %v4316_v52, %v4244_v41  ;;  %v4349_v26 = vadd.f32 %v4317_v33, %v4245_v14  ;;  %v3829_v23 = vadd.f32 %v3797_v7, %v3725_v31  ;;  %v15209_v33 = vld [vmem:[#allocation3 + $0xca] sm:$0xff] }
 0x418   : > { %v3830_v5 = vadd.f32 %v3798_v27, %v3726_v35  ;;  %v4111_v56 = vmul.f32 %v15191_v42, %v14882_v46  ;;  %v4214_v37 = vmul.f32 %v15195_v60, %v14889_v44  ;;  %v4215_v28 = vmul.f32 %v15199_v22, %v14889_v44 }
 0x419   : > { %v4318_v17 = vmul.f32 %v15203_v47, %v14900_v18  ;;  %v4387_v16 = vmul.f32 %v14951_v3, %v4348_v63  ;;  %v4388_v54 = vmul.f32 %v14951_v3, %v4349_v26  ;;  %v3933_v32 = vadd.f32 %v3901_v45, %v3829_v23  ;;  %v15242_v63 = vld [vmem:[#allocation3 + $0xe0] sm:$0xff] }
 0x41a   : > { %v3934_v52 = vadd.f32 %v3902_v58, %v3830_v5  ;;  %v4319_v55 = vmul.f32 %v15209_v33, %v14900_v18  ;;  %v3487_v0 = vmul.f32 %v15143_v38, %v14926_v53  ;;  %v3488_v48 = vmul.f32 %v15147_v2, %v14926_v53  ;;  %v15238_v58 = vld [vmem:[#allocation3 + $0xd8] sm:$0xff] }
 0x41b   : > { %v3591_v6 = vmul.f32 %v12025_v34, %v14935_v21  ;;  %v4426_v59 = vadd.f32 %v14960_v62, %v4387_v16  ;;  %v4427_v49 = vadd.f32 %v14960_v62, %v4388_v54  ;;  %v4037_v9 = vadd.f32 %v4005_v61, %v3933_v32  ;;  %v15246_v23 = vld [vmem:[#allocation3 + $0xd9] sm:$0xff] }
 0x41c   : > { %v4038_v57 = vadd.f32 %v4006_v19, %v3934_v52  ;;  %v3592_v10 = vmul.f32 %v15154_v15, %v14935_v21  ;;  %v3695_v20 = vmul.f32 %v15158_v29, %v14942_v4  ;;  %v3696_v38 = vmul.f32 %v12028_v8, %v14942_v4  ;;  %v15256_v16 = vld [vmem:[#allocation3 + $0xda] sm:$0xff] }
 0x41d   : > { %v3623_v39 = vadd.f32 %v3591_v6, %v3487_v0  ;;  %v4458_v30 = vmax.f32 %v4426_v59, 0.0  ;;  %v4459_v1 = vmax.f32 %v4427_v49, 0.0  ;;  %v4142_v2 = vadd.f32 %v4110_v12, %v4037_v9 }
 0x41e   : > { %v4143_v25 = vadd.f32 %v4111_v56, %v4038_v57  ;;  %v3624_v34 = vadd.f32 %v3592_v10, %v3488_v48  ;;  %v3799_v40 = vmul.f32 %v15187_v11, %v14855_v24  ;;  %v3800_v51 = vmul.f32 %v15191_v42, %v14855_v24 }
 0x41f   : > { %v3727_v50 = vadd.f32 %v3695_v20, %v3623_v39  ;;  %v4485_v36 = vpack.c.bf16 %v4459_v1, %v4458_v30  ;;  %v4246_v15 = vadd.f32 %v4214_v37, %v4142_v2  ;;  %v3903_v29 = vmul.f32 %v15195_v60, %v14863_v13 }
 0x420   : > { %v4247_v7 = vadd.f32 %v4215_v28, %v4143_v25  ;;  %v3728_v27 = vadd.f32 %v3696_v38, %v3624_v34  ;;  %v3904_v45 = vmul.f32 %v15199_v22, %v14863_v13  ;;  %v4007_v41 = vmul.f32 %v15203_v47, %v14874_v43  ;;  %v15252_v28 = vld [vmem:[#allocation3 + $0xe1] sm:$0xff] }
 0x421   : > { %v3831_v8 = vadd.f32 %v3799_v40, %v3727_v50  ;;  %11293 = vmatmul.mubr.msk.bf16.gmra.mrb[40].mxu1 %vm458_vm0, %v4485_v36  ;;  %v4350_v14 = vadd.f32 %v4318_v17, %v4246_v15  ;;  %v4008_v35 = vmul.f32 %v15209_v33, %v14874_v43  ;;  %v4112_v61 = vmul.f32 %v15238_v58, %v14882_v46 }
 0x422   : > { %v4351_v31 = vadd.f32 %v4319_v55, %v4247_v7  ;;  %v3832_v19 = vadd.f32 %v3800_v51, %v3728_v27  ;;  %v4113_v26 = vmul.f32 %v15242_v63, %v14882_v46  ;;  %v4216_v5 = vmul.f32 %v15246_v23, %v14889_v44  ;;  %v12040_v55 = vld [vmem:[#allocation3 + $0xe2] sm:$0xff]  ;;  %v15287_v27 = vld [vmem:[#allocation3 + $0xf0] sm:$0xff] }
 0x423   : > { %v3935_v12 = vadd.f32 %v3903_v29, %v3831_v8  ;;  %v4389_v56 = vmul.f32 %v14951_v3, %v4350_v14  ;;  %v4217_v17 = vmul.f32 %v15252_v28, %v14889_v44  ;;  %v4320_v54 = vmul.f32 %v15256_v16, %v14900_v18 }
 0x424   : > { %v4390_v37 = vmul.f32 %v14951_v3, %v4351_v31  ;;  %v3936_v32 = vadd.f32 %v3904_v45, %v3832_v19  ;;  %v4321_v0 = vmul.f32 %v12040_v55, %v14900_v18  ;;  %v3489_v48 = vmul.f32 %v15187_v11, %v14926_v53  ;;  %v15292_v31 = vld [vmem:[#allocation3 + $0xf8] sm:$0xff] }
 0x425   : > { %v4039_v52 = vadd.f32 %v4007_v41, %v3935_v12  ;;  %v4428_v6 = vadd.f32 %v14960_v62, %v4389_v56  ;;  %v3490_v49 = vmul.f32 %v15191_v42, %v14926_v53  ;;  %v3593_v9 = vmul.f32 %v15195_v60, %v14935_v21  ;;  %v15296_v19 = vld [vmem:[#allocation3 + $0xf1] sm:$0xff] }
 0x426   : > { %v4429_v59 = vadd.f32 %v14960_v62, %v4390_v37  ;;  %v4040_v57 = vadd.f32 %v4008_v35, %v3936_v32  ;;  %v3594_v39 = vmul.f32 %v15199_v22, %v14935_v21  ;;  %v3697_v20 = vmul.f32 %v15203_v47, %v14942_v4  ;;  %v15304_v56 = vld [vmem:[#allocation3 + $0xf2] sm:$0xff] }
 0x427   : > { %v4144_v10 = vadd.f32 %v4112_v61, %v4039_v52  ;;  %v4460_v38 = vmax.f32 %v4428_v6, 0.0  ;;  %v3625_v30 = vadd.f32 %v3593_v9, %v3489_v48  ;;  %v3698_v1 = vmul.f32 %v15209_v33, %v14942_v4  ;;  %v12046_v52 = vld [vmem:[#allocation3 + $0xfa] sm:$0xff] }
 0x428   : > { %v4461_v11 = vmax.f32 %v4429_v59, 0.0  ;;  %v4145_v2 = vadd.f32 %v4113_v26, %v4040_v57  ;;  %v3626_v42 = vadd.f32 %v3594_v39, %v3490_v49  ;;  %v3801_v60 = vmul.f32 %v15238_v58, %v14855_v24  ;;  %v15300_v26 = vld [vmem:[#allocation3 + $0xf9] sm:$0xff] }
 0x429   : > { %v4248_v25 = vadd.f32 %v4216_v5, %v4144_v10  ;;  %v3729_v50 = vadd.f32 %v3697_v20, %v3625_v30  ;;  %v3802_v22 = vmul.f32 %v15242_v63, %v14855_v24  ;;  %v3905_v47 = vmul.f32 %v15246_v23, %v14863_v13 }
 0x42a   : > { %v4486_v34 = vpack.c.bf16 %v4461_v11, %v4460_v38  ;;  %v4249_v40 = vadd.f32 %v4217_v17, %v4145_v2  ;;  %v3730_v36 = vadd.f32 %v3698_v1, %v3626_v42  ;;  %v3906_v33 = vmul.f32 %v15252_v28, %v14863_v13 }
 0x42b   : > { %v4352_v51 = vadd.f32 %v4320_v54, %v4248_v25  ;;  %v3833_v15 = vadd.f32 %v3801_v60, %v3729_v50  ;;  %v4009_v7 = vmul.f32 %v15256_v16, %v14874_v43  ;;  %v4010_v29 = vmul.f32 %v12040_v55, %v14874_v43 }
 0x42c   : > { %11296 = vmatprep.mubr.msk.bf16.mxu1 %vm458_vm0, %v4486_v34  ;;  %v4114_v8 = vmul.f32 %v15287_v27, %v14882_v46  ;;  %v4353_v45 = vadd.f32 %v4321_v0, %v4249_v40  ;;  %v3834_v14 = vadd.f32 %v3802_v22, %v3730_v36  ;;  %v4115_v35 = vmul.f32 %v15292_v31, %v14882_v46 }
 0x42d   : > { %v4391_v41 = vmul.f32 %v14951_v3, %v4352_v51  ;;  %v3937_v61 = vadd.f32 %v3905_v47, %v3833_v15  ;;  %v4218_v12 = vmul.f32 %v15296_v19, %v14889_v44  ;;  %v4219_v5 = vmul.f32 %v15300_v26, %v14889_v44 }
 0x42e   : > { %v4322_v37 = vmul.f32 %v15304_v56, %v14900_v18  ;;  %v4392_v17 = vmul.f32 %v14951_v3, %v4353_v45  ;;  %v3938_v32 = vadd.f32 %v3906_v33, %v3834_v14  ;;  %v4323_v0 = vmul.f32 %v12046_v52, %v14900_v18  ;;  %v15335_v33 = vld [vmem:[#allocation3 + $0x108] sm:$0xff] }
 0x42f   : > { %v4430_v54 = vadd.f32 %v14960_v62, %v4391_v41  ;;  %v4041_v48 = vadd.f32 %v4009_v7, %v3937_v61  ;;  %v3491_v6 = vmul.f32 %v15238_v58, %v14926_v53  ;;  %v3492_v59 = vmul.f32 %v15242_v63, %v14926_v53  ;;  %v15339_v7 = vld [vmem:[#allocation3 + $0x110] sm:$0xff] }
 0x430   : > { %v3595_v49 = vmul.f32 %v15246_v23, %v14935_v21  ;;  %v4431_v9 = vadd.f32 %v14960_v62, %v4392_v17  ;;  %v4042_v10 = vadd.f32 %v4010_v29, %v3938_v32  ;;  %v3596_v39 = vmul.f32 %v15252_v28, %v14935_v21  ;;  %v15344_v41 = vld [vmem:[#allocation3 + $0x109] sm:$0xff] }
 0x431   : > { %v4462_v57 = vmax.f32 %v4430_v54, 0.0  ;;  %v4146_v20 = vadd.f32 %v4114_v8, %v4041_v48  ;;  %v3699_v11 = vmul.f32 %v15256_v16, %v14942_v4  ;;  %v3700_v58 = vmul.f32 %v12040_v55, %v14942_v4  ;;  %v12052_v54 = vld [vmem:[#allocation3 + $0x112] sm:$0xff] }
 0x432   : > { %v3627_v38 = vadd.f32 %v3595_v49, %v3491_v6  ;;  %v4463_v30 = vmax.f32 %v4431_v9, 0.0  ;;  %v4147_v1 = vadd.f32 %v4115_v35, %v4042_v10  ;;  %v3628_v63 = vadd.f32 %v3596_v39, %v3492_v59  ;;  %v15348_v35 = vld [vmem:[#allocation3 + $0x111] sm:$0xff] }
 0x433   : > { %v3803_v23 = vmul.f32 %v15287_v27, %v14855_v24  ;;  %v4250_v2 = vadd.f32 %v4218_v12, %v4146_v20  ;;  %v3804_v42 = vmul.f32 %v15292_v31, %v14855_v24  ;;  %v3907_v28 = vmul.f32 %v15296_v19, %v14863_v13 }
 0x434   : > { %v3731_v25 = vadd.f32 %v3699_v11, %v3627_v38  ;;  %v4487_v60 = vpack.c.bf16 %v4463_v30, %v4462_v57  ;;  %v4251_v34 = vadd.f32 %v4219_v5, %v4147_v1  ;;  %v3732_v50 = vadd.f32 %v3700_v58, %v3628_v63 }
 0x435   : > { %v3908_v16 = vmul.f32 %v15300_v26, %v14863_v13  ;;  %v4354_v55 = vadd.f32 %v4322_v37, %v4250_v2  ;;  %v4011_v47 = vmul.f32 %v15304_v56, %v14874_v43  ;;  %v4012_v40 = vmul.f32 %v12046_v52, %v14874_v43  ;;  %v12051_v37 = vld [vmem:[#allocation3 + $0x10a] sm:$0xff] }
 0x436   : > { %v3835_v22 = vadd.f32 %v3803_v23, %v3731_v25  ;;  %11297 = vmatmul.mubr.msk.bf16.gmra.mrb[44].mxu1 %vm458_vm0, %v4487_v60  ;;  %v4355_v51 = vadd.f32 %v4323_v0, %v4251_v34  ;;  %v3836_v36 = vadd.f32 %v3804_v42, %v3732_v50  ;;  %v4116_v15 = vmul.f32 %v15335_v33, %v14882_v46 }
 0x437   : > { %v4117_v29 = vmul.f32 %v15339_v7, %v14882_v46  ;;  %v4393_v8 = vmul.f32 %v14951_v3, %v4354_v55  ;;  %v4220_v14 = vmul.f32 %v15344_v41, %v14889_v44  ;;  %v4221_v61 = vmul.f32 %v15348_v35, %v14889_v44  ;;  %v15379_v55 = vld [vmem:[#allocation3 + $0x120] sm:$0xff] }
 0x438   : > { %v3939_v45 = vadd.f32 %v3907_v28, %v3835_v22  ;;  %v4394_v12 = vmul.f32 %v14951_v3, %v4355_v51  ;;  %v3940_v5 = vadd.f32 %v3908_v16, %v3836_v36  ;;  %v4324_v17 = vmul.f32 %v12051_v37, %v14900_v18  ;;  %v15385_v36 = vld [vmem:[#allocation3 + $0x121] sm:$0xff] }
 0x439   : > { %v4325_v32 = vmul.f32 %v12052_v54, %v14900_v18  ;;  %v4432_v0 = vadd.f32 %v14960_v62, %v4393_v8  ;;  %v3493_v6 = vmul.f32 %v15287_v27, %v14926_v53  ;;  %v3494_v59 = vmul.f32 %v15292_v31, %v14926_v53 }
 0x43a   : > { %v4043_v48 = vadd.f32 %v4011_v47, %v3939_v45  ;;  %v4433_v49 = vadd.f32 %v14960_v62, %v4394_v12  ;;  %v4044_v9 = vadd.f32 %v4012_v40, %v3940_v5  ;;  %v3597_v57 = vmul.f32 %v15296_v19, %v14935_v21  ;;  %v12054_v40 = vld [vmem:[#allocation3 + $0x128] sm:$0xff] }
 0x43b   : > { %v3598_v10 = vmul.f32 %v15300_v26, %v14935_v21  ;;  %v4464_v39 = vmax.f32 %v4432_v0, 0.0  ;;  %v3701_v38 = vmul.f32 %v15304_v56, %v14942_v4  ;;  %v3702_v11 = vmul.f32 %v12046_v52, %v14942_v4  ;;  %v12057_v12 = vld [vmem:[#allocation3 + $0x122] sm:$0xff] }
 0x43c   : > { %v4148_v20 = vadd.f32 %v4116_v15, %v4043_v48  ;;  %v4465_v27 = vmax.f32 %v4433_v49, 0.0  ;;  %v4149_v58 = vadd.f32 %v4117_v29, %v4044_v9  ;;  %v3629_v30 = vadd.f32 %v3597_v57, %v3493_v6  ;;  %v15389_v29 = vld [vmem:[#allocation3 + $0x129] sm:$0xff] }
 0x43d   : > { %v3630_v31 = vadd.f32 %v3598_v10, %v3494_v59  ;;  %v3805_v63 = vmul.f32 %v15335_v33, %v14855_v24  ;;  %v3806_v19 = vmul.f32 %v15339_v7, %v14855_v24  ;;  %v3909_v26 = vmul.f32 %v15344_v41, %v14863_v13 }
 0x43e   : > { %v4252_v1 = vadd.f32 %v4220_v14, %v4148_v20  ;;  %v4488_v23 = vpack.c.bf16 %v4465_v27, %v4464_v39  ;;  %v4253_v2 = vadd.f32 %v4221_v61, %v4149_v58  ;;  %v3733_v25 = vadd.f32 %v3701_v38, %v3629_v30 }
 0x43f   : > { %v3734_v56 = vadd.f32 %v3702_v11, %v3630_v31  ;;  %v3910_v52 = vmul.f32 %v15348_v35, %v14863_v13  ;;  %v4013_v28 = vmul.f32 %v12051_v37, %v14874_v43  ;;  %v4014_v60 = vmul.f32 %v12052_v54, %v14874_v43 }
 0x440   : > { %v4356_v42 = vadd.f32 %v4324_v17, %v4252_v1  ;;  %11300 = vmatprep.mubr.msk.bf16.mxu1 %vm458_vm0, %v4488_v23  ;;  %v4357_v34 = vadd.f32 %v4325_v32, %v4253_v2  ;;  %v3837_v50 = vadd.f32 %v3805_v63, %v3733_v25  ;;  %v4118_v22 = vmul.f32 %v15379_v55, %v14882_v46  ;;  %v12058_v32 = vld [vmem:[#allocation3 + $0x12a] sm:$0xff] }
 0x441   : > { %v3838_v16 = vadd.f32 %v3806_v19, %v3734_v56  ;;  %v4119_v51 = vmul.f32 %v12054_v40, %v14882_v46  ;;  %v4222_v15 = vmul.f32 %v15385_v36, %v14889_v44  ;;  %v4223_v8 = vmul.f32 %v15389_v29, %v14889_v44  ;;  %v15418_v56 = vld [vmem:[#allocation3 + $0x138] sm:$0xff] }
 0x442   : > { %v4395_v47 = vmul.f32 %v14951_v3, %v4356_v42  ;;  %v4396_v45 = vmul.f32 %v14951_v3, %v4357_v34  ;;  %v3941_v14 = vadd.f32 %v3909_v26, %v3837_v50  ;;  %v4326_v5 = vmul.f32 %v12057_v12, %v14900_v18  ;;  %v15430_v34 = vld [vmem:[#allocation3 + $0x141] sm:$0xff] }
 0x443   : > { %v3942_v61 = vadd.f32 %v3910_v52, %v3838_v16  ;;  %v4327_v0 = vmul.f32 %v12058_v32, %v14900_v18  ;;  %v3495_v48 = vmul.f32 %v15335_v33, %v14926_v53  ;;  %v3496_v6 = vmul.f32 %v15339_v7, %v14926_v53 }
 0x444   : > { %v4434_v17 = vadd.f32 %v14960_v62, %v4395_v47  ;;  %v4435_v59 = vadd.f32 %v14960_v62, %v4396_v45  ;;  %v4045_v49 = vadd.f32 %v4013_v28, %v3941_v14  ;;  %v3599_v57 = vmul.f32 %v15344_v41, %v14935_v21  ;;  %v15422_v28 = vld [vmem:[#allocation3 + $0x140] sm:$0xff] }
 0x445   : > { %v4046_v9 = vadd.f32 %v4014_v60, %v3942_v61  ;;  %v3600_v39 = vmul.f32 %v15348_v35, %v14935_v21  ;;  %v3703_v20 = vmul.f32 %v12051_v37, %v14942_v4  ;;  %v3704_v38 = vmul.f32 %v12052_v54, %v14942_v4  ;;  %v15426_v60 = vld [vmem:[#allocation3 + $0x139] sm:$0xff] }
 0x446   : > { %v4466_v10 = vmax.f32 %v4434_v17, 0.0  ;;  %v4467_v11 = vmax.f32 %v4435_v59, 0.0  ;;  %v4150_v33 = vadd.f32 %v4118_v22, %v4045_v49  ;;  %v3631_v58 = vadd.f32 %v3599_v57, %v3495_v48 }
 0x447   : > { %v4151_v27 = vadd.f32 %v4119_v51, %v4046_v9  ;;  %v3632_v7 = vadd.f32 %v3600_v39, %v3496_v6  ;;  %v3807_v30 = vmul.f32 %v15379_v55, %v14855_v24  ;;  %v3808_v31 = vmul.f32 %v12054_v40, %v14855_v24  ;;  %v15436_v51 = vld [vmem:[#allocation3 + $0x13a] sm:$0xff] }
 0x448   : > { %v3911_v41 = vmul.f32 %v15385_v36, %v14863_v13  ;;  %v4489_v1 = vpack.c.bf16 %v4467_v11, %v4466_v10  ;;  %v4254_v63 = vadd.f32 %v4222_v15, %v4150_v33  ;;  %v3735_v19 = vadd.f32 %v3703_v20, %v3631_v58  ;;  %v15458_v10 = vld [vmem:[%s19000_s4 + $0x3] ss:$0 sm:$0xff] }
 0x449   : > { %v4255_v35 = vadd.f32 %v4223_v8, %v4151_v27  ;;  %v3736_v37 = vadd.f32 %v3704_v38, %v3632_v7  ;;  %v3912_v54 = vmul.f32 %v15389_v29, %v14863_v13  ;;  %v4015_v26 = vmul.f32 %v12057_v12, %v14874_v43  ;;  %v15440_v8 = vld [vmem:[#allocation3 + $0x142] sm:$0xff]  ;;  %v15476_v27 = vld [vmem:[%s19000_s4 + $0x5] ss:$0 sm:$0xff] }
 0x44a   : > { %v4016_v23 = vmul.f32 %v12058_v32, %v14874_v43  ;;  %11301 = vmatmul.mubr.msk.bf16.gmra.mrb[48].mxu1 %vm458_vm0, %v4489_v1  ;;  %v4358_v2 = vadd.f32 %v4326_v5, %v4254_v63  ;;  %v3839_v24 = vadd.f32 %v3807_v30, %v3735_v19  ;;  %v4120_v42 = vmul.f32 %v15418_v56, %v14882_v46  ;;  %v15488_v1 = vld [vmem:[%s19000_s4 + $0x6] ss:$0 sm:$0xff] }
 0x44b   : > { %v4359_v25 = vadd.f32 %v4327_v0, %v4255_v35  ;;  %v3840_v52 = vadd.f32 %v3808_v31, %v3736_v37  ;;  %v4121_v13 = vmul.f32 %v15422_v28, %v14882_v46  ;;  %v4224_v43 = vmul.f32 %v15426_v60, %v14889_v44  ;;  %v15492_v37 = vld [vmem:[#allocation3 + $0x158] sm:$0xff] }
 0x44c   : > { %v4225_v50 = vmul.f32 %v15430_v34, %v14889_v44  ;;  %v4397_v16 = vmul.f32 %v14951_v3, %v4358_v2  ;;  %v3943_v47 = vadd.f32 %v3911_v41, %v3839_v24  ;;  %v4328_v46 = vmul.f32 %v15436_v51, %v14900_v18  ;;  %v15483_v41 = vld [vmem:[#allocation3 + $0x150] sm:$0xff] }
 0x44d   : > { %v4398_v22 = vmul.f32 %v14951_v3, %v4359_v25  ;;  %v3944_v15 = vadd.f32 %v3912_v54, %v3840_v52  ;;  %v4329_v45 = vmul.f32 %v15440_v8, %v14900_v18  ;;  %v3497_v14 = vmul.f32 %v15379_v55, %v14926_v53 }
 0x44e   : > { %v3498_v44 = vmul.f32 %v12054_v40, %v14926_v53  ;;  %v4436_v61 = vadd.f32 %v14960_v62, %v4397_v16  ;;  %v4047_v17 = vadd.f32 %v4015_v26, %v3943_v47  ;;  %v3601_v0 = vmul.f32 %v15385_v36, %v14935_v21  ;;  %v15496_v26 = vld [vmem:[#allocation3 + $0x151] sm:$0xff]  ;;  %v15520_v47 = vld [vmem:[#allocation3 + $0x15a] sm:$0xff] }
 0x44f   : > { %v4437_v5 = vadd.f32 %v14960_v62, %v4398_v22  ;;  %v4048_v48 = vadd.f32 %v4016_v23, %v3944_v15  ;;  %v3602_v6 = vmul.f32 %v15389_v29, %v14935_v21  ;;  %v3705_v59 = vmul.f32 %v12057_v12, %v14942_v4  ;;  %v15501_v23 = vld [vmem:[%s19000_s4 + $0x7] ss:$0 sm:$0xff]  ;;  %v15527_v15 = vld [vmem:[%s19000_s4] ss:$0 sm:$0xff] }
 0x450   : > { %v3706_v18 = vmul.f32 %v12058_v32, %v14942_v4  ;;  %v4468_v49 = vmax.f32 %v4436_v61, 0.0  ;;  %v4152_v9 = vadd.f32 %v4120_v42, %v4047_v17  ;;  %v3633_v53 = vadd.f32 %v3601_v0, %v3497_v14  ;;  %v15467_v32 = vld [vmem:[%s19000_s4 + $0x4] ss:$0 sm:$0xff]  ;;  %v15506_v42 = vld [vmem:[#allocation3 + $0x159] sm:$0xff]  ;;  %v15540_v0 = vld [vmem:[%s19000_s4 + $0x1] ss:$0 sm:$0xff] }
 0x451   : > { %v4469_v55 = vmax.f32 %v4437_v5, 0.0  ;;  %v4153_v40 = vadd.f32 %v4121_v13, %v4048_v48  ;;  %v3634_v57 = vadd.f32 %v3602_v6, %v3498_v44  ;;  %v3809_v36 = vmul.f32 %v15458_v10, %v15418_v56  ;;  %v15510_v13 = vld [vmem:[#allocation3 + $0x152] sm:$0xff] }
 0x452   : > { %v3810_v29 = vmul.f32 %v15458_v10, %v15422_v28  ;;  %v4256_v39 = vadd.f32 %v4224_v43, %v4152_v9  ;;  %v3737_v4 = vadd.f32 %v3705_v59, %v3633_v53  ;;  %v3913_v20 = vmul.f32 %v15467_v32, %v15426_v60  ;;  %v15515_v43 = vld [vmem:[%s19000_s4 + $0x8] ss:$0 sm:$0xff]  ;;  %v15547_v48 = vld [vmem:[%s19000_s4 + $0x2] ss:$0 sm:$0xff] }
 0x453   : > { %v4490_v12 = vpack.c.bf16 %v4469_v55, %v4468_v49  ;;  %v4257_v38 = vadd.f32 %v4225_v50, %v4153_v40  ;;  %v3738_v11 = vadd.f32 %v3706_v18, %v3634_v57  ;;  %v3914_v33 = vmul.f32 %v15467_v32, %v15430_v34 }
 0x454   : > { %v4017_v58 = vmul.f32 %v15476_v27, %v15436_v51  ;;  %v4360_v7 = vadd.f32 %v4328_v46, %v4256_v39  ;;  %v3841_v30 = vadd.f32 %v3809_v36, %v3737_v4  ;;  %v4018_v31 = vmul.f32 %v15476_v27, %v15440_v8 }
 0x455   : > { %11304 = vmatprep.mubr.msk.bf16.mxu1 %vm458_vm0, %v4490_v12  ;;  %v4122_v63 = vmul.f32 %v15488_v1, %v15483_v41  ;;  %v4361_v35 = vadd.f32 %v4329_v45, %v4257_v38  ;;  %v3842_v19 = vadd.f32 %v3810_v29, %v3738_v11  ;;  %v4123_v54 = vmul.f32 %v15492_v37, %v15488_v1  ;;  %v15566_v11 = vld [vmem:[#allocation3 + $0x168] sm:$0xff] }
 0x456   : > { %v4226_v2 = vmul.f32 %v15501_v23, %v15496_v26  ;;  %v4399_v25 = vmul.f32 %v14951_v3, %v4360_v7  ;;  %v3945_v24 = vadd.f32 %v3913_v20, %v3841_v30  ;;  %v4227_v52 = vmul.f32 %v15506_v42, %v15501_v23  ;;  %v15577_v30 = vld [vmem:[%s19001_s5] ss:$0 sm:$0xff] }
 0x457   : > { %v4330_v50 = vmul.f32 %v15515_v43, %v15510_v13  ;;  %v4400_v16 = vmul.f32 %v14951_v3, %v4361_v35  ;;  %v3946_v22 = vadd.f32 %v3914_v33, %v3842_v19  ;;  %v4331_v46 = vmul.f32 %v15520_v47, %v15515_v43  ;;  %v15580_v35 = vld [vmem:[#allocation3 + $0x169] sm:$0xff] }
 0x458   : > { %v3499_v45 = vmul.f32 %v15527_v15, %v15418_v56  ;;  %v4438_v14 = vadd.f32 %v14960_v62, %v4399_v25  ;;  %v4049_v44 = vadd.f32 %v4017_v58, %v3945_v24  ;;  %v3500_v3 = vmul.f32 %v15527_v15, %v15422_v28  ;;  %v15570_v58 = vld [vmem:[#allocation3 + $0x170] sm:$0xff] }
 0x459   : > { %v3603_v61 = vmul.f32 %v15426_v60, %v14935_v21  ;;  %v4439_v5 = vadd.f32 %v14960_v62, %v4400_v16  ;;  %v4050_v17 = vadd.f32 %v4018_v31, %v3946_v22  ;;  %v3604_v56 = vmul.f32 %v15540_v0, %v15430_v34  ;;  %v12086_v16 = vld [vmem:[#allocation3 + $0x172] sm:$0xff] }
 0x45a   : > { %v3707_v28 = vmul.f32 %v15547_v48, %v15436_v51  ;;  %v4470_v21 = vmax.f32 %v4438_v14, 0.0  ;;  %v4154_v60 = vadd.f32 %v4122_v63, %v4049_v44  ;;  %v3708_v6 = vmul.f32 %v15547_v48, %v15440_v8 }
 0x45b   : > { %v3635_v62 = vadd.f32 %v3603_v61, %v3499_v45  ;;  %v4471_v59 = vmax.f32 %v4439_v5, 0.0  ;;  %v4155_v18 = vadd.f32 %v4123_v54, %v4050_v17  ;;  %v3636_v49 = vadd.f32 %v3604_v56, %v3500_v3  ;;  %v15584_v54 = vld [vmem:[#allocation3 + $0x171] sm:$0xff] }
 0x45c   : > { %v3811_v34 = vmul.f32 %v15483_v41, %v15458_v10  ;;  %v4258_v55 = vadd.f32 %v4226_v2, %v4154_v60  ;;  %v3812_v53 = vmul.f32 %v15492_v37, %v15458_v10  ;;  %v3915_v51 = vmul.f32 %v15496_v26, %v15467_v32 }
 0x45d   : > { %v3739_v9 = vadd.f32 %v3707_v28, %v3635_v62  ;;  %v4491_v40 = vpack.c.bf16 %v4471_v59, %v4470_v21  ;;  %v4259_v57 = vadd.f32 %v4227_v52, %v4155_v18  ;;  %v3740_v36 = vadd.f32 %v3708_v6, %v3636_v49  ;;  %v12085_v52 = vld [vmem:[#allocation3 + $0x16a] sm:$0xff] }
 0x45e   : > { %v3916_v8 = vmul.f32 %v15506_v42, %v15467_v32  ;;  %v4362_v29 = vadd.f32 %v4330_v50, %v4258_v55  ;;  %v4019_v39 = vmul.f32 %v15510_v13, %v15476_v27  ;;  %v4020_v4 = vmul.f32 %v15520_v47, %v15476_v27 }
 0x45f   : > { %v3843_v12 = vadd.f32 %v3811_v34, %v3739_v9  ;;  %11305 = vmatmul.mubr.msk.bf16.gmra.mrb[52].mxu1 %vm458_vm0, %v4491_v40  ;;  %v4363_v20 = vadd.f32 %v4331_v46, %v4259_v57  ;;  %v3844_v38 = vadd.f32 %v3812_v53, %v3740_v36  ;;  %v4124_v33 = vmul.f32 %v15566_v11, %v15488_v1  ;;  %v15594_v46 = vld [vmem:[%s19002_s6] ss:$0 sm:$0xff] }
 0x460   : > { %v4125_v7 = vmul.f32 %v15570_v58, %v15488_v1  ;;  %v4401_v31 = vmul.f32 %v15577_v30, %v4362_v29  ;;  %v4228_v19 = vmul.f32 %v15580_v35, %v15501_v23  ;;  %v4229_v2 = vmul.f32 %v15584_v54, %v15501_v23  ;;  %v12088_v29 = vld [vmem:[#allocation3 + $0x180] sm:$0xff] }
 0x461   : > { %v3947_v63 = vadd.f32 %v3915_v51, %v3843_v12  ;;  %v4402_v25 = vmul.f32 %v15577_v30, %v4363_v20  ;;  %v3948_v24 = vadd.f32 %v3916_v8, %v3844_v38  ;;  %v4332_v50 = vmul.f32 %v12085_v52, %v15515_v43  ;;  %v12090_v38 = vld [vmem:[#allocation3 + $0x181] sm:$0xff] }
 0x462   : > { %v4333_v22 = vmul.f32 %v12086_v16, %v15515_v43  ;;  %v4440_v45 = vadd.f32 %v15594_v46, %v4401_v31  ;;  %v3501_v44 = vmul.f32 %v15527_v15, %v15483_v41  ;;  %v3502_v3 = vmul.f32 %v15527_v15, %v15492_v37 }
 0x463   : > { %v4051_v14 = vadd.f32 %v4019_v39, %v3947_v63  ;;  %v4441_v61 = vadd.f32 %v15594_v46, %v4402_v25  ;;  %v4052_v5 = vadd.f32 %v4020_v4, %v3948_v24  ;;  %v3605_v17 = vmul.f32 %v15540_v0, %v15496_v26  ;;  %v12089_v4 = vld [vmem:[#allocation3 + $0x188] sm:$0xff] }
 0x464   : > { %v3606_v56 = vmul.f32 %v15540_v0, %v15506_v42  ;;  %v4472_v28 = vmax.f32 %v4440_v45, 0.0  ;;  %v3709_v60 = vmul.f32 %v15547_v48, %v15510_v13  ;;  %v3710_v41 = vmul.f32 %v15547_v48, %v15520_v47  ;;  %v12092_v25 = vld [vmem:[#allocation3 + $0x182] sm:$0xff] }
 0x465   : > { %v4156_v21 = vadd.f32 %v4124_v33, %v4051_v14  ;;  %v4473_v62 = vmax.f32 %v4441_v61, 0.0  ;;  %v4157_v6 = vadd.f32 %v4125_v7, %v4052_v5  ;;  %v3637_v37 = vadd.f32 %v3605_v17, %v3501_v44  ;;  %v12091_v7 = vld [vmem:[#allocation3 + $0x189] sm:$0xff] }
 0x466   : > { %v3638_v59 = vadd.f32 %v3606_v56, %v3502_v3  ;;  %v3813_v49 = vmul.f32 %v15566_v11, %v15458_v10  ;;  %v3814_v26 = vmul.f32 %v15570_v58, %v15458_v10  ;;  %v3917_v42 = vmul.f32 %v15580_v35, %v15467_v32 }
 0x467   : > { %v4260_v18 = vadd.f32 %v4228_v19, %v4156_v21  ;;  %v4492_v34 = vpack.c.bf16 %v4473_v62, %v4472_v28  ;;  %v4261_v55 = vadd.f32 %v4229_v2, %v4157_v6  ;;  %v3741_v13 = vadd.f32 %v3709_v60, %v3637_v37 }
 0x468   : > { %v3742_v9 = vadd.f32 %v3710_v41, %v3638_v59  ;;  %v3918_v47 = vmul.f32 %v15584_v54, %v15467_v32  ;;  %v4021_v51 = vmul.f32 %v12085_v52, %v15476_v27  ;;  %v4022_v40 = vmul.f32 %v12086_v16, %v15476_v27 }
 0x469   : > { %v4364_v53 = vadd.f32 %v4332_v50, %v4260_v18  ;;  %11308 = vmatprep.mubr.msk.bf16.mxu1 %vm458_vm0, %v4492_v34  ;;  %v4365_v57 = vadd.f32 %v4333_v22, %v4261_v55  ;;  %v3845_v36 = vadd.f32 %v3813_v49, %v3741_v13  ;;  %v4126_v12 = vmul.f32 %v12088_v29, %v15488_v1  ;;  %v12093_v22 = vld [vmem:[#allocation3 + $0x18a] sm:$0xff]  ;;  %v12094_v55 = vld [vmem:[#allocation3 + $0x198] sm:$0xff]  ;;  %v15652_v13 = vld [vmem:[%s19000_s4 + $0x12] ss:$0 sm:$0xff] }
 0x46a   : > { %v3846_v8 = vadd.f32 %v3814_v26, %v3742_v9  ;;  %v4127_v20 = vmul.f32 %v12089_v4, %v15488_v1  ;;  %v4230_v33 = vmul.f32 %v12090_v38, %v15501_v23  ;;  %v4231_v31 = vmul.f32 %v12091_v7, %v15501_v23 }
 0x46b   : > { %v4403_v39 = vmul.f32 %v15577_v30, %v4364_v53  ;;  %v4404_v63 = vmul.f32 %v15577_v30, %v4365_v57  ;;  %v3949_v19 = vadd.f32 %v3917_v42, %v3845_v36  ;;  %v4334_v24 = vmul.f32 %v12092_v25, %v15515_v43  ;;  %v12095_v53 = vld [vmem:[#allocation3 + $0x1a0] sm:$0xff] }
 0x46c   : > { %v3950_v2 = vadd.f32 %v3918_v47, %v3846_v8  ;;  %v4335_v45 = vmul.f32 %v12093_v22, %v15515_v43  ;;  %v3503_v14 = vmul.f32 %v15566_v11, %v15527_v15  ;;  %v3504_v44 = vmul.f32 %v15570_v58, %v15527_v15  ;;  %v12096_v47 = vld [vmem:[#allocation3 + $0x199] sm:$0xff]  ;;  %v15660_v57 = vld [vmem:[%s19000_s4 + $0x13] ss:$0 sm:$0xff] }
 0x46d   : > { %v4442_v50 = vadd.f32 %v15594_v46, %v4403_v39  ;;  %v4443_v3 = vadd.f32 %v15594_v46, %v4404_v63  ;;  %v4053_v61 = vadd.f32 %v4021_v51, %v3949_v19  ;;  %v3607_v17 = vmul.f32 %v15580_v35, %v15540_v0  ;;  %v12097_v51 = vld [vmem:[#allocation3 + $0x1a1] sm:$0xff] }
 0x46e   : > { %v4054_v5 = vadd.f32 %v4022_v40, %v3950_v2  ;;  %v3608_v28 = vmul.f32 %v15584_v54, %v15540_v0  ;;  %v3711_v21 = vmul.f32 %v12085_v52, %v15547_v48  ;;  %v3712_v60 = vmul.f32 %v12086_v16, %v15547_v48 }
 0x46f   : > { %v4474_v56 = vmax.f32 %v4442_v50, 0.0  ;;  %v4475_v41 = vmax.f32 %v4443_v3, 0.0  ;;  %v4158_v11 = vadd.f32 %v4126_v12, %v4053_v61  ;;  %v3639_v6 = vadd.f32 %v3607_v17, %v3503_v14  ;;  %v12098_v12 = vld [vmem:[#allocation3 + $0x19a] sm:$0xff]  ;;  %v15679_v50 = vld [vmem:[%s19000_s4 + $0x15] ss:$0 sm:$0xff]  ;;  %v12105_v3 = vld [vmem:[#allocation3 + $0xa] sm:$0xff] }
 0x470   : > { %v4159_v62 = vadd.f32 %v4127_v20, %v4054_v5  ;;  %v3640_v15 = vadd.f32 %v3608_v28, %v3504_v44  ;;  %v3815_v58 = vmul.f32 %v12088_v29, %v15458_v10  ;;  %v3816_v37 = vmul.f32 %v12089_v4, %v15458_v10  ;;  %v12104_v14 = vld [vmem:[#allocation3 + $0x2] sm:$0xff] }
 0x471   : > { %v3919_v59 = vmul.f32 %v12090_v38, %v15467_v32  ;;  %v4493_v35 = vpack.c.bf16 %v4475_v41, %v4474_v56  ;;  %v4262_v18 = vadd.f32 %v4230_v33, %v4158_v11  ;;  %v3743_v26 = vadd.f32 %v3711_v21, %v3639_v6  ;;  %v12100_v38 = vld [vmem:[#allocation3] sm:$0xff] }
 0x472   : > { %v4263_v49 = vadd.f32 %v4231_v31, %v4159_v62  ;;  %v3744_v0 = vadd.f32 %v3712_v60, %v3640_v15  ;;  %v3920_v54 = vmul.f32 %v12091_v7, %v15467_v32  ;;  %v4023_v48 = vmul.f32 %v12092_v25, %v15476_v27  ;;  %v12101_v7 = vld [vmem:[#allocation3 + $0x8] sm:$0xff]  ;;  %v15687_v5 = vld [vmem:[%s19000_s4 + $0x16] ss:$0 sm:$0xff]  ;;  %v15692_v60 = vld [vmem:[%s19000_s4 + $0x17] ss:$0 sm:$0xff] }
 0x473   : > { %v4024_v52 = vmul.f32 %v12093_v22, %v15476_v27  ;;  %11309 = vmatmul.mubr.msk.bf16.gmra.mrb[56].mxu1 %vm458_vm0, %v4493_v35  ;;  %v4366_v16 = vadd.f32 %v4334_v24, %v4262_v18  ;;  %v3847_v34 = vadd.f32 %v3815_v58, %v3743_v26  ;;  %v4128_v10 = vmul.f32 %v12094_v55, %v15488_v1  ;;  %v12102_v25 = vld [vmem:[#allocation3 + $0x1] sm:$0xff]  ;;  %v12103_v22 = vld [vmem:[#allocation3 + $0x9] sm:$0xff]  ;;  %v12106_v62 = vld [vmem:[#allocation3 + $0x18] sm:$0xff] }
 0x474   : > { %v4367_v42 = vadd.f32 %v4335_v45, %v4263_v49  ;;  %v3848_v9 = vadd.f32 %v3816_v37, %v3744_v0  ;;  %v4129_v32 = vmul.f32 %v12095_v53, %v15488_v1  ;;  %v4232_v27 = vmul.f32 %v12096_v47, %v15501_v23  ;;  %v15668_v1 = vld [vmem:[%s19000_s4 + $0x14] ss:$0 sm:$0xff]  ;;  %v15699_v37 = vld [vmem:[%s19000_s4 + $0x18] ss:$0 sm:$0xff]  ;;  %v12108_v49 = vld [vmem:[#allocation3 + $0x19] sm:$0xff] }
 0x475   : > { %v4233_v40 = vmul.f32 %v12097_v51, %v15501_v23  ;;  %v4405_v36 = vmul.f32 %v15577_v30, %v4366_v16  ;;  %v3951_v29 = vadd.f32 %v3919_v59, %v3847_v34  ;;  %v4336_v39 = vmul.f32 %v12098_v12, %v15515_v43  ;;  %v12099_v23 = vld [vmem:[#allocation3 + $0x1a2] sm:$0xff]  ;;  %v15712_v55 = vld [vmem:[%s19000_s4 + $0x1a] ss:$0 sm:$0xff]  ;;  %v15716_v47 = vld [vmem:[#allocation3 + $0x30] sm:$0xff] }
 0x476   : > { %v4406_v8 = vmul.f32 %v15577_v30, %v4367_v42  ;;  %v3952_v4 = vadd.f32 %v3920_v54, %v3848_v9  ;;  %v4337_v20 = vmul.f32 %v12099_v23, %v15515_v43  ;;  %v5731_v33 = vmul.f32 %v12100_v38, %v15652_v13  ;;  %v12107_v15 = vld [vmem:[#allocation3 + $0x20] sm:$0xff]  ;;  %v15705_v0 = vld [vmem:[%s19000_s4 + $0x19] ss:$0 sm:$0xff] }
 0x477   : > { %v5732_v31 = vmul.f32 %v12101_v7, %v15652_v13  ;;  %v4444_v63 = vadd.f32 %v15594_v46, %v4405_v36  ;;  %v4055_v2 = vadd.f32 %v4023_v48, %v3951_v29  ;;  %v5803_v24 = vmul.f32 %v12102_v25, %v15660_v57  ;;  %v12110_v42 = vld [vmem:[#allocation3 + $0x1a] sm:$0xff]  ;;  %v12111_v53 = vld [vmem:[#allocation3 + $0x22] sm:$0xff]  ;;  %v15724_v29 = vld [vmem:[#allocation3 + $0x31] sm:$0xff] }
 0x478   : > { %v4445_v19 = vadd.f32 %v15594_v46, %v4406_v8  ;;  %v4056_v43 = vadd.f32 %v4024_v52, %v3952_v4  ;;  %v5804_v45 = vmul.f32 %v12103_v22, %v15660_v57  ;;  %v5875_v44 = vmul.f32 %v12104_v14, %v15668_v1  ;;  %v12109_v52 = vld [vmem:[#allocation3 + $0x21] sm:$0xff]  ;;  %v15720_v36 = vld [vmem:[#allocation3 + $0x38] sm:$0xff] }
 0x479   : > { %v5876_v61 = vmul.f32 %v12105_v3, %v15668_v1  ;;  %v4476_v17 = vmax.f32 %v4444_v63, 0.0  ;;  %v4160_v28 = vadd.f32 %v4128_v10, %v4055_v2  ;;  %v5835_v21 = vadd.f32 %v5803_v24, %v5731_v33  ;;  %v15729_v23 = vld [vmem:[#allocation3 + $0x39] sm:$0xff] }
 0x47a   : > { %v4477_v56 = vmax.f32 %v4445_v19, 0.0  ;;  %v4161_v41 = vadd.f32 %v4129_v32, %v4056_v43  ;;  %v5836_v11 = vadd.f32 %v5804_v45, %v5732_v31  ;;  %v5947_v6 = vmul.f32 %v12106_v62, %v15679_v50  ;;  %v15738_v63 = vld [vmem:[#allocation3 + $0x3a] sm:$0xff] }
 0x47b   : > { %v5948_v58 = vmul.f32 %v12107_v15, %v15679_v50  ;;  %v4264_v35 = vadd.f32 %v4232_v27, %v4160_v28  ;;  %v5907_v18 = vadd.f32 %v5875_v44, %v5835_v21  ;;  %v6019_v26 = vmul.f32 %v12108_v49, %v15687_v5 }
 0x47c   : > { %v4494_v59 = vpack.c.bf16 %v4477_v56, %v4476_v17  ;;  %v4265_v54 = vadd.f32 %v4233_v40, %v4161_v41  ;;  %v5908_v48 = vadd.f32 %v5876_v61, %v5836_v11  ;;  %v6020_v16 = vmul.f32 %v12109_v52, %v15687_v5 }
 0x47d   : > { %v6091_v34 = vmul.f32 %v12110_v42, %v15692_v60  ;;  %v4368_v10 = vadd.f32 %v4336_v39, %v4264_v35  ;;  %v5979_v9 = vadd.f32 %v5947_v6, %v5907_v18  ;;  %v6092_v32 = vmul.f32 %v12111_v53, %v15692_v60  ;;  %v15759_v35 = vld [vmem:[%s19001_s5 + $0x2] ss:$0 sm:$0xff] }
 0x47e   : > { %11312 = vmatprep.mubr.msk.bf16.mxu1 %vm458_vm0, %v4494_v59  ;;  %v6163_v27 = vmul.f32 %v15716_v47, %v15699_v37  ;;  %v4369_v51 = vadd.f32 %v4337_v20, %v4265_v54  ;;  %v5980_v40 = vadd.f32 %v5948_v58, %v5908_v48  ;;  %v6164_v8 = vmul.f32 %v15720_v36, %v15699_v37  ;;  %v15733_v20 = vld [vmem:[#allocation3 + $0x32] sm:$0xff] }
 0x47f   : > { %v6235_v12 = vmul.f32 %v15724_v29, %v15705_v0  ;;  %v4407_v39 = vmul.f32 %v15577_v30, %v4368_v10  ;;  %v6051_v4 = vadd.f32 %v6019_v26, %v5979_v9  ;;  %v6236_v38 = vmul.f32 %v15729_v23, %v15705_v0  ;;  %v15773_v10 = vld [vmem:[#allocation3 + $0x48] sm:$0xff] }
 0x480   : > { %v6307_v33 = vmul.f32 %v15733_v20, %v15712_v55  ;;  %v4408_v7 = vmul.f32 %v15577_v30, %v4369_v51  ;;  %v6052_v31 = vadd.f32 %v6020_v16, %v5980_v40  ;;  %v6308_v19 = vmul.f32 %v15738_v63, %v15712_v55  ;;  %v15782_v40 = vld [vmem:[#allocation3 + $0x49] sm:$0xff] }
 0x481   : > { %v5733_v2 = vmul.f32 %v12106_v62, %v15652_v13  ;;  %v4446_v25 = vadd.f32 %v15594_v46, %v4407_v39  ;;  %v6123_v24 = vadd.f32 %v6091_v34, %v6051_v4  ;;  %v5734_v43 = vmul.f32 %v12107_v15, %v15652_v13 }
 0x482   : > { %v5805_v22 = vmul.f32 %v12108_v49, %v15660_v57  ;;  %v4447_v45 = vadd.f32 %v15594_v46, %v4408_v7  ;;  %v6124_v14 = vadd.f32 %v6092_v32, %v6052_v31  ;;  %v5806_v30 = vmul.f32 %v12109_v52, %v15660_v57  ;;  %v12123_v31 = vld [vmem:[#allocation3 + $0x52] sm:$0xff] }
 0x483   : > { %v5877_v44 = vmul.f32 %v12110_v42, %v15668_v1  ;;  %v4478_v3 = vmax.f32 %v4446_v25, 0.0  ;;  %v6195_v61 = vadd.f32 %v6163_v27, %v6123_v24  ;;  %v5878_v56 = vmul.f32 %v12111_v53, %v15668_v1  ;;  %v15771_v42 = vld [vmem:[%s19002_s6 + $0x2] ss:$0 sm:$0xff] }
 0x484   : > { %v5837_v17 = vadd.f32 %v5805_v22, %v5733_v2  ;;  %v4479_v28 = vmax.f32 %v4447_v45, 0.0  ;;  %v6196_v21 = vadd.f32 %v6164_v8, %v6124_v14  ;;  %v5838_v41 = vadd.f32 %v5806_v30, %v5734_v43  ;;  %v15777_v53 = vld [vmem:[#allocation3 + $0x50] sm:$0xff] }
 0x485   : > { %v5949_v11 = vmul.f32 %v15716_v47, %v15679_v50  ;;  %v6267_v62 = vadd.f32 %v6235_v12, %v6195_v61  ;;  %v5950_v46 = vmul.f32 %v15720_v36, %v15679_v50  ;;  %v6021_v15 = vmul.f32 %v15724_v29, %v15687_v5  ;;  %v15786_v12 = vld [vmem:[#allocation3 + $0x51] sm:$0xff] }
 0x486   : > { %v5909_v6 = vadd.f32 %v5877_v44, %v5837_v17  ;;  %v4495_v58 = vpack.c.bf16 %v4479_v28, %v4478_v3  ;;  %v6268_v59 = vadd.f32 %v6236_v38, %v6196_v21  ;;  %v5910_v18 = vadd.f32 %v5878_v56, %v5838_v41 }
 0x487   : > { %v6022_v49 = vmul.f32 %v15729_v23, %v15687_v5  ;;  %v6339_v26 = vadd.f32 %v6307_v33, %v6267_v62  ;;  %v6093_v48 = vmul.f32 %v15733_v20, %v15692_v60  ;;  %v6094_v52 = vmul.f32 %v15738_v63, %v15692_v60  ;;  %v12122_v33 = vld [vmem:[#allocation3 + $0x4a] sm:$0xff] }
 0x488   : > { %v5981_v54 = vadd.f32 %v5949_v11, %v5909_v6  ;;  %11313 = vmatmul.mubr.msk.bf16.gmra.mrb[60].mxu1 %vm458_vm0, %v4495_v58  ;;  %v6340_v16 = vadd.f32 %v6308_v19, %v6268_v59  ;;  %v5982_v34 = vadd.f32 %v5950_v46, %v5910_v18  ;;  %v6165_v9 = vmul.f32 %v15773_v10, %v15699_v37 }
 0x489   : > { %v6166_v32 = vmul.f32 %v15777_v53, %v15699_v37  ;;  %v6379_v27 = vmul.f32 %v15759_v35, %v6339_v26  ;;  %v6237_v8 = vmul.f32 %v15782_v40, %v15705_v0  ;;  %v6238_v39 = vmul.f32 %v15786_v12, %v15705_v0  ;;  %v15818_v26 = vld [vmem:[#allocation3 + $0x60] sm:$0xff] }
 0x48a   : > { %v6053_v51 = vadd.f32 %v6021_v15, %v5981_v54  ;;  %v6380_v4 = vmul.f32 %v15759_v35, %v6340_v16  ;;  %v6054_v38 = vadd.f32 %v6022_v49, %v5982_v34  ;;  %v6309_v7 = vmul.f32 %v12122_v33, %v15712_v55  ;;  %v15827_v34 = vld [vmem:[#allocation3 + $0x61] sm:$0xff] }
 0x48b   : > { %v6310_v19 = vmul.f32 %v12123_v31, %v15712_v55  ;;  %v6419_v2 = vadd.f32 %v15771_v42, %v6379_v27  ;;  %v5735_v24 = vmul.f32 %v15716_v47, %v15652_v13  ;;  %v5736_v43 = vmul.f32 %v15720_v36, %v15652_v13 }
 0x48c   : > { %v6125_v25 = vadd.f32 %v6093_v48, %v6053_v51  ;;  %v6420_v22 = vadd.f32 %v15771_v42, %v6380_v4  ;;  %v6126_v45 = vadd.f32 %v6094_v52, %v6054_v38  ;;  %v5807_v14 = vmul.f32 %v15724_v29, %v15660_v57  ;;  %v15823_v52 = vld [vmem:[#allocation3 + $0x68] sm:$0xff] }
 0x48d   : > { %v5808_v30 = vmul.f32 %v15729_v23, %v15660_v57  ;;  %v6451_v44 = vmax.f32 %v6419_v2, 0.0  ;;  %v5879_v61 = vmul.f32 %v15733_v20, %v15668_v1  ;;  %v5880_v47 = vmul.f32 %v15738_v63, %v15668_v1  ;;  %v15836_v4 = vld [vmem:[#allocation3 + $0x62] sm:$0xff] }
 0x48e   : > { %v6197_v3 = vadd.f32 %v6165_v9, %v6125_v25  ;;  %v6452_v17 = vmax.f32 %v6420_v22, 0.0  ;;  %v6198_v56 = vadd.f32 %v6166_v32, %v6126_v45  ;;  %v5839_v36 = vadd.f32 %v5807_v14, %v5735_v24  ;;  %v15831_v32 = vld [vmem:[#allocation3 + $0x69] sm:$0xff] }
 0x48f   : > { %v5840_v28 = vadd.f32 %v5808_v30, %v5736_v43  ;;  %v5951_v41 = vmul.f32 %v15773_v10, %v15679_v50  ;;  %v5952_v29 = vmul.f32 %v15777_v53, %v15679_v50  ;;  %v6023_v23 = vmul.f32 %v15782_v40, %v15687_v5 }
 0x490   : > { %v6269_v21 = vadd.f32 %v6237_v8, %v6197_v3  ;;  %v6483_v11 = vpack.c.bf16 %v6452_v17, %v6451_v44  ;;  %v6270_v62 = vadd.f32 %v6238_v39, %v6198_v56  ;;  %v5911_v20 = vadd.f32 %v5879_v61, %v5839_v36 }
 0x491   : > { %v5912_v6 = vadd.f32 %v5880_v47, %v5840_v28  ;;  %v6024_v63 = vmul.f32 %v15786_v12, %v15687_v5  ;;  %v6095_v15 = vmul.f32 %v12122_v33, %v15692_v60  ;;  %v6096_v58 = vmul.f32 %v12123_v31, %v15692_v60 }
 0x492   : > { %v6341_v46 = vadd.f32 %v6309_v7, %v6269_v21  ;;  %11320 = vmatprep.mubr.msk.bf16.mxu1 %vm458_vm0, %v6483_v11  ;;  %v6342_v59 = vadd.f32 %v6310_v19, %v6270_v62  ;;  %v5983_v18 = vadd.f32 %v5951_v41, %v5911_v20  ;;  %v6167_v54 = vmul.f32 %v15818_v26, %v15699_v37  ;;  %v12129_v19 = vld [vmem:[#allocation3 + $0x6a] sm:$0xff] }
 0x493   : > { %v5984_v49 = vadd.f32 %v5952_v29, %v5912_v6  ;;  %v6168_v16 = vmul.f32 %v15823_v52, %v15699_v37  ;;  %v6239_v9 = vmul.f32 %v15827_v34, %v15705_v0  ;;  %v6240_v27 = vmul.f32 %v15831_v32, %v15705_v0 }
 0x494   : > { %v6381_v48 = vmul.f32 %v15759_v35, %v6341_v46  ;;  %v6382_v51 = vmul.f32 %v15759_v35, %v6342_v59  ;;  %v6055_v8 = vadd.f32 %v6023_v23, %v5983_v18  ;;  %v6311_v38 = vmul.f32 %v15836_v4, %v15712_v55  ;;  %v15875_v18 = vld [vmem:[#allocation3 + $0x80] sm:$0xff] }
 0x495   : > { %v6056_v39 = vadd.f32 %v6024_v63, %v5984_v49  ;;  %v6312_v2 = vmul.f32 %v12129_v19, %v15712_v55  ;;  %v5737_v25 = vmul.f32 %v15773_v10, %v15652_v13  ;;  %v5738_v24 = vmul.f32 %v15777_v53, %v15652_v13  ;;  %v15868_v63 = vld [vmem:[#allocation3 + $0x78] sm:$0xff] }
 0x496   : > { %v6421_v7 = vadd.f32 %v15771_v42, %v6381_v48  ;;  %v6422_v43 = vadd.f32 %v15771_v42, %v6382_v51  ;;  %v6127_v22 = vadd.f32 %v6095_v15, %v6055_v8  ;;  %v5809_v14 = vmul.f32 %v15782_v40, %v15660_v57 }
 0x497   : > { %v6128_v45 = vadd.f32 %v6096_v58, %v6056_v39  ;;  %v5810_v44 = vmul.f32 %v15786_v12, %v15660_v57  ;;  %v5881_v3 = vmul.f32 %v12122_v33, %v15668_v1  ;;  %v5882_v61 = vmul.f32 %v12123_v31, %v15668_v1  ;;  %v11967_v31 = vld [vmem:[%s19003_s7 + $0x38] sm:$0xff]   ;;  %v12131_v58 = vld [vmem:[%s19003_s7 + $0x30] sm:$0xff]  }
 0x498   : > { %v6453_v30 = vmax.f32 %v6421_v7, 0.0  ;;  %v6454_v47 = vmax.f32 %v6422_v43, 0.0  ;;  %v6199_v10 = vadd.f32 %v6167_v54, %v6127_v22  ;;  %v5841_v56 = vadd.f32 %v5809_v14, %v5737_v25  ;;  %v15879_v54 = vld [vmem:[#allocation3 + $0x79] sm:$0xff] }
 0x499   : > { %v6200_v17 = vadd.f32 %v6168_v16, %v6128_v45  ;;  %v5842_v53 = vadd.f32 %v5810_v44, %v5738_v24  ;;  %v5953_v36 = vmul.f32 %v15818_v26, %v15679_v50  ;;  %v5954_v28 = vmul.f32 %v15823_v52, %v15679_v50  ;;  %v15883_v16 = vld [vmem:[#allocation3 + $0x81] sm:$0xff] }
 0x49a   : > { %v6025_v40 = vmul.f32 %v15827_v34, %v15687_v5  ;;  %v6484_v21 = vpack.c.bf16 %v6454_v47, %v6453_v30  ;;  %v6271_v12 = vadd.f32 %v6239_v9, %v6199_v10  ;;  %v5913_v33 = vadd.f32 %v5881_v3, %v5841_v56  ;;  %v15889_v39 = vld [vmem:[#allocation3 + $0x7a] sm:$0xff] }
 0x49b   : > { %v6272_v41 = vadd.f32 %v6240_v27, %v6200_v17  ;;  %v5914_v29 = vadd.f32 %v5882_v61, %v5842_v53  ;;  %v6026_v23 = vmul.f32 %v15831_v32, %v15687_v5  ;;  %v6097_v11 = vmul.f32 %v15836_v4, %v15692_v60 }
 0x49c   : > { %v6098_v62 = vmul.f32 %v12129_v19, %v15692_v60  ;;  %11321 = vmatmul.mubr.msk.bf16.vlgmr.msra.gmra.mrb[32].mxu1 %vm458_vm0, %v6484_v21  ;;  %v6343_v20 = vadd.f32 %v6311_v38, %v6271_v12  ;;  %v5985_v46 = vadd.f32 %v5953_v36, %v5913_v33  ;;  %v6169_v15 = vmul.f32 %v15868_v63, %v15699_v37 }
 0x49d   : > { %v6344_v6 = vadd.f32 %v6312_v2, %v6272_v41  ;;  %11353 = vmatpush3.bf16.msra.mxu1 %v12131_v58  ;;  %v5986_v59 = vadd.f32 %v5954_v28, %v5914_v29  ;;  %v6170_v49 = vmul.f32 %v15875_v18, %v15699_v37  ;;  %v6241_v48 = vmul.f32 %v15879_v54, %v15705_v0  ;;  %v15893_v2 = vld [vmem:[#allocation3 + $0x82] sm:$0xff] }
 0x49e   : > { %v6242_v9 = vmul.f32 %v15883_v16, %v15705_v0  ;;  %v6383_v27 = vmul.f32 %v15759_v35, %v6343_v20  ;;  %v6057_v8 = vadd.f32 %v6025_v40, %v5985_v46  ;;  %v6313_v38 = vmul.f32 %v15889_v39, %v15712_v55  ;;  %11354 = vmatprep.subr.bf16.mxu1 %v11967_v31 }
 0x49f   : > { %v6384_v51 = vmul.f32 %v15759_v35, %v6344_v6  ;;  %v6058_v7 = vadd.f32 %v6026_v23, %v5986_v59  ;;  %v6314_v25 = vmul.f32 %v15893_v2, %v15712_v55  ;;  %v5739_v24 = vmul.f32 %v15818_v26, %v15652_v13  ;;  %v15923_v23 = vld [vmem:[#allocation3 + $0x90] sm:$0xff]  ;;  %v15927_v6 = vld [vmem:[#allocation3 + $0x98] sm:$0xff] }
 0x4a0   : > { %v5740_v43 = vmul.f32 %v15823_v52, %v15652_v13  ;;  %v6423_v22 = vadd.f32 %v15771_v42, %v6383_v27  ;;  %v6129_v14 = vadd.f32 %v6097_v11, %v6057_v8  ;;  %v5811_v30 = vmul.f32 %v15827_v34, %v15660_v57  ;;  %v15940_v27 = vld [vmem:[#allocation3 + $0x92] sm:$0xff] }
 0x4a1   : > { %v6424_v45 = vadd.f32 %v15771_v42, %v6384_v51  ;;  %v6130_v44 = vadd.f32 %v6098_v62, %v6058_v7  ;;  %v5812_v3 = vmul.f32 %v15831_v32, %v15660_v57  ;;  %v5883_v61 = vmul.f32 %v15836_v4, %v15668_v1  ;;  %11355 = vmatpush3.bf16.msra.mxu1 %v11967_v31  ;;  %v12142_v7 = vld [vmem:[#allocation3 + $0x9a] sm:$0xff] }
 0x4a2   : > { %v5884_v26 = vmul.f32 %v12129_v19, %v15668_v1  ;;  %v6455_v47 = vmax.f32 %v6423_v22, 0.0  ;;  %v6201_v10 = vadd.f32 %v6169_v15, %v6129_v14  ;;  %v5843_v17 = vadd.f32 %v5811_v30, %v5739_v24  ;;  %v15931_v15 = vld [vmem:[#allocation3 + $0x91] sm:$0xff] }
 0x4a3   : > { %v6456_v52 = vmax.f32 %v6424_v45, 0.0  ;;  %v6202_v56 = vadd.f32 %v6170_v49, %v6130_v44  ;;  %v5844_v53 = vadd.f32 %v5812_v3, %v5740_v43  ;;  %v5955_v36 = vmul.f32 %v15868_v63, %v15679_v50 }
 0x4a4   : > { %v5956_v34 = vmul.f32 %v15875_v18, %v15679_v50  ;;  %v6273_v32 = vadd.f32 %v6241_v48, %v6201_v10  ;;  %v5915_v40 = vadd.f32 %v5883_v61, %v5843_v17  ;;  %v6027_v4 = vmul.f32 %v15879_v54, %v15687_v5  ;;  %v15936_v48 = vld [vmem:[#allocation3 + $0x99] sm:$0xff] }
 0x4a5   : > { %v6485_v28 = vpack.c.bf16 %v6456_v52, %v6455_v47  ;;  %v6274_v19 = vadd.f32 %v6242_v9, %v6202_v56  ;;  %v5916_v21 = vadd.f32 %v5884_v26, %v5844_v53  ;;  %v6028_v12 = vmul.f32 %v15883_v16, %v15687_v5 }
 0x4a6   : > { %v6099_v41 = vmul.f32 %v15889_v39, %v15692_v60  ;;  %v6345_v33 = vadd.f32 %v6313_v38, %v6273_v32  ;;  %v5987_v31 = vadd.f32 %v5955_v36, %v5915_v40  ;;  %v6100_v29 = vmul.f32 %v15893_v2, %v15692_v60 }
 0x4a7   : > { %11324 = vmatprep.mubr.msk.bf16.mxu1 %vm458_vm0, %v6485_v28  ;;  %v6171_v11 = vmul.f32 %v15923_v23, %v15699_v37  ;;  %v6346_v62 = vadd.f32 %v6314_v25, %v6274_v19  ;;  %v5988_v20 = vadd.f32 %v5956_v34, %v5916_v21  ;;  %v6172_v46 = vmul.f32 %v15927_v6, %v15699_v37 }
 0x4a8   : > { %v6243_v58 = vmul.f32 %v15931_v15, %v15705_v0  ;;  %v6385_v59 = vmul.f32 %v15759_v35, %v6345_v33  ;;  %v6059_v49 = vadd.f32 %v6027_v4, %v5987_v31  ;;  %v6244_v9 = vmul.f32 %v15936_v48, %v15705_v0  ;;  %v15976_v31 = vld [vmem:[#allocation3 + $0xb0] sm:$0xff] }
 0x4a9   : > { %v6315_v51 = vmul.f32 %v15940_v27, %v15712_v55  ;;  %v6386_v8 = vmul.f32 %v15759_v35, %v6346_v62  ;;  %v6060_v38 = vadd.f32 %v6028_v12, %v5988_v20  ;;  %v6316_v25 = vmul.f32 %v12142_v7, %v15712_v55  ;;  %v15981_v20 = vld [vmem:[#allocation3 + $0xa9] sm:$0xff] }
 0x4aa   : > { %v5741_v24 = vmul.f32 %v15868_v63, %v15652_v13  ;;  %v6425_v43 = vadd.f32 %v15771_v42, %v6385_v59  ;;  %v6131_v22 = vadd.f32 %v6099_v41, %v6059_v49  ;;  %v5742_v45 = vmul.f32 %v15875_v18, %v15652_v13  ;;  %v15972_v41 = vld [vmem:[#allocation3 + $0xa8] sm:$0xff] }
 0x4ab   : > { %v5813_v14 = vmul.f32 %v15879_v54, %v15660_v57  ;;  %v6426_v30 = vadd.f32 %v15771_v42, %v6386_v8  ;;  %v6132_v44 = vadd.f32 %v6100_v29, %v6060_v38  ;;  %v5814_v3 = vmul.f32 %v15883_v16, %v15660_v57  ;;  %v12148_v38 = vld [vmem:[#allocation3 + $0xb2] sm:$0xff] }
 0x4ac   : > { %v5885_v61 = vmul.f32 %v15889_v39, %v15668_v1  ;;  %v6457_v26 = vmax.f32 %v6425_v43, 0.0  ;;  %v6203_v63 = vadd.f32 %v6171_v11, %v6131_v22  ;;  %v5886_v52 = vmul.f32 %v15893_v2, %v15668_v1 }
 0x4ad   : > { %v5845_v47 = vadd.f32 %v5813_v14, %v5741_v24  ;;  %v6458_v10 = vmax.f32 %v6426_v30, 0.0  ;;  %v6204_v18 = vadd.f32 %v6172_v46, %v6132_v44  ;;  %v5846_v17 = vadd.f32 %v5814_v3, %v5742_v45 }
 0x4ae   : > { %v5957_v54 = vmul.f32 %v15923_v23, %v15679_v50  ;;  %v6275_v56 = vadd.f32 %v6243_v58, %v6203_v63  ;;  %v5958_v16 = vmul.f32 %v15927_v6, %v15679_v50  ;;  %v6029_v39 = vmul.f32 %v15931_v15, %v15687_v5  ;;  %v15985_v58 = vld [vmem:[#allocation3 + $0xb1] sm:$0xff] }
 0x4af   : > { %v5917_v53 = vadd.f32 %v5885_v61, %v5845_v47  ;;  %v6486_v36 = vpack.c.bf16 %v6458_v10, %v6457_v26  ;;  %v6276_v34 = vadd.f32 %v6244_v9, %v6204_v18  ;;  %v5918_v28 = vadd.f32 %v5886_v52, %v5846_v17 }
 0x4b0   : > { %v6030_v2 = vmul.f32 %v15936_v48, %v15687_v5  ;;  %v6347_v32 = vadd.f32 %v6315_v51, %v6275_v56  ;;  %v6101_v4 = vmul.f32 %v15940_v27, %v15692_v60  ;;  %v6102_v19 = vmul.f32 %v12142_v7, %v15692_v60  ;;  %v15990_v51 = vld [vmem:[#allocation3 + $0xaa] sm:$0xff] }
 0x4b1   : > { %v5989_v40 = vadd.f32 %v5957_v54, %v5917_v53  ;;  %11325 = vmatmul.mubr.msk.bf16.gmra.mrb[36].mxu1 %vm458_vm0, %v6486_v36  ;;  %v6348_v21 = vadd.f32 %v6316_v25, %v6276_v34  ;;  %v5990_v12 = vadd.f32 %v5958_v16, %v5918_v28  ;;  %v6173_v33 = vmul.f32 %v15972_v41, %v15699_v37 }
 0x4b2   : > { %v6174_v29 = vmul.f32 %v15976_v31, %v15699_v37  ;;  %v6387_v11 = vmul.f32 %v15759_v35, %v6347_v32  ;;  %v6245_v46 = vmul.f32 %v15981_v20, %v15705_v0  ;;  %v6246_v59 = vmul.f32 %v15985_v58, %v15705_v0 }
 0x4b3   : > { %v6061_v62 = vadd.f32 %v6029_v39, %v5989_v40  ;;  %v6388_v49 = vmul.f32 %v15759_v35, %v6348_v21  ;;  %v6062_v9 = vadd.f32 %v6030_v2, %v5990_v12  ;;  %v6317_v8 = vmul.f32 %v15990_v51, %v15712_v55  ;;  %v16023_v40 = vld [vmem:[#allocation3 + $0xc0] sm:$0xff]  ;;  %v12150_v21 = vld [vmem:[#allocation3 + $0xc8] sm:$0xff] }
 0x4b4   : > { %v6318_v25 = vmul.f32 %v12148_v38, %v15712_v55  ;;  %v6427_v24 = vadd.f32 %v15771_v42, %v6387_v11  ;;  %v5743_v22 = vmul.f32 %v15923_v23, %v15652_v13  ;;  %v5744_v45 = vmul.f32 %v15927_v6, %v15652_v13  ;;  %v11968_v23 = vld [vmem:[%s19003_s7 + $0x40] sm:$0xff]  }
 0x4b5   : > { %v6133_v43 = vadd.f32 %v6101_v4, %v6061_v62  ;;  %v6428_v14 = vadd.f32 %v15771_v42, %v6388_v49  ;;  %v6134_v30 = vadd.f32 %v6102_v19, %v6062_v9  ;;  %v5815_v44 = vmul.f32 %v15931_v15, %v15660_v57  ;;  %11388 = vmatprep.subr.bf16.mxu1 %v11968_v23  ;;  %v16033_v11 = vld [vmem:[#allocation3 + $0xc9] sm:$0xff] }
 0x4b6   : > { %v5816_v3 = vmul.f32 %v15936_v48, %v15660_v57  ;;  %v6459_v61 = vmax.f32 %v6427_v24, 0.0  ;;  %v5887_v63 = vmul.f32 %v15940_v27, %v15668_v1  ;;  %v5888_v47 = vmul.f32 %v12142_v7, %v15668_v1  ;;  %v12153_v9 = vld [vmem:[#allocation3 + $0xc2] sm:$0xff]  ;;  %v12154_v24 = vld [vmem:[#allocation3 + $0xca] sm:$0xff] }
 0x4b7   : > { %v6205_v26 = vadd.f32 %v6173_v33, %v6133_v43  ;;  %v6460_v6 = vmax.f32 %v6428_v14, 0.0  ;;  %v6206_v52 = vadd.f32 %v6174_v29, %v6134_v30  ;;  %v5847_v10 = vadd.f32 %v5815_v44, %v5743_v22  ;;  %v16029_v33 = vld [vmem:[#allocation3 + $0xc1] sm:$0xff] }
 0x4b8   : > { %v5848_v18 = vadd.f32 %v5816_v3, %v5744_v45  ;;  %v5959_v15 = vmul.f32 %v15972_v41, %v15679_v50  ;;  %v5960_v48 = vmul.f32 %v15976_v31, %v15679_v50  ;;  %v6031_v27 = vmul.f32 %v15981_v20, %v15687_v5 }
 0x4b9   : > { %v6277_v17 = vadd.f32 %v6245_v46, %v6205_v26  ;;  %v6487_v7 = vpack.c.bf16 %v6460_v6, %v6459_v61  ;;  %v6278_v54 = vadd.f32 %v6246_v59, %v6206_v52  ;;  %v5919_v56 = vadd.f32 %v5887_v63, %v5847_v10 }
 0x4ba   : > { %v5920_v53 = vadd.f32 %v5888_v47, %v5848_v18  ;;  %v6032_v39 = vmul.f32 %v15985_v58, %v15687_v5  ;;  %v6103_v36 = vmul.f32 %v15990_v51, %v15692_v60  ;;  %v6104_v34 = vmul.f32 %v12148_v38, %v15692_v60 }
 0x4bb   : > { %v6349_v16 = vadd.f32 %v6317_v8, %v6277_v17  ;;  %11328 = vmatprep.mubr.msk.bf16.mxu1 %vm458_vm0, %v6487_v7  ;;  %v6350_v28 = vadd.f32 %v6318_v25, %v6278_v54  ;;  %v5991_v2 = vadd.f32 %v5959_v15, %v5919_v56  ;;  %v6175_v4 = vmul.f32 %v16023_v40, %v15699_v37 }
 0x4bc   : > { %v5992_v32 = vadd.f32 %v5960_v48, %v5920_v53  ;;  %v6176_v12 = vmul.f32 %v12150_v21, %v15699_v37  ;;  %v6247_v29 = vmul.f32 %v16029_v33, %v15705_v0  ;;  %v6248_v62 = vmul.f32 %v16033_v11, %v15705_v0 }
 0x4bd   : > { %v6389_v19 = vmul.f32 %v15759_v35, %v6349_v16  ;;  %v6390_v46 = vmul.f32 %v15759_v35, %v6350_v28  ;;  %v6063_v59 = vadd.f32 %v6031_v27, %v5991_v2  ;;  %v6319_v8 = vmul.f32 %v12153_v9, %v15712_v55  ;;  %v16063_v16 = vld [vmem:[#allocation3 + $0xd8] sm:$0xff] }
 0x4be   : > { %v6064_v49 = vadd.f32 %v6032_v39, %v5992_v32  ;;  %v6320_v43 = vmul.f32 %v12154_v24, %v15712_v55  ;;  %v5745_v22 = vmul.f32 %v15972_v41, %v15652_v13  ;;  %v5746_v45 = vmul.f32 %v15976_v31, %v15652_v13  ;;  %v16071_v2 = vld [vmem:[#allocation3 + $0xd9] sm:$0xff] }
 0x4bf   : > { %v6429_v25 = vadd.f32 %v15771_v42, %v6389_v19  ;;  %v6430_v14 = vadd.f32 %v15771_v42, %v6390_v46  ;;  %v6135_v30 = vadd.f32 %v6103_v36, %v6063_v59  ;;  %v5817_v3 = vmul.f32 %v15981_v20, %v15660_v57  ;;  %v12159_v46 = vld [vmem:[#allocation3 + $0xda] sm:$0xff] }
 0x4c0   : > { %v6136_v44 = vadd.f32 %v6104_v34, %v6064_v49  ;;  %v5818_v26 = vmul.f32 %v15985_v58, %v15660_v57  ;;  %v5889_v63 = vmul.f32 %v15990_v51, %v15668_v1  ;;  %v5890_v47 = vmul.f32 %v12148_v38, %v15668_v1  ;;  %v16067_v34 = vld [vmem:[#allocation3 + $0xe0] sm:$0xff] }
 0x4c1   : > { %v6461_v61 = vmax.f32 %v6429_v25, 0.0  ;;  %v6462_v41 = vmax.f32 %v6430_v14, 0.0  ;;  %v6207_v23 = vadd.f32 %v6175_v4, %v6135_v30  ;;  %v5849_v31 = vadd.f32 %v5817_v3, %v5745_v22  ;;  %v16075_v4 = vld [vmem:[#allocation3 + $0xe1] sm:$0xff] }
 0x4c2   : > { %v6208_v6 = vadd.f32 %v6176_v12, %v6136_v44  ;;  %v5850_v52 = vadd.f32 %v5818_v26, %v5746_v45  ;;  %v5961_v10 = vmul.f32 %v16023_v40, %v15679_v50  ;;  %v5962_v18 = vmul.f32 %v12150_v21, %v15679_v50 }
 0x4c3   : > { %v6033_v20 = vmul.f32 %v16029_v33, %v15687_v5  ;;  %v6488_v17 = vpack.c.bf16 %v6462_v41, %v6461_v61  ;;  %v6279_v58 = vadd.f32 %v6247_v29, %v6207_v23  ;;  %v5921_v48 = vadd.f32 %v5889_v63, %v5849_v31 }
 0x4c4   : > { %v6280_v15 = vadd.f32 %v6248_v62, %v6208_v6  ;;  %v5922_v51 = vadd.f32 %v5890_v47, %v5850_v52  ;;  %v6034_v38 = vmul.f32 %v16033_v11, %v15687_v5  ;;  %v6105_v27 = vmul.f32 %v12153_v9, %v15692_v60 }
 0x4c5   : > { %v6106_v7 = vmul.f32 %v12154_v24, %v15692_v60  ;;  %11329 = vmatmul.mubr.msk.bf16.gmra.mrb[40].mxu1 %vm458_vm0, %v6488_v17  ;;  %v6351_v54 = vadd.f32 %v6319_v8, %v6279_v58  ;;  %v5993_v53 = vadd.f32 %v5961_v10, %v5921_v48  ;;  %v6177_v39 = vmul.f32 %v16063_v16, %v15699_v37  ;;  %v12160_v8 = vld [vmem:[#allocation3 + $0xe2] sm:$0xff] }
 0x4c6   : > { %v6352_v56 = vadd.f32 %v6320_v43, %v6280_v15  ;;  %v5994_v36 = vadd.f32 %v5962_v18, %v5922_v51  ;;  %v6178_v28 = vmul.f32 %v16067_v34, %v15699_v37  ;;  %v6249_v32 = vmul.f32 %v16071_v2, %v15705_v0  ;;  %v16105_v51 = vld [vmem:[#allocation3 + $0xf0] sm:$0xff] }
 0x4c7   : > { %v6250_v19 = vmul.f32 %v16075_v4, %v15705_v0  ;;  %v6391_v12 = vmul.f32 %v15759_v35, %v6351_v54  ;;  %v6065_v62 = vadd.f32 %v6033_v20, %v5993_v53  ;;  %v6321_v59 = vmul.f32 %v12159_v46, %v15712_v55  ;;  %v16109_v54 = vld [vmem:[#allocation3 + $0xf8] sm:$0xff] }
 0x4c8   : > { %v6392_v29 = vmul.f32 %v15759_v35, %v6352_v56  ;;  %v6066_v49 = vadd.f32 %v6034_v38, %v5994_v36  ;;  %v6322_v25 = vmul.f32 %v12160_v8, %v15712_v55  ;;  %v5747_v43 = vmul.f32 %v16023_v40, %v15652_v13  ;;  %v16113_v53 = vld [vmem:[#allocation3 + $0xf1] sm:$0xff] }
 0x4c9   : > { %v5748_v22 = vmul.f32 %v12150_v21, %v15652_v13  ;;  %v6431_v45 = vadd.f32 %v15771_v42, %v6391_v12  ;;  %v6137_v30 = vadd.f32 %v6105_v27, %v6065_v62  ;;  %v5819_v44 = vmul.f32 %v16029_v33, %v15660_v57  ;;  %v16122_v12 = vld [vmem:[#allocation3 + $0xf2] sm:$0xff] }
 0x4ca   : > { %v6432_v14 = vadd.f32 %v15771_v42, %v6392_v29  ;;  %v6138_v3 = vadd.f32 %v6106_v7, %v6066_v49  ;;  %v5820_v61 = vmul.f32 %v16033_v11, %v15660_v57  ;;  %v5891_v26 = vmul.f32 %v12153_v9, %v15668_v1  ;;  %v12166_v49 = vld [vmem:[#allocation3 + $0xfa] sm:$0xff] }
 0x4cb   : > { %v5892_v63 = vmul.f32 %v12154_v24, %v15668_v1  ;;  %v6463_v47 = vmax.f32 %v6431_v45, 0.0  ;;  %v6209_v41 = vadd.f32 %v6177_v39, %v6137_v30  ;;  %v5851_v21 = vadd.f32 %v5819_v44, %v5747_v43 }
 0x4cc   : > { %v6464_v40 = vmax.f32 %v6432_v14, 0.0  ;;  %v6210_v23 = vadd.f32 %v6178_v28, %v6138_v3  ;;  %v5852_v6 = vadd.f32 %v5820_v61, %v5748_v22  ;;  %v5963_v31 = vmul.f32 %v16063_v16, %v15679_v50 }
 0x4cd   : > { %v5964_v33 = vmul.f32 %v16067_v34, %v15679_v50  ;;  %v6281_v10 = vadd.f32 %v6249_v32, %v6209_v41  ;;  %v5923_v18 = vadd.f32 %v5891_v26, %v5851_v21  ;;  %v6035_v11 = vmul.f32 %v16071_v2, %v15687_v5  ;;  %v16118_v32 = vld [vmem:[#allocation3 + $0xf9] sm:$0xff] }
 0x4ce   : > { %v6489_v52 = vpack.c.bf16 %v6464_v40, %v6463_v47  ;;  %v6282_v9 = vadd.f32 %v6250_v19, %v6210_v23  ;;  %v5924_v24 = vadd.f32 %v5892_v63, %v5852_v6  ;;  %v6036_v20 = vmul.f32 %v16075_v4, %v15687_v5 }
 0x4cf   : > { %v6107_v17 = vmul.f32 %v12159_v46, %v15692_v60  ;;  %v6353_v58 = vadd.f32 %v6321_v59, %v6281_v10  ;;  %v5995_v15 = vadd.f32 %v5963_v31, %v5923_v18  ;;  %v6108_v48 = vmul.f32 %v12160_v8, %v15692_v60 }
 0x4d0   : > { %11332 = vmatprep.mubr.msk.bf16.mxu1 %vm458_vm0, %v6489_v52  ;;  %v6179_v38 = vmul.f32 %v16105_v51, %v15699_v37  ;;  %v6354_v27 = vadd.f32 %v6322_v25, %v6282_v9  ;;  %v5996_v7 = vadd.f32 %v5964_v33, %v5924_v24  ;;  %v6180_v56 = vmul.f32 %v16109_v54, %v15699_v37 }
 0x4d1   : > { %v6251_v39 = vmul.f32 %v16113_v53, %v15705_v0  ;;  %v6393_v36 = vmul.f32 %v15759_v35, %v6353_v58  ;;  %v6067_v28 = vadd.f32 %v6035_v11, %v5995_v15  ;;  %v6252_v19 = vmul.f32 %v16118_v32, %v15705_v0  ;;  %v16156_v15 = vld [vmem:[#allocation3 + $0x110] sm:$0xff] }
 0x4d2   : > { %v6323_v29 = vmul.f32 %v16122_v12, %v15712_v55  ;;  %v6394_v62 = vmul.f32 %v15759_v35, %v6354_v27  ;;  %v6068_v59 = vadd.f32 %v6036_v20, %v5996_v7  ;;  %v6324_v25 = vmul.f32 %v12166_v49, %v15712_v55  ;;  %v16161_v7 = vld [vmem:[#allocation3 + $0x109] sm:$0xff] }
 0x4d3   : > { %v5749_v43 = vmul.f32 %v16063_v16, %v15652_v13  ;;  %v6433_v22 = vadd.f32 %v15771_v42, %v6393_v36  ;;  %v6139_v45 = vadd.f32 %v6107_v17, %v6067_v28  ;;  %v5750_v14 = vmul.f32 %v16067_v34, %v15652_v13  ;;  %v16152_v17 = vld [vmem:[#allocation3 + $0x108] sm:$0xff] }
 0x4d4   : > { %v5821_v30 = vmul.f32 %v16071_v2, %v15660_v57  ;;  %v6434_v44 = vadd.f32 %v15771_v42, %v6394_v62  ;;  %v6140_v3 = vadd.f32 %v6108_v48, %v6068_v59  ;;  %v5822_v61 = vmul.f32 %v16075_v4, %v15660_v57  ;;  %v12172_v59 = vld [vmem:[#allocation3 + $0x112] sm:$0xff] }
 0x4d5   : > { %v5893_v26 = vmul.f32 %v12159_v46, %v15668_v1  ;;  %v6465_v63 = vmax.f32 %v6433_v22, 0.0  ;;  %v6211_v47 = vadd.f32 %v6179_v38, %v6139_v45  ;;  %v5894_v40 = vmul.f32 %v12160_v8, %v15668_v1 }
 0x4d6   : > { %v5853_v16 = vadd.f32 %v5821_v30, %v5749_v43  ;;  %v6466_v41 = vmax.f32 %v6434_v44, 0.0  ;;  %v6212_v21 = vadd.f32 %v6180_v56, %v6140_v3  ;;  %v5854_v23 = vadd.f32 %v5822_v61, %v5750_v14 }
 0x4d7   : > { %v5965_v34 = vmul.f32 %v16105_v51, %v15679_v50  ;;  %v6283_v2 = vadd.f32 %v6251_v39, %v6211_v47  ;;  %v5966_v31 = vmul.f32 %v16109_v54, %v15679_v50  ;;  %v6037_v4 = vmul.f32 %v16113_v53, %v15687_v5  ;;  %v16165_v39 = vld [vmem:[#allocation3 + $0x111] sm:$0xff] }
 0x4d8   : > { %v5925_v6 = vadd.f32 %v5893_v26, %v5853_v16  ;;  %v6490_v46 = vpack.c.bf16 %v6466_v41, %v6465_v63  ;;  %v6284_v33 = vadd.f32 %v6252_v19, %v6212_v21  ;;  %v5926_v52 = vadd.f32 %v5894_v40, %v5854_v23 }
 0x4d9   : > { %v6038_v8 = vmul.f32 %v16118_v32, %v15687_v5  ;;  %v6355_v10 = vadd.f32 %v6323_v29, %v6283_v2  ;;  %v6109_v11 = vmul.f32 %v16122_v12, %v15692_v60  ;;  %v6110_v9 = vmul.f32 %v12166_v49, %v15692_v60  ;;  %v12171_v29 = vld [vmem:[#allocation3 + $0x10a] sm:$0xff] }
 0x4da   : > { %v5997_v18 = vadd.f32 %v5965_v34, %v5925_v6  ;;  %11333 = vmatmul.mubr.msk.bf16.gmra.mrb[44].mxu1 %vm458_vm0, %v6490_v46  ;;  %v6356_v24 = vadd.f32 %v6324_v25, %v6284_v33  ;;  %v5998_v20 = vadd.f32 %v5966_v31, %v5926_v52  ;;  %v6181_v58 = vmul.f32 %v16152_v17, %v15699_v37 }
 0x4db   : > { %v6182_v48 = vmul.f32 %v16156_v15, %v15699_v37  ;;  %v6395_v38 = vmul.f32 %v15759_v35, %v6355_v10  ;;  %v6253_v56 = vmul.f32 %v16161_v7, %v15705_v0  ;;  %v6254_v36 = vmul.f32 %v16165_v39, %v15705_v0  ;;  %v16196_v10 = vld [vmem:[#allocation3 + $0x120] sm:$0xff] }
 0x4dc   : > { %v6069_v27 = vadd.f32 %v6037_v4, %v5997_v18  ;;  %v6396_v28 = vmul.f32 %v15759_v35, %v6356_v24  ;;  %v6070_v19 = vadd.f32 %v6038_v8, %v5998_v20  ;;  %v6325_v62 = vmul.f32 %v12171_v29, %v15712_v55  ;;  %v16205_v20 = vld [vmem:[#allocation3 + $0x121] sm:$0xff] }
 0x4dd   : > { %v6326_v25 = vmul.f32 %v12172_v59, %v15712_v55  ;;  %v6435_v43 = vadd.f32 %v15771_v42, %v6395_v38  ;;  %v5751_v45 = vmul.f32 %v16105_v51, %v15652_v13  ;;  %v5752_v14 = vmul.f32 %v16109_v54, %v15652_v13 }
 0x4de   : > { %v6141_v22 = vadd.f32 %v6109_v11, %v6069_v27  ;;  %v6436_v30 = vadd.f32 %v15771_v42, %v6396_v28  ;;  %v6142_v44 = vadd.f32 %v6110_v9, %v6070_v19  ;;  %v5823_v3 = vmul.f32 %v16113_v53, %v15660_v57  ;;  %v16201_v9 = vld [vmem:[#allocation3 + $0x128] sm:$0xff] }
 0x4df   : > { %v5824_v61 = vmul.f32 %v16118_v32, %v15660_v57  ;;  %v6467_v26 = vmax.f32 %v6435_v43, 0.0  ;;  %v5895_v47 = vmul.f32 %v16122_v12, %v15668_v1  ;;  %v5896_v16 = vmul.f32 %v12166_v49, %v15668_v1  ;;  %v16214_v28 = vld [vmem:[#allocation3 + $0x122] sm:$0xff] }
 0x4e0   : > { %v6213_v63 = vadd.f32 %v6181_v58, %v6141_v22  ;;  %v6468_v51 = vmax.f32 %v6436_v30, 0.0  ;;  %v6214_v40 = vadd.f32 %v6182_v48, %v6142_v44  ;;  %v5855_v41 = vadd.f32 %v5823_v3, %v5751_v45  ;;  %v16209_v48 = vld [vmem:[#allocation3 + $0x129] sm:$0xff] }
 0x4e1   : > { %v5856_v54 = vadd.f32 %v5824_v61, %v5752_v14  ;;  %v5967_v23 = vmul.f32 %v16152_v17, %v15679_v50  ;;  %v5968_v53 = vmul.f32 %v16156_v15, %v15679_v50  ;;  %v6039_v32 = vmul.f32 %v16161_v7, %v15687_v5 }
 0x4e2   : > { %v6285_v21 = vadd.f32 %v6253_v56, %v6213_v63  ;;  %v6491_v34 = vpack.c.bf16 %v6468_v51, %v6467_v26  ;;  %v6286_v2 = vadd.f32 %v6254_v36, %v6214_v40  ;;  %v5927_v6 = vadd.f32 %v5895_v47, %v5855_v41 }
 0x4e3   : > { %v5928_v12 = vadd.f32 %v5896_v16, %v5856_v54  ;;  %v6040_v49 = vmul.f32 %v16165_v39, %v15687_v5  ;;  %v6111_v4 = vmul.f32 %v12171_v29, %v15692_v60  ;;  %v6112_v46 = vmul.f32 %v12172_v59, %v15692_v60 }
 0x4e4   : > { %v6357_v31 = vadd.f32 %v6325_v62, %v6285_v21  ;;  %11336 = vmatprep.mubr.msk.bf16.mxu1 %vm458_vm0, %v6491_v34  ;;  %v6358_v33 = vadd.f32 %v6326_v25, %v6286_v2  ;;  %v5999_v52 = vadd.f32 %v5967_v23, %v5927_v6  ;;  %v6183_v18 = vmul.f32 %v16196_v10, %v15699_v37  ;;  %v12178_v25 = vld [vmem:[#allocation3 + $0x12a] sm:$0xff]  ;;  %v16243_v34 = vld [vmem:[#allocation3 + $0x138] sm:$0xff] }
 0x4e5   : > { %v6000_v8 = vadd.f32 %v5968_v53, %v5928_v12  ;;  %v6184_v24 = vmul.f32 %v16201_v9, %v15699_v37  ;;  %v6255_v58 = vmul.f32 %v16205_v20, %v15705_v0  ;;  %v6256_v38 = vmul.f32 %v16209_v48, %v15705_v0  ;;  %v16247_v12 = vld [vmem:[#allocation3 + $0x140] sm:$0xff] }
 0x4e6   : > { %v6397_v11 = vmul.f32 %v15759_v35, %v6357_v31  ;;  %v6398_v27 = vmul.f32 %v15759_v35, %v6358_v33  ;;  %v6071_v56 = vadd.f32 %v6039_v32, %v5999_v52  ;;  %v6327_v19 = vmul.f32 %v16214_v28, %v15712_v55  ;;  %v16251_v31 = vld [vmem:[#allocation3 + $0x139] sm:$0xff] }
 0x4e7   : > { %v6072_v36 = vadd.f32 %v6040_v49, %v6000_v8  ;;  %v6328_v43 = vmul.f32 %v12178_v25, %v15712_v55  ;;  %v5753_v22 = vmul.f32 %v16152_v17, %v15652_v13  ;;  %v5754_v45 = vmul.f32 %v16156_v15, %v15652_v13  ;;  %v16255_v49 = vld [vmem:[#allocation3 + $0x141] sm:$0xff] }
 0x4e8   : > { %v6437_v62 = vadd.f32 %v15771_v42, %v6397_v11  ;;  %v6438_v14 = vadd.f32 %v15771_v42, %v6398_v27  ;;  %v6143_v30 = vadd.f32 %v6111_v4, %v6071_v56  ;;  %v5825_v3 = vmul.f32 %v16161_v7, %v15660_v57  ;;  %v16261_v8 = vld [vmem:[#allocation3 + $0x13a] sm:$0xff]  ;;  %v16265_v11 = vld [vmem:[#allocation3 + $0x142] sm:$0xff] }
 0x4e9   : > { %v6144_v44 = vadd.f32 %v6112_v46, %v6072_v36  ;;  %v5826_v26 = vmul.f32 %v16165_v39, %v15660_v57  ;;  %v5897_v63 = vmul.f32 %v12171_v29, %v15668_v1  ;;  %v5898_v47 = vmul.f32 %v12172_v59, %v15668_v1 }
 0x4ea   : > { %v6469_v61 = vmax.f32 %v6437_v62, 0.0  ;;  %v6470_v16 = vmax.f32 %v6438_v14, 0.0  ;;  %v6215_v17 = vadd.f32 %v6183_v18, %v6143_v30  ;;  %v5857_v40 = vadd.f32 %v5825_v3, %v5753_v22 }
 0x4eb   : > { %v6216_v51 = vadd.f32 %v6184_v24, %v6144_v44  ;;  %v5858_v13 = vadd.f32 %v5826_v26, %v5754_v45  ;;  %v5969_v15 = vmul.f32 %v16196_v10, %v15679_v50  ;;  %v5970_v41 = vmul.f32 %v16201_v9, %v15679_v50 }
 0x4ec   : > { %v6041_v7 = vmul.f32 %v16205_v20, %v15687_v5  ;;  %v6492_v54 = vpack.c.bf16 %v6470_v16, %v6469_v61  ;;  %v6287_v57 = vadd.f32 %v6255_v58, %v6215_v17  ;;  %v5929_v29 = vadd.f32 %v5897_v63, %v5857_v40 }
 0x4ed   : > { %v6288_v39 = vadd.f32 %v6256_v38, %v6216_v51  ;;  %v5930_v21 = vadd.f32 %v5898_v47, %v5858_v13  ;;  %v6042_v1 = vmul.f32 %v16209_v48, %v15687_v5  ;;  %v6113_v59 = vmul.f32 %v16214_v28, %v15692_v60  ;;  %v16309_v47 = vld [vmem:[%s19000_s4 + $0x16] ss:$0 sm:$0xff]  ;;  %v16318_v13 = vld [vmem:[%s19000_s4 + $0x17] ss:$0 sm:$0xff] }
 0x4ee   : > { %v6114_v23 = vmul.f32 %v12178_v25, %v15692_v60  ;;  %11337 = vmatmul.mubr.msk.bf16.gmra.mrb[48].mxu1 %vm458_vm0, %v6492_v54  ;;  %v6359_v53 = vadd.f32 %v6327_v19, %v6287_v57  ;;  %v6001_v32 = vadd.f32 %v5969_v15, %v5929_v29  ;;  %v6185_v2 = vmul.f32 %v16243_v34, %v15699_v37  ;;  %v16325_v57 = vld [vmem:[#allocation3 + $0x150] sm:$0xff] }
 0x4ef   : > { %v6360_v50 = vadd.f32 %v6328_v43, %v6288_v39  ;;  %v6002_v6 = vadd.f32 %v5970_v41, %v5930_v21  ;;  %v6186_v5 = vmul.f32 %v16247_v12, %v15699_v37  ;;  %v6257_v60 = vmul.f32 %v16251_v31, %v15705_v0  ;;  %v16330_v39 = vld [vmem:[%s19000_s4 + $0x18] ss:$0 sm:$0xff] }
 0x4f0   : > { %v6258_v4 = vmul.f32 %v16255_v49, %v15705_v0  ;;  %v6399_v46 = vmul.f32 %v15759_v35, %v6359_v53  ;;  %v6073_v52 = vadd.f32 %v6041_v7, %v6001_v32  ;;  %v6329_v37 = vmul.f32 %v16261_v8, %v15712_v55  ;;  %v16272_v0 = vld [vmem:[%s19000_s4 + $0x12] ss:$0 sm:$0xff]  ;;  %v16338_v53 = vld [vmem:[#allocation3 + $0x151] sm:$0xff] }
 0x4f1   : > { %v6400_v33 = vmul.f32 %v15759_v35, %v6360_v50  ;;  %v6074_v18 = vadd.f32 %v6042_v1, %v6002_v6  ;;  %v6330_v24 = vmul.f32 %v16265_v11, %v15712_v55  ;;  %v5755_v58 = vmul.f32 %v16272_v0, %v16196_v10  ;;  %v16283_v55 = vld [vmem:[%s19000_s4 + $0x13] ss:$0 sm:$0xff]  ;;  %v16343_v50 = vld [vmem:[%s19000_s4 + $0x19] ss:$0 sm:$0xff] }
 0x4f2   : > { %v5756_v38 = vmul.f32 %v16272_v0, %v16201_v9  ;;  %v6439_v27 = vadd.f32 %v15771_v42, %v6399_v46  ;;  %v6145_v36 = vadd.f32 %v6113_v59, %v6073_v52  ;;  %v5827_v19 = vmul.f32 %v16283_v55, %v16205_v20  ;;  %v16292_v9 = vld [vmem:[%s19000_s4 + $0x14] ss:$0 sm:$0xff]  ;;  %v16334_v59 = vld [vmem:[#allocation3 + $0x158] sm:$0xff]  ;;  %v16357_v46 = vld [vmem:[%s19000_s4 + $0x1a] ss:$0 sm:$0xff] }
 0x4f3   : > { %v6440_v56 = vadd.f32 %v15771_v42, %v6400_v33  ;;  %v6146_v62 = vadd.f32 %v6114_v23, %v6074_v18  ;;  %v5828_v10 = vmul.f32 %v16283_v55, %v16209_v48  ;;  %v5899_v43 = vmul.f32 %v16292_v9, %v16214_v28  ;;  %v16300_v48 = vld [vmem:[%s19000_s4 + $0x15] ss:$0 sm:$0xff]  ;;  %v16362_v18 = vld [vmem:[#allocation3 + $0x15a] sm:$0xff] }
 0x4f4   : > { %v5900_v22 = vmul.f32 %v16292_v9, %v12178_v25  ;;  %v6471_v45 = vmax.f32 %v6439_v27, 0.0  ;;  %v6217_v30 = vadd.f32 %v6185_v2, %v6145_v36  ;;  %v5859_v44 = vadd.f32 %v5827_v19, %v5755_v58 }
 0x4f5   : > { %v6472_v14 = vmax.f32 %v6440_v56, 0.0  ;;  %v6218_v3 = vadd.f32 %v6186_v5, %v6146_v62  ;;  %v5860_v20 = vadd.f32 %v5828_v10, %v5756_v38  ;;  %v5971_v61 = vmul.f32 %v16300_v48, %v16243_v34  ;;  %v16348_v5 = vld [vmem:[#allocation3 + $0x159] sm:$0xff] }
 0x4f6   : > { %v5972_v26 = vmul.f32 %v16300_v48, %v16247_v12  ;;  %v6289_v63 = vadd.f32 %v6257_v60, %v6217_v30  ;;  %v5931_v25 = vadd.f32 %v5899_v43, %v5859_v44  ;;  %v6043_v16 = vmul.f32 %v16309_v47, %v16251_v31 }
 0x4f7   : > { %v6493_v28 = vpack.c.bf16 %v6472_v14, %v6471_v45  ;;  %v6290_v17 = vadd.f32 %v6258_v4, %v6218_v3  ;;  %v5932_v51 = vadd.f32 %v5900_v22, %v5860_v20  ;;  %v6044_v40 = vmul.f32 %v16309_v47, %v16255_v49  ;;  %v16352_v4 = vld [vmem:[#allocation3 + $0x152] sm:$0xff] }
 0x4f8   : > { %v6115_v15 = vmul.f32 %v16318_v13, %v16261_v8  ;;  %v6361_v41 = vadd.f32 %v6329_v37, %v6289_v63  ;;  %v6003_v7 = vadd.f32 %v5971_v61, %v5931_v25  ;;  %v6116_v54 = vmul.f32 %v16318_v13, %v16265_v11 }
 0x4f9   : > { %11340 = vmatprep.mubr.msk.bf16.mxu1 %vm458_vm0, %v6493_v28  ;;  %v6187_v29 = vmul.f32 %v16330_v39, %v16325_v57  ;;  %v6362_v21 = vadd.f32 %v6330_v24, %v6290_v17  ;;  %v6004_v1 = vadd.f32 %v5972_v26, %v5932_v51  ;;  %v6188_v23 = vmul.f32 %v16334_v59, %v16330_v39  ;;  %v16393_v51 = vld [vmem:[#allocation3 + $0x168] sm:$0xff] }
 0x4fa   : > { %v6259_v32 = vmul.f32 %v16343_v50, %v16338_v53  ;;  %v6401_v2 = vmul.f32 %v15759_v35, %v6361_v41  ;;  %v6075_v6 = vadd.f32 %v6043_v16, %v6003_v7  ;;  %v6260_v60 = vmul.f32 %v16348_v5, %v16343_v50  ;;  %v16404_v7 = vld [vmem:[%s19001_s5 + $0x2] ss:$0 sm:$0xff] }
 0x4fb   : > { %v6331_v33 = vmul.f32 %v16357_v46, %v16352_v4  ;;  %v6402_v52 = vmul.f32 %v15759_v35, %v6362_v21  ;;  %v6076_v37 = vadd.f32 %v6044_v40, %v6004_v1  ;;  %v6332_v24 = vmul.f32 %v16362_v18, %v16357_v46  ;;  %v16407_v21 = vld [vmem:[#allocation3 + $0x169] sm:$0xff] }
 0x4fc   : > { %v5757_v58 = vmul.f32 %v16272_v0, %v16243_v34  ;;  %v6441_v38 = vadd.f32 %v15771_v42, %v6401_v2  ;;  %v6147_v27 = vadd.f32 %v6115_v15, %v6075_v6  ;;  %v5758_v56 = vmul.f32 %v16272_v0, %v16247_v12  ;;  %v16397_v15 = vld [vmem:[#allocation3 + $0x170] sm:$0xff] }
 0x4fd   : > { %v5829_v36 = vmul.f32 %v16283_v55, %v16251_v31  ;;  %v6442_v35 = vadd.f32 %v15771_v42, %v6402_v52  ;;  %v6148_v19 = vadd.f32 %v6116_v54, %v6076_v37  ;;  %v5830_v62 = vmul.f32 %v16283_v55, %v16255_v49  ;;  %v12206_v52 = vld [vmem:[#allocation3 + $0x172] sm:$0xff] }
 0x4fe   : > { %v5901_v10 = vmul.f32 %v16292_v9, %v16261_v8  ;;  %v6473_v43 = vmax.f32 %v6441_v38, 0.0  ;;  %v6219_v34 = vadd.f32 %v6187_v29, %v6147_v27  ;;  %v5902_v45 = vmul.f32 %v16292_v9, %v16265_v11 }
 0x4ff   : > { %v5861_v22 = vadd.f32 %v5829_v36, %v5757_v58  ;;  %v6474_v14 = vmax.f32 %v6442_v35, 0.0  ;;  %v6220_v12 = vadd.f32 %v6188_v23, %v6148_v19  ;;  %v5862_v30 = vadd.f32 %v5830_v62, %v5758_v56  ;;  %v16411_v23 = vld [vmem:[#allocation3 + $0x171] sm:$0xff] }
 0x500   : > { %v5973_v31 = vmul.f32 %v16325_v57, %v16300_v48  ;;  %v6291_v42 = vadd.f32 %v6259_v32, %v6219_v34  ;;  %v5974_v49 = vmul.f32 %v16334_v59, %v16300_v48  ;;  %v6045_v8 = vmul.f32 %v16338_v53, %v16309_v47 }
 0x501   : > { %v5933_v44 = vadd.f32 %v5901_v10, %v5861_v22  ;;  %v6494_v3 = vpack.c.bf16 %v6474_v14, %v6473_v43  ;;  %v6292_v20 = vadd.f32 %v6260_v60, %v6220_v12  ;;  %v5934_v61 = vadd.f32 %v5902_v45, %v5862_v30  ;;  %v12205_v60 = vld [vmem:[#allocation3 + $0x16a] sm:$0xff] }
 0x502   : > { %v6046_v11 = vmul.f32 %v16348_v5, %v16309_v47  ;;  %v6363_v26 = vadd.f32 %v6331_v33, %v6291_v42  ;;  %v6117_v63 = vmul.f32 %v16352_v4, %v16318_v13  ;;  %v6118_v25 = vmul.f32 %v16362_v18, %v16318_v13 }
 0x503   : > { %v6005_v28 = vadd.f32 %v5973_v31, %v5933_v44  ;;  %11341 = vmatmul.mubr.msk.bf16.gmra.mrb[52].mxu1 %vm458_vm0, %v6494_v3  ;;  %v6364_v16 = vadd.f32 %v6332_v24, %v6292_v20  ;;  %v6006_v17 = vadd.f32 %v5974_v49, %v5934_v61  ;;  %v6189_v40 = vmul.f32 %v16393_v51, %v16330_v39  ;;  %v16421_v24 = vld [vmem:[%s19002_s6 + $0x2] ss:$0 sm:$0xff] }
 0x504   : > { %v6190_v41 = vmul.f32 %v16397_v15, %v16330_v39  ;;  %v6403_v54 = vmul.f32 %v16404_v7, %v6363_v26  ;;  %v6261_v1 = vmul.f32 %v16407_v21, %v16343_v50  ;;  %v6262_v32 = vmul.f32 %v16411_v23, %v16343_v50  ;;  %v12208_v26 = vld [vmem:[#allocation3 + $0x180] sm:$0xff] }
 0x505   : > { %v6077_v29 = vadd.f32 %v6045_v8, %v6005_v28  ;;  %v6404_v2 = vmul.f32 %v16404_v7, %v6364_v16  ;;  %v6078_v6 = vadd.f32 %v6046_v11, %v6006_v17  ;;  %v6333_v33 = vmul.f32 %v12205_v60, %v16357_v46  ;;  %v12210_v17 = vld [vmem:[#allocation3 + $0x181] sm:$0xff] }
 0x506   : > { %v6334_v37 = vmul.f32 %v12206_v52, %v16357_v46  ;;  %v6443_v58 = vadd.f32 %v16421_v24, %v6403_v54  ;;  %v5759_v27 = vmul.f32 %v16325_v57, %v16272_v0  ;;  %v5760_v56 = vmul.f32 %v16334_v59, %v16272_v0 }
 0x507   : > { %v6149_v38 = vadd.f32 %v6117_v63, %v6077_v29  ;;  %v6444_v36 = vadd.f32 %v16421_v24, %v6404_v2  ;;  %v6150_v35 = vadd.f32 %v6118_v25, %v6078_v6  ;;  %v5831_v19 = vmul.f32 %v16338_v53, %v16283_v55  ;;  %v12209_v25 = vld [vmem:[#allocation3 + $0x188] sm:$0xff] }
 0x508   : > { %v5832_v62 = vmul.f32 %v16348_v5, %v16283_v55  ;;  %v6475_v10 = vmax.f32 %v6443_v58, 0.0  ;;  %v5903_v34 = vmul.f32 %v16352_v4, %v16292_v9  ;;  %v5904_v57 = vmul.f32 %v16362_v18, %v16292_v9  ;;  %v12212_v2 = vld [vmem:[#allocation3 + $0x182] sm:$0xff] }
 0x509   : > { %v6221_v43 = vadd.f32 %v6189_v40, %v6149_v38  ;;  %v6476_v22 = vmax.f32 %v6444_v36, 0.0  ;;  %v6222_v45 = vadd.f32 %v6190_v41, %v6150_v35  ;;  %v5863_v59 = vadd.f32 %v5831_v19, %v5759_v27  ;;  %v12211_v41 = vld [vmem:[#allocation3 + $0x189] sm:$0xff] }
 0x50a   : > { %v5864_v14 = vadd.f32 %v5832_v62, %v5760_v56  ;;  %v5975_v30 = vmul.f32 %v16393_v51, %v16300_v48  ;;  %v5976_v53 = vmul.f32 %v16397_v15, %v16300_v48  ;;  %v6047_v5 = vmul.f32 %v16407_v21, %v16309_v47 }
 0x50b   : > { %v6293_v12 = vadd.f32 %v6261_v1, %v6221_v43  ;;  %v6495_v31 = vpack.c.bf16 %v6476_v22, %v6475_v10  ;;  %v6294_v42 = vadd.f32 %v6262_v32, %v6222_v45  ;;  %v5935_v4 = vadd.f32 %v5903_v34, %v5863_v59 }
 0x50c   : > { %v5936_v44 = vadd.f32 %v5904_v57, %v5864_v14  ;;  %v6048_v18 = vmul.f32 %v16411_v23, %v16309_v47  ;;  %v6119_v8 = vmul.f32 %v12205_v60, %v16318_v13  ;;  %v6120_v3 = vmul.f32 %v12206_v52, %v16318_v13 }
 0x50d   : > { %v6365_v49 = vadd.f32 %v6333_v33, %v6293_v12  ;;  %11344 = vmatprep.mubr.msk.bf16.mxu1 %vm458_vm0, %v6495_v31  ;;  %v6366_v20 = vadd.f32 %v6334_v37, %v6294_v42  ;;  %v6007_v61 = vadd.f32 %v5975_v30, %v5935_v4  ;;  %v6191_v28 = vmul.f32 %v12208_v26, %v16330_v39  ;;  %v12213_v37 = vld [vmem:[#allocation3 + $0x18a] sm:$0xff]  ;;  %v12214_v42 = vld [vmem:[#allocation3 + $0x198] sm:$0xff] }
 0x50e   : > { %v6008_v11 = vadd.f32 %v5976_v53, %v5936_v44  ;;  %v6192_v16 = vmul.f32 %v12209_v25, %v16330_v39  ;;  %v6263_v40 = vmul.f32 %v12210_v17, %v16343_v50  ;;  %v6264_v54 = vmul.f32 %v12211_v41, %v16343_v50  ;;  %v16479_v4 = vld [vmem:[%s19000_s4 + $0x1b] ss:$0 sm:$0xff] }
 0x50f   : > { %v6405_v63 = vmul.f32 %v16404_v7, %v6365_v49  ;;  %v6406_v29 = vmul.f32 %v16404_v7, %v6366_v20  ;;  %v6079_v1 = vadd.f32 %v6047_v5, %v6007_v61  ;;  %v6335_v6 = vmul.f32 %v12212_v2, %v16357_v46  ;;  %v12215_v49 = vld [vmem:[#allocation3 + $0x1a0] sm:$0xff]  ;;  %v16487_v20 = vld [vmem:[%s19000_s4 + $0x1c] ss:$0 sm:$0xff] }
 0x510   : > { %v6080_v32 = vadd.f32 %v6048_v18, %v6008_v11  ;;  %v6336_v58 = vmul.f32 %v12213_v37, %v16357_v46  ;;  %v5761_v38 = vmul.f32 %v16393_v51, %v16272_v0  ;;  %v5762_v27 = vmul.f32 %v16397_v15, %v16272_v0  ;;  %v12216_v18 = vld [vmem:[#allocation3 + $0x199] sm:$0xff] }
 0x511   : > { %v6445_v33 = vadd.f32 %v16421_v24, %v6405_v63  ;;  %v6446_v56 = vadd.f32 %v16421_v24, %v6406_v29  ;;  %v6151_v36 = vadd.f32 %v6119_v8, %v6079_v1  ;;  %v5833_v19 = vmul.f32 %v16407_v21, %v16283_v55  ;;  %v12217_v8 = vld [vmem:[#allocation3 + $0x1a1] sm:$0xff] }
 0x512   : > { %v6152_v35 = vadd.f32 %v6120_v3, %v6080_v32  ;;  %v5834_v10 = vmul.f32 %v16411_v23, %v16283_v55  ;;  %v5905_v43 = vmul.f32 %v12205_v60, %v16292_v9  ;;  %v5906_v34 = vmul.f32 %v12206_v52, %v16292_v9 }
 0x513   : > { %v6477_v62 = vmax.f32 %v6445_v33, 0.0  ;;  %v6478_v57 = vmax.f32 %v6446_v56, 0.0  ;;  %v6223_v51 = vadd.f32 %v6191_v28, %v6151_v36  ;;  %v5865_v45 = vadd.f32 %v5833_v19, %v5761_v38  ;;  %v12218_v28 = vld [vmem:[#allocation3 + $0x19a] sm:$0xff]  ;;  %v16506_v33 = vld [vmem:[%s19000_s4 + $0x1e] ss:$0 sm:$0xff]  ;;  %v12224_v38 = vld [vmem:[#allocation3 + $0x2] sm:$0xff] }
 0x514   : > { %v6224_v22 = vadd.f32 %v6192_v16, %v6152_v35  ;;  %v5866_v0 = vadd.f32 %v5834_v10, %v5762_v27  ;;  %v5977_v15 = vmul.f32 %v12208_v26, %v16300_v48  ;;  %v5978_v59 = vmul.f32 %v12209_v25, %v16300_v48  ;;  %v12225_v56 = vld [vmem:[#allocation3 + $0xa] sm:$0xff] }
 0x515   : > { %v6049_v14 = vmul.f32 %v12210_v17, %v16309_v47  ;;  %v6496_v21 = vpack.c.bf16 %v6478_v57, %v6477_v62  ;;  %v6295_v12 = vadd.f32 %v6263_v40, %v6223_v51  ;;  %v5937_v53 = vadd.f32 %v5905_v43, %v5865_v45  ;;  %v12220_v17 = vld [vmem:[#allocation3] sm:$0xff]  ;;  %v16514_v35 = vld [vmem:[%s19000_s4 + $0x1f] ss:$0 sm:$0xff] }
 0x516   : > { %v6296_v30 = vadd.f32 %v6264_v54, %v6224_v22  ;;  %v5938_v55 = vadd.f32 %v5906_v34, %v5866_v0  ;;  %v6050_v23 = vmul.f32 %v12211_v41, %v16309_v47  ;;  %v6121_v9 = vmul.f32 %v12212_v2, %v16318_v13  ;;  %v12221_v41 = vld [vmem:[#allocation3 + $0x8] sm:$0xff]  ;;  %v16519_v34 = vld [vmem:[%s19000_s4 + $0x20] ss:$0 sm:$0xff]  ;;  %v12226_v22 = vld [vmem:[#allocation3 + $0x18] sm:$0xff] }
 0x517   : > { %v6122_v60 = vmul.f32 %v12213_v37, %v16318_v13  ;;  %11345 = vmatmul.mubr.msk.bf16.gmra.mrb[56].mxu1 %vm458_vm0, %v6496_v21  ;;  %v6367_v52 = vadd.f32 %v6335_v6, %v6295_v12  ;;  %v6009_v31 = vadd.f32 %v5977_v15, %v5937_v53  ;;  %v6193_v48 = vmul.f32 %v12214_v42, %v16330_v39  ;;  %v12222_v2 = vld [vmem:[#allocation3 + $0x1] sm:$0xff]  ;;  %v12223_v37 = vld [vmem:[#allocation3 + $0x9] sm:$0xff]  ;;  %v16539_v42 = vld [vmem:[%s19000_s4 + $0x23] ss:$0 sm:$0xff] }
 0x518   : > { %v6368_v5 = vadd.f32 %v6336_v58, %v6296_v30  ;;  %v6010_v44 = vadd.f32 %v5978_v59, %v5938_v55  ;;  %v6194_v47 = vmul.f32 %v12215_v49, %v16330_v39  ;;  %v6265_v13 = vmul.f32 %v12216_v18, %v16343_v50  ;;  %v16495_v39 = vld [vmem:[%s19000_s4 + $0x1d] ss:$0 sm:$0xff]  ;;  %v12227_v0 = vld [vmem:[#allocation3 + $0x20] sm:$0xff]  ;;  %v16526_v59 = vld [vmem:[%s19000_s4 + $0x21] ss:$0 sm:$0xff] }
 0x519   : > { %v6266_v3 = vmul.f32 %v12217_v8, %v16343_v50  ;;  %v6407_v61 = vmul.f32 %v16404_v7, %v6367_v52  ;;  %v6081_v26 = vadd.f32 %v6049_v14, %v6009_v31  ;;  %v6337_v63 = vmul.f32 %v12218_v28, %v16357_v46  ;;  %v12219_v50 = vld [vmem:[#allocation3 + $0x1a2] sm:$0xff]  ;;  %v12228_v30 = vld [vmem:[#allocation3 + $0x19] sm:$0xff]  ;;  %v16532_v55 = vld [vmem:[%s19000_s4 + $0x22] ss:$0 sm:$0xff] }
 0x51a   : > { %v6408_v11 = vmul.f32 %v16404_v7, %v6368_v5  ;;  %v6082_v25 = vadd.f32 %v6050_v23, %v6010_v44  ;;  %v6338_v16 = vmul.f32 %v12219_v50, %v16357_v46  ;;  %v6765_v40 = vmul.f32 %v12220_v17, %v16479_v4  ;;  %v12230_v5 = vld [vmem:[#allocation3 + $0x1a] sm:$0xff]  ;;  %v12231_v49 = vld [vmem:[#allocation3 + $0x22] sm:$0xff]  ;;  %v16543_v18 = vld [vmem:[#allocation3 + $0x30] sm:$0xff] }
 0x51b   : > { %v6766_v54 = vmul.f32 %v12221_v41, %v16479_v4  ;;  %v6447_v29 = vadd.f32 %v16421_v24, %v6407_v61  ;;  %v6153_v32 = vadd.f32 %v6121_v9, %v6081_v26  ;;  %v6837_v6 = vmul.f32 %v12222_v2, %v16487_v20  ;;  %v16547_v61 = vld [vmem:[#allocation3 + $0x38] sm:$0xff] }
 0x51c   : > { %v6448_v1 = vadd.f32 %v16421_v24, %v6408_v11  ;;  %v6154_v46 = vadd.f32 %v6122_v60, %v6082_v25  ;;  %v6838_v58 = vmul.f32 %v12223_v37, %v16487_v20  ;;  %v6909_v27 = vmul.f32 %v12224_v38, %v16495_v39  ;;  %v12229_v60 = vld [vmem:[#allocation3 + $0x21] sm:$0xff]  ;;  %v16551_v26 = vld [vmem:[#allocation3 + $0x31] sm:$0xff]  ;;  %v16556_v50 = vld [vmem:[#allocation3 + $0x39] sm:$0xff] }
 0x51d   : > { %v6910_v36 = vmul.f32 %v12225_v56, %v16495_v39  ;;  %v6479_v19 = vmax.f32 %v6447_v29, 0.0  ;;  %v6225_v10 = vadd.f32 %v6193_v48, %v6153_v32  ;;  %v6869_v43 = vadd.f32 %v6837_v6, %v6765_v40  ;;  %v16565_v29 = vld [vmem:[#allocation3 + $0x3a] sm:$0xff] }
 0x51e   : > { %v6480_v62 = vmax.f32 %v6448_v1, 0.0  ;;  %v6226_v57 = vadd.f32 %v6194_v47, %v6154_v46  ;;  %v6870_v51 = vadd.f32 %v6838_v58, %v6766_v54  ;;  %v6981_v45 = vmul.f32 %v12226_v22, %v16506_v33 }
 0x51f   : > { %v6982_v15 = vmul.f32 %v12227_v0, %v16506_v33  ;;  %v6297_v21 = vadd.f32 %v6265_v13, %v6225_v10  ;;  %v6941_v12 = vadd.f32 %v6909_v27, %v6869_v43  ;;  %v7053_v53 = vmul.f32 %v12228_v30, %v16514_v35 }
 0x520   : > { %v6497_v14 = vpack.c.bf16 %v6480_v62, %v6479_v19  ;;  %v6298_v23 = vadd.f32 %v6266_v3, %v6226_v57  ;;  %v6942_v9 = vadd.f32 %v6910_v36, %v6870_v51  ;;  %v7054_v52 = vmul.f32 %v12229_v60, %v16514_v35 }
 0x521   : > { %v7125_v31 = vmul.f32 %v12230_v5, %v16519_v34  ;;  %v6369_v48 = vadd.f32 %v6337_v63, %v6297_v21  ;;  %v7013_v44 = vadd.f32 %v6981_v45, %v6941_v12  ;;  %v7126_v47 = vmul.f32 %v12231_v49, %v16519_v34  ;;  %v16586_v21 = vld [vmem:[%s19001_s5 + $0x3] ss:$0 sm:$0xff] }
 0x522   : > { %11348 = vmatprep.mubr.msk.bf16.mxu1 %vm458_vm0, %v6497_v14  ;;  %v7197_v13 = vmul.f32 %v16543_v18, %v16526_v59  ;;  %v6370_v8 = vadd.f32 %v6338_v16, %v6298_v23  ;;  %v7014_v3 = vadd.f32 %v6982_v15, %v6942_v9  ;;  %v7198_v11 = vmul.f32 %v16547_v61, %v16526_v59  ;;  %v16560_v16 = vld [vmem:[#allocation3 + $0x32] sm:$0xff] }
 0x523   : > { %v7269_v28 = vmul.f32 %v16551_v26, %v16532_v55  ;;  %v6409_v63 = vmul.f32 %v16404_v7, %v6369_v48  ;;  %v7085_v25 = vadd.f32 %v7053_v53, %v7013_v44  ;;  %v7270_v17 = vmul.f32 %v16556_v50, %v16532_v55  ;;  %v16600_v48 = vld [vmem:[#allocation3 + $0x48] sm:$0xff] }
 0x524   : > { %v7341_v40 = vmul.f32 %v16560_v16, %v16539_v42  ;;  %v6410_v41 = vmul.f32 %v16404_v7, %v6370_v8  ;;  %v7086_v54 = vadd.f32 %v7054_v52, %v7014_v3  ;;  %v7342_v1 = vmul.f32 %v16565_v29, %v16539_v42  ;;  %v16609_v3 = vld [vmem:[#allocation3 + $0x49] sm:$0xff] }
 0x525   : > { %v6767_v32 = vmul.f32 %v12226_v22, %v16479_v4  ;;  %v6449_v2 = vadd.f32 %v16421_v24, %v6409_v63  ;;  %v7157_v6 = vadd.f32 %v7125_v31, %v7085_v25  ;;  %v6768_v46 = vmul.f32 %v12227_v0, %v16479_v4 }
 0x526   : > { %v6839_v37 = vmul.f32 %v12228_v30, %v16487_v20  ;;  %v6450_v58 = vadd.f32 %v16421_v24, %v6410_v41  ;;  %v7158_v38 = vadd.f32 %v7126_v47, %v7086_v54  ;;  %v6840_v7 = vmul.f32 %v12229_v60, %v16487_v20  ;;  %v12243_v54 = vld [vmem:[#allocation3 + $0x52] sm:$0xff] }
 0x527   : > { %v6911_v27 = vmul.f32 %v12230_v5, %v16495_v39  ;;  %v6481_v56 = vmax.f32 %v6449_v2, 0.0  ;;  %v7229_v36 = vadd.f32 %v7197_v13, %v7157_v6  ;;  %v6912_v62 = vmul.f32 %v12231_v49, %v16495_v39  ;;  %v16598_v5 = vld [vmem:[%s19002_s6 + $0x3] ss:$0 sm:$0xff] }
 0x528   : > { %v6871_v19 = vadd.f32 %v6839_v37, %v6767_v32  ;;  %v6482_v10 = vmax.f32 %v6450_v58, 0.0  ;;  %v7230_v43 = vadd.f32 %v7198_v11, %v7158_v38  ;;  %v6872_v57 = vadd.f32 %v6840_v7, %v6768_v46  ;;  %v16604_v49 = vld [vmem:[#allocation3 + $0x50] sm:$0xff] }
 0x529   : > { %v6983_v51 = vmul.f32 %v16543_v18, %v16506_v33  ;;  %v7301_v22 = vadd.f32 %v7269_v28, %v7229_v36  ;;  %v6984_v24 = vmul.f32 %v16547_v61, %v16506_v33  ;;  %v7055_v0 = vmul.f32 %v16551_v26, %v16514_v35  ;;  %v16613_v28 = vld [vmem:[#allocation3 + $0x51] sm:$0xff] }
 0x52a   : > { %v6943_v45 = vadd.f32 %v6911_v27, %v6871_v19  ;;  %v6498_v15 = vpack.c.bf16 %v6482_v10, %v6481_v56  ;;  %v7302_v14 = vadd.f32 %v7270_v17, %v7230_v43  ;;  %v6944_v12 = vadd.f32 %v6912_v62, %v6872_v57 }
 0x52b   : > { %v7056_v30 = vmul.f32 %v16556_v50, %v16514_v35  ;;  %v7373_v53 = vadd.f32 %v7341_v40, %v7301_v22  ;;  %v7127_v9 = vmul.f32 %v16560_v16, %v16519_v34  ;;  %v7128_v60 = vmul.f32 %v16565_v29, %v16519_v34  ;;  %v12242_v40 = vld [vmem:[#allocation3 + $0x4a] sm:$0xff] }
 0x52c   : > { %v7015_v23 = vadd.f32 %v6983_v51, %v6943_v45  ;;  %11349 = vmatmul.mubr.msk.bf16.gmra.mrb[60].mxu1 %vm458_vm0, %v6498_v15  ;;  %v7374_v52 = vadd.f32 %v7342_v1, %v7302_v14  ;;  %v7016_v31 = vadd.f32 %v6984_v24, %v6944_v12  ;;  %v7199_v44 = vmul.f32 %v16600_v48, %v16526_v59 }
 0x52d   : > { %v7200_v47 = vmul.f32 %v16604_v49, %v16526_v59  ;;  %v7413_v13 = vmul.f32 %v16586_v21, %v7373_v53  ;;  %v7271_v11 = vmul.f32 %v16609_v3, %v16532_v55  ;;  %v7272_v63 = vmul.f32 %v16613_v28, %v16532_v55  ;;  %v16645_v53 = vld [vmem:[#allocation3 + $0x60] sm:$0xff] }
 0x52e   : > { %v7087_v8 = vadd.f32 %v7055_v0, %v7015_v23  ;;  %v7414_v25 = vmul.f32 %v16586_v21, %v7374_v52  ;;  %v7088_v17 = vadd.f32 %v7056_v30, %v7016_v31  ;;  %v7343_v41 = vmul.f32 %v12242_v40, %v16539_v42  ;;  %v16654_v31 = vld [vmem:[#allocation3 + $0x61] sm:$0xff] }
 0x52f   : > { %v7344_v1 = vmul.f32 %v12243_v54, %v16539_v42  ;;  %v7453_v32 = vadd.f32 %v16598_v5, %v7413_v13  ;;  %v6769_v6 = vmul.f32 %v16543_v18, %v16479_v4  ;;  %v6770_v46 = vmul.f32 %v16547_v61, %v16479_v4 }
 0x530   : > { %v7159_v2 = vadd.f32 %v7127_v9, %v7087_v8  ;;  %v7454_v37 = vadd.f32 %v16598_v5, %v7414_v25  ;;  %v7160_v58 = vadd.f32 %v7128_v60, %v7088_v17  ;;  %v6841_v38 = vmul.f32 %v16551_v26, %v16487_v20  ;;  %v16650_v60 = vld [vmem:[#allocation3 + $0x68] sm:$0xff] }
 0x531   : > { %v6842_v7 = vmul.f32 %v16556_v50, %v16487_v20  ;;  %v7485_v27 = vmax.f32 %v7453_v32, 0.0  ;;  %v6913_v36 = vmul.f32 %v16560_v16, %v16495_v39  ;;  %v6914_v18 = vmul.f32 %v16565_v29, %v16495_v39  ;;  %v16663_v25 = vld [vmem:[#allocation3 + $0x62] sm:$0xff] }
 0x532   : > { %v7231_v56 = vadd.f32 %v7199_v44, %v7159_v2  ;;  %v7486_v19 = vmax.f32 %v7454_v37, 0.0  ;;  %v7232_v62 = vadd.f32 %v7200_v47, %v7160_v58  ;;  %v6873_v61 = vadd.f32 %v6841_v38, %v6769_v6  ;;  %v16658_v47 = vld [vmem:[#allocation3 + $0x69] sm:$0xff] }
 0x533   : > { %v6874_v10 = vadd.f32 %v6842_v7, %v6770_v46  ;;  %v6985_v57 = vmul.f32 %v16600_v48, %v16506_v33  ;;  %v6986_v26 = vmul.f32 %v16604_v49, %v16506_v33  ;;  %v7057_v50 = vmul.f32 %v16609_v3, %v16514_v35 }
 0x534   : > { %v7303_v43 = vadd.f32 %v7271_v11, %v7231_v56  ;;  %v7517_v51 = vpack.c.bf16 %v7486_v19, %v7485_v27  ;;  %v7304_v22 = vadd.f32 %v7272_v63, %v7232_v62  ;;  %v6945_v16 = vadd.f32 %v6913_v36, %v6873_v61 }
 0x535   : > { %v6946_v45 = vadd.f32 %v6914_v18, %v6874_v10  ;;  %v7058_v29 = vmul.f32 %v16613_v28, %v16514_v35  ;;  %v7129_v0 = vmul.f32 %v12242_v40, %v16519_v34  ;;  %v7130_v15 = vmul.f32 %v12243_v54, %v16519_v34 }
 0x536   : > { %v7375_v24 = vadd.f32 %v7343_v41, %v7303_v43  ;;  %11356 = vmatprep.mubr.msk.bf16.mxu1 %vm458_vm0, %v7517_v51  ;;  %v7376_v14 = vadd.f32 %v7344_v1, %v7304_v22  ;;  %v7017_v12 = vadd.f32 %v6985_v57, %v6945_v16  ;;  %v7201_v23 = vmul.f32 %v16645_v53, %v16526_v59  ;;  %v12249_v1 = vld [vmem:[#allocation3 + $0x6a] sm:$0xff] }
 0x537   : > { %v7018_v30 = vadd.f32 %v6986_v26, %v6946_v45  ;;  %v7202_v52 = vmul.f32 %v16650_v60, %v16526_v59  ;;  %v7273_v44 = vmul.f32 %v16654_v31, %v16532_v55  ;;  %v7274_v13 = vmul.f32 %v16658_v47, %v16532_v55 }
 0x538   : > { %v7415_v9 = vmul.f32 %v16586_v21, %v7375_v24  ;;  %v7416_v8 = vmul.f32 %v16586_v21, %v7376_v14  ;;  %v7089_v11 = vadd.f32 %v7057_v50, %v7017_v12  ;;  %v7345_v17 = vmul.f32 %v16663_v25, %v16539_v42  ;;  %v16702_v12 = vld [vmem:[#allocation3 + $0x80] sm:$0xff] }
 0x539   : > { %v7090_v63 = vadd.f32 %v7058_v29, %v7018_v30  ;;  %v7346_v32 = vmul.f32 %v12249_v1, %v16539_v42  ;;  %v6771_v2 = vmul.f32 %v16600_v48, %v16479_v4  ;;  %v6772_v6 = vmul.f32 %v16604_v49, %v16479_v4  ;;  %v16695_v29 = vld [vmem:[#allocation3 + $0x78] sm:$0xff] }
 0x53a   : > { %v7455_v41 = vadd.f32 %v16598_v5, %v7415_v9  ;;  %v7456_v46 = vadd.f32 %v16598_v5, %v7416_v8  ;;  %v7161_v37 = vadd.f32 %v7129_v0, %v7089_v11  ;;  %v6843_v38 = vmul.f32 %v16609_v3, %v16487_v20 }
 0x53b   : > { %v7162_v58 = vadd.f32 %v7130_v15, %v7090_v63  ;;  %v6844_v27 = vmul.f32 %v16613_v28, %v16487_v20  ;;  %v6915_v56 = vmul.f32 %v12242_v40, %v16495_v39  ;;  %v6916_v36 = vmul.f32 %v12243_v54, %v16495_v39  ;;  %v11969_v54 = vld [vmem:[%s19003_s7 + $0x48] sm:$0xff]   ;;  %v12251_v15 = vld [vmem:[%s19003_s7 + $0x40] sm:$0xff]  }
 0x53c   : > { %v7487_v7 = vmax.f32 %v7455_v41, 0.0  ;;  %v7488_v18 = vmax.f32 %v7456_v46, 0.0  ;;  %v7233_v48 = vadd.f32 %v7201_v23, %v7161_v37  ;;  %v6875_v62 = vadd.f32 %v6843_v38, %v6771_v2  ;;  %v16706_v23 = vld [vmem:[#allocation3 + $0x79] sm:$0xff] }
 0x53d   : > { %v7234_v19 = vadd.f32 %v7202_v52, %v7162_v58  ;;  %v6876_v49 = vadd.f32 %v6844_v27, %v6772_v6  ;;  %v6987_v61 = vmul.f32 %v16645_v53, %v16506_v33  ;;  %v6988_v10 = vmul.f32 %v16650_v60, %v16506_v33  ;;  %v16710_v52 = vld [vmem:[#allocation3 + $0x81] sm:$0xff] }
 0x53e   : > { %v7059_v3 = vmul.f32 %v16654_v31, %v16514_v35  ;;  %v7518_v43 = vpack.c.bf16 %v7488_v18, %v7487_v7  ;;  %v7305_v28 = vadd.f32 %v7273_v44, %v7233_v48  ;;  %v6947_v40 = vadd.f32 %v6915_v56, %v6875_v62  ;;  %v16716_v63 = vld [vmem:[#allocation3 + $0x7a] sm:$0xff] }
 0x53f   : > { %v7306_v57 = vadd.f32 %v7274_v13, %v7234_v19  ;;  %v6948_v26 = vadd.f32 %v6916_v36, %v6876_v49  ;;  %v7060_v50 = vmul.f32 %v16658_v47, %v16514_v35  ;;  %v7131_v51 = vmul.f32 %v16663_v25, %v16519_v34 }
 0x540   : > { %v7132_v22 = vmul.f32 %v12249_v1, %v16519_v34  ;;  %11357 = vmatmul.mubr.msk.bf16.vlgmr.msra.gmra.mrb[32].mxu1 %vm458_vm0, %v7518_v43  ;;  %v7377_v16 = vadd.f32 %v7345_v17, %v7305_v28  ;;  %v7019_v24 = vadd.f32 %v6987_v61, %v6947_v40  ;;  %v7203_v0 = vmul.f32 %v16695_v29, %v16526_v59 }
 0x541   : > { %v7378_v45 = vadd.f32 %v7346_v32, %v7306_v57  ;;  %11389 = vmatpush3.bf16.msra.mxu1 %v12251_v15  ;;  %v7020_v14 = vadd.f32 %v6988_v10, %v6948_v26  ;;  %v7204_v30 = vmul.f32 %v16702_v12, %v16526_v59  ;;  %v7275_v9 = vmul.f32 %v16706_v23, %v16532_v55  ;;  %v16720_v32 = vld [vmem:[#allocation3 + $0x82] sm:$0xff] }
 0x542   : > { %v7276_v44 = vmul.f32 %v16710_v52, %v16532_v55  ;;  %v7417_v13 = vmul.f32 %v16586_v21, %v7377_v16  ;;  %v7091_v11 = vadd.f32 %v7059_v3, %v7019_v24  ;;  %v7347_v17 = vmul.f32 %v16716_v63, %v16539_v42  ;;  %11390 = vmatprep.subr.bf16.mxu1 %v11969_v54 }
 0x543   : > { %v7418_v8 = vmul.f32 %v16586_v21, %v7378_v45  ;;  %v7092_v41 = vadd.f32 %v7060_v50, %v7020_v14  ;;  %v7348_v2 = vmul.f32 %v16720_v32, %v16539_v42  ;;  %v6773_v6 = vmul.f32 %v16645_v53, %v16479_v4  ;;  %v16750_v50 = vld [vmem:[#allocation3 + $0x90] sm:$0xff]  ;;  %v16754_v45 = vld [vmem:[#allocation3 + $0x98] sm:$0xff] }
 0x544   : > { %v6774_v46 = vmul.f32 %v16650_v60, %v16479_v4  ;;  %v7457_v37 = vadd.f32 %v16598_v5, %v7417_v13  ;;  %v7163_v38 = vadd.f32 %v7131_v51, %v7091_v11  ;;  %v6845_v7 = vmul.f32 %v16654_v31, %v16487_v20  ;;  %v16767_v13 = vld [vmem:[#allocation3 + $0x92] sm:$0xff] }
 0x545   : > { %v7458_v58 = vadd.f32 %v16598_v5, %v7418_v8  ;;  %v7164_v27 = vadd.f32 %v7132_v22, %v7092_v41  ;;  %v6846_v56 = vmul.f32 %v16658_v47, %v16487_v20  ;;  %v6917_v36 = vmul.f32 %v16663_v25, %v16495_v39  ;;  %11391 = vmatpush3.bf16.msra.mxu1 %v11969_v54  ;;  %v12262_v41 = vld [vmem:[#allocation3 + $0x9a] sm:$0xff] }
 0x546   : > { %v6918_v53 = vmul.f32 %v12249_v1, %v16495_v39  ;;  %v7489_v18 = vmax.f32 %v7457_v37, 0.0  ;;  %v7235_v48 = vadd.f32 %v7203_v0, %v7163_v38  ;;  %v6877_v19 = vadd.f32 %v6845_v7, %v6773_v6  ;;  %v16758_v0 = vld [vmem:[#allocation3 + $0x91] sm:$0xff] }
 0x547   : > { %v7490_v60 = vmax.f32 %v7458_v58, 0.0  ;;  %v7236_v62 = vadd.f32 %v7204_v30, %v7164_v27  ;;  %v6878_v49 = vadd.f32 %v6846_v56, %v6774_v46  ;;  %v6989_v61 = vmul.f32 %v16695_v29, %v16506_v33 }
 0x548   : > { %v6990_v31 = vmul.f32 %v16702_v12, %v16506_v33  ;;  %v7307_v47 = vadd.f32 %v7275_v9, %v7235_v48  ;;  %v6949_v3 = vadd.f32 %v6917_v36, %v6877_v19  ;;  %v7061_v25 = vmul.f32 %v16706_v23, %v16514_v35  ;;  %v16763_v9 = vld [vmem:[#allocation3 + $0x99] sm:$0xff] }
 0x549   : > { %v7519_v10 = vpack.c.bf16 %v7490_v60, %v7489_v18  ;;  %v7308_v1 = vadd.f32 %v7276_v44, %v7236_v62  ;;  %v6950_v43 = vadd.f32 %v6918_v53, %v6878_v49  ;;  %v7062_v28 = vmul.f32 %v16710_v52, %v16514_v35 }
 0x54a   : > { %v7133_v57 = vmul.f32 %v16716_v63, %v16519_v34  ;;  %v7379_v40 = vadd.f32 %v7347_v17, %v7307_v47  ;;  %v7021_v54 = vadd.f32 %v6989_v61, %v6949_v3  ;;  %v7134_v26 = vmul.f32 %v16720_v32, %v16519_v34 }
 0x54b   : > { %11360 = vmatprep.mubr.msk.bf16.mxu1 %vm458_vm0, %v7519_v10  ;;  %v7205_v51 = vmul.f32 %v16750_v50, %v16526_v59  ;;  %v7380_v22 = vadd.f32 %v7348_v2, %v7308_v1  ;;  %v7022_v16 = vadd.f32 %v6990_v31, %v6950_v43  ;;  %v7206_v24 = vmul.f32 %v16754_v45, %v16526_v59 }
 0x54c   : > { %v7277_v15 = vmul.f32 %v16758_v0, %v16532_v55  ;;  %v7419_v14 = vmul.f32 %v16586_v21, %v7379_v40  ;;  %v7093_v30 = vadd.f32 %v7061_v25, %v7021_v54  ;;  %v7278_v44 = vmul.f32 %v16763_v9, %v16532_v55  ;;  %v16803_v54 = vld [vmem:[#allocation3 + $0xb0] sm:$0xff] }
 0x54d   : > { %v7349_v8 = vmul.f32 %v16767_v13, %v16539_v42  ;;  %v7420_v11 = vmul.f32 %v16586_v21, %v7380_v22  ;;  %v7094_v17 = vadd.f32 %v7062_v28, %v7022_v16  ;;  %v7350_v2 = vmul.f32 %v12262_v41, %v16539_v42  ;;  %v16808_v16 = vld [vmem:[#allocation3 + $0xa9] sm:$0xff] }
 0x54e   : > { %v6775_v6 = vmul.f32 %v16695_v29, %v16479_v4  ;;  %v7459_v46 = vadd.f32 %v16598_v5, %v7419_v14  ;;  %v7165_v37 = vadd.f32 %v7133_v57, %v7093_v30  ;;  %v6776_v58 = vmul.f32 %v16702_v12, %v16479_v4  ;;  %v16799_v57 = vld [vmem:[#allocation3 + $0xa8] sm:$0xff] }
 0x54f   : > { %v6847_v38 = vmul.f32 %v16706_v23, %v16487_v20  ;;  %v7460_v7 = vadd.f32 %v16598_v5, %v7420_v11  ;;  %v7166_v27 = vadd.f32 %v7134_v26, %v7094_v17  ;;  %v6848_v56 = vmul.f32 %v16710_v52, %v16487_v20  ;;  %v12268_v17 = vld [vmem:[#allocation3 + $0xb2] sm:$0xff] }
 0x550   : > { %v6919_v36 = vmul.f32 %v16716_v63, %v16495_v39  ;;  %v7491_v53 = vmax.f32 %v7459_v46, 0.0  ;;  %v7237_v29 = vadd.f32 %v7205_v51, %v7165_v37  ;;  %v6920_v60 = vmul.f32 %v16720_v32, %v16495_v39 }
 0x551   : > { %v6879_v18 = vadd.f32 %v6847_v38, %v6775_v6  ;;  %v7492_v48 = vmax.f32 %v7460_v7, 0.0  ;;  %v7238_v12 = vadd.f32 %v7206_v24, %v7166_v27  ;;  %v6880_v19 = vadd.f32 %v6848_v56, %v6776_v58 }
 0x552   : > { %v6991_v23 = vmul.f32 %v16750_v50, %v16506_v33  ;;  %v7309_v62 = vadd.f32 %v7277_v15, %v7237_v29  ;;  %v6992_v52 = vmul.f32 %v16754_v45, %v16506_v33  ;;  %v7063_v63 = vmul.f32 %v16758_v0, %v16514_v35  ;;  %v16812_v15 = vld [vmem:[#allocation3 + $0xb1] sm:$0xff] }
 0x553   : > { %v6951_v49 = vadd.f32 %v6919_v36, %v6879_v18  ;;  %v7520_v61 = vpack.c.bf16 %v7492_v48, %v7491_v53  ;;  %v7310_v31 = vadd.f32 %v7278_v44, %v7238_v12  ;;  %v6952_v10 = vadd.f32 %v6920_v60, %v6880_v19 }
 0x554   : > { %v7064_v32 = vmul.f32 %v16763_v9, %v16514_v35  ;;  %v7381_v47 = vadd.f32 %v7349_v8, %v7309_v62  ;;  %v7135_v25 = vmul.f32 %v16767_v13, %v16519_v34  ;;  %v7136_v1 = vmul.f32 %v12262_v41, %v16519_v34  ;;  %v16817_v8 = vld [vmem:[#allocation3 + $0xaa] sm:$0xff] }
 0x555   : > { %v7023_v3 = vadd.f32 %v6991_v23, %v6951_v49  ;;  %11361 = vmatmul.mubr.msk.bf16.gmra.mrb[36].mxu1 %vm458_vm0, %v7520_v61  ;;  %v7382_v43 = vadd.f32 %v7350_v2, %v7310_v31  ;;  %v7024_v28 = vadd.f32 %v6992_v52, %v6952_v10  ;;  %v7207_v40 = vmul.f32 %v16799_v57, %v16526_v59 }
 0x556   : > { %v7208_v26 = vmul.f32 %v16803_v54, %v16526_v59  ;;  %v7421_v51 = vmul.f32 %v16586_v21, %v7381_v47  ;;  %v7279_v24 = vmul.f32 %v16808_v16, %v16532_v55  ;;  %v7280_v14 = vmul.f32 %v16812_v15, %v16532_v55 }
 0x557   : > { %v7095_v22 = vadd.f32 %v7063_v63, %v7023_v3  ;;  %v7422_v30 = vmul.f32 %v16586_v21, %v7382_v43  ;;  %v7096_v44 = vadd.f32 %v7064_v32, %v7024_v28  ;;  %v7351_v11 = vmul.f32 %v16817_v8, %v16539_v42  ;;  %v16850_v3 = vld [vmem:[#allocation3 + $0xc0] sm:$0xff]  ;;  %v12270_v43 = vld [vmem:[#allocation3 + $0xc8] sm:$0xff] }
 0x558   : > { %v7352_v2 = vmul.f32 %v12268_v17, %v16539_v42  ;;  %v7461_v6 = vadd.f32 %v16598_v5, %v7421_v51  ;;  %v6777_v37 = vmul.f32 %v16750_v50, %v16479_v4  ;;  %v6778_v58 = vmul.f32 %v16754_v45, %v16479_v4  ;;  %v11970_v50 = vld [vmem:[%s19003_s7 + $0x50] sm:$0xff]   ;;  %v16860_v51 = vld [vmem:[#allocation3 + $0xc9] sm:$0xff] }
 0x559   : > { %v7167_v46 = vadd.f32 %v7135_v25, %v7095_v22  ;;  %v7462_v38 = vadd.f32 %v16598_v5, %v7422_v30  ;;  %v7168_v7 = vadd.f32 %v7136_v1, %v7096_v44  ;;  %v6849_v27 = vmul.f32 %v16758_v0, %v16487_v20  ;;  %11424 = vmatprep.subr.bf16.mxu1 %v11970_v50  ;;  %v12273_v44 = vld [vmem:[#allocation3 + $0xc2] sm:$0xff] }
 0x55a   : > { %v6850_v56 = vmul.f32 %v16763_v9, %v16487_v20  ;;  %v7493_v36 = vmax.f32 %v7461_v6, 0.0  ;;  %v6921_v29 = vmul.f32 %v16767_v13, %v16495_v39  ;;  %v6922_v18 = vmul.f32 %v12262_v41, %v16495_v39  ;;  %v12274_v6 = vld [vmem:[#allocation3 + $0xca] sm:$0xff] }
 0x55b   : > { %v7239_v53 = vadd.f32 %v7207_v40, %v7167_v46  ;;  %v7494_v45 = vmax.f32 %v7462_v38, 0.0  ;;  %v7240_v60 = vadd.f32 %v7208_v26, %v7168_v7  ;;  %v6881_v48 = vadd.f32 %v6849_v27, %v6777_v37  ;;  %v16856_v40 = vld [vmem:[#allocation3 + $0xc1] sm:$0xff] }
 0x55c   : > { %v6882_v12 = vadd.f32 %v6850_v56, %v6778_v58  ;;  %v6993_v0 = vmul.f32 %v16799_v57, %v16506_v33  ;;  %v6994_v9 = vmul.f32 %v16803_v54, %v16506_v33  ;;  %v7065_v13 = vmul.f32 %v16808_v16, %v16514_v35 }
 0x55d   : > { %v7311_v19 = vadd.f32 %v7279_v24, %v7239_v53  ;;  %v7521_v41 = vpack.c.bf16 %v7494_v45, %v7493_v36  ;;  %v7312_v23 = vadd.f32 %v7280_v14, %v7240_v60  ;;  %v6953_v62 = vadd.f32 %v6921_v29, %v6881_v48 }
 0x55e   : > { %v6954_v49 = vadd.f32 %v6922_v18, %v6882_v12  ;;  %v7066_v63 = vmul.f32 %v16812_v15, %v16514_v35  ;;  %v7137_v61 = vmul.f32 %v16817_v8, %v16519_v34  ;;  %v7138_v31 = vmul.f32 %v12268_v17, %v16519_v34 }
 0x55f   : > { %v7383_v52 = vadd.f32 %v7351_v11, %v7311_v19  ;;  %11364 = vmatprep.mubr.msk.bf16.mxu1 %vm458_vm0, %v7521_v41  ;;  %v7384_v10 = vadd.f32 %v7352_v2, %v7312_v23  ;;  %v7025_v32 = vadd.f32 %v6993_v0, %v6953_v62  ;;  %v7209_v25 = vmul.f32 %v16850_v3, %v16526_v59 }
 0x560   : > { %v7026_v47 = vadd.f32 %v6994_v9, %v6954_v49  ;;  %v7210_v28 = vmul.f32 %v12270_v43, %v16526_v59  ;;  %v7281_v26 = vmul.f32 %v16856_v40, %v16532_v55  ;;  %v7282_v22 = vmul.f32 %v16860_v51, %v16532_v55 }
 0x561   : > { %v7423_v1 = vmul.f32 %v16586_v21, %v7383_v52  ;;  %v7424_v24 = vmul.f32 %v16586_v21, %v7384_v10  ;;  %v7097_v14 = vadd.f32 %v7065_v13, %v7025_v32  ;;  %v7353_v11 = vmul.f32 %v12273_v44, %v16539_v42  ;;  %v16890_v52 = vld [vmem:[#allocation3 + $0xd8] sm:$0xff] }
 0x562   : > { %v7098_v30 = vadd.f32 %v7066_v63, %v7026_v47  ;;  %v7354_v46 = vmul.f32 %v12274_v6, %v16539_v42  ;;  %v6779_v37 = vmul.f32 %v16799_v57, %v16479_v4  ;;  %v6780_v58 = vmul.f32 %v16803_v54, %v16479_v4  ;;  %v16898_v32 = vld [vmem:[#allocation3 + $0xd9] sm:$0xff] }
 0x563   : > { %v7463_v2 = vadd.f32 %v16598_v5, %v7423_v1  ;;  %v7464_v38 = vadd.f32 %v16598_v5, %v7424_v24  ;;  %v7169_v7 = vadd.f32 %v7137_v61, %v7097_v14  ;;  %v6851_v56 = vmul.f32 %v16808_v16, %v16487_v20  ;;  %v12279_v24 = vld [vmem:[#allocation3 + $0xda] sm:$0xff] }
 0x564   : > { %v7170_v27 = vadd.f32 %v7138_v31, %v7098_v30  ;;  %v6852_v53 = vmul.f32 %v16812_v15, %v16487_v20  ;;  %v6923_v29 = vmul.f32 %v16817_v8, %v16495_v39  ;;  %v6924_v18 = vmul.f32 %v12268_v17, %v16495_v39  ;;  %v16894_v31 = vld [vmem:[#allocation3 + $0xe0] sm:$0xff] }
 0x565   : > { %v7495_v36 = vmax.f32 %v7463_v2, 0.0  ;;  %v7496_v57 = vmax.f32 %v7464_v38, 0.0  ;;  %v7241_v50 = vadd.f32 %v7209_v25, %v7169_v7  ;;  %v6883_v54 = vadd.f32 %v6851_v56, %v6779_v37  ;;  %v16902_v25 = vld [vmem:[#allocation3 + $0xe1] sm:$0xff] }
 0x566   : > { %v7242_v45 = vadd.f32 %v7210_v28, %v7170_v27  ;;  %v6884_v60 = vadd.f32 %v6852_v53, %v6780_v58  ;;  %v6995_v48 = vmul.f32 %v16850_v3, %v16506_v33  ;;  %v6996_v12 = vmul.f32 %v12270_v43, %v16506_v33 }
 0x567   : > { %v7067_v16 = vmul.f32 %v16856_v40, %v16514_v35  ;;  %v7522_v19 = vpack.c.bf16 %v7496_v57, %v7495_v36  ;;  %v7313_v15 = vadd.f32 %v7281_v26, %v7241_v50  ;;  %v6955_v9 = vadd.f32 %v6923_v29, %v6883_v54 }
 0x568   : > { %v7314_v0 = vadd.f32 %v7282_v22, %v7242_v45  ;;  %v6956_v8 = vadd.f32 %v6924_v18, %v6884_v60  ;;  %v7068_v17 = vmul.f32 %v16860_v51, %v16514_v35  ;;  %v7139_v13 = vmul.f32 %v12273_v44, %v16519_v34 }
 0x569   : > { %v7140_v41 = vmul.f32 %v12274_v6, %v16519_v34  ;;  %11365 = vmatmul.mubr.msk.bf16.gmra.mrb[40].mxu1 %vm458_vm0, %v7522_v19  ;;  %v7385_v23 = vadd.f32 %v7353_v11, %v7313_v15  ;;  %v7027_v49 = vadd.f32 %v6995_v48, %v6955_v9  ;;  %v7211_v63 = vmul.f32 %v16890_v52, %v16526_v59  ;;  %v12280_v11 = vld [vmem:[#allocation3 + $0xe2] sm:$0xff] }
 0x56a   : > { %v7386_v62 = vadd.f32 %v7354_v46, %v7314_v0  ;;  %v7028_v61 = vadd.f32 %v6996_v12, %v6956_v8  ;;  %v7212_v10 = vmul.f32 %v16894_v31, %v16526_v59  ;;  %v7283_v47 = vmul.f32 %v16898_v32, %v16532_v55  ;;  %v16932_v8 = vld [vmem:[#allocation3 + $0xf0] sm:$0xff] }
 0x56b   : > { %v7284_v1 = vmul.f32 %v16902_v25, %v16532_v55  ;;  %v7425_v28 = vmul.f32 %v16586_v21, %v7385_v23  ;;  %v7099_v22 = vadd.f32 %v7067_v16, %v7027_v49  ;;  %v7355_v14 = vmul.f32 %v12279_v24, %v16539_v42  ;;  %v16936_v23 = vld [vmem:[#allocation3 + $0xf8] sm:$0xff] }
 0x56c   : > { %v7426_v26 = vmul.f32 %v16586_v21, %v7386_v62  ;;  %v7100_v30 = vadd.f32 %v7068_v17, %v7028_v61  ;;  %v7356_v2 = vmul.f32 %v12280_v11, %v16539_v42  ;;  %v6781_v46 = vmul.f32 %v16850_v3, %v16479_v4  ;;  %v16940_v49 = vld [vmem:[#allocation3 + $0xf1] sm:$0xff] }
 0x56d   : > { %v6782_v37 = vmul.f32 %v12270_v43, %v16479_v4  ;;  %v7465_v58 = vadd.f32 %v16598_v5, %v7425_v28  ;;  %v7171_v7 = vadd.f32 %v7139_v13, %v7099_v22  ;;  %v6853_v27 = vmul.f32 %v16856_v40, %v16487_v20  ;;  %v16949_v28 = vld [vmem:[#allocation3 + $0xf2] sm:$0xff] }
 0x56e   : > { %v7466_v38 = vadd.f32 %v16598_v5, %v7426_v26  ;;  %v7172_v56 = vadd.f32 %v7140_v41, %v7100_v30  ;;  %v6854_v36 = vmul.f32 %v16860_v51, %v16487_v20  ;;  %v6925_v53 = vmul.f32 %v12273_v44, %v16495_v39  ;;  %v12286_v30 = vld [vmem:[#allocation3 + $0xfa] sm:$0xff] }
 0x56f   : > { %v6926_v29 = vmul.f32 %v12274_v6, %v16495_v39  ;;  %v7497_v18 = vmax.f32 %v7465_v58, 0.0  ;;  %v7243_v57 = vadd.f32 %v7211_v63, %v7171_v7  ;;  %v6885_v43 = vadd.f32 %v6853_v27, %v6781_v46 }
 0x570   : > { %v7498_v3 = vmax.f32 %v7466_v38, 0.0  ;;  %v7244_v50 = vadd.f32 %v7212_v10, %v7172_v56  ;;  %v6886_v45 = vadd.f32 %v6854_v36, %v6782_v37  ;;  %v6997_v54 = vmul.f32 %v16890_v52, %v16506_v33 }
 0x571   : > { %v6998_v40 = vmul.f32 %v16894_v31, %v16506_v33  ;;  %v7315_v48 = vadd.f32 %v7283_v47, %v7243_v57  ;;  %v6957_v12 = vadd.f32 %v6925_v53, %v6885_v43  ;;  %v7069_v51 = vmul.f32 %v16898_v32, %v16514_v35  ;;  %v16945_v47 = vld [vmem:[#allocation3 + $0xf9] sm:$0xff] }
 0x572   : > { %v7523_v60 = vpack.c.bf16 %v7498_v3, %v7497_v18  ;;  %v7316_v44 = vadd.f32 %v7284_v1, %v7244_v50  ;;  %v6958_v6 = vadd.f32 %v6926_v29, %v6886_v45  ;;  %v7070_v16 = vmul.f32 %v16902_v25, %v16514_v35 }
 0x573   : > { %v7141_v19 = vmul.f32 %v12279_v24, %v16519_v34  ;;  %v7387_v15 = vadd.f32 %v7355_v14, %v7315_v48  ;;  %v7029_v0 = vadd.f32 %v6997_v54, %v6957_v12  ;;  %v7142_v9 = vmul.f32 %v12280_v11, %v16519_v34 }
 0x574   : > { %11368 = vmatprep.mubr.msk.bf16.mxu1 %vm458_vm0, %v7523_v60  ;;  %v7213_v17 = vmul.f32 %v16932_v8, %v16526_v59  ;;  %v7388_v13 = vadd.f32 %v7356_v2, %v7316_v44  ;;  %v7030_v41 = vadd.f32 %v6998_v40, %v6958_v6  ;;  %v7214_v62 = vmul.f32 %v16936_v23, %v16526_v59 }
 0x575   : > { %v7285_v63 = vmul.f32 %v16940_v49, %v16532_v55  ;;  %v7427_v61 = vmul.f32 %v16586_v21, %v7387_v15  ;;  %v7101_v10 = vadd.f32 %v7069_v51, %v7029_v0  ;;  %v7286_v1 = vmul.f32 %v16945_v47, %v16532_v55  ;;  %v16983_v0 = vld [vmem:[#allocation3 + $0x110] sm:$0xff] }
 0x576   : > { %v7357_v26 = vmul.f32 %v16949_v28, %v16539_v42  ;;  %v7428_v22 = vmul.f32 %v16586_v21, %v7388_v13  ;;  %v7102_v14 = vadd.f32 %v7070_v16, %v7030_v41  ;;  %v7358_v2 = vmul.f32 %v12286_v30, %v16539_v42  ;;  %v16988_v41 = vld [vmem:[#allocation3 + $0x109] sm:$0xff] }
 0x577   : > { %v6783_v46 = vmul.f32 %v16890_v52, %v16479_v4  ;;  %v7467_v37 = vadd.f32 %v16598_v5, %v7427_v61  ;;  %v7173_v58 = vadd.f32 %v7141_v19, %v7101_v10  ;;  %v6784_v38 = vmul.f32 %v16894_v31, %v16479_v4  ;;  %v16979_v19 = vld [vmem:[#allocation3 + $0x108] sm:$0xff] }
 0x578   : > { %v6855_v7 = vmul.f32 %v16898_v32, %v16487_v20  ;;  %v7468_v27 = vadd.f32 %v16598_v5, %v7428_v22  ;;  %v7174_v56 = vadd.f32 %v7142_v9, %v7102_v14  ;;  %v6856_v36 = vmul.f32 %v16902_v25, %v16487_v20  ;;  %v12292_v14 = vld [vmem:[#allocation3 + $0x112] sm:$0xff] }
 0x579   : > { %v6927_v53 = vmul.f32 %v12279_v24, %v16495_v39  ;;  %v7499_v29 = vmax.f32 %v7467_v37, 0.0  ;;  %v7245_v18 = vadd.f32 %v7213_v17, %v7173_v58  ;;  %v6928_v3 = vmul.f32 %v12280_v11, %v16495_v39 }
 0x57a   : > { %v6887_v52 = vadd.f32 %v6855_v7, %v6783_v46  ;;  %v7500_v57 = vmax.f32 %v7468_v27, 0.0  ;;  %v7246_v43 = vadd.f32 %v7214_v62, %v7174_v56  ;;  %v6888_v50 = vadd.f32 %v6856_v36, %v6784_v38 }
 0x57b   : > { %v6999_v31 = vmul.f32 %v16932_v8, %v16506_v33  ;;  %v7317_v32 = vadd.f32 %v7285_v63, %v7245_v18  ;;  %v7000_v54 = vmul.f32 %v16936_v23, %v16506_v33  ;;  %v7071_v25 = vmul.f32 %v16940_v49, %v16514_v35  ;;  %v16992_v63 = vld [vmem:[#allocation3 + $0x111] sm:$0xff] }
 0x57c   : > { %v6959_v45 = vadd.f32 %v6927_v53, %v6887_v52  ;;  %v7524_v24 = vpack.c.bf16 %v7500_v57, %v7499_v29  ;;  %v7318_v40 = vadd.f32 %v7286_v1, %v7246_v43  ;;  %v6960_v60 = vadd.f32 %v6928_v3, %v6888_v50 }
 0x57d   : > { %v7072_v11 = vmul.f32 %v16945_v47, %v16514_v35  ;;  %v7389_v48 = vadd.f32 %v7357_v26, %v7317_v32  ;;  %v7143_v51 = vmul.f32 %v16949_v28, %v16519_v34  ;;  %v7144_v44 = vmul.f32 %v12286_v30, %v16519_v34  ;;  %v12291_v26 = vld [vmem:[#allocation3 + $0x10a] sm:$0xff] }
 0x57e   : > { %v7031_v12 = vadd.f32 %v6999_v31, %v6959_v45  ;;  %11369 = vmatmul.mubr.msk.bf16.gmra.mrb[44].mxu1 %vm458_vm0, %v7524_v24  ;;  %v7390_v6 = vadd.f32 %v7358_v2, %v7318_v40  ;;  %v7032_v16 = vadd.f32 %v7000_v54, %v6960_v60  ;;  %v7215_v15 = vmul.f32 %v16979_v19, %v16526_v59 }
 0x57f   : > { %v7216_v9 = vmul.f32 %v16983_v0, %v16526_v59  ;;  %v7429_v17 = vmul.f32 %v16586_v21, %v7389_v48  ;;  %v7287_v62 = vmul.f32 %v16988_v41, %v16532_v55  ;;  %v7288_v61 = vmul.f32 %v16992_v63, %v16532_v55  ;;  %v17023_v48 = vld [vmem:[#allocation3 + $0x120] sm:$0xff] }
 0x580   : > { %v7103_v13 = vadd.f32 %v7071_v25, %v7031_v12  ;;  %v7430_v10 = vmul.f32 %v16586_v21, %v7390_v6  ;;  %v7104_v1 = vadd.f32 %v7072_v11, %v7032_v16  ;;  %v7359_v22 = vmul.f32 %v12291_v26, %v16539_v42  ;;  %v17032_v16 = vld [vmem:[#allocation3 + $0x121] sm:$0xff] }
 0x581   : > { %v7360_v2 = vmul.f32 %v12292_v14, %v16539_v42  ;;  %v7469_v46 = vadd.f32 %v16598_v5, %v7429_v17  ;;  %v6785_v58 = vmul.f32 %v16932_v8, %v16479_v4  ;;  %v6786_v38 = vmul.f32 %v16936_v23, %v16479_v4 }
 0x582   : > { %v7175_v37 = vadd.f32 %v7143_v51, %v7103_v13  ;;  %v7470_v7 = vadd.f32 %v16598_v5, %v7430_v10  ;;  %v7176_v27 = vadd.f32 %v7144_v44, %v7104_v1  ;;  %v6857_v56 = vmul.f32 %v16940_v49, %v16487_v20  ;;  %v17028_v44 = vld [vmem:[#allocation3 + $0x128] sm:$0xff] }
 0x583   : > { %v6858_v36 = vmul.f32 %v16945_v47, %v16487_v20  ;;  %v7501_v53 = vmax.f32 %v7469_v46, 0.0  ;;  %v6929_v18 = vmul.f32 %v16949_v28, %v16495_v39  ;;  %v6930_v52 = vmul.f32 %v12286_v30, %v16495_v39  ;;  %v17041_v10 = vld [vmem:[#allocation3 + $0x122] sm:$0xff] }
 0x584   : > { %v7247_v29 = vadd.f32 %v7215_v15, %v7175_v37  ;;  %v7502_v8 = vmax.f32 %v7470_v7, 0.0  ;;  %v7248_v3 = vadd.f32 %v7216_v9, %v7176_v27  ;;  %v6889_v57 = vadd.f32 %v6857_v56, %v6785_v58  ;;  %v17036_v9 = vld [vmem:[#allocation3 + $0x129] sm:$0xff] }
 0x585   : > { %v6890_v23 = vadd.f32 %v6858_v36, %v6786_v38  ;;  %v7001_v50 = vmul.f32 %v16979_v19, %v16506_v33  ;;  %v7002_v49 = vmul.f32 %v16983_v0, %v16506_v33  ;;  %v7073_v47 = vmul.f32 %v16988_v41, %v16514_v35 }
 0x586   : > { %v7319_v43 = vadd.f32 %v7287_v62, %v7247_v29  ;;  %v7525_v31 = vpack.c.bf16 %v7502_v8, %v7501_v53  ;;  %v7320_v32 = vadd.f32 %v7288_v61, %v7248_v3  ;;  %v6961_v45 = vadd.f32 %v6929_v18, %v6889_v57 }
 0x587   : > { %v6962_v28 = vadd.f32 %v6930_v52, %v6890_v23  ;;  %v7074_v30 = vmul.f32 %v16992_v63, %v16514_v35  ;;  %v7145_v25 = vmul.f32 %v12291_v26, %v16519_v34  ;;  %v7146_v24 = vmul.f32 %v12292_v14, %v16519_v34 }
 0x588   : > { %v7391_v54 = vadd.f32 %v7359_v22, %v7319_v43  ;;  %11372 = vmatprep.mubr.msk.bf16.mxu1 %vm458_vm0, %v7525_v31  ;;  %v7392_v40 = vadd.f32 %v7360_v2, %v7320_v32  ;;  %v7033_v60 = vadd.f32 %v7001_v50, %v6961_v45  ;;  %v7217_v12 = vmul.f32 %v17023_v48, %v16526_v59  ;;  %v12298_v2 = vld [vmem:[#allocation3 + $0x12a] sm:$0xff]  ;;  %v17070_v31 = vld [vmem:[#allocation3 + $0x138] sm:$0xff] }
 0x589   : > { %v7034_v11 = vadd.f32 %v7002_v49, %v6962_v28  ;;  %v7218_v6 = vmul.f32 %v17028_v44, %v16526_v59  ;;  %v7289_v15 = vmul.f32 %v17032_v16, %v16532_v55  ;;  %v7290_v17 = vmul.f32 %v17036_v9, %v16532_v55  ;;  %v17074_v28 = vld [vmem:[#allocation3 + $0x140] sm:$0xff] }
 0x58a   : > { %v7431_v51 = vmul.f32 %v16586_v21, %v7391_v54  ;;  %v7432_v13 = vmul.f32 %v16586_v21, %v7392_v40  ;;  %v7105_v62 = vadd.f32 %v7073_v47, %v7033_v60  ;;  %v7361_v1 = vmul.f32 %v17041_v10, %v16539_v42  ;;  %v17078_v54 = vld [vmem:[#allocation3 + $0x139] sm:$0xff] }
 0x58b   : > { %v7106_v61 = vadd.f32 %v7074_v30, %v7034_v11  ;;  %v7362_v46 = vmul.f32 %v12298_v2, %v16539_v42  ;;  %v6787_v37 = vmul.f32 %v16979_v19, %v16479_v4  ;;  %v6788_v58 = vmul.f32 %v16983_v0, %v16479_v4  ;;  %v17082_v30 = vld [vmem:[#allocation3 + $0x141] sm:$0xff] }
 0x58c   : > { %v7471_v22 = vadd.f32 %v16598_v5, %v7431_v51  ;;  %v7472_v38 = vadd.f32 %v16598_v5, %v7432_v13  ;;  %v7177_v7 = vadd.f32 %v7145_v25, %v7105_v62  ;;  %v6859_v56 = vmul.f32 %v16988_v41, %v16487_v20  ;;  %v17088_v11 = vld [vmem:[#allocation3 + $0x13a] sm:$0xff]  ;;  %v17092_v51 = vld [vmem:[#allocation3 + $0x142] sm:$0xff] }
 0x58d   : > { %v7178_v27 = vadd.f32 %v7146_v24, %v7106_v61  ;;  %v6860_v53 = vmul.f32 %v16992_v63, %v16487_v20  ;;  %v6931_v29 = vmul.f32 %v12291_v26, %v16495_v39  ;;  %v6932_v18 = vmul.f32 %v12292_v14, %v16495_v39 }
 0x58e   : > { %v7503_v36 = vmax.f32 %v7471_v22, 0.0  ;;  %v7504_v52 = vmax.f32 %v7472_v38, 0.0  ;;  %v7249_v19 = vadd.f32 %v7217_v12, %v7177_v7  ;;  %v6891_v3 = vadd.f32 %v6859_v56, %v6787_v37 }
 0x58f   : > { %v7250_v8 = vadd.f32 %v7218_v6, %v7178_v27  ;;  %v6892_v4 = vadd.f32 %v6860_v53, %v6788_v58  ;;  %v7003_v0 = vmul.f32 %v17023_v48, %v16506_v33  ;;  %v7004_v57 = vmul.f32 %v17028_v44, %v16506_v33 }
 0x590   : > { %v7075_v41 = vmul.f32 %v17032_v16, %v16514_v35  ;;  %v7526_v23 = vpack.c.bf16 %v7504_v52, %v7503_v36  ;;  %v7321_v20 = vadd.f32 %v7289_v15, %v7249_v19  ;;  %v6963_v26 = vadd.f32 %v6931_v29, %v6891_v3 }
 0x591   : > { %v7322_v63 = vadd.f32 %v7290_v17, %v7250_v8  ;;  %v6964_v43 = vadd.f32 %v6932_v18, %v6892_v4  ;;  %v7076_v39 = vmul.f32 %v17036_v9, %v16514_v35  ;;  %v7147_v14 = vmul.f32 %v17041_v10, %v16519_v34  ;;  %v17136_v18 = vld [vmem:[%s19000_s4 + $0x1f] ss:$0 sm:$0xff]  ;;  %v17145_v4 = vld [vmem:[%s19000_s4 + $0x20] ss:$0 sm:$0xff] }
 0x592   : > { %v7148_v50 = vmul.f32 %v12298_v2, %v16519_v34  ;;  %11373 = vmatmul.mubr.msk.bf16.gmra.mrb[48].mxu1 %vm458_vm0, %v7526_v23  ;;  %v7393_v49 = vadd.f32 %v7361_v1, %v7321_v20  ;;  %v7035_v47 = vadd.f32 %v7003_v0, %v6963_v26  ;;  %v7219_v32 = vmul.f32 %v17070_v31, %v16526_v59  ;;  %v17152_v20 = vld [vmem:[#allocation3 + $0x150] sm:$0xff] }
 0x593   : > { %v7394_v33 = vadd.f32 %v7362_v46, %v7322_v63  ;;  %v7036_v45 = vadd.f32 %v7004_v57, %v6964_v43  ;;  %v7220_v35 = vmul.f32 %v17074_v28, %v16526_v59  ;;  %v7291_v34 = vmul.f32 %v17078_v54, %v16532_v55  ;;  %v17157_v63 = vld [vmem:[%s19000_s4 + $0x21] ss:$0 sm:$0xff] }
 0x594   : > { %v7292_v25 = vmul.f32 %v17082_v30, %v16532_v55  ;;  %v7433_v24 = vmul.f32 %v16586_v21, %v7393_v49  ;;  %v7107_v60 = vadd.f32 %v7075_v41, %v7035_v47  ;;  %v7363_v59 = vmul.f32 %v17088_v11, %v16539_v42  ;;  %v17099_v55 = vld [vmem:[%s19000_s4 + $0x1b] ss:$0 sm:$0xff]  ;;  %v17165_v49 = vld [vmem:[#allocation3 + $0x151] sm:$0xff] }
 0x595   : > { %v7434_v40 = vmul.f32 %v16586_v21, %v7394_v33  ;;  %v7108_v12 = vadd.f32 %v7076_v39, %v7036_v45  ;;  %v7364_v6 = vmul.f32 %v17092_v51, %v16539_v42  ;;  %v6789_v15 = vmul.f32 %v17099_v55, %v17023_v48  ;;  %v17110_v42 = vld [vmem:[%s19000_s4 + $0x1c] ss:$0 sm:$0xff]  ;;  %v17170_v33 = vld [vmem:[%s19000_s4 + $0x22] ss:$0 sm:$0xff] }
 0x596   : > { %v6790_v17 = vmul.f32 %v17099_v55, %v17028_v44  ;;  %v7473_v13 = vadd.f32 %v16598_v5, %v7433_v24  ;;  %v7179_v61 = vadd.f32 %v7147_v14, %v7107_v60  ;;  %v6861_v1 = vmul.f32 %v17110_v42, %v17032_v16  ;;  %v17119_v44 = vld [vmem:[%s19000_s4 + $0x1d] ss:$0 sm:$0xff]  ;;  %v17161_v14 = vld [vmem:[#allocation3 + $0x158] sm:$0xff]  ;;  %v17184_v24 = vld [vmem:[%s19000_s4 + $0x23] ss:$0 sm:$0xff] }
 0x597   : > { %v7474_v62 = vadd.f32 %v16598_v5, %v7434_v40  ;;  %v7180_v22 = vadd.f32 %v7148_v50, %v7108_v12  ;;  %v6862_v48 = vmul.f32 %v17110_v42, %v17036_v9  ;;  %v6933_v46 = vmul.f32 %v17119_v44, %v17041_v10  ;;  %v17127_v9 = vld [vmem:[%s19000_s4 + $0x1e] ss:$0 sm:$0xff]  ;;  %v17189_v12 = vld [vmem:[#allocation3 + $0x15a] sm:$0xff] }
 0x598   : > { %v6934_v37 = vmul.f32 %v17119_v44, %v12298_v2  ;;  %v7505_v58 = vmax.f32 %v7473_v13, 0.0  ;;  %v7251_v7 = vadd.f32 %v7219_v32, %v7179_v61  ;;  %v6893_v27 = vadd.f32 %v6861_v1, %v6789_v15 }
 0x599   : > { %v7506_v38 = vmax.f32 %v7474_v62, 0.0  ;;  %v7252_v56 = vadd.f32 %v7220_v35, %v7180_v22  ;;  %v6894_v16 = vadd.f32 %v6862_v48, %v6790_v17  ;;  %v7005_v36 = vmul.f32 %v17127_v9, %v17070_v31  ;;  %v17175_v35 = vld [vmem:[#allocation3 + $0x159] sm:$0xff] }
 0x59a   : > { %v7006_v53 = vmul.f32 %v17127_v9, %v17074_v28  ;;  %v7323_v29 = vadd.f32 %v7291_v34, %v7251_v7  ;;  %v6965_v2 = vadd.f32 %v6933_v46, %v6893_v27  ;;  %v7077_v52 = vmul.f32 %v17136_v18, %v17078_v54 }
 0x59b   : > { %v7527_v10 = vpack.c.bf16 %v7506_v38, %v7505_v58  ;;  %v7324_v19 = vadd.f32 %v7292_v25, %v7252_v56  ;;  %v6966_v8 = vadd.f32 %v6934_v37, %v6894_v16  ;;  %v7078_v3 = vmul.f32 %v17136_v18, %v17082_v30  ;;  %v17179_v25 = vld [vmem:[#allocation3 + $0x152] sm:$0xff] }
 0x59c   : > { %v7149_v0 = vmul.f32 %v17145_v4, %v17088_v11  ;;  %v7395_v57 = vadd.f32 %v7363_v59, %v7323_v29  ;;  %v7037_v41 = vadd.f32 %v7005_v36, %v6965_v2  ;;  %v7150_v23 = vmul.f32 %v17145_v4, %v17092_v51 }
 0x59d   : > { %11376 = vmatprep.mubr.msk.bf16.mxu1 %vm458_vm0, %v7527_v10  ;;  %v7221_v26 = vmul.f32 %v17157_v63, %v17152_v20  ;;  %v7396_v43 = vadd.f32 %v7364_v6, %v7324_v19  ;;  %v7038_v39 = vadd.f32 %v7006_v53, %v6966_v8  ;;  %v7222_v50 = vmul.f32 %v17161_v14, %v17157_v63  ;;  %v17220_v8 = vld [vmem:[#allocation3 + $0x168] sm:$0xff] }
 0x59e   : > { %v7293_v47 = vmul.f32 %v17170_v33, %v17165_v49  ;;  %v7435_v32 = vmul.f32 %v16586_v21, %v7395_v57  ;;  %v7109_v45 = vadd.f32 %v7077_v52, %v7037_v41  ;;  %v7294_v34 = vmul.f32 %v17175_v35, %v17170_v33  ;;  %v17231_v41 = vld [vmem:[%s19001_s5 + $0x3] ss:$0 sm:$0xff] }
 0x59f   : > { %v7365_v40 = vmul.f32 %v17184_v24, %v17179_v25  ;;  %v7436_v60 = vmul.f32 %v16586_v21, %v7396_v43  ;;  %v7110_v59 = vadd.f32 %v7078_v3, %v7038_v39  ;;  %v7366_v6 = vmul.f32 %v17189_v12, %v17184_v24  ;;  %v17234_v43 = vld [vmem:[#allocation3 + $0x169] sm:$0xff] }
 0x5a0   : > { %v6791_v15 = vmul.f32 %v17099_v55, %v17070_v31  ;;  %v7475_v17 = vadd.f32 %v16598_v5, %v7435_v32  ;;  %v7181_v13 = vadd.f32 %v7149_v0, %v7109_v45  ;;  %v6792_v62 = vmul.f32 %v17099_v55, %v17074_v28  ;;  %v17224_v0 = vld [vmem:[#allocation3 + $0x170] sm:$0xff] }
 0x5a1   : > { %v6863_v61 = vmul.f32 %v17110_v42, %v17078_v54  ;;  %v7476_v21 = vadd.f32 %v16598_v5, %v7436_v60  ;;  %v7182_v1 = vadd.f32 %v7150_v23, %v7110_v59  ;;  %v6864_v22 = vmul.f32 %v17110_v42, %v17082_v30  ;;  %v12326_v60 = vld [vmem:[#allocation3 + $0x172] sm:$0xff] }
 0x5a2   : > { %v6935_v48 = vmul.f32 %v17119_v44, %v17088_v11  ;;  %v7507_v46 = vmax.f32 %v7475_v17, 0.0  ;;  %v7253_v31 = vadd.f32 %v7221_v26, %v7181_v13  ;;  %v6936_v58 = vmul.f32 %v17119_v44, %v17092_v51 }
 0x5a3   : > { %v6895_v37 = vadd.f32 %v6863_v61, %v6791_v15  ;;  %v7508_v38 = vmax.f32 %v7476_v21, 0.0  ;;  %v7254_v28 = vadd.f32 %v7222_v50, %v7182_v1  ;;  %v6896_v7 = vadd.f32 %v6864_v22, %v6792_v62  ;;  %v17238_v50 = vld [vmem:[#allocation3 + $0x171] sm:$0xff] }
 0x5a4   : > { %v7007_v54 = vmul.f32 %v17152_v20, %v17127_v9  ;;  %v7325_v5 = vadd.f32 %v7293_v47, %v7253_v31  ;;  %v7008_v30 = vmul.f32 %v17161_v14, %v17127_v9  ;;  %v7079_v11 = vmul.f32 %v17165_v49, %v17136_v18 }
 0x5a5   : > { %v6967_v27 = vadd.f32 %v6935_v48, %v6895_v37  ;;  %v7528_v56 = vpack.c.bf16 %v7508_v38, %v7507_v46  ;;  %v7326_v16 = vadd.f32 %v7294_v34, %v7254_v28  ;;  %v6968_v36 = vadd.f32 %v6936_v58, %v6896_v7  ;;  %v12325_v34 = vld [vmem:[#allocation3 + $0x16a] sm:$0xff] }
 0x5a6   : > { %v7080_v51 = vmul.f32 %v17175_v35, %v17136_v18  ;;  %v7397_v53 = vadd.f32 %v7365_v40, %v7325_v5  ;;  %v7151_v29 = vmul.f32 %v17179_v25, %v17145_v4  ;;  %v7152_v2 = vmul.f32 %v17189_v12, %v17145_v4 }
 0x5a7   : > { %v7039_v10 = vadd.f32 %v7007_v54, %v6967_v27  ;;  %11377 = vmatmul.mubr.msk.bf16.gmra.mrb[52].mxu1 %vm458_vm0, %v7528_v56  ;;  %v7398_v52 = vadd.f32 %v7366_v6, %v7326_v16  ;;  %v7040_v19 = vadd.f32 %v7008_v30, %v6968_v36  ;;  %v7223_v3 = vmul.f32 %v17220_v8, %v17157_v63  ;;  %v17248_v6 = vld [vmem:[%s19002_s6 + $0x3] ss:$0 sm:$0xff] }
 0x5a8   : > { %v7224_v57 = vmul.f32 %v17224_v0, %v17157_v63  ;;  %v7437_v23 = vmul.f32 %v17231_v41, %v7397_v53  ;;  %v7295_v39 = vmul.f32 %v17234_v43, %v17170_v33  ;;  %v7296_v47 = vmul.f32 %v17238_v50, %v17170_v33  ;;  %v12328_v53 = vld [vmem:[#allocation3 + $0x180] sm:$0xff] }
 0x5a9   : > { %v7111_v26 = vadd.f32 %v7079_v11, %v7039_v10  ;;  %v7438_v32 = vmul.f32 %v17231_v41, %v7398_v52  ;;  %v7112_v45 = vadd.f32 %v7080_v51, %v7040_v19  ;;  %v7367_v40 = vmul.f32 %v12325_v34, %v17184_v24  ;;  %v12330_v19 = vld [vmem:[#allocation3 + $0x181] sm:$0xff] }
 0x5aa   : > { %v7368_v59 = vmul.f32 %v12326_v60, %v17184_v24  ;;  %v7477_v15 = vadd.f32 %v17248_v6, %v7437_v23  ;;  %v6793_v13 = vmul.f32 %v17152_v20, %v17099_v55  ;;  %v6794_v62 = vmul.f32 %v17161_v14, %v17099_v55 }
 0x5ab   : > { %v7183_v17 = vadd.f32 %v7151_v29, %v7111_v26  ;;  %v7478_v61 = vadd.f32 %v17248_v6, %v7438_v32  ;;  %v7184_v21 = vadd.f32 %v7152_v2, %v7112_v45  ;;  %v6865_v1 = vmul.f32 %v17165_v49, %v17110_v42  ;;  %v12329_v2 = vld [vmem:[#allocation3 + $0x188] sm:$0xff] }
 0x5ac   : > { %v6866_v22 = vmul.f32 %v17175_v35, %v17110_v42  ;;  %v7509_v48 = vmax.f32 %v7477_v15, 0.0  ;;  %v6937_v31 = vmul.f32 %v17179_v25, %v17119_v44  ;;  %v6938_v20 = vmul.f32 %v17189_v12, %v17119_v44  ;;  %v12332_v32 = vld [vmem:[#allocation3 + $0x182] sm:$0xff] }
 0x5ad   : > { %v7255_v46 = vadd.f32 %v7223_v3, %v7183_v17  ;;  %v7510_v37 = vmax.f32 %v7478_v61, 0.0  ;;  %v7256_v58 = vadd.f32 %v7224_v57, %v7184_v21  ;;  %v6897_v14 = vadd.f32 %v6865_v1, %v6793_v13  ;;  %v12331_v57 = vld [vmem:[#allocation3 + $0x189] sm:$0xff] }
 0x5ae   : > { %v6898_v38 = vadd.f32 %v6866_v22, %v6794_v62  ;;  %v7009_v7 = vmul.f32 %v17220_v8, %v17127_v9  ;;  %v7010_v49 = vmul.f32 %v17224_v0, %v17127_v9  ;;  %v7081_v35 = vmul.f32 %v17234_v43, %v17136_v18 }
 0x5af   : > { %v7327_v28 = vadd.f32 %v7295_v39, %v7255_v46  ;;  %v7529_v54 = vpack.c.bf16 %v7510_v37, %v7509_v48  ;;  %v7328_v5 = vadd.f32 %v7296_v47, %v7256_v58  ;;  %v6969_v25 = vadd.f32 %v6937_v31, %v6897_v14 }
 0x5b0   : > { %v6970_v27 = vadd.f32 %v6938_v20, %v6898_v38  ;;  %v7082_v12 = vmul.f32 %v17238_v50, %v17136_v18  ;;  %v7153_v11 = vmul.f32 %v12325_v34, %v17145_v4  ;;  %v7154_v56 = vmul.f32 %v12326_v60, %v17145_v4 }
 0x5b1   : > { %v7399_v30 = vadd.f32 %v7367_v40, %v7327_v28  ;;  %11380 = vmatprep.mubr.msk.bf16.mxu1 %vm458_vm0, %v7529_v54  ;;  %v7400_v16 = vadd.f32 %v7368_v59, %v7328_v5  ;;  %v7041_v36 = vadd.f32 %v7009_v7, %v6969_v25  ;;  %v7225_v10 = vmul.f32 %v12328_v53, %v17157_v63  ;;  %v12333_v59 = vld [vmem:[#allocation3 + $0x18a] sm:$0xff]  ;;  %v12334_v5 = vld [vmem:[#allocation3 + $0x198] sm:$0xff]  ;;  %v17306_v25 = vld [vmem:[%s19000_s4 + $0x24] ss:$0 sm:$0xff] }
 0x5b2   : > { %v7042_v51 = vadd.f32 %v7010_v49, %v6970_v27  ;;  %v7226_v52 = vmul.f32 %v12329_v2, %v17157_v63  ;;  %v7297_v3 = vmul.f32 %v12330_v19, %v17170_v33  ;;  %v7298_v23 = vmul.f32 %v12331_v57, %v17170_v33 }
 0x5b3   : > { %v7439_v29 = vmul.f32 %v17231_v41, %v7399_v30  ;;  %v7440_v26 = vmul.f32 %v17231_v41, %v7400_v16  ;;  %v7113_v39 = vadd.f32 %v7081_v35, %v7041_v36  ;;  %v7369_v45 = vmul.f32 %v12332_v32, %v17184_v24  ;;  %v12335_v30 = vld [vmem:[#allocation3 + $0x1a0] sm:$0xff]  ;;  %v17314_v16 = vld [vmem:[%s19000_s4 + $0x25] ss:$0 sm:$0xff] }
 0x5b4   : > { %v7114_v47 = vadd.f32 %v7082_v12, %v7042_v51  ;;  %v7370_v15 = vmul.f32 %v12333_v59, %v17184_v24  ;;  %v6795_v17 = vmul.f32 %v17220_v8, %v17099_v55  ;;  %v6796_v13 = vmul.f32 %v17224_v0, %v17099_v55  ;;  %v12336_v12 = vld [vmem:[#allocation3 + $0x199] sm:$0xff] }
 0x5b5   : > { %v7479_v40 = vadd.f32 %v17248_v6, %v7439_v29  ;;  %v7480_v62 = vadd.f32 %v17248_v6, %v7440_v26  ;;  %v7185_v61 = vadd.f32 %v7153_v11, %v7113_v39  ;;  %v6867_v1 = vmul.f32 %v17234_v43, %v17110_v42  ;;  %v12337_v11 = vld [vmem:[#allocation3 + $0x1a1] sm:$0xff] }
 0x5b6   : > { %v7186_v21 = vadd.f32 %v7154_v56, %v7114_v47  ;;  %v6868_v48 = vmul.f32 %v17238_v50, %v17110_v42  ;;  %v6939_v46 = vmul.f32 %v12325_v34, %v17119_v44  ;;  %v6940_v31 = vmul.f32 %v12326_v60, %v17119_v44 }
 0x5b7   : > { %v7511_v22 = vmax.f32 %v7479_v40, 0.0  ;;  %v7512_v20 = vmax.f32 %v7480_v62, 0.0  ;;  %v7257_v8 = vadd.f32 %v7225_v10, %v7185_v61  ;;  %v6899_v58 = vadd.f32 %v6867_v1, %v6795_v17  ;;  %v12338_v10 = vld [vmem:[#allocation3 + $0x19a] sm:$0xff]  ;;  %v17333_v40 = vld [vmem:[%s19000_s4 + $0x27] ss:$0 sm:$0xff]  ;;  %v12344_v17 = vld [vmem:[#allocation3 + $0x2] sm:$0xff] }
 0x5b8   : > { %v7258_v37 = vadd.f32 %v7226_v52, %v7186_v21  ;;  %v6900_v55 = vadd.f32 %v6868_v48, %v6796_v13  ;;  %v7011_v0 = vmul.f32 %v12328_v53, %v17127_v9  ;;  %v7012_v14 = vmul.f32 %v12329_v2, %v17127_v9  ;;  %v12345_v62 = vld [vmem:[#allocation3 + $0xa] sm:$0xff]  ;;  %v17341_v21 = vld [vmem:[%s19000_s4 + $0x28] ss:$0 sm:$0xff] }
 0x5b9   : > { %v7083_v38 = vmul.f32 %v12330_v19, %v17136_v18  ;;  %v7530_v43 = vpack.c.bf16 %v7512_v20, %v7511_v22  ;;  %v7329_v28 = vadd.f32 %v7297_v3, %v7257_v8  ;;  %v6971_v49 = vadd.f32 %v6939_v46, %v6899_v58  ;;  %v12340_v19 = vld [vmem:[#allocation3] sm:$0xff] }
 0x5ba   : > { %v7330_v7 = vadd.f32 %v7298_v23, %v7258_v37  ;;  %v6972_v42 = vadd.f32 %v6940_v31, %v6900_v55  ;;  %v7084_v50 = vmul.f32 %v12331_v57, %v17136_v18  ;;  %v7155_v44 = vmul.f32 %v12332_v32, %v17145_v4  ;;  %v12341_v57 = vld [vmem:[#allocation3 + $0x8] sm:$0xff]  ;;  %v17346_v31 = vld [vmem:[%s19000_s4 + $0x29] ss:$0 sm:$0xff]  ;;  %v12347_v55 = vld [vmem:[#allocation3 + $0x20] sm:$0xff] }
 0x5bb   : > { %v7156_v34 = vmul.f32 %v12333_v59, %v17145_v4  ;;  %11381 = vmatmul.mubr.msk.bf16.gmra.mrb[56].mxu1 %vm458_vm0, %v7530_v43  ;;  %v7401_v60 = vadd.f32 %v7369_v45, %v7329_v28  ;;  %v7043_v54 = vadd.f32 %v7011_v0, %v6971_v49  ;;  %v7227_v9 = vmul.f32 %v12334_v5, %v17157_v63  ;;  %v12342_v32 = vld [vmem:[#allocation3 + $0x1] sm:$0xff]  ;;  %v12343_v59 = vld [vmem:[#allocation3 + $0x9] sm:$0xff]  ;;  %v12346_v37 = vld [vmem:[#allocation3 + $0x18] sm:$0xff] }
 0x5bc   : > { %v7402_v35 = vadd.f32 %v7370_v15, %v7330_v7  ;;  %v7044_v27 = vadd.f32 %v7012_v14, %v6972_v42  ;;  %v7228_v18 = vmul.f32 %v12335_v30, %v17157_v63  ;;  %v7299_v4 = vmul.f32 %v12336_v12, %v17170_v33  ;;  %v17322_v63 = vld [vmem:[%s19000_s4 + $0x26] ss:$0 sm:$0xff]  ;;  %v17353_v14 = vld [vmem:[%s19000_s4 + $0x2a] ss:$0 sm:$0xff]  ;;  %v17359_v42 = vld [vmem:[%s19000_s4 + $0x2b] ss:$0 sm:$0xff] }
 0x5bd   : > { %v7300_v56 = vmul.f32 %v12337_v11, %v17170_v33  ;;  %v7441_v36 = vmul.f32 %v17231_v41, %v7401_v60  ;;  %v7115_v53 = vadd.f32 %v7083_v38, %v7043_v54  ;;  %v7371_v29 = vmul.f32 %v12338_v10, %v17184_v24  ;;  %v12339_v33 = vld [vmem:[#allocation3 + $0x1a2] sm:$0xff]  ;;  %v12348_v7 = vld [vmem:[#allocation3 + $0x19] sm:$0xff]  ;;  %v17370_v12 = vld [vmem:[#allocation3 + $0x30] sm:$0xff] }
 0x5be   : > { %v7442_v51 = vmul.f32 %v17231_v41, %v7402_v35  ;;  %v7116_v2 = vadd.f32 %v7084_v50, %v7044_v27  ;;  %v7372_v52 = vmul.f32 %v12339_v33, %v17184_v24  ;;  %v7799_v3 = vmul.f32 %v12340_v19, %v17306_v25  ;;  %v12350_v35 = vld [vmem:[#allocation3 + $0x1a] sm:$0xff]  ;;  %v12351_v30 = vld [vmem:[#allocation3 + $0x22] sm:$0xff] }
 0x5bf   : > { %v7800_v23 = vmul.f32 %v12341_v57, %v17306_v25  ;;  %v7481_v26 = vadd.f32 %v17248_v6, %v7441_v36  ;;  %v7187_v47 = vadd.f32 %v7155_v44, %v7115_v53  ;;  %v7871_v45 = vmul.f32 %v12342_v32, %v17314_v16  ;;  %v17366_v5 = vld [vmem:[%s19000_s4 + $0x2c] ss:$0 sm:$0xff]  ;;  %v17378_v53 = vld [vmem:[#allocation3 + $0x31] sm:$0xff] }
 0x5c0   : > { %v7482_v39 = vadd.f32 %v17248_v6, %v7442_v51  ;;  %v7188_v24 = vadd.f32 %v7156_v34, %v7116_v2  ;;  %v7872_v15 = vmul.f32 %v12343_v59, %v17314_v16  ;;  %v7943_v13 = vmul.f32 %v12344_v17, %v17322_v63  ;;  %v12349_v34 = vld [vmem:[#allocation3 + $0x21] sm:$0xff]  ;;  %v17374_v36 = vld [vmem:[#allocation3 + $0x38] sm:$0xff] }
 0x5c1   : > { %v7944_v61 = vmul.f32 %v12345_v62, %v17322_v63  ;;  %v7513_v1 = vmax.f32 %v7481_v26, 0.0  ;;  %v7259_v48 = vadd.f32 %v7227_v9, %v7187_v47  ;;  %v7903_v46 = vadd.f32 %v7871_v45, %v7799_v3  ;;  %v17383_v33 = vld [vmem:[#allocation3 + $0x39] sm:$0xff] }
 0x5c2   : > { %v7514_v22 = vmax.f32 %v7482_v39, 0.0  ;;  %v7260_v20 = vadd.f32 %v7228_v18, %v7188_v24  ;;  %v7904_v8 = vadd.f32 %v7872_v15, %v7800_v23  ;;  %v8015_v58 = vmul.f32 %v12346_v37, %v17333_v40  ;;  %v17392_v26 = vld [vmem:[#allocation3 + $0x3a] sm:$0xff] }
 0x5c3   : > { %v8016_v0 = vmul.f32 %v12347_v55, %v17333_v40  ;;  %v7331_v43 = vadd.f32 %v7299_v4, %v7259_v48  ;;  %v7975_v28 = vadd.f32 %v7943_v13, %v7903_v46  ;;  %v8087_v49 = vmul.f32 %v12348_v7, %v17341_v21 }
 0x5c4   : > { %v7531_v38 = vpack.c.bf16 %v7514_v22, %v7513_v1  ;;  %v7332_v50 = vadd.f32 %v7300_v56, %v7260_v20  ;;  %v7976_v44 = vadd.f32 %v7944_v61, %v7904_v8  ;;  %v8088_v60 = vmul.f32 %v12349_v34, %v17341_v21 }
 0x5c5   : > { %v8159_v54 = vmul.f32 %v12350_v35, %v17346_v31  ;;  %v7403_v9 = vadd.f32 %v7371_v29, %v7331_v43  ;;  %v8047_v27 = vadd.f32 %v8015_v58, %v7975_v28  ;;  %v8160_v18 = vmul.f32 %v12351_v30, %v17346_v31  ;;  %v17413_v43 = vld [vmem:[%s19001_s5 + $0x4] ss:$0 sm:$0xff] }
 0x5c6   : > { %11384 = vmatprep.mubr.msk.bf16.mxu1 %vm458_vm0, %v7531_v38  ;;  %v8231_v4 = vmul.f32 %v17370_v12, %v17353_v14  ;;  %v7404_v11 = vadd.f32 %v7372_v52, %v7332_v50  ;;  %v8048_v56 = vadd.f32 %v8016_v0, %v7976_v44  ;;  %v8232_v51 = vmul.f32 %v17374_v36, %v17353_v14  ;;  %v17387_v52 = vld [vmem:[#allocation3 + $0x32] sm:$0xff] }
 0x5c7   : > { %v8303_v10 = vmul.f32 %v17378_v53, %v17359_v42  ;;  %v7443_v29 = vmul.f32 %v17231_v41, %v7403_v9  ;;  %v8119_v2 = vadd.f32 %v8087_v49, %v8047_v27  ;;  %v8304_v19 = vmul.f32 %v17383_v33, %v17359_v42  ;;  %v17427_v9 = vld [vmem:[#allocation3 + $0x48] sm:$0xff] }
 0x5c8   : > { %v8375_v3 = vmul.f32 %v17387_v52, %v17366_v5  ;;  %v7444_v57 = vmul.f32 %v17231_v41, %v7404_v11  ;;  %v8120_v23 = vadd.f32 %v8088_v60, %v8048_v56  ;;  %v8376_v39 = vmul.f32 %v17392_v26, %v17366_v5  ;;  %v17436_v56 = vld [vmem:[#allocation3 + $0x49] sm:$0xff] }
 0x5c9   : > { %v7801_v47 = vmul.f32 %v12346_v37, %v17306_v25  ;;  %v7483_v32 = vadd.f32 %v17248_v6, %v7443_v29  ;;  %v8191_v45 = vadd.f32 %v8159_v54, %v8119_v2  ;;  %v7802_v24 = vmul.f32 %v12347_v55, %v17306_v25 }
 0x5ca   : > { %v7873_v59 = vmul.f32 %v12348_v7, %v17314_v16  ;;  %v7484_v15 = vadd.f32 %v17248_v6, %v7444_v57  ;;  %v8192_v17 = vadd.f32 %v8160_v18, %v8120_v23  ;;  %v7874_v41 = vmul.f32 %v12349_v34, %v17314_v16  ;;  %v12363_v23 = vld [vmem:[#allocation3 + $0x52] sm:$0xff] }
 0x5cb   : > { %v7945_v13 = vmul.f32 %v12350_v35, %v17322_v63  ;;  %v7515_v62 = vmax.f32 %v7483_v32, 0.0  ;;  %v8263_v61 = vadd.f32 %v8231_v4, %v8191_v45  ;;  %v7946_v22 = vmul.f32 %v12351_v30, %v17322_v63  ;;  %v17425_v35 = vld [vmem:[%s19002_s6 + $0x4] ss:$0 sm:$0xff] }
 0x5cc   : > { %v7905_v1 = vadd.f32 %v7873_v59, %v7801_v47  ;;  %v7516_v48 = vmax.f32 %v7484_v15, 0.0  ;;  %v8264_v46 = vadd.f32 %v8232_v51, %v8192_v17  ;;  %v7906_v20 = vadd.f32 %v7874_v41, %v7802_v24  ;;  %v17431_v30 = vld [vmem:[#allocation3 + $0x50] sm:$0xff] }
 0x5cd   : > { %v8017_v8 = vmul.f32 %v17370_v12, %v17333_v40  ;;  %v8335_v37 = vadd.f32 %v8303_v10, %v8263_v61  ;;  %v8018_v6 = vmul.f32 %v17374_v36, %v17333_v40  ;;  %v8089_v55 = vmul.f32 %v17378_v53, %v17341_v21  ;;  %v17440_v10 = vld [vmem:[#allocation3 + $0x51] sm:$0xff] }
 0x5ce   : > { %v7977_v58 = vadd.f32 %v7945_v13, %v7905_v1  ;;  %v7532_v0 = vpack.c.bf16 %v7516_v48, %v7515_v62  ;;  %v8336_v38 = vadd.f32 %v8304_v19, %v8264_v46  ;;  %v7978_v28 = vadd.f32 %v7946_v22, %v7906_v20 }
 0x5cf   : > { %v8090_v7 = vmul.f32 %v17383_v33, %v17341_v21  ;;  %v8407_v49 = vadd.f32 %v8375_v3, %v8335_v37  ;;  %v8161_v44 = vmul.f32 %v17387_v52, %v17346_v31  ;;  %v8162_v34 = vmul.f32 %v17392_v26, %v17346_v31  ;;  %v12362_v3 = vld [vmem:[#allocation3 + $0x4a] sm:$0xff] }
 0x5d0   : > { %v8049_v50 = vadd.f32 %v8017_v8, %v7977_v58  ;;  %11385 = vmatmul.mubr.msk.bf16.gmra.mrb[60].mxu1 %vm458_vm0, %v7532_v0  ;;  %v8408_v60 = vadd.f32 %v8376_v39, %v8336_v38  ;;  %v8050_v54 = vadd.f32 %v8018_v6, %v7978_v28  ;;  %v8233_v27 = vmul.f32 %v17427_v9, %v17353_v14 }
 0x5d1   : > { %v8234_v18 = vmul.f32 %v17431_v30, %v17353_v14  ;;  %v8447_v4 = vmul.f32 %v17413_v43, %v8407_v49  ;;  %v8305_v51 = vmul.f32 %v17436_v56, %v17359_v42  ;;  %v8306_v29 = vmul.f32 %v17440_v10, %v17359_v42  ;;  %v17472_v49 = vld [vmem:[#allocation3 + $0x60] sm:$0xff] }
 0x5d2   : > { %v8121_v11 = vadd.f32 %v8089_v55, %v8049_v50  ;;  %v8448_v2 = vmul.f32 %v17413_v43, %v8408_v60  ;;  %v8122_v19 = vadd.f32 %v8090_v7, %v8050_v54  ;;  %v8377_v57 = vmul.f32 %v12362_v3, %v17366_v5  ;;  %v17481_v54 = vld [vmem:[#allocation3 + $0x61] sm:$0xff] }
 0x5d3   : > { %v8378_v39 = vmul.f32 %v12363_v23, %v17366_v5  ;;  %v8487_v47 = vadd.f32 %v17425_v35, %v8447_v4  ;;  %v7803_v45 = vmul.f32 %v17370_v12, %v17306_v25  ;;  %v7804_v24 = vmul.f32 %v17374_v36, %v17306_v25 }
 0x5d4   : > { %v8193_v32 = vadd.f32 %v8161_v44, %v8121_v11  ;;  %v8488_v59 = vadd.f32 %v17425_v35, %v8448_v2  ;;  %v8194_v15 = vadd.f32 %v8162_v34, %v8122_v19  ;;  %v7875_v17 = vmul.f32 %v17378_v53, %v17314_v16  ;;  %v17477_v34 = vld [vmem:[#allocation3 + $0x68] sm:$0xff] }
 0x5d5   : > { %v7876_v41 = vmul.f32 %v17383_v33, %v17314_v16  ;;  %v8519_v13 = vmax.f32 %v8487_v47, 0.0  ;;  %v7947_v61 = vmul.f32 %v17387_v52, %v17322_v63  ;;  %v7948_v12 = vmul.f32 %v17392_v26, %v17322_v63  ;;  %v17490_v2 = vld [vmem:[#allocation3 + $0x62] sm:$0xff] }
 0x5d6   : > { %v8265_v62 = vadd.f32 %v8233_v27, %v8193_v32  ;;  %v8520_v1 = vmax.f32 %v8488_v59, 0.0  ;;  %v8266_v22 = vadd.f32 %v8234_v18, %v8194_v15  ;;  %v7907_v36 = vadd.f32 %v7875_v17, %v7803_v45  ;;  %v17485_v18 = vld [vmem:[#allocation3 + $0x69] sm:$0xff] }
 0x5d7   : > { %v7908_v48 = vadd.f32 %v7876_v41, %v7804_v24  ;;  %v8019_v20 = vmul.f32 %v17427_v9, %v17333_v40  ;;  %v8020_v53 = vmul.f32 %v17431_v30, %v17333_v40  ;;  %v8091_v33 = vmul.f32 %v17436_v56, %v17341_v21 }
 0x5d8   : > { %v8337_v46 = vadd.f32 %v8305_v51, %v8265_v62  ;;  %v8551_v8 = vpack.c.bf16 %v8520_v1, %v8519_v13  ;;  %v8338_v37 = vadd.f32 %v8306_v29, %v8266_v22  ;;  %v7979_v52 = vadd.f32 %v7947_v61, %v7907_v36 }
 0x5d9   : > { %v7980_v58 = vadd.f32 %v7948_v12, %v7908_v48  ;;  %v8092_v26 = vmul.f32 %v17440_v10, %v17341_v21  ;;  %v8163_v55 = vmul.f32 %v12362_v3, %v17346_v31  ;;  %v8164_v0 = vmul.f32 %v12363_v23, %v17346_v31 }
 0x5da   : > { %v8409_v6 = vadd.f32 %v8377_v57, %v8337_v46  ;;  %11392 = vmatprep.mubr.msk.bf16.mxu1 %vm458_vm0, %v8551_v8  ;;  %v8410_v38 = vadd.f32 %v8378_v39, %v8338_v37  ;;  %v8051_v28 = vadd.f32 %v8019_v20, %v7979_v52  ;;  %v8235_v50 = vmul.f32 %v17472_v49, %v17353_v14  ;;  %v12369_v39 = vld [vmem:[#allocation3 + $0x6a] sm:$0xff] }
 0x5db   : > { %v8052_v7 = vadd.f32 %v8020_v53, %v7980_v58  ;;  %v8236_v60 = vmul.f32 %v17477_v34, %v17353_v14  ;;  %v8307_v27 = vmul.f32 %v17481_v54, %v17359_v42  ;;  %v8308_v4 = vmul.f32 %v17485_v18, %v17359_v42 }
 0x5dc   : > { %v8449_v44 = vmul.f32 %v17413_v43, %v8409_v6  ;;  %v8450_v11 = vmul.f32 %v17413_v43, %v8410_v38  ;;  %v8123_v51 = vadd.f32 %v8091_v33, %v8051_v28  ;;  %v8379_v19 = vmul.f32 %v17490_v2, %v17366_v5  ;;  %v17529_v28 = vld [vmem:[#allocation3 + $0x80] sm:$0xff] }
 0x5dd   : > { %v8124_v29 = vadd.f32 %v8092_v26, %v8052_v7  ;;  %v8380_v47 = vmul.f32 %v12369_v39, %v17366_v5  ;;  %v7805_v32 = vmul.f32 %v17427_v9, %v17306_v25  ;;  %v7806_v45 = vmul.f32 %v17431_v30, %v17306_v25  ;;  %v17522_v26 = vld [vmem:[#allocation3 + $0x78] sm:$0xff] }
 0x5de   : > { %v8489_v57 = vadd.f32 %v17425_v35, %v8449_v44  ;;  %v8490_v24 = vadd.f32 %v17425_v35, %v8450_v11  ;;  %v8195_v59 = vadd.f32 %v8163_v55, %v8123_v51  ;;  %v7877_v17 = vmul.f32 %v17436_v56, %v17314_v16 }
 0x5df   : > { %v8196_v15 = vadd.f32 %v8164_v0, %v8124_v29  ;;  %v7878_v13 = vmul.f32 %v17440_v10, %v17314_v16  ;;  %v7949_v62 = vmul.f32 %v12362_v3, %v17322_v63  ;;  %v7950_v61 = vmul.f32 %v12363_v23, %v17322_v63  ;;  %v11971_v23 = vld [vmem:[%s19003_s7 + $0x58] sm:$0xff]   ;;  %v12371_v0 = vld [vmem:[%s19003_s7 + $0x50] sm:$0xff]  }
 0x5e0   : > { %v8521_v41 = vmax.f32 %v8489_v57, 0.0  ;;  %v8522_v12 = vmax.f32 %v8490_v24, 0.0  ;;  %v8267_v9 = vadd.f32 %v8235_v50, %v8195_v59  ;;  %v7909_v22 = vadd.f32 %v7877_v17, %v7805_v32  ;;  %v17533_v50 = vld [vmem:[#allocation3 + $0x79] sm:$0xff] }
 0x5e1   : > { %v8268_v1 = vadd.f32 %v8236_v60, %v8196_v15  ;;  %v7910_v30 = vadd.f32 %v7878_v13, %v7806_v45  ;;  %v8021_v36 = vmul.f32 %v17472_v49, %v17333_v40  ;;  %v8022_v48 = vmul.f32 %v17477_v34, %v17333_v40  ;;  %v17537_v60 = vld [vmem:[#allocation3 + $0x81] sm:$0xff] }
 0x5e2   : > { %v8093_v56 = vmul.f32 %v17481_v54, %v17341_v21  ;;  %v8552_v46 = vpack.c.bf16 %v8522_v12, %v8521_v41  ;;  %v8339_v10 = vadd.f32 %v8307_v27, %v8267_v9  ;;  %v7981_v3 = vadd.f32 %v7949_v62, %v7909_v22  ;;  %v17543_v29 = vld [vmem:[#allocation3 + $0x7a] sm:$0xff] }
 0x5e3   : > { %v8340_v20 = vadd.f32 %v8308_v4, %v8268_v1  ;;  %v7982_v53 = vadd.f32 %v7950_v61, %v7910_v30  ;;  %v8094_v33 = vmul.f32 %v17485_v18, %v17341_v21  ;;  %v8165_v8 = vmul.f32 %v17490_v2, %v17346_v31 }
 0x5e4   : > { %v8166_v37 = vmul.f32 %v12369_v39, %v17346_v31  ;;  %11393 = vmatmul.mubr.msk.bf16.vlgmr.msra.gmra.mrb[32].mxu1 %vm458_vm0, %v8552_v46  ;;  %v8411_v52 = vadd.f32 %v8379_v19, %v8339_v10  ;;  %v8053_v6 = vadd.f32 %v8021_v36, %v7981_v3  ;;  %v8237_v55 = vmul.f32 %v17522_v26, %v17353_v14 }
 0x5e5   : > { %v8412_v58 = vadd.f32 %v8380_v47, %v8340_v20  ;;  %11425 = vmatpush3.bf16.msra.mxu1 %v12371_v0  ;;  %v8054_v38 = vadd.f32 %v8022_v48, %v7982_v53  ;;  %v8238_v7 = vmul.f32 %v17529_v28, %v17353_v14  ;;  %v8309_v44 = vmul.f32 %v17533_v50, %v17359_v42  ;;  %v17547_v47 = vld [vmem:[#allocation3 + $0x82] sm:$0xff] }
 0x5e6   : > { %v8310_v27 = vmul.f32 %v17537_v60, %v17359_v42  ;;  %v8451_v4 = vmul.f32 %v17413_v43, %v8411_v52  ;;  %v8125_v51 = vadd.f32 %v8093_v56, %v8053_v6  ;;  %v8381_v19 = vmul.f32 %v17543_v29, %v17366_v5  ;;  %11426 = vmatprep.subr.bf16.mxu1 %v11971_v23 }
 0x5e7   : > { %v8452_v11 = vmul.f32 %v17413_v43, %v8412_v58  ;;  %v8126_v57 = vadd.f32 %v8094_v33, %v8054_v38  ;;  %v8382_v32 = vmul.f32 %v17547_v47, %v17366_v5  ;;  %v7807_v45 = vmul.f32 %v17472_v49, %v17306_v25  ;;  %v17577_v33 = vld [vmem:[#allocation3 + $0x90] sm:$0xff]  ;;  %v17581_v58 = vld [vmem:[#allocation3 + $0x98] sm:$0xff] }
 0x5e8   : > { %v7808_v24 = vmul.f32 %v17477_v34, %v17306_v25  ;;  %v8491_v59 = vadd.f32 %v17425_v35, %v8451_v4  ;;  %v8197_v17 = vadd.f32 %v8165_v8, %v8125_v51  ;;  %v7879_v41 = vmul.f32 %v17481_v54, %v17314_v16  ;;  %v17594_v4 = vld [vmem:[#allocation3 + $0x92] sm:$0xff] }
 0x5e9   : > { %v8492_v15 = vadd.f32 %v17425_v35, %v8452_v11  ;;  %v8198_v13 = vadd.f32 %v8166_v37, %v8126_v57  ;;  %v7880_v62 = vmul.f32 %v17485_v18, %v17314_v16  ;;  %v7951_v61 = vmul.f32 %v17490_v2, %v17322_v63  ;;  %11427 = vmatpush3.bf16.msra.mxu1 %v11971_v23  ;;  %v12382_v57 = vld [vmem:[#allocation3 + $0x9a] sm:$0xff] }
 0x5ea   : > { %v7952_v49 = vmul.f32 %v12369_v39, %v17322_v63  ;;  %v8523_v12 = vmax.f32 %v8491_v59, 0.0  ;;  %v8269_v9 = vadd.f32 %v8237_v55, %v8197_v17  ;;  %v7911_v1 = vadd.f32 %v7879_v41, %v7807_v45  ;;  %v17585_v55 = vld [vmem:[#allocation3 + $0x91] sm:$0xff] }
 0x5eb   : > { %v8524_v34 = vmax.f32 %v8492_v15, 0.0  ;;  %v8270_v22 = vadd.f32 %v8238_v7, %v8198_v13  ;;  %v7912_v30 = vadd.f32 %v7880_v62, %v7808_v24  ;;  %v8023_v36 = vmul.f32 %v17522_v26, %v17333_v40 }
 0x5ec   : > { %v8024_v54 = vmul.f32 %v17529_v28, %v17333_v40  ;;  %v8341_v18 = vadd.f32 %v8309_v44, %v8269_v9  ;;  %v7983_v56 = vadd.f32 %v7951_v61, %v7911_v1  ;;  %v8095_v2 = vmul.f32 %v17533_v50, %v17341_v21  ;;  %v17590_v44 = vld [vmem:[#allocation3 + $0x99] sm:$0xff] }
 0x5ed   : > { %v8553_v48 = vpack.c.bf16 %v8524_v34, %v8523_v12  ;;  %v8342_v39 = vadd.f32 %v8310_v27, %v8270_v22  ;;  %v7984_v46 = vadd.f32 %v7952_v49, %v7912_v30  ;;  %v8096_v10 = vmul.f32 %v17537_v60, %v17341_v21 }
 0x5ee   : > { %v8167_v20 = vmul.f32 %v17543_v29, %v17346_v31  ;;  %v8413_v3 = vadd.f32 %v8381_v19, %v8341_v18  ;;  %v8055_v23 = vadd.f32 %v8023_v36, %v7983_v56  ;;  %v8168_v53 = vmul.f32 %v17547_v47, %v17346_v31 }
 0x5ef   : > { %11396 = vmatprep.mubr.msk.bf16.mxu1 %vm458_vm0, %v8553_v48  ;;  %v8239_v8 = vmul.f32 %v17577_v33, %v17353_v14  ;;  %v8414_v37 = vadd.f32 %v8382_v32, %v8342_v39  ;;  %v8056_v52 = vadd.f32 %v8024_v54, %v7984_v46  ;;  %v8240_v6 = vmul.f32 %v17581_v58, %v17353_v14 }
 0x5f0   : > { %v8311_v0 = vmul.f32 %v17585_v55, %v17359_v42  ;;  %v8453_v38 = vmul.f32 %v17413_v43, %v8413_v3  ;;  %v8127_v7 = vadd.f32 %v8095_v2, %v8055_v23  ;;  %v8312_v27 = vmul.f32 %v17590_v44, %v17359_v42  ;;  %v17630_v23 = vld [vmem:[#allocation3 + $0xb0] sm:$0xff] }
 0x5f1   : > { %v8383_v11 = vmul.f32 %v17594_v4, %v17366_v5  ;;  %v8454_v51 = vmul.f32 %v17413_v43, %v8414_v37  ;;  %v8128_v19 = vadd.f32 %v8096_v10, %v8056_v52  ;;  %v8384_v32 = vmul.f32 %v12382_v57, %v17366_v5  ;;  %v17635_v52 = vld [vmem:[#allocation3 + $0xa9] sm:$0xff] }
 0x5f2   : > { %v7809_v45 = vmul.f32 %v17522_v26, %v17306_v25  ;;  %v8493_v24 = vadd.f32 %v17425_v35, %v8453_v38  ;;  %v8199_v59 = vadd.f32 %v8167_v20, %v8127_v7  ;;  %v7810_v15 = vmul.f32 %v17529_v28, %v17306_v25  ;;  %v17626_v20 = vld [vmem:[#allocation3 + $0xa8] sm:$0xff] }
 0x5f3   : > { %v7881_v17 = vmul.f32 %v17533_v50, %v17314_v16  ;;  %v8494_v41 = vadd.f32 %v17425_v35, %v8454_v51  ;;  %v8200_v13 = vadd.f32 %v8168_v53, %v8128_v19  ;;  %v7882_v62 = vmul.f32 %v17537_v60, %v17314_v16  ;;  %v12388_v19 = vld [vmem:[#allocation3 + $0xb2] sm:$0xff] }
 0x5f4   : > { %v7953_v61 = vmul.f32 %v17543_v29, %v17322_v63  ;;  %v8525_v49 = vmax.f32 %v8493_v24, 0.0  ;;  %v8271_v26 = vadd.f32 %v8239_v8, %v8199_v59  ;;  %v7954_v34 = vmul.f32 %v17547_v47, %v17322_v63 }
 0x5f5   : > { %v7913_v12 = vadd.f32 %v7881_v17, %v7809_v45  ;;  %v8526_v9 = vmax.f32 %v8494_v41, 0.0  ;;  %v8272_v28 = vadd.f32 %v8240_v6, %v8200_v13  ;;  %v7914_v1 = vadd.f32 %v7882_v62, %v7810_v15 }
 0x5f6   : > { %v8025_v50 = vmul.f32 %v17577_v33, %v17333_v40  ;;  %v8343_v22 = vadd.f32 %v8311_v0, %v8271_v26  ;;  %v8026_v60 = vmul.f32 %v17581_v58, %v17333_v40  ;;  %v8097_v29 = vmul.f32 %v17585_v55, %v17341_v21  ;;  %v17639_v0 = vld [vmem:[#allocation3 + $0xb1] sm:$0xff] }
 0x5f7   : > { %v7985_v30 = vadd.f32 %v7953_v61, %v7913_v12  ;;  %v8554_v36 = vpack.c.bf16 %v8526_v9, %v8525_v49  ;;  %v8344_v54 = vadd.f32 %v8312_v27, %v8272_v28  ;;  %v7986_v48 = vadd.f32 %v7954_v34, %v7914_v1 }
 0x5f8   : > { %v8098_v47 = vmul.f32 %v17590_v44, %v17341_v21  ;;  %v8415_v18 = vadd.f32 %v8383_v11, %v8343_v22  ;;  %v8169_v2 = vmul.f32 %v17594_v4, %v17346_v31  ;;  %v8170_v39 = vmul.f32 %v12382_v57, %v17346_v31  ;;  %v12387_v11 = vld [vmem:[#allocation3 + $0xaa] sm:$0xff] }
 0x5f9   : > { %v8057_v56 = vadd.f32 %v8025_v50, %v7985_v30  ;;  %11397 = vmatmul.mubr.msk.bf16.gmra.mrb[36].mxu1 %vm458_vm0, %v8554_v36  ;;  %v8416_v46 = vadd.f32 %v8384_v32, %v8344_v54  ;;  %v8058_v10 = vadd.f32 %v8026_v60, %v7986_v48  ;;  %v8241_v3 = vmul.f32 %v17626_v20, %v17353_v14 }
 0x5fa   : > { %v8242_v53 = vmul.f32 %v17630_v23, %v17353_v14  ;;  %v8455_v8 = vmul.f32 %v17413_v43, %v8415_v18  ;;  %v8313_v6 = vmul.f32 %v17635_v52, %v17359_v42  ;;  %v8314_v38 = vmul.f32 %v17639_v0, %v17359_v42  ;;  %v17670_v18 = vld [vmem:[#allocation3 + $0xc0] sm:$0xff] }
 0x5fb   : > { %v8129_v37 = vadd.f32 %v8097_v29, %v8057_v56  ;;  %v8456_v7 = vmul.f32 %v17413_v43, %v8416_v46  ;;  %v8130_v27 = vadd.f32 %v8098_v47, %v8058_v10  ;;  %v8385_v51 = vmul.f32 %v12387_v11, %v17366_v5  ;;  %v17676_v10 = vld [vmem:[#allocation3 + $0xc1] sm:$0xff] }
 0x5fc   : > { %v8386_v32 = vmul.f32 %v12388_v19, %v17366_v5  ;;  %v8495_v45 = vadd.f32 %v17425_v35, %v8455_v8  ;;  %v7811_v59 = vmul.f32 %v17577_v33, %v17306_v25  ;;  %v7812_v15 = vmul.f32 %v17581_v58, %v17306_v25 }
 0x5fd   : > { %v8201_v24 = vadd.f32 %v8169_v2, %v8129_v37  ;;  %v8496_v17 = vadd.f32 %v17425_v35, %v8456_v7  ;;  %v8202_v41 = vadd.f32 %v8170_v39, %v8130_v27  ;;  %v7883_v13 = vmul.f32 %v17585_v55, %v17314_v16  ;;  %v12390_v39 = vld [vmem:[#allocation3 + $0xc8] sm:$0xff] }
 0x5fe   : > { %v7884_v62 = vmul.f32 %v17590_v44, %v17314_v16  ;;  %v8527_v61 = vmax.f32 %v8495_v45, 0.0  ;;  %v7955_v26 = vmul.f32 %v17594_v4, %v17322_v63  ;;  %v7956_v12 = vmul.f32 %v12382_v57, %v17322_v63  ;;  %v12393_v7 = vld [vmem:[#allocation3 + $0xc2] sm:$0xff] }
 0x5ff   : > { %v8273_v49 = vadd.f32 %v8241_v3, %v8201_v24  ;;  %v8528_v33 = vmax.f32 %v8496_v17, 0.0  ;;  %v8274_v34 = vadd.f32 %v8242_v53, %v8202_v41  ;;  %v7915_v9 = vadd.f32 %v7883_v13, %v7811_v59  ;;  %v17680_v53 = vld [vmem:[#allocation3 + $0xc9] sm:$0xff] }
 0x600   : > { %v7916_v58 = vadd.f32 %v7884_v62, %v7812_v15  ;;  %v8027_v1 = vmul.f32 %v17626_v20, %v17333_v40  ;;  %v8028_v55 = vmul.f32 %v17630_v23, %v17333_v40  ;;  %v8099_v44 = vmul.f32 %v17635_v52, %v17341_v21 }
 0x601   : > { %v8345_v28 = vadd.f32 %v8313_v6, %v8273_v49  ;;  %v8555_v50 = vpack.c.bf16 %v8528_v33, %v8527_v61  ;;  %v8346_v22 = vadd.f32 %v8314_v38, %v8274_v34  ;;  %v7987_v30 = vadd.f32 %v7955_v26, %v7915_v9 }
 0x602   : > { %v7988_v4 = vadd.f32 %v7956_v12, %v7916_v58  ;;  %v8100_v57 = vmul.f32 %v17639_v0, %v17341_v21  ;;  %v8171_v29 = vmul.f32 %v12387_v11, %v17346_v31  ;;  %v8172_v36 = vmul.f32 %v12388_v19, %v17346_v31 }
 0x603   : > { %v8417_v60 = vadd.f32 %v8385_v51, %v8345_v28  ;;  %11400 = vmatprep.mubr.msk.bf16.mxu1 %vm458_vm0, %v8555_v50  ;;  %v8418_v54 = vadd.f32 %v8386_v32, %v8346_v22  ;;  %v8059_v48 = vadd.f32 %v8027_v1, %v7987_v30  ;;  %v8243_v56 = vmul.f32 %v17670_v18, %v17353_v14  ;;  %v12394_v32 = vld [vmem:[#allocation3 + $0xca] sm:$0xff] }
 0x604   : > { %v8060_v47 = vadd.f32 %v8028_v55, %v7988_v4  ;;  %v8244_v46 = vmul.f32 %v12390_v39, %v17353_v14  ;;  %v8315_v3 = vmul.f32 %v17676_v10, %v17359_v42  ;;  %v8316_v8 = vmul.f32 %v17680_v53, %v17359_v42 }
 0x605   : > { %v8457_v2 = vmul.f32 %v17413_v43, %v8417_v60  ;;  %v8458_v37 = vmul.f32 %v17413_v43, %v8418_v54  ;;  %v8131_v6 = vadd.f32 %v8099_v44, %v8059_v48  ;;  %v8387_v27 = vmul.f32 %v12393_v7, %v17366_v5  ;;  %v17709_v60 = vld [vmem:[#allocation3 + $0xd8] sm:$0xff] }
 0x606   : > { %v8132_v38 = vadd.f32 %v8100_v57, %v8060_v47  ;;  %v8388_v45 = vmul.f32 %v12394_v32, %v17366_v5  ;;  %v7813_v24 = vmul.f32 %v17626_v20, %v17306_v25  ;;  %v7814_v59 = vmul.f32 %v17630_v23, %v17306_v25  ;;  %v17717_v48 = vld [vmem:[#allocation3 + $0xd9] sm:$0xff] }
 0x607   : > { %v8497_v51 = vadd.f32 %v17425_v35, %v8457_v2  ;;  %v8498_v15 = vadd.f32 %v17425_v35, %v8458_v37  ;;  %v8203_v17 = vadd.f32 %v8171_v29, %v8131_v6  ;;  %v7885_v13 = vmul.f32 %v17635_v52, %v17314_v16  ;;  %v12399_v37 = vld [vmem:[#allocation3 + $0xda] sm:$0xff] }
 0x608   : > { %v8204_v41 = vadd.f32 %v8172_v36, %v8132_v38  ;;  %v7886_v61 = vmul.f32 %v17639_v0, %v17314_v16  ;;  %v7957_v49 = vmul.f32 %v12387_v11, %v17322_v63  ;;  %v7958_v26 = vmul.f32 %v12388_v19, %v17322_v63  ;;  %v17713_v36 = vld [vmem:[#allocation3 + $0xe0] sm:$0xff] }
 0x609   : > { %v8529_v62 = vmax.f32 %v8497_v51, 0.0  ;;  %v8530_v12 = vmax.f32 %v8498_v15, 0.0  ;;  %v8275_v20 = vadd.f32 %v8243_v56, %v8203_v17  ;;  %v7917_v34 = vadd.f32 %v7885_v13, %v7813_v24  ;;  %v17721_v56 = vld [vmem:[#allocation3 + $0xe1] sm:$0xff] }
 0x60a   : > { %v8276_v33 = vadd.f32 %v8244_v46, %v8204_v41  ;;  %v7918_v23 = vadd.f32 %v7886_v61, %v7814_v59  ;;  %v8029_v9 = vmul.f32 %v17670_v18, %v17333_v40  ;;  %v8030_v58 = vmul.f32 %v12390_v39, %v17333_v40 }
 0x60b   : > { %v8101_v52 = vmul.f32 %v17676_v10, %v17341_v21  ;;  %v8556_v28 = vpack.c.bf16 %v8530_v12, %v8529_v62  ;;  %v8347_v1 = vadd.f32 %v8315_v3, %v8275_v20  ;;  %v7989_v55 = vadd.f32 %v7957_v49, %v7917_v34 }
 0x60c   : > { %v8348_v0 = vadd.f32 %v8316_v8, %v8276_v33  ;;  %v7990_v11 = vadd.f32 %v7958_v26, %v7918_v23  ;;  %v8102_v19 = vmul.f32 %v17680_v53, %v17341_v21  ;;  %v8173_v44 = vmul.f32 %v12393_v7, %v17346_v31 }
 0x60d   : > { %v8174_v50 = vmul.f32 %v12394_v32, %v17346_v31  ;;  %11401 = vmatmul.mubr.msk.bf16.gmra.mrb[40].mxu1 %vm458_vm0, %v8556_v28  ;;  %v8419_v22 = vadd.f32 %v8387_v27, %v8347_v1  ;;  %v8061_v4 = vadd.f32 %v8029_v9, %v7989_v55  ;;  %v8245_v57 = vmul.f32 %v17709_v60, %v17353_v14  ;;  %v12400_v27 = vld [vmem:[#allocation3 + $0xe2] sm:$0xff] }
 0x60e   : > { %v8420_v30 = vadd.f32 %v8388_v45, %v8348_v0  ;;  %v8062_v29 = vadd.f32 %v8030_v58, %v7990_v11  ;;  %v8246_v54 = vmul.f32 %v17713_v36, %v17353_v14  ;;  %v8317_v47 = vmul.f32 %v17717_v48, %v17359_v42  ;;  %v17751_v11 = vld [vmem:[#allocation3 + $0xf0] sm:$0xff] }
 0x60f   : > { %v8318_v2 = vmul.f32 %v17721_v56, %v17359_v42  ;;  %v8459_v46 = vmul.f32 %v17413_v43, %v8419_v22  ;;  %v8133_v8 = vadd.f32 %v8101_v52, %v8061_v4  ;;  %v8389_v6 = vmul.f32 %v12399_v37, %v17366_v5  ;;  %v17755_v22 = vld [vmem:[#allocation3 + $0xf8] sm:$0xff] }
 0x610   : > { %v8460_v3 = vmul.f32 %v17413_v43, %v8420_v30  ;;  %v8134_v38 = vadd.f32 %v8102_v19, %v8062_v29  ;;  %v8390_v51 = vmul.f32 %v12400_v27, %v17366_v5  ;;  %v7815_v45 = vmul.f32 %v17670_v18, %v17306_v25  ;;  %v17759_v4 = vld [vmem:[#allocation3 + $0xf1] sm:$0xff] }
 0x611   : > { %v7816_v24 = vmul.f32 %v12390_v39, %v17306_v25  ;;  %v8499_v59 = vadd.f32 %v17425_v35, %v8459_v46  ;;  %v8205_v17 = vadd.f32 %v8173_v44, %v8133_v8  ;;  %v7887_v41 = vmul.f32 %v17676_v10, %v17314_v16  ;;  %v17768_v46 = vld [vmem:[#allocation3 + $0xf2] sm:$0xff] }
 0x612   : > { %v8500_v15 = vadd.f32 %v17425_v35, %v8460_v3  ;;  %v8206_v13 = vadd.f32 %v8174_v50, %v8134_v38  ;;  %v7888_v62 = vmul.f32 %v17680_v53, %v17314_v16  ;;  %v7959_v61 = vmul.f32 %v12393_v7, %v17322_v63  ;;  %v12406_v38 = vld [vmem:[#allocation3 + $0xfa] sm:$0xff] }
 0x613   : > { %v7960_v49 = vmul.f32 %v12394_v32, %v17322_v63  ;;  %v8531_v26 = vmax.f32 %v8499_v59, 0.0  ;;  %v8277_v12 = vadd.f32 %v8245_v57, %v8205_v17  ;;  %v7919_v39 = vadd.f32 %v7887_v41, %v7815_v45 }
 0x614   : > { %v8532_v18 = vmax.f32 %v8500_v15, 0.0  ;;  %v8278_v20 = vadd.f32 %v8246_v54, %v8206_v13  ;;  %v7920_v33 = vadd.f32 %v7888_v62, %v7816_v24  ;;  %v8031_v34 = vmul.f32 %v17709_v60, %v17333_v40 }
 0x615   : > { %v8032_v10 = vmul.f32 %v17713_v36, %v17333_v40  ;;  %v8349_v9 = vadd.f32 %v8317_v47, %v8277_v12  ;;  %v7991_v58 = vadd.f32 %v7959_v61, %v7919_v39  ;;  %v8103_v53 = vmul.f32 %v17717_v48, %v17341_v21  ;;  %v17764_v47 = vld [vmem:[#allocation3 + $0xf9] sm:$0xff] }
 0x616   : > { %v8557_v23 = vpack.c.bf16 %v8532_v18, %v8531_v26  ;;  %v8350_v7 = vadd.f32 %v8318_v2, %v8278_v20  ;;  %v7992_v32 = vadd.f32 %v7960_v49, %v7920_v33  ;;  %v8104_v52 = vmul.f32 %v17721_v56, %v17341_v21 }
 0x617   : > { %v8175_v28 = vmul.f32 %v12399_v37, %v17346_v31  ;;  %v8421_v1 = vadd.f32 %v8389_v6, %v8349_v9  ;;  %v8063_v0 = vadd.f32 %v8031_v34, %v7991_v58  ;;  %v8176_v55 = vmul.f32 %v12400_v27, %v17346_v31 }
 0x618   : > { %11404 = vmatprep.mubr.msk.bf16.mxu1 %vm458_vm0, %v8557_v23  ;;  %v8247_v19 = vmul.f32 %v17751_v11, %v17353_v14  ;;  %v8422_v44 = vadd.f32 %v8390_v51, %v8350_v7  ;;  %v8064_v50 = vadd.f32 %v8032_v10, %v7992_v32  ;;  %v8248_v30 = vmul.f32 %v17755_v22, %v17353_v14 }
 0x619   : > { %v8319_v57 = vmul.f32 %v17759_v4, %v17359_v42  ;;  %v8461_v29 = vmul.f32 %v17413_v43, %v8421_v1  ;;  %v8135_v54 = vadd.f32 %v8103_v53, %v8063_v0  ;;  %v8320_v2 = vmul.f32 %v17764_v47, %v17359_v42  ;;  %v17802_v0 = vld [vmem:[#allocation3 + $0x110] sm:$0xff] }
 0x61a   : > { %v8391_v3 = vmul.f32 %v17768_v46, %v17366_v5  ;;  %v8462_v8 = vmul.f32 %v17413_v43, %v8422_v44  ;;  %v8136_v6 = vadd.f32 %v8104_v52, %v8064_v50  ;;  %v8392_v51 = vmul.f32 %v12406_v38, %v17366_v5  ;;  %v17807_v50 = vld [vmem:[#allocation3 + $0x109] sm:$0xff] }
 0x61b   : > { %v7817_v45 = vmul.f32 %v17709_v60, %v17306_v25  ;;  %v8501_v24 = vadd.f32 %v17425_v35, %v8461_v29  ;;  %v8207_v59 = vadd.f32 %v8175_v28, %v8135_v54  ;;  %v7818_v15 = vmul.f32 %v17713_v36, %v17306_v25  ;;  %v17798_v28 = vld [vmem:[#allocation3 + $0x108] sm:$0xff] }
 0x61c   : > { %v7889_v17 = vmul.f32 %v17717_v48, %v17314_v16  ;;  %v8502_v41 = vadd.f32 %v17425_v35, %v8462_v8  ;;  %v8208_v13 = vadd.f32 %v8176_v55, %v8136_v6  ;;  %v7890_v62 = vmul.f32 %v17721_v56, %v17314_v16  ;;  %v12412_v6 = vld [vmem:[#allocation3 + $0x112] sm:$0xff] }
 0x61d   : > { %v7961_v61 = vmul.f32 %v12399_v37, %v17322_v63  ;;  %v8533_v49 = vmax.f32 %v8501_v24, 0.0  ;;  %v8279_v26 = vadd.f32 %v8247_v19, %v8207_v59  ;;  %v7962_v18 = vmul.f32 %v12400_v27, %v17322_v63 }
 0x61e   : > { %v7921_v60 = vadd.f32 %v7889_v17, %v7817_v45  ;;  %v8534_v12 = vmax.f32 %v8502_v41, 0.0  ;;  %v8280_v39 = vadd.f32 %v8248_v30, %v8208_v13  ;;  %v7922_v20 = vadd.f32 %v7890_v62, %v7818_v15 }
 0x61f   : > { %v8033_v36 = vmul.f32 %v17751_v11, %v17333_v40  ;;  %v8351_v48 = vadd.f32 %v8319_v57, %v8279_v26  ;;  %v8034_v34 = vmul.f32 %v17755_v22, %v17333_v40  ;;  %v8105_v56 = vmul.f32 %v17759_v4, %v17341_v21  ;;  %v17811_v57 = vld [vmem:[#allocation3 + $0x111] sm:$0xff] }
 0x620   : > { %v7993_v33 = vadd.f32 %v7961_v61, %v7921_v60  ;;  %v8558_v37 = vpack.c.bf16 %v8534_v12, %v8533_v49  ;;  %v8352_v10 = vadd.f32 %v8320_v2, %v8280_v39  ;;  %v7994_v23 = vadd.f32 %v7962_v18, %v7922_v20 }
 0x621   : > { %v8106_v27 = vmul.f32 %v17764_v47, %v17341_v21  ;;  %v8423_v9 = vadd.f32 %v8391_v3, %v8351_v48  ;;  %v8177_v53 = vmul.f32 %v17768_v46, %v17346_v31  ;;  %v8178_v7 = vmul.f32 %v12406_v38, %v17346_v31  ;;  %v12411_v3 = vld [vmem:[#allocation3 + $0x10a] sm:$0xff] }
 0x622   : > { %v8065_v58 = vadd.f32 %v8033_v36, %v7993_v33  ;;  %11405 = vmatmul.mubr.msk.bf16.gmra.mrb[44].mxu1 %vm458_vm0, %v8558_v37  ;;  %v8424_v32 = vadd.f32 %v8392_v51, %v8352_v10  ;;  %v8066_v52 = vadd.f32 %v8034_v34, %v7994_v23  ;;  %v8249_v1 = vmul.f32 %v17798_v28, %v17353_v14 }
 0x623   : > { %v8250_v55 = vmul.f32 %v17802_v0, %v17353_v14  ;;  %v8463_v19 = vmul.f32 %v17413_v43, %v8423_v9  ;;  %v8321_v30 = vmul.f32 %v17807_v50, %v17359_v42  ;;  %v8322_v29 = vmul.f32 %v17811_v57, %v17359_v42  ;;  %v17842_v9 = vld [vmem:[#allocation3 + $0x120] sm:$0xff] }
 0x624   : > { %v8137_v44 = vadd.f32 %v8105_v56, %v8065_v58  ;;  %v8464_v54 = vmul.f32 %v17413_v43, %v8424_v32  ;;  %v8138_v2 = vadd.f32 %v8106_v27, %v8066_v52  ;;  %v8393_v8 = vmul.f32 %v12411_v3, %v17366_v5  ;;  %v17851_v52 = vld [vmem:[#allocation3 + $0x121] sm:$0xff] }
 0x625   : > { %v8394_v51 = vmul.f32 %v12412_v6, %v17366_v5  ;;  %v8503_v45 = vadd.f32 %v17425_v35, %v8463_v19  ;;  %v7819_v59 = vmul.f32 %v17751_v11, %v17306_v25  ;;  %v7820_v15 = vmul.f32 %v17755_v22, %v17306_v25 }
 0x626   : > { %v8209_v24 = vadd.f32 %v8177_v53, %v8137_v44  ;;  %v8504_v17 = vadd.f32 %v17425_v35, %v8464_v54  ;;  %v8210_v41 = vadd.f32 %v8178_v7, %v8138_v2  ;;  %v7891_v13 = vmul.f32 %v17759_v4, %v17314_v16  ;;  %v17847_v7 = vld [vmem:[#allocation3 + $0x128] sm:$0xff] }
 0x627   : > { %v7892_v62 = vmul.f32 %v17764_v47, %v17314_v16  ;;  %v8535_v61 = vmax.f32 %v8503_v45, 0.0  ;;  %v7963_v26 = vmul.f32 %v17768_v46, %v17322_v63  ;;  %v7964_v60 = vmul.f32 %v12406_v38, %v17322_v63  ;;  %v17860_v54 = vld [vmem:[#allocation3 + $0x122] sm:$0xff] }
 0x628   : > { %v8281_v49 = vadd.f32 %v8249_v1, %v8209_v24  ;;  %v8536_v11 = vmax.f32 %v8504_v17, 0.0  ;;  %v8282_v18 = vadd.f32 %v8250_v55, %v8210_v41  ;;  %v7923_v12 = vadd.f32 %v7891_v13, %v7819_v59  ;;  %v17855_v55 = vld [vmem:[#allocation3 + $0x129] sm:$0xff] }
 0x629   : > { %v7924_v22 = vadd.f32 %v7892_v62, %v7820_v15  ;;  %v8035_v20 = vmul.f32 %v17798_v28, %v17333_v40  ;;  %v8036_v4 = vmul.f32 %v17802_v0, %v17333_v40  ;;  %v8107_v47 = vmul.f32 %v17807_v50, %v17341_v21 }
 0x62a   : > { %v8353_v39 = vadd.f32 %v8321_v30, %v8281_v49  ;;  %v8559_v36 = vpack.c.bf16 %v8536_v11, %v8535_v61  ;;  %v8354_v48 = vadd.f32 %v8322_v29, %v8282_v18  ;;  %v7995_v33 = vadd.f32 %v7963_v26, %v7923_v12 }
 0x62b   : > { %v7996_v46 = vadd.f32 %v7964_v60, %v7924_v22  ;;  %v8108_v38 = vmul.f32 %v17811_v57, %v17341_v21  ;;  %v8179_v56 = vmul.f32 %v12411_v3, %v17346_v31  ;;  %v8180_v37 = vmul.f32 %v12412_v6, %v17346_v31 }
 0x62c   : > { %v8425_v34 = vadd.f32 %v8393_v8, %v8353_v39  ;;  %11408 = vmatprep.mubr.msk.bf16.mxu1 %vm458_vm0, %v8559_v36  ;;  %v8426_v10 = vadd.f32 %v8394_v51, %v8354_v48  ;;  %v8067_v23 = vadd.f32 %v8035_v20, %v7995_v33  ;;  %v8251_v58 = vmul.f32 %v17842_v9, %v17353_v14  ;;  %v12418_v51 = vld [vmem:[#allocation3 + $0x12a] sm:$0xff]  ;;  %v17889_v36 = vld [vmem:[#allocation3 + $0x138] sm:$0xff] }
 0x62d   : > { %v8068_v27 = vadd.f32 %v8036_v4, %v7996_v46  ;;  %v8252_v32 = vmul.f32 %v17847_v7, %v17353_v14  ;;  %v8323_v1 = vmul.f32 %v17851_v52, %v17359_v42  ;;  %v8324_v19 = vmul.f32 %v17855_v55, %v17359_v42  ;;  %v17893_v46 = vld [vmem:[#allocation3 + $0x140] sm:$0xff] }
 0x62e   : > { %v8465_v53 = vmul.f32 %v17413_v43, %v8425_v34  ;;  %v8466_v44 = vmul.f32 %v17413_v43, %v8426_v10  ;;  %v8139_v30 = vadd.f32 %v8107_v47, %v8067_v23  ;;  %v8395_v2 = vmul.f32 %v17860_v54, %v17366_v5  ;;  %v17897_v34 = vld [vmem:[#allocation3 + $0x139] sm:$0xff] }
 0x62f   : > { %v8140_v29 = vadd.f32 %v8108_v38, %v8068_v27  ;;  %v8396_v45 = vmul.f32 %v12418_v51, %v17366_v5  ;;  %v7821_v24 = vmul.f32 %v17798_v28, %v17306_v25  ;;  %v7822_v59 = vmul.f32 %v17802_v0, %v17306_v25  ;;  %v17901_v38 = vld [vmem:[#allocation3 + $0x141] sm:$0xff] }
 0x630   : > { %v8505_v8 = vadd.f32 %v17425_v35, %v8465_v53  ;;  %v8506_v15 = vadd.f32 %v17425_v35, %v8466_v44  ;;  %v8211_v17 = vadd.f32 %v8179_v56, %v8139_v30  ;;  %v7893_v13 = vmul.f32 %v17807_v50, %v17314_v16  ;;  %v17907_v27 = vld [vmem:[#allocation3 + $0x13a] sm:$0xff]  ;;  %v17911_v53 = vld [vmem:[#allocation3 + $0x142] sm:$0xff] }
 0x631   : > { %v8212_v41 = vadd.f32 %v8180_v37, %v8140_v29  ;;  %v7894_v61 = vmul.f32 %v17811_v57, %v17314_v16  ;;  %v7965_v49 = vmul.f32 %v12411_v3, %v17322_v63  ;;  %v7966_v26 = vmul.f32 %v12412_v6, %v17322_v63 }
 0x632   : > { %v8537_v62 = vmax.f32 %v8505_v8, 0.0  ;;  %v8538_v60 = vmax.f32 %v8506_v15, 0.0  ;;  %v8283_v28 = vadd.f32 %v8251_v58, %v8211_v17  ;;  %v7925_v18 = vadd.f32 %v7893_v13, %v7821_v24 }
 0x633   : > { %v8284_v11 = vadd.f32 %v8252_v32, %v8212_v41  ;;  %v7926_v25 = vadd.f32 %v7894_v61, %v7822_v59  ;;  %v8037_v0 = vmul.f32 %v17842_v9, %v17333_v40  ;;  %v8038_v12 = vmul.f32 %v17847_v7, %v17333_v40 }
 0x634   : > { %v8109_v50 = vmul.f32 %v17851_v52, %v17341_v21  ;;  %v8560_v22 = vpack.c.bf16 %v8538_v60, %v8537_v62  ;;  %v8355_v16 = vadd.f32 %v8323_v1, %v8283_v28  ;;  %v7997_v3 = vadd.f32 %v7965_v49, %v7925_v18 }
 0x635   : > { %v8356_v57 = vadd.f32 %v8324_v19, %v8284_v11  ;;  %v7998_v39 = vadd.f32 %v7966_v26, %v7926_v25  ;;  %v8110_v63 = vmul.f32 %v17855_v55, %v17341_v21  ;;  %v8181_v6 = vmul.f32 %v17860_v54, %v17346_v31  ;;  %v17955_v26 = vld [vmem:[%s19000_s4 + $0x28] ss:$0 sm:$0xff]  ;;  %v17964_v25 = vld [vmem:[%s19000_s4 + $0x29] ss:$0 sm:$0xff] }
 0x636   : > { %v8182_v20 = vmul.f32 %v12418_v51, %v17346_v31  ;;  %11409 = vmatmul.mubr.msk.bf16.gmra.mrb[48].mxu1 %vm458_vm0, %v8560_v22  ;;  %v8427_v4 = vadd.f32 %v8395_v2, %v8355_v16  ;;  %v8069_v47 = vadd.f32 %v8037_v0, %v7997_v3  ;;  %v8253_v48 = vmul.f32 %v17889_v36, %v17353_v14  ;;  %v17971_v16 = vld [vmem:[#allocation3 + $0x150] sm:$0xff] }
 0x637   : > { %v8428_v40 = vadd.f32 %v8396_v45, %v8356_v57  ;;  %v8070_v33 = vadd.f32 %v8038_v12, %v7998_v39  ;;  %v8254_v21 = vmul.f32 %v17893_v46, %v17353_v14  ;;  %v8325_v31 = vmul.f32 %v17897_v34, %v17359_v42  ;;  %v17976_v57 = vld [vmem:[%s19000_s4 + $0x2a] ss:$0 sm:$0xff] }
 0x638   : > { %v8326_v56 = vmul.f32 %v17901_v38, %v17359_v42  ;;  %v8467_v37 = vmul.f32 %v17413_v43, %v8427_v4  ;;  %v8141_v23 = vadd.f32 %v8109_v50, %v8069_v47  ;;  %v8397_v14 = vmul.f32 %v17907_v27, %v17366_v5  ;;  %v17918_v42 = vld [vmem:[%s19000_s4 + $0x24] ss:$0 sm:$0xff] }
 0x639   : > { %v8468_v10 = vmul.f32 %v17413_v43, %v8428_v40  ;;  %v8142_v58 = vadd.f32 %v8110_v63, %v8070_v33  ;;  %v8398_v32 = vmul.f32 %v17911_v53, %v17366_v5  ;;  %v7823_v1 = vmul.f32 %v17918_v42, %v17842_v9  ;;  %v17929_v5 = vld [vmem:[%s19000_s4 + $0x25] ss:$0 sm:$0xff]  ;;  %v17989_v40 = vld [vmem:[%s19000_s4 + $0x2b] ss:$0 sm:$0xff] }
 0x63a   : > { %v7824_v19 = vmul.f32 %v17918_v42, %v17847_v7  ;;  %v8507_v44 = vadd.f32 %v17425_v35, %v8467_v37  ;;  %v8213_v29 = vadd.f32 %v8181_v6, %v8141_v23  ;;  %v7895_v2 = vmul.f32 %v17929_v5, %v17851_v52  ;;  %v17938_v7 = vld [vmem:[%s19000_s4 + $0x26] ss:$0 sm:$0xff]  ;;  %v17980_v6 = vld [vmem:[#allocation3 + $0x158] sm:$0xff] }
 0x63b   : > { %v8508_v30 = vadd.f32 %v17425_v35, %v8468_v10  ;;  %v8214_v8 = vadd.f32 %v8182_v20, %v8142_v58  ;;  %v7896_v9 = vmul.f32 %v17929_v5, %v17855_v55  ;;  %v7967_v45 = vmul.f32 %v17938_v7, %v17860_v54  ;;  %v17946_v55 = vld [vmem:[%s19000_s4 + $0x27] ss:$0 sm:$0xff]  ;;  %v18003_v37 = vld [vmem:[%s19000_s4 + $0x2c] ss:$0 sm:$0xff] }
 0x63c   : > { %v7968_v24 = vmul.f32 %v17938_v7, %v12418_v51  ;;  %v8539_v59 = vmax.f32 %v8507_v44, 0.0  ;;  %v8285_v17 = vadd.f32 %v8253_v48, %v8213_v29  ;;  %v7927_v41 = vadd.f32 %v7895_v2, %v7823_v1  ;;  %v17984_v4 = vld [vmem:[#allocation3 + $0x151] sm:$0xff]  ;;  %v18008_v58 = vld [vmem:[#allocation3 + $0x15a] sm:$0xff] }
 0x63d   : > { %v8540_v15 = vmax.f32 %v8508_v30, 0.0  ;;  %v8286_v13 = vadd.f32 %v8254_v21, %v8214_v8  ;;  %v7928_v52 = vadd.f32 %v7896_v9, %v7824_v19  ;;  %v8039_v62 = vmul.f32 %v17946_v55, %v17889_v36  ;;  %v17994_v21 = vld [vmem:[#allocation3 + $0x159] sm:$0xff] }
 0x63e   : > { %v8040_v61 = vmul.f32 %v17946_v55, %v17893_v46  ;;  %v8357_v49 = vadd.f32 %v8325_v31, %v8285_v17  ;;  %v7999_v51 = vadd.f32 %v7967_v45, %v7927_v41  ;;  %v8111_v60 = vmul.f32 %v17955_v26, %v17897_v34 }
 0x63f   : > { %v8561_v54 = vpack.c.bf16 %v8540_v15, %v8539_v59  ;;  %v8358_v28 = vadd.f32 %v8326_v56, %v8286_v13  ;;  %v8000_v11 = vadd.f32 %v7968_v24, %v7928_v52  ;;  %v8112_v18 = vmul.f32 %v17955_v26, %v17901_v38  ;;  %v17998_v56 = vld [vmem:[#allocation3 + $0x152] sm:$0xff] }
 0x640   : > { %v8183_v0 = vmul.f32 %v17964_v25, %v17907_v27  ;;  %v8429_v12 = vadd.f32 %v8397_v14, %v8357_v49  ;;  %v8071_v50 = vadd.f32 %v8039_v62, %v7999_v51  ;;  %v8184_v22 = vmul.f32 %v17964_v25, %v17911_v53 }
 0x641   : > { %11412 = vmatprep.mubr.msk.bf16.mxu1 %vm458_vm0, %v8561_v54  ;;  %v8255_v3 = vmul.f32 %v17976_v57, %v17971_v16  ;;  %v8430_v39 = vadd.f32 %v8398_v32, %v8358_v28  ;;  %v8072_v63 = vadd.f32 %v8040_v61, %v8000_v11  ;;  %v8256_v20 = vmul.f32 %v17980_v6, %v17976_v57  ;;  %v18039_v11 = vld [vmem:[#allocation3 + $0x168] sm:$0xff] }
 0x642   : > { %v8327_v47 = vmul.f32 %v17989_v40, %v17984_v4  ;;  %v8469_v48 = vmul.f32 %v17413_v43, %v8429_v12  ;;  %v8143_v33 = vadd.f32 %v8111_v60, %v8071_v50  ;;  %v8328_v31 = vmul.f32 %v17994_v21, %v17989_v40  ;;  %v18050_v50 = vld [vmem:[%s19001_s5 + $0x4] ss:$0 sm:$0xff] }
 0x643   : > { %v8399_v10 = vmul.f32 %v18003_v37, %v17998_v56  ;;  %v8470_v23 = vmul.f32 %v17413_v43, %v8430_v39  ;;  %v8144_v14 = vadd.f32 %v8112_v18, %v8072_v63  ;;  %v8400_v32 = vmul.f32 %v18008_v58, %v18003_v37  ;;  %v18053_v39 = vld [vmem:[#allocation3 + $0x169] sm:$0xff] }
 0x644   : > { %v7825_v1 = vmul.f32 %v17918_v42, %v17889_v36  ;;  %v8509_v19 = vadd.f32 %v17425_v35, %v8469_v48  ;;  %v8215_v44 = vadd.f32 %v8183_v0, %v8143_v33  ;;  %v7826_v30 = vmul.f32 %v17918_v42, %v17893_v46  ;;  %v18043_v0 = vld [vmem:[#allocation3 + $0x170] sm:$0xff] }
 0x645   : > { %v7897_v29 = vmul.f32 %v17929_v5, %v17897_v34  ;;  %v8510_v43 = vadd.f32 %v17425_v35, %v8470_v23  ;;  %v8216_v2 = vadd.f32 %v8184_v22, %v8144_v14  ;;  %v7898_v8 = vmul.f32 %v17929_v5, %v17901_v38  ;;  %v12446_v23 = vld [vmem:[#allocation3 + $0x172] sm:$0xff] }
 0x646   : > { %v7969_v9 = vmul.f32 %v17938_v7, %v17907_v27  ;;  %v8541_v45 = vmax.f32 %v8509_v19, 0.0  ;;  %v8287_v36 = vadd.f32 %v8255_v3, %v8215_v44  ;;  %v7970_v59 = vmul.f32 %v17938_v7, %v17911_v53 }
 0x647   : > { %v7929_v24 = vadd.f32 %v7897_v29, %v7825_v1  ;;  %v8542_v15 = vmax.f32 %v8510_v43, 0.0  ;;  %v8288_v46 = vadd.f32 %v8256_v20, %v8216_v2  ;;  %v7930_v17 = vadd.f32 %v7898_v8, %v7826_v30  ;;  %v18057_v20 = vld [vmem:[#allocation3 + $0x171] sm:$0xff] }
 0x648   : > { %v8041_v34 = vmul.f32 %v17971_v16, %v17946_v55  ;;  %v8359_v35 = vadd.f32 %v8327_v47, %v8287_v36  ;;  %v8042_v38 = vmul.f32 %v17980_v6, %v17946_v55  ;;  %v8113_v27 = vmul.f32 %v17984_v4, %v17955_v26 }
 0x649   : > { %v8001_v41 = vadd.f32 %v7969_v9, %v7929_v24  ;;  %v8562_v13 = vpack.c.bf16 %v8542_v15, %v8541_v45  ;;  %v8360_v52 = vadd.f32 %v8328_v31, %v8288_v46  ;;  %v8002_v62 = vadd.f32 %v7970_v59, %v7930_v17  ;;  %v12445_v31 = vld [vmem:[#allocation3 + $0x16a] sm:$0xff] }
 0x64a   : > { %v8114_v53 = vmul.f32 %v17994_v21, %v17955_v26  ;;  %v8431_v61 = vadd.f32 %v8399_v10, %v8359_v35  ;;  %v8185_v49 = vmul.f32 %v17998_v56, %v17964_v25  ;;  %v8186_v51 = vmul.f32 %v18008_v58, %v17964_v25 }
 0x64b   : > { %v8073_v54 = vadd.f32 %v8041_v34, %v8001_v41  ;;  %11413 = vmatmul.mubr.msk.bf16.gmra.mrb[52].mxu1 %vm458_vm0, %v8562_v13  ;;  %v8432_v60 = vadd.f32 %v8400_v32, %v8360_v52  ;;  %v8074_v28 = vadd.f32 %v8042_v38, %v8002_v62  ;;  %v8257_v18 = vmul.f32 %v18039_v11, %v17976_v57  ;;  %v18067_v32 = vld [vmem:[%s19002_s6 + $0x4] ss:$0 sm:$0xff] }
 0x64c   : > { %v8258_v12 = vmul.f32 %v18043_v0, %v17976_v57  ;;  %v8471_v22 = vmul.f32 %v18050_v50, %v8431_v61  ;;  %v8329_v63 = vmul.f32 %v18053_v39, %v17989_v40  ;;  %v8330_v47 = vmul.f32 %v18057_v20, %v17989_v40  ;;  %v12448_v61 = vld [vmem:[#allocation3 + $0x180] sm:$0xff] }
 0x64d   : > { %v8145_v3 = vadd.f32 %v8113_v27, %v8073_v54  ;;  %v8472_v48 = vmul.f32 %v18050_v50, %v8432_v60  ;;  %v8146_v33 = vadd.f32 %v8114_v53, %v8074_v28  ;;  %v8401_v10 = vmul.f32 %v12445_v31, %v18003_v37  ;;  %v12450_v28 = vld [vmem:[#allocation3 + $0x181] sm:$0xff] }
 0x64e   : > { %v8402_v14 = vmul.f32 %v12446_v23, %v18003_v37  ;;  %v8511_v1 = vadd.f32 %v18067_v32, %v8471_v22  ;;  %v7827_v44 = vmul.f32 %v17971_v16, %v17918_v42  ;;  %v7828_v30 = vmul.f32 %v17980_v6, %v17918_v42 }
 0x64f   : > { %v8217_v19 = vadd.f32 %v8185_v49, %v8145_v3  ;;  %v8512_v29 = vadd.f32 %v18067_v32, %v8472_v48  ;;  %v8218_v43 = vadd.f32 %v8186_v51, %v8146_v33  ;;  %v7899_v2 = vmul.f32 %v17984_v4, %v17929_v5  ;;  %v12449_v51 = vld [vmem:[#allocation3 + $0x188] sm:$0xff] }
 0x650   : > { %v7900_v8 = vmul.f32 %v17994_v21, %v17929_v5  ;;  %v8543_v9 = vmax.f32 %v8511_v1, 0.0  ;;  %v7971_v36 = vmul.f32 %v17998_v56, %v17938_v7  ;;  %v7972_v16 = vmul.f32 %v18008_v58, %v17938_v7  ;;  %v12452_v48 = vld [vmem:[#allocation3 + $0x182] sm:$0xff] }
 0x651   : > { %v8289_v45 = vadd.f32 %v8257_v18, %v8217_v19  ;;  %v8544_v24 = vmax.f32 %v8512_v29, 0.0  ;;  %v8290_v59 = vadd.f32 %v8258_v12, %v8218_v43  ;;  %v7931_v6 = vadd.f32 %v7899_v2, %v7827_v44  ;;  %v12451_v12 = vld [vmem:[#allocation3 + $0x189] sm:$0xff] }
 0x652   : > { %v7932_v15 = vadd.f32 %v7900_v8, %v7828_v30  ;;  %v8043_v17 = vmul.f32 %v18039_v11, %v17946_v55  ;;  %v8044_v4 = vmul.f32 %v18043_v0, %v17946_v55  ;;  %v8115_v21 = vmul.f32 %v18053_v39, %v17955_v26 }
 0x653   : > { %v8361_v46 = vadd.f32 %v8329_v63, %v8289_v45  ;;  %v8563_v34 = vpack.c.bf16 %v8544_v24, %v8543_v9  ;;  %v8362_v35 = vadd.f32 %v8330_v47, %v8290_v59  ;;  %v8003_v56 = vadd.f32 %v7971_v36, %v7931_v6 }
 0x654   : > { %v8004_v41 = vadd.f32 %v7972_v16, %v7932_v15  ;;  %v8116_v58 = vmul.f32 %v18057_v20, %v17955_v26  ;;  %v8187_v27 = vmul.f32 %v12445_v31, %v17964_v25  ;;  %v8188_v13 = vmul.f32 %v12446_v23, %v17964_v25 }
 0x655   : > { %v8433_v38 = vadd.f32 %v8401_v10, %v8361_v46  ;;  %11416 = vmatprep.mubr.msk.bf16.mxu1 %vm458_vm0, %v8563_v34  ;;  %v8434_v52 = vadd.f32 %v8402_v14, %v8362_v35  ;;  %v8075_v62 = vadd.f32 %v8043_v17, %v8003_v56  ;;  %v8259_v54 = vmul.f32 %v12448_v61, %v17976_v57  ;;  %v12453_v14 = vld [vmem:[#allocation3 + $0x18a] sm:$0xff]  ;;  %v12454_v35 = vld [vmem:[#allocation3 + $0x198] sm:$0xff] }
 0x656   : > { %v8076_v53 = vadd.f32 %v8044_v4, %v8004_v41  ;;  %v8260_v60 = vmul.f32 %v12449_v51, %v17976_v57  ;;  %v8331_v18 = vmul.f32 %v12450_v28, %v17989_v40  ;;  %v8332_v22 = vmul.f32 %v12451_v12, %v17989_v40  ;;  %v18125_v56 = vld [vmem:[%s19000_s4 + $0x2d] ss:$0 sm:$0xff] }
 0x657   : > { %v8473_v49 = vmul.f32 %v18050_v50, %v8433_v38  ;;  %v8474_v3 = vmul.f32 %v18050_v50, %v8434_v52  ;;  %v8147_v63 = vadd.f32 %v8115_v21, %v8075_v62  ;;  %v8403_v33 = vmul.f32 %v12452_v48, %v18003_v37  ;;  %v12455_v38 = vld [vmem:[#allocation3 + $0x1a0] sm:$0xff]  ;;  %v18133_v52 = vld [vmem:[%s19000_s4 + $0x2e] ss:$0 sm:$0xff] }
 0x658   : > { %v8148_v47 = vadd.f32 %v8116_v58, %v8076_v53  ;;  %v8404_v1 = vmul.f32 %v12453_v14, %v18003_v37  ;;  %v7829_v19 = vmul.f32 %v18039_v11, %v17918_v42  ;;  %v7830_v44 = vmul.f32 %v18043_v0, %v17918_v42  ;;  %v12456_v58 = vld [vmem:[#allocation3 + $0x199] sm:$0xff] }
 0x659   : > { %v8513_v10 = vadd.f32 %v18067_v32, %v8473_v49  ;;  %v8514_v30 = vadd.f32 %v18067_v32, %v8474_v3  ;;  %v8219_v29 = vadd.f32 %v8187_v27, %v8147_v63  ;;  %v7901_v2 = vmul.f32 %v18053_v39, %v17929_v5  ;;  %v12457_v27 = vld [vmem:[#allocation3 + $0x1a1] sm:$0xff] }
 0x65a   : > { %v8220_v43 = vadd.f32 %v8188_v13, %v8148_v47  ;;  %v7902_v9 = vmul.f32 %v18057_v20, %v17929_v5  ;;  %v7973_v45 = vmul.f32 %v12445_v31, %v17938_v7  ;;  %v7974_v36 = vmul.f32 %v12446_v23, %v17938_v7 }
 0x65b   : > { %v8545_v8 = vmax.f32 %v8513_v10, 0.0  ;;  %v8546_v16 = vmax.f32 %v8514_v30, 0.0  ;;  %v8291_v11 = vadd.f32 %v8259_v54, %v8219_v29  ;;  %v7933_v59 = vadd.f32 %v7901_v2, %v7829_v19  ;;  %v12458_v54 = vld [vmem:[#allocation3 + $0x19a] sm:$0xff]  ;;  %v12464_v19 = vld [vmem:[#allocation3 + $0x2] sm:$0xff]  ;;  %v12465_v30 = vld [vmem:[#allocation3 + $0xa] sm:$0xff] }
 0x65c   : > { %v8292_v24 = vadd.f32 %v8260_v60, %v8220_v43  ;;  %v7934_v42 = vadd.f32 %v7902_v9, %v7830_v44  ;;  %v8045_v0 = vmul.f32 %v12448_v61, %v17946_v55  ;;  %v8046_v6 = vmul.f32 %v12449_v51, %v17946_v55  ;;  %v18152_v10 = vld [vmem:[%s19000_s4 + $0x30] ss:$0 sm:$0xff] }
 0x65d   : > { %v8117_v15 = vmul.f32 %v12450_v28, %v17955_v26  ;;  %v8564_v39 = vpack.c.bf16 %v8546_v16, %v8545_v8  ;;  %v8363_v46 = vadd.f32 %v8331_v18, %v8291_v11  ;;  %v8005_v4 = vadd.f32 %v7973_v45, %v7933_v59  ;;  %v12460_v28 = vld [vmem:[#allocation3] sm:$0xff]  ;;  %v12466_v11 = vld [vmem:[#allocation3 + $0x18] sm:$0xff] }
 0x65e   : > { %v8364_v17 = vadd.f32 %v8332_v22, %v8292_v24  ;;  %v8006_v5 = vadd.f32 %v7974_v36, %v7934_v42  ;;  %v8118_v20 = vmul.f32 %v12451_v12, %v17955_v26  ;;  %v8189_v7 = vmul.f32 %v12452_v48, %v17964_v25  ;;  %v12461_v12 = vld [vmem:[#allocation3 + $0x8] sm:$0xff]  ;;  %v18160_v45 = vld [vmem:[%s19000_s4 + $0x31] ss:$0 sm:$0xff] }
 0x65f   : > { %v8190_v31 = vmul.f32 %v12453_v14, %v17964_v25  ;;  %11417 = vmatmul.mubr.msk.bf16.gmra.mrb[56].mxu1 %vm458_vm0, %v8564_v39  ;;  %v8435_v23 = vadd.f32 %v8403_v33, %v8363_v46  ;;  %v8077_v34 = vadd.f32 %v8045_v0, %v8005_v4  ;;  %v8261_v55 = vmul.f32 %v12454_v35, %v17976_v57  ;;  %v12462_v48 = vld [vmem:[#allocation3 + $0x1] sm:$0xff]  ;;  %v12463_v14 = vld [vmem:[#allocation3 + $0x9] sm:$0xff] }
 0x660   : > { %v8436_v21 = vadd.f32 %v8404_v1, %v8364_v17  ;;  %v8078_v41 = vadd.f32 %v8046_v6, %v8006_v5  ;;  %v8262_v26 = vmul.f32 %v12455_v38, %v17976_v57  ;;  %v8333_v25 = vmul.f32 %v12456_v58, %v17989_v40  ;;  %v18141_v57 = vld [vmem:[%s19000_s4 + $0x2f] ss:$0 sm:$0xff]  ;;  %v12467_v59 = vld [vmem:[#allocation3 + $0x20] sm:$0xff] }
 0x661   : > { %v8334_v13 = vmul.f32 %v12457_v27, %v17989_v40  ;;  %v8475_v62 = vmul.f32 %v18050_v50, %v8435_v23  ;;  %v8149_v61 = vadd.f32 %v8117_v15, %v8077_v34  ;;  %v8405_v49 = vmul.f32 %v12458_v54, %v18003_v37  ;;  %v12459_v40 = vld [vmem:[#allocation3 + $0x1a2] sm:$0xff]  ;;  %v12468_v5 = vld [vmem:[#allocation3 + $0x19] sm:$0xff]  ;;  %v18189_v27 = vld [vmem:[#allocation3 + $0x30] sm:$0xff] }
 0x662   : > { %v8476_v53 = vmul.f32 %v18050_v50, %v8436_v21  ;;  %v8150_v51 = vadd.f32 %v8118_v20, %v8078_v41  ;;  %v8406_v60 = vmul.f32 %v12459_v40, %v18003_v37  ;;  %v8833_v18 = vmul.f32 %v12460_v28, %v18125_v56  ;;  %v18167_v0 = vld [vmem:[%s19000_s4 + $0x32] ss:$0 sm:$0xff]  ;;  %v18172_v46 = vld [vmem:[%s19000_s4 + $0x33] ss:$0 sm:$0xff]  ;;  %v18179_v23 = vld [vmem:[%s19000_s4 + $0x34] ss:$0 sm:$0xff] }
 0x663   : > { %v8834_v22 = vmul.f32 %v12461_v12, %v18125_v56  ;;  %v8515_v3 = vadd.f32 %v18067_v32, %v8475_v62  ;;  %v8221_v47 = vadd.f32 %v8189_v7, %v8149_v61  ;;  %v8905_v33 = vmul.f32 %v12462_v48, %v18133_v52  ;;  %v12469_v7 = vld [vmem:[#allocation3 + $0x21] sm:$0xff]  ;;  %v18193_v62 = vld [vmem:[#allocation3 + $0x38] sm:$0xff] }
 0x664   : > { %v8516_v63 = vadd.f32 %v18067_v32, %v8476_v53  ;;  %v8222_v37 = vadd.f32 %v8190_v31, %v8150_v51  ;;  %v8906_v1 = vmul.f32 %v12463_v14, %v18133_v52  ;;  %v8977_v44 = vmul.f32 %v12464_v19, %v18141_v57  ;;  %v12470_v35 = vld [vmem:[#allocation3 + $0x1a] sm:$0xff]  ;;  %v12471_v41 = vld [vmem:[#allocation3 + $0x22] sm:$0xff]  ;;  %v12476_v12 = vld [vmem:[#allocation3 + $0x32] sm:$0xff] }
 0x665   : > { %v8978_v29 = vmul.f32 %v12465_v30, %v18141_v57  ;;  %v8547_v43 = vmax.f32 %v8515_v3, 0.0  ;;  %v8293_v8 = vadd.f32 %v8261_v55, %v8221_v47  ;;  %v8937_v9 = vadd.f32 %v8905_v33, %v8833_v18  ;;  %v18202_v40 = vld [vmem:[#allocation3 + $0x39] sm:$0xff] }
 0x666   : > { %v8548_v2 = vmax.f32 %v8516_v63, 0.0  ;;  %v8294_v36 = vadd.f32 %v8262_v26, %v8222_v37  ;;  %v8938_v16 = vadd.f32 %v8906_v1, %v8834_v22  ;;  %v9049_v24 = vmul.f32 %v12466_v11, %v18152_v10  ;;  %v18187_v26 = vld [vmem:[%s19000_s4 + $0x35] ss:$0 sm:$0xff]  ;;  %v12477_v30 = vld [vmem:[#allocation3 + $0x3a] sm:$0xff] }
 0x667   : > { %v9050_v42 = vmul.f32 %v12467_v59, %v18152_v10  ;;  %v8365_v15 = vadd.f32 %v8333_v25, %v8293_v8  ;;  %v9009_v39 = vadd.f32 %v8977_v44, %v8937_v9  ;;  %v9121_v20 = vmul.f32 %v12468_v5, %v18160_v45 }
 0x668   : > { %v8565_v6 = vpack.c.bf16 %v8548_v2, %v8547_v43  ;;  %v8366_v17 = vadd.f32 %v8334_v13, %v8294_v36  ;;  %v9010_v4 = vadd.f32 %v8978_v29, %v8938_v16  ;;  %v9122_v31 = vmul.f32 %v12469_v7, %v18160_v45 }
 0x669   : > { %v8437_v21 = vadd.f32 %v8405_v49, %v8365_v15  ;;  %v9081_v34 = vadd.f32 %v9049_v24, %v9009_v39  ;;  %v9193_v55 = vmul.f32 %v12470_v35, %v18167_v0  ;;  %v9194_v38 = vmul.f32 %v12471_v41, %v18167_v0  ;;  %v18198_v49 = vld [vmem:[#allocation3 + $0x31] sm:$0xff] }
 0x66a   : > { %11420 = vmatprep.mubr.msk.bf16.mxu1 %vm458_vm0, %v8565_v6  ;;  %v8438_v58 = vadd.f32 %v8406_v60, %v8366_v17  ;;  %v9082_v25 = vadd.f32 %v9050_v42, %v9010_v4  ;;  %v9265_v13 = vmul.f32 %v18189_v27, %v18172_v46  ;;  %v9266_v53 = vmul.f32 %v18193_v62, %v18172_v46  ;;  %v18224_v6 = vld [vmem:[%s19001_s5 + $0x5] ss:$0 sm:$0xff] }
 0x66b   : > { %v8477_v61 = vmul.f32 %v18050_v50, %v8437_v21  ;;  %v9153_v54 = vadd.f32 %v9121_v20, %v9081_v34  ;;  %v9337_v51 = vmul.f32 %v18198_v49, %v18179_v23  ;;  %v9338_v60 = vmul.f32 %v18202_v40, %v18179_v23 }
 0x66c   : > { %v8478_v28 = vmul.f32 %v18050_v50, %v8438_v58  ;;  %v9154_v18 = vadd.f32 %v9122_v31, %v9082_v25  ;;  %v9409_v22 = vmul.f32 %v12476_v12, %v18187_v26  ;;  %v8835_v3 = vmul.f32 %v12466_v11, %v18125_v56  ;;  %v18235_v31 = vld [vmem:[%s19002_s6 + $0x5] ss:$0 sm:$0xff] }
 0x66d   : > { %v8517_v63 = vadd.f32 %v18067_v32, %v8477_v61  ;;  %v9225_v47 = vadd.f32 %v9193_v55, %v9153_v54  ;;  %v8836_v48 = vmul.f32 %v12467_v59, %v18125_v56  ;;  %v8907_v33 = vmul.f32 %v12468_v5, %v18133_v52  ;;  %v12479_v58 = vld [vmem:[#allocation3 + $0x50] sm:$0xff] }
 0x66e   : > { %v8518_v37 = vadd.f32 %v18067_v32, %v8478_v28  ;;  %v9226_v14 = vadd.f32 %v9194_v38, %v9154_v18  ;;  %v8908_v1 = vmul.f32 %v12469_v7, %v18133_v52  ;;  %v8979_v50 = vmul.f32 %v12470_v35, %v18141_v57  ;;  %v18238_v35 = vld [vmem:[#allocation3 + $0x48] sm:$0xff] }
 0x66f   : > { %v8549_v19 = vmax.f32 %v8517_v63, 0.0  ;;  %v9297_v44 = vadd.f32 %v9265_v13, %v9225_v47  ;;  %v9410_v29 = vmul.f32 %v12477_v30, %v18187_v26  ;;  %v8939_v43 = vadd.f32 %v8907_v33, %v8835_v3  ;;  %v12480_v13 = vld [vmem:[#allocation3 + $0x49] sm:$0xff] }
 0x670   : > { %v8550_v2 = vmax.f32 %v8518_v37, 0.0  ;;  %v9298_v8 = vadd.f32 %v9266_v53, %v9226_v14  ;;  %v8940_v9 = vadd.f32 %v8908_v1, %v8836_v48  ;;  %v8980_v36 = vmul.f32 %v12471_v41, %v18141_v57  ;;  %v12482_v28 = vld [vmem:[#allocation3 + $0x4a] sm:$0xff] }
 0x671   : > { %v9369_v16 = vadd.f32 %v9337_v51, %v9297_v44  ;;  %v9011_v11 = vadd.f32 %v8979_v50, %v8939_v43  ;;  %v9051_v32 = vmul.f32 %v18189_v27, %v18152_v10  ;;  %v9052_v24 = vmul.f32 %v18193_v62, %v18152_v10  ;;  %v12481_v51 = vld [vmem:[#allocation3 + $0x51] sm:$0xff] }
 0x672   : > { %v8566_v59 = vpack.c.bf16 %v8550_v2, %v8549_v19  ;;  %v9370_v42 = vadd.f32 %v9338_v60, %v9298_v8  ;;  %v9012_v15 = vadd.f32 %v8980_v36, %v8940_v9  ;;  %v9123_v39 = vmul.f32 %v18198_v49, %v18160_v45  ;;  %v12483_v8 = vld [vmem:[#allocation3 + $0x52] sm:$0xff] }
 0x673   : > { %v9441_v17 = vadd.f32 %v9409_v22, %v9369_v16  ;;  %v9083_v4 = vadd.f32 %v9051_v32, %v9011_v11  ;;  %v9124_v5 = vmul.f32 %v18202_v40, %v18160_v45  ;;  %v9195_v20 = vmul.f32 %v12476_v12, %v18167_v0 }
 0x674   : > { %11421 = vmatmul.mubr.msk.bf16.gmra.mrb[60].mxu1 %vm458_vm0, %v8566_v59  ;;  %v9442_v7 = vadd.f32 %v9410_v29, %v9370_v42  ;;  %v9084_v21 = vadd.f32 %v9052_v24, %v9012_v15  ;;  %v9196_v34 = vmul.f32 %v12477_v30, %v18167_v0  ;;  %v9267_v55 = vmul.f32 %v18238_v35, %v18172_v46 }
 0x675   : > { %v9481_v41 = vmul.f32 %v18224_v6, %v9441_v17  ;;  %v9155_v38 = vadd.f32 %v9123_v39, %v9083_v4  ;;  %v9268_v25 = vmul.f32 %v12479_v58, %v18172_v46  ;;  %v9339_v53 = vmul.f32 %v12480_v13, %v18179_v23 }
 0x676   : > { %v9482_v61 = vmul.f32 %v18224_v6, %v9442_v7  ;;  %v9156_v54 = vadd.f32 %v9124_v5, %v9084_v21  ;;  %v9340_v60 = vmul.f32 %v12481_v51, %v18179_v23  ;;  %v9411_v18 = vmul.f32 %v12482_v28, %v18187_v26  ;;  %v12484_v5 = vld [vmem:[#allocation3 + $0x60] sm:$0xff]  ;;  %v12485_v7 = vld [vmem:[#allocation3 + $0x68] sm:$0xff] }
 0x677   : > { %v9521_v22 = vadd.f32 %v18235_v31, %v9481_v41  ;;  %v9227_v3 = vadd.f32 %v9195_v20, %v9155_v38  ;;  %v8837_v63 = vmul.f32 %v18189_v27, %v18125_v56  ;;  %v8838_v47 = vmul.f32 %v18193_v62, %v18125_v56 }
 0x678   : > { %v9522_v48 = vadd.f32 %v18235_v31, %v9482_v61  ;;  %v9228_v33 = vadd.f32 %v9196_v34, %v9156_v54  ;;  %v8909_v37 = vmul.f32 %v18198_v49, %v18133_v52  ;;  %v8910_v14 = vmul.f32 %v18202_v40, %v18133_v52  ;;  %v12486_v34 = vld [vmem:[#allocation3 + $0x61] sm:$0xff] }
 0x679   : > { %v9553_v1 = vmax.f32 %v9521_v22, 0.0  ;;  %v9299_v50 = vadd.f32 %v9267_v55, %v9227_v3  ;;  %v8981_v19 = vmul.f32 %v12476_v12, %v18141_v57  ;;  %v8982_v44 = vmul.f32 %v12477_v30, %v18141_v57 }
 0x67a   : > { %v9554_v29 = vmax.f32 %v9522_v48, 0.0  ;;  %v9300_v27 = vadd.f32 %v9268_v25, %v9228_v33  ;;  %v8941_v43 = vadd.f32 %v8909_v37, %v8837_v63  ;;  %v8942_v2 = vadd.f32 %v8910_v14, %v8838_v47  ;;  %v12489_v14 = vld [vmem:[#allocation3 + $0x6a] sm:$0xff] }
 0x67b   : > { %v9371_v62 = vadd.f32 %v9339_v53, %v9299_v50  ;;  %v9412_v9 = vmul.f32 %v12483_v8, %v18187_v26  ;;  %v9053_v49 = vmul.f32 %v18238_v35, %v18152_v10  ;;  %v9054_v36 = vmul.f32 %v12479_v58, %v18152_v10  ;;  %v12487_v53 = vld [vmem:[#allocation3 + $0x69] sm:$0xff] }
 0x67c   : > { %v9585_v40 = vpack.c.bf16 %v9554_v29, %v9553_v1  ;;  %v9372_v16 = vadd.f32 %v9340_v60, %v9300_v27  ;;  %v9013_v11 = vadd.f32 %v8981_v19, %v8941_v43  ;;  %v9014_v32 = vadd.f32 %v8982_v44, %v8942_v2  ;;  %v12488_v60 = vld [vmem:[#allocation3 + $0x62] sm:$0xff] }
 0x67d   : > { %v9443_v12 = vadd.f32 %v9411_v18, %v9371_v62  ;;  %v9125_v30 = vmul.f32 %v12480_v13, %v18160_v45  ;;  %v9126_v24 = vmul.f32 %v12481_v51, %v18160_v45  ;;  %v9197_v59 = vmul.f32 %v12482_v28, %v18167_v0 }
 0x67e   : > { %11428 = vmatprep.mubr.msk.bf16.mxu1 %vm458_vm0, %v9585_v40  ;;  %v9444_v42 = vadd.f32 %v9412_v9, %v9372_v16  ;;  %v9085_v15 = vadd.f32 %v9053_v49, %v9013_v11  ;;  %v9086_v39 = vadd.f32 %v9054_v36, %v9014_v32  ;;  %v9198_v17 = vmul.f32 %v12483_v8, %v18167_v0 }
 0x67f   : > { %v9483_v4 = vmul.f32 %v18224_v6, %v9443_v12  ;;  %v9269_v20 = vmul.f32 %v12484_v5, %v18172_v46  ;;  %v9270_v21 = vmul.f32 %v12485_v7, %v18172_v46  ;;  %v9341_v55 = vmul.f32 %v12486_v34, %v18179_v23 }
 0x680   : > { %v9484_v41 = vmul.f32 %v18224_v6, %v9444_v42  ;;  %v9157_v38 = vadd.f32 %v9125_v30, %v9085_v15  ;;  %v9158_v25 = vadd.f32 %v9126_v24, %v9086_v39  ;;  %v9342_v61 = vmul.f32 %v12487_v53, %v18179_v23  ;;  %v12490_v24 = vld [vmem:[#allocation3 + $0x78] sm:$0xff]  ;;  %v18294_v42 = vld [vmem:[#allocation3 + $0x80] sm:$0xff] }
 0x681   : > { %v9523_v54 = vadd.f32 %v18235_v31, %v9483_v4  ;;  %v9413_v18 = vmul.f32 %v12488_v60, %v18187_v26  ;;  %v8839_v22 = vmul.f32 %v18238_v35, %v18125_v56  ;;  %v8840_v3 = vmul.f32 %v12479_v58, %v18125_v56  ;;  %v12492_v39 = vld [vmem:[#allocation3 + $0x79] sm:$0xff] }
 0x682   : > { %v9524_v63 = vadd.f32 %v18235_v31, %v9484_v41  ;;  %v9229_v47 = vadd.f32 %v9197_v59, %v9157_v38  ;;  %v9230_v48 = vadd.f32 %v9198_v17, %v9158_v25  ;;  %v8911_v33 = vmul.f32 %v12480_v13, %v18133_v52  ;;  %v12494_v25 = vld [vmem:[#allocation3 + $0x7a] sm:$0xff] }
 0x683   : > { %v9555_v37 = vmax.f32 %v9523_v54, 0.0  ;;  %v9414_v1 = vmul.f32 %v12489_v14, %v18187_v26  ;;  %v8912_v50 = vmul.f32 %v12481_v51, %v18133_v52  ;;  %v8983_v19 = vmul.f32 %v12482_v28, %v18141_v57 }
 0x684   : > { %v9556_v44 = vmax.f32 %v9524_v63, 0.0  ;;  %v9301_v29 = vadd.f32 %v9269_v20, %v9229_v47  ;;  %v9302_v27 = vadd.f32 %v9270_v21, %v9230_v48  ;;  %v8943_v35 = vadd.f32 %v8911_v33, %v8839_v22 }
 0x685   : > { %v8944_v43 = vadd.f32 %v8912_v50, %v8840_v3  ;;  %v8984_v58 = vmul.f32 %v12483_v8, %v18141_v57  ;;  %v9055_v2 = vmul.f32 %v12484_v5, %v18152_v10  ;;  %v9056_v62 = vmul.f32 %v12485_v7, %v18152_v10 }
 0x686   : > { %v9586_v13 = vpack.c.bf16 %v9556_v44, %v9555_v37  ;;  %v9373_v9 = vadd.f32 %v9341_v55, %v9301_v29  ;;  %v9374_v49 = vadd.f32 %v9342_v61, %v9302_v27  ;;  %v9015_v36 = vadd.f32 %v8983_v19, %v8943_v35  ;;  %v12493_v55 = vld [vmem:[#allocation3 + $0x81] sm:$0xff] }
 0x687   : > { %v9016_v40 = vadd.f32 %v8984_v58, %v8944_v43  ;;  %v9127_v51 = vmul.f32 %v12486_v34, %v18160_v45  ;;  %v9128_v28 = vmul.f32 %v12487_v53, %v18160_v45  ;;  %v9199_v16 = vmul.f32 %v12488_v60, %v18167_v0  ;;  %v12495_v58 = vld [vmem:[#allocation3 + $0x82] sm:$0xff] }
 0x688   : > { %11429 = vmatmul.mubr.msk.bf16.vlgmr.msra.gmra.mrb[32].mxu1 %vm458_vm0, %v9586_v13  ;;  %v9445_v11 = vadd.f32 %v9413_v18, %v9373_v9  ;;  %v9446_v32 = vadd.f32 %v9414_v1, %v9374_v49  ;;  %v9087_v8 = vadd.f32 %v9055_v2, %v9015_v36  ;;  %v9200_v12 = vmul.f32 %v12489_v14, %v18167_v0 }
 0x689   : > { %v9088_v30 = vadd.f32 %v9056_v62, %v9016_v40  ;;  %v9271_v59 = vmul.f32 %v12490_v24, %v18172_v46  ;;  %v9272_v15 = vmul.f32 %v18294_v42, %v18172_v46  ;;  %v9343_v17 = vmul.f32 %v12492_v39, %v18179_v23 }
 0x68a   : > { %v9485_v4 = vmul.f32 %v18224_v6, %v9445_v11  ;;  %v9486_v20 = vmul.f32 %v18224_v6, %v9446_v32  ;;  %v9159_v21 = vadd.f32 %v9127_v51, %v9087_v8  ;;  %v9344_v41 = vmul.f32 %v12493_v55, %v18179_v23  ;;  %v18324_v32 = vld [vmem:[#allocation3 + $0x98] sm:$0xff] }
 0x68b   : > { %v9160_v38 = vadd.f32 %v9128_v28, %v9088_v30  ;;  %v9415_v61 = vmul.f32 %v12494_v25, %v18187_v26  ;;  %v8841_v54 = vmul.f32 %v12484_v5, %v18125_v56  ;;  %v8842_v18 = vmul.f32 %v12485_v7, %v18125_v56 }
 0x68c   : > { %v9525_v22 = vadd.f32 %v18235_v31, %v9485_v4  ;;  %v9526_v3 = vadd.f32 %v18235_v31, %v9486_v20  ;;  %v9231_v63 = vadd.f32 %v9199_v16, %v9159_v21  ;;  %v8913_v47 = vmul.f32 %v12486_v34, %v18133_v52  ;;  %v18320_v16 = vld [vmem:[#allocation3 + $0x90] sm:$0xff] }
 0x68d   : > { %v9232_v48 = vadd.f32 %v9200_v12, %v9160_v38  ;;  %v8914_v33 = vmul.f32 %v12487_v53, %v18133_v52  ;;  %v8985_v37 = vmul.f32 %v12488_v60, %v18141_v57  ;;  %v8986_v1 = vmul.f32 %v12489_v14, %v18141_v57 }
 0x68e   : > { %v9557_v50 = vmax.f32 %v9525_v22, 0.0  ;;  %v9558_v19 = vmax.f32 %v9526_v3, 0.0  ;;  %v9303_v44 = vadd.f32 %v9271_v59, %v9231_v63  ;;  %v8945_v5 = vadd.f32 %v8913_v47, %v8841_v54  ;;  %v12498_v59 = vld [vmem:[#allocation3 + $0x91] sm:$0xff] }
 0x68f   : > { %v9304_v29 = vadd.f32 %v9272_v15, %v9232_v48  ;;  %v8946_v7 = vadd.f32 %v8914_v33, %v8842_v18  ;;  %v9057_v27 = vmul.f32 %v12490_v24, %v18152_v10  ;;  %v9058_v35 = vmul.f32 %v18294_v42, %v18152_v10 }
 0x690   : > { %v9587_v43 = vpack.c.bf16 %v9558_v19, %v9557_v50  ;;  %v9375_v34 = vadd.f32 %v9343_v17, %v9303_v44  ;;  %v9416_v53 = vmul.f32 %v12495_v58, %v18187_v26  ;;  %v9017_v2 = vadd.f32 %v8985_v37, %v8945_v5  ;;  %v12499_v17 = vld [vmem:[#allocation3 + $0x99] sm:$0xff] }
 0x691   : > { %v9376_v60 = vadd.f32 %v9344_v41, %v9304_v29  ;;  %v9018_v62 = vadd.f32 %v8986_v1, %v8946_v7  ;;  %v9129_v14 = vmul.f32 %v12492_v39, %v18160_v45  ;;  %v9130_v13 = vmul.f32 %v12493_v55, %v18160_v45  ;;  %v12500_v41 = vld [vmem:[#allocation3 + $0x92] sm:$0xff]  ;;  %v12501_v50 = vld [vmem:[#allocation3 + $0x9a] sm:$0xff] }
 0x692   : > { %11432 = vmatprep.mubr.msk.bf16.mxu1 %vm458_vm0, %v9587_v43  ;;  %v9447_v9 = vadd.f32 %v9415_v61, %v9375_v34  ;;  %v9089_v49 = vadd.f32 %v9057_v27, %v9017_v2  ;;  %v9201_v36 = vmul.f32 %v12494_v25, %v18167_v0  ;;  %v9202_v40 = vmul.f32 %v12495_v58, %v18167_v0 }
 0x693   : > { %v9448_v51 = vadd.f32 %v9416_v53, %v9376_v60  ;;  %v9090_v28 = vadd.f32 %v9058_v35, %v9018_v62  ;;  %v9273_v11 = vmul.f32 %v18320_v16, %v18172_v46  ;;  %v9274_v8 = vmul.f32 %v18324_v32, %v18172_v46 }
 0x694   : > { %v9487_v12 = vmul.f32 %v18224_v6, %v9447_v9  ;;  %v9161_v30 = vadd.f32 %v9129_v14, %v9089_v49  ;;  %v9345_v15 = vmul.f32 %v12498_v59, %v18179_v23  ;;  %v9346_v4 = vmul.f32 %v12499_v17, %v18179_v23  ;;  %v18352_v9 = vld [vmem:[#allocation3 + $0xa8] sm:$0xff] }
 0x695   : > { %v9488_v20 = vmul.f32 %v18224_v6, %v9448_v51  ;;  %v9162_v21 = vadd.f32 %v9130_v13, %v9090_v28  ;;  %v9417_v38 = vmul.f32 %v12500_v41, %v18187_v26  ;;  %v8843_v61 = vmul.f32 %v12490_v24, %v18125_v56  ;;  %v12503_v51 = vld [vmem:[#allocation3 + $0xb0] sm:$0xff] }
 0x696   : > { %v9527_v54 = vadd.f32 %v18235_v31, %v9487_v12  ;;  %v9233_v18 = vadd.f32 %v9201_v36, %v9161_v30  ;;  %v8844_v22 = vmul.f32 %v18294_v42, %v18125_v56  ;;  %v8915_v3 = vmul.f32 %v12492_v39, %v18133_v52 }
 0x697   : > { %v9528_v63 = vadd.f32 %v18235_v31, %v9488_v20  ;;  %v9234_v47 = vadd.f32 %v9202_v40, %v9162_v21  ;;  %v8916_v48 = vmul.f32 %v12493_v55, %v18133_v52  ;;  %v8987_v33 = vmul.f32 %v12494_v25, %v18141_v57  ;;  %v12506_v20 = vld [vmem:[#allocation3 + $0xaa] sm:$0xff] }
 0x698   : > { %v9559_v37 = vmax.f32 %v9527_v54, 0.0  ;;  %v9305_v1 = vadd.f32 %v9273_v11, %v9233_v18  ;;  %v9418_v24 = vmul.f32 %v12501_v50, %v18187_v26  ;;  %v8947_v19 = vadd.f32 %v8915_v3, %v8843_v61  ;;  %v12504_v11 = vld [vmem:[#allocation3 + $0xa9] sm:$0xff] }
 0x699   : > { %v9560_v44 = vmax.f32 %v9528_v63, 0.0  ;;  %v9306_v5 = vadd.f32 %v9274_v8, %v9234_v47  ;;  %v8948_v29 = vadd.f32 %v8916_v48, %v8844_v22  ;;  %v8988_v42 = vmul.f32 %v12495_v58, %v18141_v57 }
 0x69a   : > { %v9377_v7 = vadd.f32 %v9345_v15, %v9305_v1  ;;  %v9019_v39 = vadd.f32 %v8987_v33, %v8947_v19  ;;  %v9059_v27 = vmul.f32 %v18320_v16, %v18152_v10  ;;  %v9060_v55 = vmul.f32 %v18324_v32, %v18152_v10  ;;  %v12505_v15 = vld [vmem:[#allocation3 + $0xb1] sm:$0xff] }
 0x69b   : > { %v9588_v25 = vpack.c.bf16 %v9560_v44, %v9559_v37  ;;  %v9378_v35 = vadd.f32 %v9346_v4, %v9306_v5  ;;  %v9020_v43 = vadd.f32 %v8988_v42, %v8948_v29  ;;  %v9131_v34 = vmul.f32 %v12498_v59, %v18160_v45  ;;  %v12507_v29 = vld [vmem:[#allocation3 + $0xb2] sm:$0xff] }
 0x69c   : > { %v9449_v53 = vadd.f32 %v9417_v38, %v9377_v7  ;;  %v9091_v2 = vadd.f32 %v9059_v27, %v9019_v39  ;;  %v9132_v60 = vmul.f32 %v12499_v17, %v18160_v45  ;;  %v9203_v62 = vmul.f32 %v12500_v41, %v18167_v0 }
 0x69d   : > { %11433 = vmatmul.mubr.msk.bf16.gmra.mrb[36].mxu1 %vm458_vm0, %v9588_v25  ;;  %v9450_v58 = vadd.f32 %v9418_v24, %v9378_v35  ;;  %v9092_v14 = vadd.f32 %v9060_v55, %v9020_v43  ;;  %v9204_v13 = vmul.f32 %v12501_v50, %v18167_v0  ;;  %v9275_v49 = vmul.f32 %v18352_v9, %v18172_v46 }
 0x69e   : > { %v9489_v36 = vmul.f32 %v18224_v6, %v9449_v53  ;;  %v9163_v40 = vadd.f32 %v9131_v34, %v9091_v2  ;;  %v9276_v28 = vmul.f32 %v12503_v51, %v18172_v46  ;;  %v9347_v8 = vmul.f32 %v12504_v11, %v18179_v23 }
 0x69f   : > { %v9490_v12 = vmul.f32 %v18224_v6, %v9450_v58  ;;  %v9164_v30 = vadd.f32 %v9132_v60, %v9092_v14  ;;  %v9348_v4 = vmul.f32 %v12505_v15, %v18179_v23  ;;  %v9419_v21 = vmul.f32 %v12506_v20, %v18187_v26  ;;  %v12508_v60 = vld [vmem:[#allocation3 + $0xc0] sm:$0xff]  ;;  %v12509_v58 = vld [vmem:[#allocation3 + $0xc8] sm:$0xff] }
 0x6a0   : > { %v9529_v38 = vadd.f32 %v18235_v31, %v9489_v36  ;;  %v9235_v61 = vadd.f32 %v9203_v62, %v9163_v40  ;;  %v8845_v54 = vmul.f32 %v18320_v16, %v18125_v56  ;;  %v8846_v18 = vmul.f32 %v18324_v32, %v18125_v56 }
 0x6a1   : > { %v9530_v22 = vadd.f32 %v18235_v31, %v9490_v12  ;;  %v9236_v3 = vadd.f32 %v9204_v13, %v9164_v30  ;;  %v8917_v63 = vmul.f32 %v12498_v59, %v18133_v52  ;;  %v8918_v47 = vmul.f32 %v12499_v17, %v18133_v52  ;;  %v12510_v13 = vld [vmem:[#allocation3 + $0xc1] sm:$0xff] }
 0x6a2   : > { %v9561_v48 = vmax.f32 %v9529_v38, 0.0  ;;  %v9307_v33 = vadd.f32 %v9275_v49, %v9235_v61  ;;  %v8989_v37 = vmul.f32 %v12500_v41, %v18141_v57  ;;  %v8990_v1 = vmul.f32 %v12501_v50, %v18141_v57 }
 0x6a3   : > { %v9562_v24 = vmax.f32 %v9530_v22, 0.0  ;;  %v9308_v19 = vadd.f32 %v9276_v28, %v9236_v3  ;;  %v8949_v44 = vadd.f32 %v8917_v63, %v8845_v54  ;;  %v8950_v16 = vadd.f32 %v8918_v47, %v8846_v18  ;;  %v12513_v47 = vld [vmem:[#allocation3 + $0xca] sm:$0xff] }
 0x6a4   : > { %v9379_v5 = vadd.f32 %v9347_v8, %v9307_v33  ;;  %v9420_v32 = vmul.f32 %v12507_v29, %v18187_v26  ;;  %v9061_v42 = vmul.f32 %v18352_v9, %v18152_v10  ;;  %v9062_v59 = vmul.f32 %v12503_v51, %v18152_v10  ;;  %v12511_v8 = vld [vmem:[#allocation3 + $0xc9] sm:$0xff] }
 0x6a5   : > { %v9589_v17 = vpack.c.bf16 %v9562_v24, %v9561_v48  ;;  %v9380_v7 = vadd.f32 %v9348_v4, %v9308_v19  ;;  %v9021_v39 = vadd.f32 %v8989_v37, %v8949_v44  ;;  %v9022_v27 = vadd.f32 %v8990_v1, %v8950_v16  ;;  %v12512_v4 = vld [vmem:[#allocation3 + $0xc2] sm:$0xff] }
 0x6a6   : > { %v9451_v41 = vadd.f32 %v9419_v21, %v9379_v5  ;;  %v9133_v50 = vmul.f32 %v12504_v11, %v18160_v45  ;;  %v9134_v55 = vmul.f32 %v12505_v15, %v18160_v45  ;;  %v9205_v25 = vmul.f32 %v12506_v20, %v18167_v0 }
 0x6a7   : > { %11436 = vmatprep.mubr.msk.bf16.mxu1 %vm458_vm0, %v9589_v17  ;;  %v9452_v35 = vadd.f32 %v9420_v32, %v9380_v7  ;;  %v9093_v43 = vadd.f32 %v9061_v42, %v9021_v39  ;;  %v9094_v34 = vadd.f32 %v9062_v59, %v9022_v27  ;;  %v9206_v53 = vmul.f32 %v12507_v29, %v18167_v0 }
 0x6a8   : > { %v9491_v2 = vmul.f32 %v18224_v6, %v9451_v41  ;;  %v9277_v62 = vmul.f32 %v12508_v60, %v18172_v46  ;;  %v9278_v14 = vmul.f32 %v12509_v58, %v18172_v46  ;;  %v9349_v49 = vmul.f32 %v12510_v13, %v18179_v23 }
 0x6a9   : > { %v9492_v36 = vmul.f32 %v18224_v6, %v9452_v35  ;;  %v9165_v40 = vadd.f32 %v9133_v50, %v9093_v43  ;;  %v9166_v28 = vadd.f32 %v9134_v55, %v9094_v34  ;;  %v9350_v12 = vmul.f32 %v12511_v8, %v18179_v23  ;;  %v12514_v55 = vld [vmem:[#allocation3 + $0xd8] sm:$0xff]  ;;  %v18406_v35 = vld [vmem:[#allocation3 + $0xe0] sm:$0xff] }
 0x6aa   : > { %v9531_v30 = vadd.f32 %v18235_v31, %v9491_v2  ;;  %v9421_v21 = vmul.f32 %v12512_v4, %v18187_v26  ;;  %v8847_v38 = vmul.f32 %v18352_v9, %v18125_v56  ;;  %v8848_v61 = vmul.f32 %v12503_v51, %v18125_v56  ;;  %v12516_v34 = vld [vmem:[#allocation3 + $0xd9] sm:$0xff] }
 0x6ab   : > { %v9532_v54 = vadd.f32 %v18235_v31, %v9492_v36  ;;  %v9237_v18 = vadd.f32 %v9205_v25, %v9165_v40  ;;  %v9238_v22 = vadd.f32 %v9206_v53, %v9166_v28  ;;  %v8919_v3 = vmul.f32 %v12504_v11, %v18133_v52  ;;  %v12518_v28 = vld [vmem:[#allocation3 + $0xda] sm:$0xff] }
 0x6ac   : > { %v9563_v63 = vmax.f32 %v9531_v30, 0.0  ;;  %v9422_v48 = vmul.f32 %v12513_v47, %v18187_v26  ;;  %v8920_v33 = vmul.f32 %v12505_v15, %v18133_v52  ;;  %v8991_v37 = vmul.f32 %v12506_v20, %v18141_v57 }
 0x6ad   : > { %v9564_v1 = vmax.f32 %v9532_v54, 0.0  ;;  %v9309_v24 = vadd.f32 %v9277_v62, %v9237_v18  ;;  %v9310_v19 = vadd.f32 %v9278_v14, %v9238_v22  ;;  %v8951_v9 = vadd.f32 %v8919_v3, %v8847_v38 }
 0x6ae   : > { %v8952_v44 = vadd.f32 %v8920_v33, %v8848_v61  ;;  %v8992_v51 = vmul.f32 %v12507_v29, %v18141_v57  ;;  %v9063_v16 = vmul.f32 %v12508_v60, %v18152_v10  ;;  %v9064_v5 = vmul.f32 %v12509_v58, %v18152_v10 }
 0x6af   : > { %v9590_v11 = vpack.c.bf16 %v9564_v1, %v9563_v63  ;;  %v9381_v32 = vadd.f32 %v9349_v49, %v9309_v24  ;;  %v9382_v42 = vadd.f32 %v9350_v12, %v9310_v19  ;;  %v9023_v59 = vadd.f32 %v8991_v37, %v8951_v9  ;;  %v12517_v49 = vld [vmem:[#allocation3 + $0xe1] sm:$0xff] }
 0x6b0   : > { %v9024_v17 = vadd.f32 %v8992_v51, %v8952_v44  ;;  %v9135_v15 = vmul.f32 %v12510_v13, %v18160_v45  ;;  %v9136_v20 = vmul.f32 %v12511_v8, %v18160_v45  ;;  %v9207_v7 = vmul.f32 %v12512_v4, %v18167_v0  ;;  %v12519_v51 = vld [vmem:[#allocation3 + $0xe2] sm:$0xff] }
 0x6b1   : > { %11437 = vmatmul.mubr.msk.bf16.gmra.mrb[40].mxu1 %vm458_vm0, %v9590_v11  ;;  %v9453_v39 = vadd.f32 %v9421_v21, %v9381_v32  ;;  %v9454_v27 = vadd.f32 %v9422_v48, %v9382_v42  ;;  %v9095_v29 = vadd.f32 %v9063_v16, %v9023_v59  ;;  %v9208_v41 = vmul.f32 %v12513_v47, %v18167_v0 }
 0x6b2   : > { %v9096_v50 = vadd.f32 %v9064_v5, %v9024_v17  ;;  %v9279_v25 = vmul.f32 %v12514_v55, %v18172_v46  ;;  %v9280_v43 = vmul.f32 %v18406_v35, %v18172_v46  ;;  %v9351_v53 = vmul.f32 %v12516_v34, %v18179_v23 }
 0x6b3   : > { %v9493_v2 = vmul.f32 %v18224_v6, %v9453_v39  ;;  %v9494_v62 = vmul.f32 %v18224_v6, %v9454_v27  ;;  %v9167_v14 = vadd.f32 %v9135_v15, %v9095_v29  ;;  %v9352_v36 = vmul.f32 %v12517_v49, %v18179_v23  ;;  %v18436_v27 = vld [vmem:[#allocation3 + $0xf8] sm:$0xff] }
 0x6b4   : > { %v9168_v40 = vadd.f32 %v9136_v20, %v9096_v50  ;;  %v9423_v12 = vmul.f32 %v12518_v28, %v18187_v26  ;;  %v8849_v30 = vmul.f32 %v12508_v60, %v18125_v56  ;;  %v8850_v21 = vmul.f32 %v12509_v58, %v18125_v56 }
 0x6b5   : > { %v9533_v38 = vadd.f32 %v18235_v31, %v9493_v2  ;;  %v9534_v61 = vadd.f32 %v18235_v31, %v9494_v62  ;;  %v9239_v54 = vadd.f32 %v9207_v7, %v9167_v14  ;;  %v8921_v18 = vmul.f32 %v12510_v13, %v18133_v52  ;;  %v18432_v7 = vld [vmem:[#allocation3 + $0xf0] sm:$0xff] }
 0x6b6   : > { %v9240_v22 = vadd.f32 %v9208_v41, %v9168_v40  ;;  %v8922_v3 = vmul.f32 %v12511_v8, %v18133_v52  ;;  %v8993_v63 = vmul.f32 %v12512_v4, %v18141_v57  ;;  %v8994_v48 = vmul.f32 %v12513_v47, %v18141_v57 }
 0x6b7   : > { %v9565_v33 = vmax.f32 %v9533_v38, 0.0  ;;  %v9566_v37 = vmax.f32 %v9534_v61, 0.0  ;;  %v9311_v1 = vadd.f32 %v9279_v25, %v9239_v54  ;;  %v8953_v60 = vadd.f32 %v8921_v18, %v8849_v30  ;;  %v12522_v25 = vld [vmem:[#allocation3 + $0xf1] sm:$0xff] }
 0x6b8   : > { %v9312_v24 = vadd.f32 %v9280_v43, %v9240_v22  ;;  %v8954_v58 = vadd.f32 %v8922_v3, %v8850_v21  ;;  %v9065_v19 = vmul.f32 %v12514_v55, %v18152_v10  ;;  %v9066_v9 = vmul.f32 %v18406_v35, %v18152_v10 }
 0x6b9   : > { %v9591_v44 = vpack.c.bf16 %v9566_v37, %v9565_v33  ;;  %v9383_v13 = vadd.f32 %v9351_v53, %v9311_v1  ;;  %v9424_v8 = vmul.f32 %v12519_v51, %v18187_v26  ;;  %v9025_v16 = vadd.f32 %v8993_v63, %v8953_v60  ;;  %v12523_v53 = vld [vmem:[#allocation3 + $0xf9] sm:$0xff] }
 0x6ba   : > { %v9384_v4 = vadd.f32 %v9352_v36, %v9312_v24  ;;  %v9026_v5 = vadd.f32 %v8994_v48, %v8954_v58  ;;  %v9137_v47 = vmul.f32 %v12516_v34, %v18160_v45  ;;  %v9138_v11 = vmul.f32 %v12517_v49, %v18160_v45  ;;  %v12524_v36 = vld [vmem:[#allocation3 + $0xf2] sm:$0xff]  ;;  %v12525_v33 = vld [vmem:[#allocation3 + $0xfa] sm:$0xff] }
 0x6bb   : > { %11440 = vmatprep.mubr.msk.bf16.mxu1 %vm458_vm0, %v9591_v44  ;;  %v9455_v32 = vadd.f32 %v9423_v12, %v9383_v13  ;;  %v9097_v42 = vadd.f32 %v9065_v19, %v9025_v16  ;;  %v9209_v59 = vmul.f32 %v12518_v28, %v18167_v0  ;;  %v9210_v17 = vmul.f32 %v12519_v51, %v18167_v0 }
 0x6bc   : > { %v9456_v15 = vadd.f32 %v9424_v8, %v9384_v4  ;;  %v9098_v20 = vadd.f32 %v9066_v9, %v9026_v5  ;;  %v9281_v39 = vmul.f32 %v18432_v7, %v18172_v46  ;;  %v9282_v29 = vmul.f32 %v18436_v27, %v18172_v46 }
 0x6bd   : > { %v9495_v41 = vmul.f32 %v18224_v6, %v9455_v32  ;;  %v9169_v50 = vadd.f32 %v9137_v47, %v9097_v42  ;;  %v9353_v43 = vmul.f32 %v12522_v25, %v18179_v23  ;;  %v9354_v2 = vmul.f32 %v12523_v53, %v18179_v23  ;;  %v18464_v32 = vld [vmem:[#allocation3 + $0x108] sm:$0xff] }
 0x6be   : > { %v9496_v62 = vmul.f32 %v18224_v6, %v9456_v15  ;;  %v9170_v14 = vadd.f32 %v9138_v11, %v9098_v20  ;;  %v9425_v40 = vmul.f32 %v12524_v36, %v18187_v26  ;;  %v8851_v12 = vmul.f32 %v12514_v55, %v18125_v56  ;;  %v12527_v15 = vld [vmem:[#allocation3 + $0x110] sm:$0xff] }
 0x6bf   : > { %v9535_v30 = vadd.f32 %v18235_v31, %v9495_v41  ;;  %v9241_v21 = vadd.f32 %v9209_v59, %v9169_v50  ;;  %v8852_v38 = vmul.f32 %v18406_v35, %v18125_v56  ;;  %v8923_v61 = vmul.f32 %v12516_v34, %v18133_v52 }
 0x6c0   : > { %v9536_v54 = vadd.f32 %v18235_v31, %v9496_v62  ;;  %v9242_v18 = vadd.f32 %v9210_v17, %v9170_v14  ;;  %v8924_v22 = vmul.f32 %v12517_v49, %v18133_v52  ;;  %v8995_v3 = vmul.f32 %v12518_v28, %v18141_v57  ;;  %v12530_v62 = vld [vmem:[#allocation3 + $0x10a] sm:$0xff] }
 0x6c1   : > { %v9567_v63 = vmax.f32 %v9535_v30, 0.0  ;;  %v9313_v48 = vadd.f32 %v9281_v39, %v9241_v21  ;;  %v9426_v55 = vmul.f32 %v12525_v33, %v18187_v26  ;;  %v8955_v37 = vadd.f32 %v8923_v61, %v8851_v12  ;;  %v12528_v39 = vld [vmem:[#allocation3 + $0x109] sm:$0xff] }
 0x6c2   : > { %v9568_v1 = vmax.f32 %v9536_v54, 0.0  ;;  %v9314_v60 = vadd.f32 %v9282_v29, %v9242_v18  ;;  %v8956_v24 = vadd.f32 %v8924_v22, %v8852_v38  ;;  %v8996_v35 = vmul.f32 %v12519_v51, %v18141_v57 }
 0x6c3   : > { %v9385_v58 = vadd.f32 %v9353_v43, %v9313_v48  ;;  %v9027_v34 = vadd.f32 %v8995_v3, %v8955_v37  ;;  %v9067_v19 = vmul.f32 %v18432_v7, %v18152_v10  ;;  %v9068_v49 = vmul.f32 %v18436_v27, %v18152_v10  ;;  %v12529_v43 = vld [vmem:[#allocation3 + $0x111] sm:$0xff] }
 0x6c4   : > { %v9592_v28 = vpack.c.bf16 %v9568_v1, %v9567_v63  ;;  %v9386_v9 = vadd.f32 %v9354_v2, %v9314_v60  ;;  %v9028_v44 = vadd.f32 %v8996_v35, %v8956_v24  ;;  %v9139_v13 = vmul.f32 %v12522_v25, %v18160_v45  ;;  %v12531_v24 = vld [vmem:[#allocation3 + $0x112] sm:$0xff] }
 0x6c5   : > { %v9457_v8 = vadd.f32 %v9425_v40, %v9385_v58  ;;  %v9099_v16 = vadd.f32 %v9067_v19, %v9027_v34  ;;  %v9140_v4 = vmul.f32 %v12523_v53, %v18160_v45  ;;  %v9211_v5 = vmul.f32 %v12524_v36, %v18167_v0 }
 0x6c6   : > { %11441 = vmatmul.mubr.msk.bf16.gmra.mrb[44].mxu1 %vm458_vm0, %v9592_v28  ;;  %v9458_v51 = vadd.f32 %v9426_v55, %v9386_v9  ;;  %v9100_v47 = vadd.f32 %v9068_v49, %v9028_v44  ;;  %v9212_v11 = vmul.f32 %v12525_v33, %v18167_v0  ;;  %v9283_v42 = vmul.f32 %v18464_v32, %v18172_v46 }
 0x6c7   : > { %v9497_v59 = vmul.f32 %v18224_v6, %v9457_v8  ;;  %v9171_v17 = vadd.f32 %v9139_v13, %v9099_v16  ;;  %v9284_v20 = vmul.f32 %v12527_v15, %v18172_v46  ;;  %v9355_v29 = vmul.f32 %v12528_v39, %v18179_v23 }
 0x6c8   : > { %v9498_v41 = vmul.f32 %v18224_v6, %v9458_v51  ;;  %v9172_v50 = vadd.f32 %v9140_v4, %v9100_v47  ;;  %v9356_v2 = vmul.f32 %v12529_v43, %v18179_v23  ;;  %v9427_v14 = vmul.f32 %v12530_v62, %v18187_v26  ;;  %v12532_v4 = vld [vmem:[#allocation3 + $0x120] sm:$0xff]  ;;  %v12533_v51 = vld [vmem:[#allocation3 + $0x128] sm:$0xff] }
 0x6c9   : > { %v9537_v40 = vadd.f32 %v18235_v31, %v9497_v59  ;;  %v9243_v12 = vadd.f32 %v9211_v5, %v9171_v17  ;;  %v8853_v30 = vmul.f32 %v18432_v7, %v18125_v56  ;;  %v8854_v21 = vmul.f32 %v18436_v27, %v18125_v56 }
 0x6ca   : > { %v9538_v38 = vadd.f32 %v18235_v31, %v9498_v41  ;;  %v9244_v61 = vadd.f32 %v9212_v11, %v9172_v50  ;;  %v8925_v54 = vmul.f32 %v12522_v25, %v18133_v52  ;;  %v8926_v18 = vmul.f32 %v12523_v53, %v18133_v52  ;;  %v18496_v11 = vld [vmem:[#allocation3 + $0x121] sm:$0xff] }
 0x6cb   : > { %v9569_v22 = vmax.f32 %v9537_v40, 0.0  ;;  %v9315_v3 = vadd.f32 %v9283_v42, %v9243_v12  ;;  %v8997_v63 = vmul.f32 %v12524_v36, %v18141_v57  ;;  %v8998_v48 = vmul.f32 %v12525_v33, %v18141_v57 }
 0x6cc   : > { %v9570_v55 = vmax.f32 %v9538_v38, 0.0  ;;  %v9316_v37 = vadd.f32 %v9284_v20, %v9244_v61  ;;  %v8957_v1 = vadd.f32 %v8925_v54, %v8853_v30  ;;  %v8958_v7 = vadd.f32 %v8926_v18, %v8854_v21  ;;  %v12537_v18 = vld [vmem:[#allocation3 + $0x12a] sm:$0xff] }
 0x6cd   : > { %v9387_v60 = vadd.f32 %v9355_v29, %v9315_v3  ;;  %v9428_v27 = vmul.f32 %v12531_v24, %v18187_v26  ;;  %v9069_v35 = vmul.f32 %v18464_v32, %v18152_v10  ;;  %v9070_v25 = vmul.f32 %v12527_v15, %v18152_v10  ;;  %v12535_v29 = vld [vmem:[#allocation3 + $0x129] sm:$0xff] }
 0x6ce   : > { %v9593_v53 = vpack.c.bf16 %v9570_v55, %v9569_v22  ;;  %v9388_v58 = vadd.f32 %v9356_v2, %v9316_v37  ;;  %v9029_v34 = vadd.f32 %v8997_v63, %v8957_v1  ;;  %v9030_v19 = vadd.f32 %v8998_v48, %v8958_v7  ;;  %v12536_v2 = vld [vmem:[#allocation3 + $0x122] sm:$0xff] }
 0x6cf   : > { %v9459_v36 = vadd.f32 %v9427_v14, %v9387_v60  ;;  %v9141_v33 = vmul.f32 %v12528_v39, %v18160_v45  ;;  %v9142_v49 = vmul.f32 %v12529_v43, %v18160_v45  ;;  %v9213_v28 = vmul.f32 %v12530_v62, %v18167_v0 }
 0x6d0   : > { %11444 = vmatprep.mubr.msk.bf16.mxu1 %vm458_vm0, %v9593_v53  ;;  %v9460_v9 = vadd.f32 %v9428_v27, %v9388_v58  ;;  %v9101_v44 = vadd.f32 %v9069_v35, %v9029_v34  ;;  %v9102_v13 = vadd.f32 %v9070_v25, %v9030_v19  ;;  %v9214_v8 = vmul.f32 %v12531_v24, %v18167_v0  ;;  %v18521_v34 = vld [vmem:[#allocation3 + $0x138] sm:$0xff] }
 0x6d1   : > { %v9499_v16 = vmul.f32 %v18224_v6, %v9459_v36  ;;  %v9285_v5 = vmul.f32 %v12532_v4, %v18172_v46  ;;  %v9286_v47 = vmul.f32 %v12533_v51, %v18172_v46  ;;  %v9357_v42 = vmul.f32 %v18496_v11, %v18179_v23  ;;  %v18525_v36 = vld [vmem:[#allocation3 + $0x140] sm:$0xff] }
 0x6d2   : > { %v9500_v59 = vmul.f32 %v18224_v6, %v9460_v9  ;;  %v9173_v17 = vadd.f32 %v9141_v33, %v9101_v44  ;;  %v9174_v20 = vadd.f32 %v9142_v49, %v9102_v13  ;;  %v9358_v41 = vmul.f32 %v12535_v29, %v18179_v23  ;;  %v18529_v33 = vld [vmem:[#allocation3 + $0x139] sm:$0xff]  ;;  %v18535_v44 = vld [vmem:[#allocation3 + $0x141] sm:$0xff] }
 0x6d3   : > { %v9539_v50 = vadd.f32 %v18235_v31, %v9499_v16  ;;  %v9429_v14 = vmul.f32 %v12536_v2, %v18187_v26  ;;  %v8855_v40 = vmul.f32 %v18464_v32, %v18125_v56  ;;  %v8856_v12 = vmul.f32 %v12527_v15, %v18125_v56  ;;  %v18539_v16 = vld [vmem:[#allocation3 + $0x13a] sm:$0xff] }
 0x6d4   : > { %v9540_v30 = vadd.f32 %v18235_v31, %v9500_v59  ;;  %v9245_v21 = vadd.f32 %v9213_v28, %v9173_v17  ;;  %v9246_v38 = vadd.f32 %v9214_v8, %v9174_v20  ;;  %v8927_v61 = vmul.f32 %v12528_v39, %v18133_v52  ;;  %v18555_v20 = vld [vmem:[%s19000_s4 + $0x2e] ss:$0 sm:$0xff] }
 0x6d5   : > { %v9571_v54 = vmax.f32 %v9539_v50, 0.0  ;;  %v9430_v22 = vmul.f32 %v12537_v18, %v18187_v26  ;;  %v8928_v3 = vmul.f32 %v12529_v43, %v18133_v52  ;;  %v8999_v63 = vmul.f32 %v12530_v62, %v18141_v57 }
 0x6d6   : > { %v9572_v48 = vmax.f32 %v9540_v30, 0.0  ;;  %v9317_v55 = vadd.f32 %v9285_v5, %v9245_v21  ;;  %v9318_v37 = vadd.f32 %v9286_v47, %v9246_v38  ;;  %v8959_v32 = vadd.f32 %v8927_v61, %v8855_v40  ;;  %v18546_v5 = vld [vmem:[%s19000_s4 + $0x2d] ss:$0 sm:$0xff] }
 0x6d7   : > { %v8960_v1 = vadd.f32 %v8928_v3, %v8856_v12  ;;  %v9000_v56 = vmul.f32 %v12531_v24, %v18141_v57  ;;  %v9071_v15 = vmul.f32 %v12532_v4, %v18152_v10  ;;  %v9072_v7 = vmul.f32 %v12533_v51, %v18152_v10 }
 0x6d8   : > { %v9594_v39 = vpack.c.bf16 %v9572_v48, %v9571_v54  ;;  %v9389_v60 = vadd.f32 %v9357_v42, %v9317_v55  ;;  %v9390_v27 = vadd.f32 %v9358_v41, %v9318_v37  ;;  %v9031_v35 = vadd.f32 %v8999_v63, %v8959_v32  ;;  %v18580_v32 = vld [vmem:[%s19000_s4 + $0x31] ss:$0 sm:$0xff] }
 0x6d9   : > { %v9032_v25 = vadd.f32 %v9000_v56, %v8960_v1  ;;  %v9143_v52 = vmul.f32 %v18496_v11, %v18160_v45  ;;  %v9144_v43 = vmul.f32 %v12535_v29, %v18160_v45  ;;  %v9215_v62 = vmul.f32 %v12536_v2, %v18167_v0 }
 0x6da   : > { %11445 = vmatmul.mubr.msk.bf16.gmra.mrb[48].mxu1 %vm458_vm0, %v9594_v39  ;;  %v9461_v53 = vadd.f32 %v9429_v14, %v9389_v60  ;;  %v9462_v57 = vadd.f32 %v9430_v22, %v9390_v27  ;;  %v9103_v24 = vadd.f32 %v9071_v15, %v9031_v35  ;;  %v9216_v58 = vmul.f32 %v12537_v18, %v18167_v0 }
 0x6db   : > { %v9104_v10 = vadd.f32 %v9072_v7, %v9032_v25  ;;  %v9287_v19 = vmul.f32 %v18521_v34, %v18172_v46  ;;  %v9288_v45 = vmul.f32 %v18525_v36, %v18172_v46  ;;  %v9359_v49 = vmul.f32 %v18529_v33, %v18179_v23  ;;  %v18595_v25 = vld [vmem:[#allocation3 + $0x150] sm:$0xff] }
 0x6dc   : > { %v9501_v28 = vmul.f32 %v18224_v6, %v9461_v53  ;;  %v9502_v0 = vmul.f32 %v18224_v6, %v9462_v57  ;;  %v9175_v9 = vadd.f32 %v9143_v52, %v9103_v24  ;;  %v9360_v13 = vmul.f32 %v18535_v44, %v18179_v23  ;;  %v18600_v52 = vld [vmem:[%s19000_s4 + $0x33] ss:$0 sm:$0xff] }
 0x6dd   : > { %v9176_v8 = vadd.f32 %v9144_v43, %v9104_v10  ;;  %v9431_v46 = vmul.f32 %v18539_v16, %v18187_v26  ;;  %v8857_v47 = vmul.f32 %v18546_v5, %v12532_v4  ;;  %v8858_v42 = vmul.f32 %v18546_v5, %v12533_v51  ;;  %v18563_v4 = vld [vmem:[%s19000_s4 + $0x2f] ss:$0 sm:$0xff]  ;;  %v18614_v10 = vld [vmem:[%s19000_s4 + $0x34] ss:$0 sm:$0xff] }
 0x6de   : > { %v9541_v59 = vadd.f32 %v18235_v31, %v9501_v28  ;;  %v9542_v17 = vadd.f32 %v18235_v31, %v9502_v0  ;;  %v9247_v23 = vadd.f32 %v9215_v62, %v9175_v9  ;;  %v8929_v41 = vmul.f32 %v18555_v20, %v18496_v11  ;;  %v18570_v11 = vld [vmem:[%s19000_s4 + $0x30] ss:$0 sm:$0xff]  ;;  %v18604_v62 = vld [vmem:[#allocation3 + $0x158] sm:$0xff] }
 0x6df   : > { %v9248_v50 = vadd.f32 %v9216_v58, %v9176_v8  ;;  %v8930_v14 = vmul.f32 %v18555_v20, %v12535_v29  ;;  %v9001_v51 = vmul.f32 %v18563_v4, %v12536_v2  ;;  %v9002_v40 = vmul.f32 %v18563_v4, %v12537_v18  ;;  %v12547_v18 = vld [vmem:[#allocation3 + $0x142] sm:$0xff]  ;;  %v18609_v58 = vld [vmem:[#allocation3 + $0x151] sm:$0xff] }
 0x6e0   : > { %v9573_v12 = vmax.f32 %v9541_v59, 0.0  ;;  %v9574_v30 = vmax.f32 %v9542_v17, 0.0  ;;  %v9319_v21 = vadd.f32 %v9287_v19, %v9247_v23  ;;  %v8961_v38 = vadd.f32 %v8929_v41, %v8857_v47  ;;  %v18623_v9 = vld [vmem:[#allocation3 + $0x152] sm:$0xff] }
 0x6e1   : > { %v9320_v61 = vadd.f32 %v9288_v45, %v9248_v50  ;;  %v8962_v54 = vadd.f32 %v8930_v14, %v8858_v42  ;;  %v9073_v29 = vmul.f32 %v18570_v11, %v18521_v34  ;;  %v9074_v22 = vmul.f32 %v18570_v11, %v18525_v36  ;;  %v18618_v45 = vld [vmem:[#allocation3 + $0x159] sm:$0xff] }
 0x6e2   : > { %v9595_v2 = vpack.c.bf16 %v9574_v30, %v9573_v12  ;;  %v9391_v3 = vadd.f32 %v9359_v49, %v9319_v21  ;;  %v9432_v63 = vmul.f32 %v12547_v18, %v18187_v26  ;;  %v9033_v48 = vadd.f32 %v9001_v51, %v8961_v38  ;;  %v18590_v26 = vld [vmem:[%s19000_s4 + $0x32] ss:$0 sm:$0xff]  ;;  %v12558_v51 = vld [vmem:[#allocation3 + $0x15a] sm:$0xff] }
 0x6e3   : > { %v9392_v55 = vadd.f32 %v9360_v13, %v9320_v61  ;;  %v9034_v37 = vadd.f32 %v9002_v40, %v8962_v54  ;;  %v9145_v1 = vmul.f32 %v18580_v32, %v18529_v33  ;;  %v9146_v56 = vmul.f32 %v18580_v32, %v18535_v44  ;;  %v18628_v13 = vld [vmem:[%s19000_s4 + $0x35] ss:$0 sm:$0xff] }
 0x6e4   : > { %11448 = vmatprep.mubr.msk.bf16.mxu1 %vm458_vm0, %v9595_v2  ;;  %v9463_v15 = vadd.f32 %v9431_v46, %v9391_v3  ;;  %v9105_v7 = vadd.f32 %v9073_v29, %v9033_v48  ;;  %v9217_v39 = vmul.f32 %v18590_v26, %v18539_v16  ;;  %v9218_v60 = vmul.f32 %v18590_v26, %v12547_v18 }
 0x6e5   : > { %v9464_v27 = vadd.f32 %v9432_v63, %v9392_v55  ;;  %v9106_v35 = vadd.f32 %v9074_v22, %v9034_v37  ;;  %v9289_v43 = vmul.f32 %v18600_v52, %v18595_v25  ;;  %v9290_v53 = vmul.f32 %v18604_v62, %v18600_v52 }
 0x6e6   : > { %v9503_v57 = vmul.f32 %v18224_v6, %v9463_v15  ;;  %v9177_v24 = vadd.f32 %v9145_v1, %v9105_v7  ;;  %v9361_v19 = vmul.f32 %v18614_v10, %v18609_v58  ;;  %v9362_v49 = vmul.f32 %v18618_v45, %v18614_v10  ;;  %v18658_v1 = vld [vmem:[#allocation3 + $0x168] sm:$0xff]  ;;  %v18665_v15 = vld [vmem:[%s19001_s5 + $0x5] ss:$0 sm:$0xff] }
 0x6e7   : > { %v9504_v28 = vmul.f32 %v18224_v6, %v9464_v27  ;;  %v9178_v0 = vadd.f32 %v9146_v56, %v9106_v35  ;;  %v9433_v8 = vmul.f32 %v18628_v13, %v18623_v9  ;;  %v8859_v46 = vmul.f32 %v18546_v5, %v18521_v34  ;;  %v12562_v35 = vld [vmem:[#allocation3 + $0x169] sm:$0xff] }
 0x6e8   : > { %v9543_v47 = vadd.f32 %v18235_v31, %v9503_v57  ;;  %v9249_v42 = vadd.f32 %v9217_v39, %v9177_v24  ;;  %v8860_v6 = vmul.f32 %v18546_v5, %v18525_v36  ;;  %v8931_v59 = vmul.f32 %v18555_v20, %v18529_v33  ;;  %v12563_v24 = vld [vmem:[#allocation3 + $0x171] sm:$0xff] }
 0x6e9   : > { %v9544_v17 = vadd.f32 %v18235_v31, %v9504_v28  ;;  %v9250_v23 = vadd.f32 %v9218_v60, %v9178_v0  ;;  %v8932_v41 = vmul.f32 %v18555_v20, %v18535_v44  ;;  %v9003_v50 = vmul.f32 %v18563_v4, %v18539_v16  ;;  %v12561_v60 = vld [vmem:[#allocation3 + $0x170] sm:$0xff] }
 0x6ea   : > { %v9575_v14 = vmax.f32 %v9543_v47, 0.0  ;;  %v9321_v34 = vadd.f32 %v9289_v43, %v9249_v42  ;;  %v9434_v40 = vmul.f32 %v12558_v51, %v18628_v13  ;;  %v8963_v12 = vadd.f32 %v8931_v59, %v8859_v46  ;;  %v18676_v0 = vld [vmem:[%s19002_s6 + $0x5] ss:$0 sm:$0xff] }
 0x6eb   : > { %v9576_v30 = vmax.f32 %v9544_v17, 0.0  ;;  %v9322_v36 = vadd.f32 %v9290_v53, %v9250_v23  ;;  %v8964_v21 = vadd.f32 %v8932_v41, %v8860_v6  ;;  %v9004_v33 = vmul.f32 %v12547_v18, %v18563_v4 }
 0x6ec   : > { %v9393_v38 = vadd.f32 %v9361_v19, %v9321_v34  ;;  %v9035_v31 = vadd.f32 %v9003_v50, %v8963_v12  ;;  %v9075_v61 = vmul.f32 %v18595_v25, %v18570_v11  ;;  %v9076_v44 = vmul.f32 %v18604_v62, %v18570_v11 }
 0x6ed   : > { %v9596_v16 = vpack.c.bf16 %v9576_v30, %v9575_v14  ;;  %v9394_v54 = vadd.f32 %v9362_v49, %v9322_v36  ;;  %v9036_v29 = vadd.f32 %v9004_v33, %v8964_v21  ;;  %v9147_v22 = vmul.f32 %v18609_v58, %v18580_v32  ;;  %v12564_v49 = vld [vmem:[#allocation3 + $0x16a] sm:$0xff]  ;;  %v12566_v36 = vld [vmem:[#allocation3 + $0x172] sm:$0xff] }
 0x6ee   : > { %v9465_v2 = vadd.f32 %v9433_v8, %v9393_v38  ;;  %v9107_v3 = vadd.f32 %v9075_v61, %v9035_v31  ;;  %v9148_v63 = vmul.f32 %v18618_v45, %v18580_v32  ;;  %v9219_v18 = vmul.f32 %v18623_v9, %v18590_v26 }
 0x6ef   : > { %11449 = vmatmul.mubr.msk.bf16.gmra.mrb[52].mxu1 %vm458_vm0, %v9596_v16  ;;  %v9466_v48 = vadd.f32 %v9434_v40, %v9394_v54  ;;  %v9108_v55 = vadd.f32 %v9076_v44, %v9036_v29  ;;  %v9220_v37 = vmul.f32 %v12558_v51, %v18590_v26  ;;  %v9291_v56 = vmul.f32 %v18658_v1, %v18600_v52 }
 0x6f0   : > { %v9505_v7 = vmul.f32 %v18665_v15, %v9465_v2  ;;  %v9179_v39 = vadd.f32 %v9147_v22, %v9107_v3  ;;  %v9292_v27 = vmul.f32 %v12561_v60, %v18600_v52  ;;  %v9363_v43 = vmul.f32 %v12562_v35, %v18614_v10 }
 0x6f1   : > { %v9506_v53 = vmul.f32 %v18665_v15, %v9466_v48  ;;  %v9180_v57 = vadd.f32 %v9148_v63, %v9108_v55  ;;  %v9364_v19 = vmul.f32 %v12563_v24, %v18614_v10  ;;  %v9435_v28 = vmul.f32 %v12564_v49, %v18628_v13  ;;  %v12567_v63 = vld [vmem:[#allocation3 + $0x180] sm:$0xff]  ;;  %v12568_v48 = vld [vmem:[#allocation3 + $0x188] sm:$0xff] }
 0x6f2   : > { %v9545_v8 = vadd.f32 %v18676_v0, %v9505_v7  ;;  %v9251_v46 = vadd.f32 %v9219_v18, %v9179_v39  ;;  %v8861_v47 = vmul.f32 %v18595_v25, %v18546_v5  ;;  %v8862_v42 = vmul.f32 %v18604_v62, %v18546_v5  ;;  %v12569_v39 = vld [vmem:[#allocation3 + $0x181] sm:$0xff] }
 0x6f3   : > { %v9546_v6 = vadd.f32 %v18676_v0, %v9506_v53  ;;  %v9252_v59 = vadd.f32 %v9220_v37, %v9180_v57  ;;  %v8933_v17 = vmul.f32 %v18609_v58, %v18555_v20  ;;  %v8934_v23 = vmul.f32 %v18618_v45, %v18555_v20  ;;  %v12570_v53 = vld [vmem:[#allocation3 + $0x189] sm:$0xff] }
 0x6f4   : > { %v9577_v41 = vmax.f32 %v9545_v8, 0.0  ;;  %v9323_v50 = vadd.f32 %v9291_v56, %v9251_v46  ;;  %v9005_v14 = vmul.f32 %v18623_v9, %v18563_v4  ;;  %v9006_v34 = vmul.f32 %v12558_v51, %v18563_v4 }
 0x6f5   : > { %v9578_v25 = vmax.f32 %v9546_v6, 0.0  ;;  %v9324_v40 = vadd.f32 %v9292_v27, %v9252_v59  ;;  %v8965_v12 = vadd.f32 %v8933_v17, %v8861_v47  ;;  %v8966_v62 = vadd.f32 %v8934_v23, %v8862_v42  ;;  %v12571_v59 = vld [vmem:[#allocation3 + $0x182] sm:$0xff] }
 0x6f6   : > { %v9395_v30 = vadd.f32 %v9363_v43, %v9323_v50  ;;  %v9436_v21 = vmul.f32 %v12566_v36, %v18628_v13  ;;  %v9077_v58 = vmul.f32 %v18658_v1, %v18570_v11  ;;  %v9078_v45 = vmul.f32 %v12561_v60, %v18570_v11 }
 0x6f7   : > { %v9597_v33 = vpack.c.bf16 %v9578_v25, %v9577_v41  ;;  %v9396_v38 = vadd.f32 %v9364_v19, %v9324_v40  ;;  %v9037_v31 = vadd.f32 %v9005_v14, %v8965_v12  ;;  %v9038_v61 = vadd.f32 %v9006_v34, %v8966_v62  ;;  %v12572_v25 = vld [vmem:[#allocation3 + $0x18a] sm:$0xff] }
 0x6f8   : > { %v9467_v9 = vadd.f32 %v9435_v28, %v9395_v30  ;;  %v9149_v51 = vmul.f32 %v12562_v35, %v18580_v32  ;;  %v9150_v44 = vmul.f32 %v12563_v24, %v18580_v32  ;;  %v9221_v22 = vmul.f32 %v12564_v49, %v18590_v26 }
 0x6f9   : > { %11452 = vmatprep.mubr.msk.bf16.mxu1 %vm458_vm0, %v9597_v33  ;;  %v9468_v16 = vadd.f32 %v9436_v21, %v9396_v38  ;;  %v9109_v54 = vadd.f32 %v9077_v58, %v9037_v31  ;;  %v9110_v29 = vadd.f32 %v9078_v45, %v9038_v61  ;;  %v9222_v3 = vmul.f32 %v12566_v36, %v18590_v26 }
 0x6fa   : > { %v9507_v2 = vmul.f32 %v18665_v15, %v9467_v9  ;;  %v9293_v18 = vmul.f32 %v12567_v63, %v18600_v52  ;;  %v9294_v55 = vmul.f32 %v12568_v48, %v18600_v52  ;;  %v9365_v27 = vmul.f32 %v12569_v39, %v18614_v10 }
 0x6fb   : > { %v9508_v37 = vmul.f32 %v18665_v15, %v9468_v16  ;;  %v9181_v56 = vadd.f32 %v9149_v51, %v9109_v54  ;;  %v9182_v7 = vadd.f32 %v9150_v44, %v9110_v29  ;;  %v9366_v57 = vmul.f32 %v12570_v53, %v18614_v10  ;;  %v12573_v51 = vld [vmem:[#allocation3 + $0x198] sm:$0xff]  ;;  %v12574_v54 = vld [vmem:[#allocation3 + $0x1a0] sm:$0xff] }
 0x6fc   : > { %v9547_v43 = vadd.f32 %v18676_v0, %v9507_v2  ;;  %v8863_v19 = vmul.f32 %v18658_v1, %v18546_v5  ;;  %v8864_v28 = vmul.f32 %v12561_v60, %v18546_v5  ;;  %v8935_v42 = vmul.f32 %v12562_v35, %v18555_v20 }
 0x6fd   : > { %v9548_v8 = vadd.f32 %v18676_v0, %v9508_v37  ;;  %v9253_v46 = vadd.f32 %v9221_v22, %v9181_v56  ;;  %v9254_v47 = vadd.f32 %v9222_v3, %v9182_v7  ;;  %v9437_v17 = vmul.f32 %v12571_v59, %v18628_v13  ;;  %v12575_v3 = vld [vmem:[#allocation3 + $0x199] sm:$0xff] }
 0x6fe   : > { %v9579_v6 = vmax.f32 %v9547_v43, 0.0  ;;  %v8936_v23 = vmul.f32 %v12563_v24, %v18555_v20  ;;  %v9007_v41 = vmul.f32 %v12564_v49, %v18563_v4  ;;  %v8967_v1 = vadd.f32 %v8935_v42, %v8863_v19 }
 0x6ff   : > { %v9580_v50 = vmax.f32 %v9548_v8, 0.0  ;;  %v9325_v14 = vadd.f32 %v9293_v18, %v9253_v46  ;;  %v9326_v34 = vadd.f32 %v9294_v55, %v9254_v47  ;;  %v9438_v5 = vmul.f32 %v12572_v25, %v18628_v13 }
 0x700   : > { %v8968_v60 = vadd.f32 %v8936_v23, %v8864_v28  ;;  %v9008_v40 = vmul.f32 %v12566_v36, %v18563_v4  ;;  %v9079_v35 = vmul.f32 %v12567_v63, %v18570_v11  ;;  %v9039_v21 = vadd.f32 %v9007_v41, %v8967_v1  ;;  %v18748_v41 = vld [vmem:[%s19005_s9] ss:$0 sm:$0xff] }
 0x701   : > { %v9598_v12 = vpack.c.bf16 %v9580_v50, %v9579_v6  ;;  %v9397_v62 = vadd.f32 %v9365_v27, %v9325_v14  ;;  %v9398_v30 = vadd.f32 %v9366_v57, %v9326_v34  ;;  %v9080_v20 = vmul.f32 %v12568_v48, %v18570_v11  ;;  %v12576_v48 = vld [vmem:[#allocation3 + $0x1a1] sm:$0xff] }
 0x702   : > { %v9040_v58 = vadd.f32 %v9008_v40, %v8968_v60  ;;  %v9111_v45 = vadd.f32 %v9079_v35, %v9039_v21  ;;  %v9151_v33 = vmul.f32 %v12569_v39, %v18580_v32  ;;  %v9152_v31 = vmul.f32 %v12570_v53, %v18580_v32  ;;  %v12577_v39 = vld [vmem:[#allocation3 + $0x19a] sm:$0xff]  ;;  %v19127_v40 = vld [vmem:[#allocation17_spill] sm:$0xff] }
 0x703   : > { %11453 = vmatmul.mubr.msk.bf16.gmra.mrb[56].mxu1 %vm458_vm0, %v9598_v12  ;;  %v9469_v24 = vadd.f32 %v9437_v17, %v9397_v62  ;;  %v9470_v49 = vadd.f32 %v9438_v5, %v9398_v30  ;;  %v9223_v4 = vmul.f32 %v12571_v59, %v18590_v26  ;;  %v9295_v11 = vmul.f32 %v12573_v51, %v18600_v52  ;;  %v19129_v30 = vld [vmem:[#allocation16_spill] sm:$0xff] }
 0x704   : > { %v9112_v38 = vadd.f32 %v9080_v20, %v9040_v58  ;;  %v9183_v9 = vadd.f32 %v9151_v33, %v9111_v45  ;;  %v9224_v16 = vmul.f32 %v12572_v25, %v18590_v26  ;;  %v9296_v29 = vmul.f32 %v12574_v54, %v18600_v52  ;;  %v12578_v52 = vld [vmem:[#allocation3 + $0x1a2] sm:$0xff] }
 0x705   : > { %v9509_v36 = vmul.f32 %v18665_v15, %v9469_v24  ;;  %v9510_v61 = vmul.f32 %v18665_v15, %v9470_v49  ;;  %v9367_v63 = vmul.f32 %v12575_v3, %v18614_v10  ;;  %v9368_v55 = vmul.f32 %v12576_v48, %v18614_v10  ;;  %v19135_v48 = vld [vmem:[#allocation18_spill] sm:$0xff] }
 0x706   : > { %v9184_v44 = vadd.f32 %v9152_v31, %v9112_v38  ;;  %v9255_v2 = vadd.f32 %v9223_v4, %v9183_v9  ;;  %v9439_v26 = vmul.f32 %v12577_v39, %v18628_v13  ;;  %v9440_v43 = vmul.f32 %v12578_v52, %v18628_v13  ;;  %v18743_v13 = vld [vmem:[%s19004_s8] ss:$0 sm:$0xff] }
 0x707   : > { %v9549_v22 = vadd.f32 %v18676_v0, %v9509_v36  ;;  %v9550_v32 = vadd.f32 %v18676_v0, %v9510_v61  ;;  %v19128_v35 = vunpack.c.l.bf16 %v19127_v40  ;;  %v19130_v21 = vunpack.c.l.bf16 %v19129_v30 }
 0x708   : > { %v9256_v18 = vadd.f32 %v9224_v16, %v9184_v44  ;;  %v9327_v7 = vadd.f32 %v9295_v11, %v9255_v2  ;;  %v19131_v49 = vunpack.c.h.bf16 %v19127_v40  ;;  %v19132_v38 = vunpack.c.h.bf16 %v19129_v30  ;;  %v19133_v2 = vld [vmem:[#allocation19_spill] sm:$0xff] }
 0x709   : > { %v9581_v37 = vmax.f32 %v9549_v22, 0.0  ;;  %v9582_v56 = vmax.f32 %v9550_v32, 0.0  ;;  %v19134_v3 = vunpack.c.l.bf16 %v19133_v2  ;;  %v19137_v39 = vunpack.c.h.bf16 %v19133_v2 }
 0x70a   : > { %v9328_v27 = vadd.f32 %v9296_v29, %v9256_v18  ;;  %v9399_v57 = vadd.f32 %v9367_v63, %v9327_v7  ;;  %v19138_v52 = vunpack.c.h.bf16 %v19135_v48 }
 0x70b   : > { %v9599_v53 = vpack.c.bf16 %v9582_v56, %v9581_v37 }
 0x70c   : > { %v9400_v19 = vadd.f32 %v9368_v55, %v9328_v27  ;;  %v9471_v28 = vadd.f32 %v9439_v26, %v9399_v57  ;;  %v19136_v55 = vunpack.c.l.bf16 %v19135_v48 }
 0x70d   : > { %11456 = vmatprep.mubr.msk.bf16.mxu1 %vm458_vm0, %v9599_v53 }
 0x70e   : > { %v9472_v8 = vadd.f32 %v9440_v43, %v9400_v19  ;;  %v9511_v10 = vmul.f32 %v18665_v15, %v9471_v28 }
 0x710   : > { %v9512_v46 = vmul.f32 %v18665_v15, %v9472_v8  ;;  %v9551_v47 = vadd.f32 %v18676_v0, %v9511_v10 }
 0x712   : > { %v9552_v42 = vadd.f32 %v18676_v0, %v9512_v46  ;;  %v9583_v6 = vmax.f32 %v9551_v47, 0.0 }
 0x714   : > { %v9584_v59 = vmax.f32 %v9552_v42, 0.0 }
 0x716   : > { %v9600_v17 = vpack.c.bf16 %v9584_v59, %v9583_v6 }
 0x718   : > { %11457 = vmatmul.mubr.msk.bf16.gmra.mrb[60].mxu1 %vm458_vm0, %v9600_v17 }
 0x75b   : > { %v11430_v23 = vpop.f32.mrb[32].mxu1 }
 0x75c   : > { %v9868_v15 = vmul.f32 %v11430_v23, %v18743_v13  ;;  %v9700_v50 = vpop.f32.mrb[33].mxu1  ;;  %v19139_v23 = vld [vmem:[#allocation21_spill] sm:$0xff] }
 0x75d   : > { %v9866_v0 = vmul.f32 %v18743_v13, %v9700_v50  ;;  %v11431_v14 = vpop.f32.mrb[34].mxu1 }
 0x75e   : > { %v9907_v34 = vadd.f32 %v18748_v41, %v9868_v15  ;;  %v9869_v1 = vmul.f32 %v11431_v14, %v18743_v13  ;;  %v9703_v25 = vpop.f32.mrb[35].mxu1  ;;  %v19140_v15 = vunpack.c.l.bf16 %v19139_v23  ;;  %v19141_v14 = vld [vmem:[#allocation20_spill] sm:$0xff] }
 0x75f   : > { %v9905_v5 = vadd.f32 %v18748_v41, %v9866_v0  ;;  %v9867_v60 = vmul.f32 %v18743_v13, %v9703_v25 }
 0x760   : > { %v9939_v12 = vadd.f32 %v19128_v35, %v9907_v34  ;;  %v9908_v62 = vadd.f32 %v18748_v41, %v9869_v1  ;;  %v19142_v34 = vunpack.c.l.bf16 %v19141_v14 }
 0x761   : > { %v9937_v58 = vadd.f32 %v19130_v21, %v9905_v5  ;;  %v9906_v20 = vadd.f32 %v18748_v41, %v9867_v60  ;;  %v19143_v60 = vunpack.c.h.bf16 %v19139_v23 }
 0x762   : > { %v9971_v24 = vmax.f32 %v9939_v12, 0.0  ;;  %v9940_v45 = vadd.f32 %v19131_v49, %v9908_v62  ;;  %v19144_v12 = vunpack.c.h.bf16 %v19141_v14 }
 0x763   : > { %v9969_v33 = vmax.f32 %v9937_v58, 0.0  ;;  %v9938_v31 = vadd.f32 %v19132_v38, %v9906_v20 }
 0x764   : > { %10003 = vst.msk [vmem:[%s18767_s13 + $0x10] sm:$0xff] %vm458_vm0, %v9971_v24  ;;  %v9972_v4 = vmax.f32 %v9940_v45, 0.0 }
 0x765   : > { %10001 = vst.msk [vmem:[%s18767_s13] sm:$0xff] %vm458_vm0, %v9969_v33  ;;  %v9970_v36 = vmax.f32 %v9938_v31, 0.0 }
 0x766   : > { %10004 = vst.msk [vmem:[%s18767_s13 + $0x18] sm:$0xff] %vm458_vm0, %v9972_v4 }
 0x767   : > { %10002 = vst.msk [vmem:[%s18767_s13 + $0x8] sm:$0xff] %vm458_vm0, %v9970_v36 }
 0x770   : > { %v11434_v61 = vpop.f32.mrb[36].mxu1 }
 0x771   : > { %v9872_v9 = vmul.f32 %v11434_v61, %v18743_v13  ;;  %v9716_v51 = vpop.f32.mrb[37].mxu1  ;;  %v19145_v61 = vld [vmem:[#allocation23_spill] sm:$0xff] }
 0x772   : > { %v9870_v11 = vmul.f32 %v18743_v13, %v9716_v51  ;;  %v11435_v44 = vpop.f32.mrb[38].mxu1 }
 0x773   : > { %v9911_v16 = vadd.f32 %v18748_v41, %v9872_v9  ;;  %v9873_v54 = vmul.f32 %v11435_v44, %v18743_v13  ;;  %v9719_v29 = vpop.f32.mrb[39].mxu1  ;;  %v19146_v9 = vunpack.c.l.bf16 %v19145_v61  ;;  %v19147_v44 = vld [vmem:[#allocation22_spill] sm:$0xff] }
 0x774   : > { %v9909_v22 = vadd.f32 %v18748_v41, %v9870_v11  ;;  %v9871_v32 = vmul.f32 %v18743_v13, %v9719_v29 }
 0x775   : > { %v9943_v63 = vadd.f32 %v19134_v3, %v9911_v16  ;;  %v9912_v18 = vadd.f32 %v18748_v41, %v9873_v54  ;;  %v19148_v16 = vunpack.c.l.bf16 %v19147_v44 }
 0x776   : > { %v9941_v37 = vadd.f32 %v19136_v55, %v9909_v22  ;;  %v9910_v56 = vadd.f32 %v18748_v41, %v9871_v32  ;;  %v19149_v32 = vunpack.c.h.bf16 %v19145_v61 }
 0x777   : > { %v9975_v7 = vmax.f32 %v9943_v63, 0.0  ;;  %v9944_v26 = vadd.f32 %v19137_v39, %v9912_v18  ;;  %v19150_v63 = vunpack.c.h.bf16 %v19147_v44 }
 0x778   : > { %v9973_v27 = vmax.f32 %v9941_v37, 0.0  ;;  %v9942_v43 = vadd.f32 %v19138_v52, %v9910_v56 }
 0x779   : > { %10007 = vst.msk [vmem:[%s18767_s13 + $0x30] sm:$0xff] %vm458_vm0, %v9975_v7  ;;  %v9976_v53 = vmax.f32 %v9944_v26, 0.0 }
 0x77a   : > { %10005 = vst.msk [vmem:[%s18767_s13 + $0x20] sm:$0xff] %vm458_vm0, %v9973_v27  ;;  %v9974_v57 = vmax.f32 %v9942_v43, 0.0 }
 0x77b   : > { %10008 = vst.msk [vmem:[%s18767_s13 + $0x38] sm:$0xff] %vm458_vm0, %v9976_v53 }
 0x77c   : > { %10006 = vst.msk [vmem:[%s18767_s13 + $0x28] sm:$0xff] %vm458_vm0, %v9974_v57 }
 0x784   : > { %v11438_v19 = vpop.f32.mrb[40].mxu1 }
 0x785   : > { %v9876_v28 = vmul.f32 %v11438_v19, %v18743_v13  ;;  %v9732_v8 = vpop.f32.mrb[41].mxu1  ;;  %v19151_v19 = vld [vmem:[#allocation25_spill] sm:$0xff] }
 0x786   : > { %v9874_v10 = vmul.f32 %v18743_v13, %v9732_v8  ;;  %v11439_v46 = vpop.f32.mrb[42].mxu1 }
 0x787   : > { %v9915_v47 = vadd.f32 %v18748_v41, %v9876_v28  ;;  %v9877_v42 = vmul.f32 %v11439_v46, %v18743_v13  ;;  %v9735_v6 = vpop.f32.mrb[43].mxu1  ;;  %v19152_v28 = vunpack.c.l.bf16 %v19151_v19  ;;  %v19153_v46 = vld [vmem:[#allocation24_spill] sm:$0xff] }
 0x788   : > { %v9913_v59 = vadd.f32 %v18748_v41, %v9874_v10  ;;  %v9875_v17 = vmul.f32 %v18743_v13, %v9735_v6 }
 0x789   : > { %v9947_v50 = vadd.f32 %v19140_v15, %v9915_v47  ;;  %v9916_v0 = vadd.f32 %v18748_v41, %v9877_v42  ;;  %v19154_v47 = vunpack.c.l.bf16 %v19153_v46 }
 0x78a   : > { %v9945_v1 = vadd.f32 %v19142_v34, %v9913_v59  ;;  %v9914_v25 = vadd.f32 %v18748_v41, %v9875_v17  ;;  %v19155_v17 = vunpack.c.h.bf16 %v19151_v19 }
 0x78b   : > { %v9979_v5 = vmax.f32 %v9947_v50, 0.0  ;;  %v9948_v40 = vadd.f32 %v19143_v60, %v9916_v0  ;;  %v19156_v50 = vunpack.c.h.bf16 %v19153_v46 }
 0x78c   : > { %v9977_v35 = vmax.f32 %v9945_v1, 0.0  ;;  %v9946_v62 = vadd.f32 %v19144_v12, %v9914_v25 }
 0x78d   : > { %10011 = vst.msk [vmem:[%s18767_s13 + $0x50] sm:$0xff] %vm458_vm0, %v9979_v5  ;;  %v9980_v30 = vmax.f32 %v9948_v40, 0.0 }
 0x78e   : > { %10009 = vst.msk [vmem:[%s18767_s13 + $0x40] sm:$0xff] %vm458_vm0, %v9977_v35  ;;  %v9978_v21 = vmax.f32 %v9946_v62, 0.0 }
 0x78f   : > { %10012 = vst.msk [vmem:[%s18767_s13 + $0x58] sm:$0xff] %vm458_vm0, %v9980_v30 }
 0x790   : > { %10010 = vst.msk [vmem:[%s18767_s13 + $0x48] sm:$0xff] %vm458_vm0, %v9978_v21 }
 0x799   : > { %v11442_v58 = vpop.f32.mrb[44].mxu1 }
 0x79a   : > { %v9880_v20 = vmul.f32 %v11442_v58, %v18743_v13  ;;  %v9748_v24 = vpop.f32.mrb[45].mxu1  ;;  %v19157_v58 = vld [vmem:[#allocation27_spill] sm:$0xff] }
 0x79b   : > { %v9878_v49 = vmul.f32 %v18743_v13, %v9748_v24  ;;  %v11443_v45 = vpop.f32.mrb[46].mxu1 }
 0x79c   : > { %v9919_v33 = vadd.f32 %v18748_v41, %v9880_v20  ;;  %v9881_v38 = vmul.f32 %v11443_v45, %v18743_v13  ;;  %v9751_v31 = vpop.f32.mrb[47].mxu1  ;;  %v19158_v20 = vunpack.c.l.bf16 %v19157_v58  ;;  %v19159_v45 = vld [vmem:[#allocation26_spill] sm:$0xff] }
 0x79d   : > { %v9917_v4 = vadd.f32 %v18748_v41, %v9878_v49  ;;  %v9879_v36 = vmul.f32 %v18743_v13, %v9751_v31 }
 0x79e   : > { %v9951_v51 = vadd.f32 %v19146_v9, %v9919_v33  ;;  %v9920_v11 = vadd.f32 %v18748_v41, %v9881_v38  ;;  %v19160_v33 = vunpack.c.l.bf16 %v19159_v45 }
 0x79f   : > { %v9949_v54 = vadd.f32 %v19148_v16, %v9917_v4  ;;  %v9918_v29 = vadd.f32 %v18748_v41, %v9879_v36  ;;  %v19161_v36 = vunpack.c.h.bf16 %v19157_v58 }
 0x7a0   : > { %v9983_v22 = vmax.f32 %v9951_v51, 0.0  ;;  %v9952_v2 = vadd.f32 %v19149_v32, %v9920_v11  ;;  %v19162_v51 = vunpack.c.h.bf16 %v19159_v45 }
 0x7a1   : > { %v9981_v3 = vmax.f32 %v9949_v54, 0.0  ;;  %v9950_v18 = vadd.f32 %v19150_v63, %v9918_v29 }
 0x7a2   : > { %10015 = vst.msk [vmem:[%s18767_s13 + $0x70] sm:$0xff] %vm458_vm0, %v9983_v22  ;;  %v9984_v48 = vmax.f32 %v9952_v2, 0.0 }
 0x7a3   : > { %10013 = vst.msk [vmem:[%s18767_s13 + $0x60] sm:$0xff] %vm458_vm0, %v9981_v3  ;;  %v9982_v55 = vmax.f32 %v9950_v18, 0.0 }
 0x7a4   : > { %10016 = vst.msk [vmem:[%s18767_s13 + $0x78] sm:$0xff] %vm458_vm0, %v9984_v48 }
 0x7a5   : > { %10014 = vst.msk [vmem:[%s18767_s13 + $0x68] sm:$0xff] %vm458_vm0, %v9982_v55 }
 0x7ad   : > { %v11446_v37 = vpop.f32.mrb[48].mxu1 }
 0x7ae   : > { %v9884_v56 = vmul.f32 %v11446_v37, %v18743_v13  ;;  %v9764_v7 = vpop.f32.mrb[49].mxu1  ;;  %v19163_v37 = vld [vmem:[#allocation29_spill] sm:$0xff] }
 0x7af   : > { %v9882_v39 = vmul.f32 %v18743_v13, %v9764_v7  ;;  %v11447_v26 = vpop.f32.mrb[50].mxu1 }
 0x7b0   : > { %v9923_v27 = vadd.f32 %v18748_v41, %v9884_v56  ;;  %v9885_v52 = vmul.f32 %v11447_v26, %v18743_v13  ;;  %v9767_v43 = vpop.f32.mrb[51].mxu1  ;;  %v19164_v56 = vunpack.c.l.bf16 %v19163_v37  ;;  %v19165_v26 = vld [vmem:[#allocation28_spill] sm:$0xff] }
 0x7b1   : > { %v9921_v53 = vadd.f32 %v18748_v41, %v9882_v39  ;;  %v9883_v57 = vmul.f32 %v18743_v13, %v9767_v43 }
 0x7b2   : > { %v9955_v8 = vadd.f32 %v19152_v28, %v9923_v27  ;;  %v9924_v10 = vadd.f32 %v18748_v41, %v9885_v52  ;;  %v19166_v27 = vunpack.c.l.bf16 %v19165_v26 }
 0x7b3   : > { %v9953_v42 = vadd.f32 %v19154_v47, %v9921_v53  ;;  %v9922_v6 = vadd.f32 %v18748_v41, %v9883_v57  ;;  %v19167_v57 = vunpack.c.h.bf16 %v19163_v37 }
 0x7b4   : > { %v9987_v59 = vmax.f32 %v9955_v8, 0.0  ;;  %v9956_v23 = vadd.f32 %v19155_v17, %v9924_v10  ;;  %v19168_v8 = vunpack.c.h.bf16 %v19165_v26 }
 0x7b5   : > { %v9985_v15 = vmax.f32 %v9953_v42, 0.0  ;;  %v9954_v0 = vadd.f32 %v19156_v50, %v9922_v6 }
 0x7b6   : > { %10019 = vst.msk [vmem:[%s18767_s13 + $0x90] sm:$0xff] %vm458_vm0, %v9987_v59  ;;  %v9988_v14 = vmax.f32 %v9956_v23, 0.0 }
 0x7b7   : > { %10017 = vst.msk [vmem:[%s18767_s13 + $0x80] sm:$0xff] %vm458_vm0, %v9985_v15  ;;  %v9986_v34 = vmax.f32 %v9954_v0, 0.0 }
 0x7b8   : > { %10020 = vst.msk [vmem:[%s18767_s13 + $0x98] sm:$0xff] %vm458_vm0, %v9988_v14 }
 0x7b9   : > { %10018 = vst.msk [vmem:[%s18767_s13 + $0x88] sm:$0xff] %vm458_vm0, %v9986_v34 }
 0x7c2   : > { %v11450_v1 = vpop.f32.mrb[52].mxu1 }
 0x7c3   : > { %v9888_v25 = vmul.f32 %v11450_v1, %v18743_v13  ;;  %v9780_v5 = vpop.f32.mrb[53].mxu1  ;;  %v19169_v1 = vld [vmem:[#allocation31_spill] sm:$0xff] }
 0x7c4   : > { %v9886_v60 = vmul.f32 %v18743_v13, %v9780_v5  ;;  %v11451_v40 = vpop.f32.mrb[54].mxu1 }
 0x7c5   : > { %v9927_v35 = vadd.f32 %v18748_v41, %v9888_v25  ;;  %v9889_v12 = vmul.f32 %v11451_v40, %v18743_v13  ;;  %v9783_v62 = vpop.f32.mrb[55].mxu1  ;;  %v19170_v25 = vunpack.c.l.bf16 %v19169_v1  ;;  %v19171_v40 = vld [vmem:[#allocation30_spill] sm:$0xff] }
 0x7c6   : > { %v9925_v30 = vadd.f32 %v18748_v41, %v9886_v60  ;;  %v9887_v21 = vmul.f32 %v18743_v13, %v9783_v62 }
 0x7c7   : > { %v9959_v24 = vadd.f32 %v19158_v20, %v9927_v35  ;;  %v9928_v49 = vadd.f32 %v18748_v41, %v9889_v12  ;;  %v19172_v35 = vunpack.c.l.bf16 %v19171_v40  ;;  %v19174_v20 = vunpack.c.h.bf16 %v19171_v40 }
 0x7c8   : > { %v9957_v38 = vadd.f32 %v19160_v33, %v9925_v30  ;;  %v9926_v31 = vadd.f32 %v18748_v41, %v9887_v21  ;;  %v19173_v21 = vunpack.c.h.bf16 %v19169_v1 }
 0x7c9   : > { %v9991_v4 = vmax.f32 %v9959_v24, 0.0  ;;  %v9960_v61 = vadd.f32 %v19161_v36, %v9928_v49 }
 0x7ca   : > { %v9989_v9 = vmax.f32 %v9957_v38, 0.0  ;;  %v9958_v11 = vadd.f32 %v19162_v51, %v9926_v31 }
 0x7cb   : > { %10023 = vst.msk [vmem:[%s18767_s13 + $0xb0] sm:$0xff] %vm458_vm0, %v9991_v4  ;;  %v9992_v44 = vmax.f32 %v9960_v61, 0.0 }
 0x7cc   : > { %10021 = vst.msk [vmem:[%s18767_s13 + $0xa0] sm:$0xff] %vm458_vm0, %v9989_v9  ;;  %v9990_v16 = vmax.f32 %v9958_v11, 0.0 }
 0x7cd   : > { %10024 = vst.msk [vmem:[%s18767_s13 + $0xb8] sm:$0xff] %vm458_vm0, %v9992_v44 }
 0x7ce   : > { %10022 = vst.msk [vmem:[%s18767_s13 + $0xa8] sm:$0xff] %vm458_vm0, %v9990_v16 }
 0x7d6   : > { %v11454_v54 = vpop.f32.mrb[56].mxu1 }
 0x7d7   : > { %v9892_v29 = vmul.f32 %v11454_v54, %v18743_v13  ;;  %v9796_v22 = vpop.f32.mrb[57].mxu1 }
 0x7d8   : > { %v9890_v32 = vmul.f32 %v18743_v13, %v9796_v22  ;;  %v11455_v2 = vpop.f32.mrb[58].mxu1 }
 0x7d9   : > { %v9931_v3 = vadd.f32 %v18748_v41, %v9892_v29  ;;  %v9893_v63 = vmul.f32 %v11455_v2, %v18743_v13  ;;  %v9799_v18 = vpop.f32.mrb[59].mxu1 }
 0x7da   : > { %v9929_v48 = vadd.f32 %v18748_v41, %v9890_v32  ;;  %v9891_v55 = vmul.f32 %v18743_v13, %v9799_v18 }
 0x7db   : > { %v9963_v7 = vadd.f32 %v19164_v56, %v9931_v3  ;;  %v9932_v39 = vadd.f32 %v18748_v41, %v9893_v63 }
 0x7dc   : > { %v9961_v52 = vadd.f32 %v19166_v27, %v9929_v48  ;;  %v9930_v43 = vadd.f32 %v18748_v41, %v9891_v55 }
 0x7dd   : > { %v9995_v53 = vmax.f32 %v9963_v7, 0.0  ;;  %v9964_v19 = vadd.f32 %v19167_v57, %v9932_v39 }
 0x7de   : > { %v9993_v28 = vmax.f32 %v9961_v52, 0.0  ;;  %v9962_v10 = vadd.f32 %v19168_v8, %v9930_v43 }
 0x7df   : > { %10027 = vst.msk [vmem:[%s18767_s13 + $0xd0] sm:$0xff] %vm458_vm0, %v9995_v53  ;;  %v9996_v46 = vmax.f32 %v9964_v19, 0.0 }
 0x7e0   : > { %10025 = vst.msk [vmem:[%s18767_s13 + $0xc0] sm:$0xff] %vm458_vm0, %v9993_v28  ;;  %v9994_v47 = vmax.f32 %v9962_v10, 0.0 }
 0x7e1   : > { %10028 = vst.msk [vmem:[%s18767_s13 + $0xd8] sm:$0xff] %vm458_vm0, %v9996_v46 }
 0x7e2   : > { %10026 = vst.msk [vmem:[%s18767_s13 + $0xc8] sm:$0xff] %vm458_vm0, %v9994_v47 }
 0x7eb   : > { %v11458_v42 = vpop.f32.mrb[60].mxu1 }
 0x7ec   : > { %v9896_v6 = vmul.f32 %v11458_v42, %v18743_v13  ;;  %v9812_v59 = vpop.f32.mrb[61].mxu1 }
 0x7ed   : > { %v9894_v17 = vmul.f32 %v18743_v13, %v9812_v59  ;;  %v11459_v23 = vpop.f32.mrb[62].mxu1 }
 0x7ee   : > { %v9935_v15 = vadd.f32 %v18748_v41, %v9896_v6  ;;  %v9897_v50 = vmul.f32 %v11459_v23, %v18743_v13  ;;  %v9815_v0 = vpop.f32.mrb[63].mxu1 }
 0x7ef   : > { %v9933_v14 = vadd.f32 %v18748_v41, %v9894_v17  ;;  %v9895_v34 = vmul.f32 %v18743_v13, %v9815_v0 }
 0x7f0   : > { %v9967_v5 = vadd.f32 %v19170_v25, %v9935_v15  ;;  %v9936_v60 = vadd.f32 %v18748_v41, %v9897_v50 }
 0x7f1   : > { %v9965_v12 = vadd.f32 %v19172_v35, %v9933_v14  ;;  %v9934_v62 = vadd.f32 %v18748_v41, %v9895_v34 }
 0x7f2   : > { %v9999_v30 = vmax.f32 %v9967_v5, 0.0  ;;  %v9968_v13 = vadd.f32 %v19173_v21, %v9936_v60 }
 0x7f3   : > { %v9997_v58 = vmax.f32 %v9965_v12, 0.0  ;;  %v9966_v24 = vadd.f32 %v19174_v20, %v9934_v62 }
 0x7f4   : > { %10031 = vst.msk [vmem:[%s18767_s13 + $0xf0] sm:$0xff] %vm458_vm0, %v9999_v30  ;;  %v10000_v49 = vmax.f32 %v9968_v13, 0.0 }
 0x7f5   : > { %10029 = vst.msk [vmem:[%s18767_s13 + $0xe0] sm:$0xff] %vm458_vm0, %v9997_v58  ;;  %v9998_v41 = vmax.f32 %v9966_v24, 0.0 }
 0x7f6   : > { %10032 = vst.msk [vmem:[%s18767_s13 + $0xf8] sm:$0xff] %vm458_vm0, %v10000_v49 }
 0x7f7   : > { %10030 = vst.msk [vmem:[%s18767_s13 + $0xe8] sm:$0xff] %vm458_vm0, %v9998_v41 }
 0x7f8   : > { %12650 = shalt.err (!%p12647_p7)
}
 0x7f9   : > { %s12651_s28 = scalar_lea.hbm %s18944_s26, 4096  ;;  %s12655_s13 = scalar_lea.hbm %s19006_s10, 8192 }
 0x7fa   : > { %p12652_p9 = scmp.ne.s32.totalorder %s18944_s26, %s12651_s28  ;;  %p12656_p5 = scmp.lt.u32.totalorder %s18944_s26, %s19006_s10 }
 0x7fb   : > { %p12657_p11 = scmp.lt.u32.totalorder %s12655_s13, %s12651_s28  ;;  %p12659_p4 = scmp.lt.u32.totalorder %s12651_s28, %s18944_s26 }
 0x7fc   : > { %p12653_p1 = pnand %p12652_p9, %p12866_p12 }
 0x7fd   : > { %p12658_p2 = por %p12657_p11, %p12656_p5 }
 0x7fe   : > { %p12654_p0 = pneg %p12653_p1 }
 0x7ff   : > { %p12660_p6 = por %p12659_p4, %p12658_p2 }
 0x801   : > { %p12661_p8 = pnand %p12660_p6, %p12654_p0 }
 0x803   : > { %12664 = shalt.err (!%p12661_p8)
}
 0x804   : > { %s12715_s25 = smov 128   ;;  %s12716_s27 = smov 8  }
 0x805   : > { %11886 = dma.vmem_to_hbm [thread:$0]  (%p12866_p12), %s18946_s21, 4096, %s18944_s26, %s10034_s17, %s12715_s25, %s12715_s25, %s12716_s27  }
 0x806 PF: > { %s19175_s30 = sld [smem:[#allocation13_spill]]  ;;  %s19176_s20 = sld [smem:[#allocation14_spill]] }
 0x807   : > { %p19178_p13 = scmp.ge.s32.totalorder %s12707_s16, 2 }
 0x80c   : > { %s10062_s22 = sand.u32 1, %s19175_s30   ;;  %p19177_p10 = scmp.ne.s32.totalorder %s19176_s20, 0 }
 0x80d   : > { %s10063_s28 = scalar_lea.sflag [#allocation6], %s10062_s22 }
 0x80e   : > { %p11897_p3 = pnand %p19178_p13, %p19177_p10 }
 0x810   : > { %12690 = dma.done.wait (!%p11897_p3), %s10063_s28, 4096  }
 0x811   : > { %12692 = vsyncadd (!%p11897_p3), %s10063_s28, 4294963200  ;;  %s19179_s16 = sld [smem:[#allocation15_spill]]  ;;  %s19180_s13 = smov %s12699_s14 }
 0x812   : > { %s19181_s14 = smov %s12703_s15  ;;  %s19182_s15 = smov %s12862_s11 }
 0x817   : > { %p24_p7 = scmp.ge.s32.totalorder %s19179_s16, 4  }
 0x819   :  { %26 = sbr.rel (!%p24_p7) target bundleno = 6 (0x6), region = 189 }
 0x820   :  { %10068 = vsyncpa [#allocation5], 1 }
 0x821   :  { %10070 = vsyncpa [#allocation5 + $0x1], 1 }
 0x822   :  { %10071 = vsyncpa [#allocation8], 1 }
 0x823   :  { %10072 = vsyncpa [#allocation6], 1 }
 0x824   :  { %10074 = vsyncpa [#allocation6 + $0x1], 1 }

</bundles_post_ra>
